<compile_context>
chip_gen: v7x
topology: tpu7x:2x2x1
jax: 0.10.0
libtpu: 0.0.40
codegen_flags: <defaults>
</compile_context>

<pallas_src>
import jax
import jax.numpy as jnp
import numpy as np
from jax.experimental import pallas as pl
from jax.experimental.pallas import tpu as pltpu


# --------------------------------------------------------------------------
# Fused forward kernel (one batch tile of `tb` images per grid step).
#
# Row layout: input rows are (image, h) with period 28 -> r = b*28 + h.
# conv1 output lanes:  co*24 + ow    (10 channels x 24 cols = 240 lanes)
# conv2 output lanes:  c2*10 + ow2   (20 channels x 10 cols = 200 lanes)
# Only rows r = b*28 + 2*oh2 (oh2<10) of the conv2 result are meaningful;
# the fc1 stage gathers them with small 0/1 selection matmuls.
# --------------------------------------------------------------------------
def _convnet_kernel(x_ref, w1b_ref, b1_ref, w2b_ref, b2_ref,
                    wfc1_ref, bfc1_ref, wfc2_ref, bfc2_ref, out_ref):
    tb = out_ref.shape[0]          # images in this batch tile
    r_in = x_ref.shape[0]          # tb * 28 input rows
    r1 = r_in - 4                  # conv1 rows kept (period-28 row layout)
    r2 = r1 - 5                    # conv2 rows kept

    x = x_ref[...]                                        # (tb*28, 28) f32

    # ---- conv1 (1->10, 5x5) as 5 banded MXU matmuls + bias + ReLU ----------
    acc1 = jnp.zeros((r1, 240), jnp.float32)
    for i in range(5):
        acc1 = acc1 + jnp.dot(x[i:i + r1, :], w1b_ref[i],
                              preferred_element_type=jnp.float32)
    y1 = jnp.maximum(acc1 + b1_ref[...], 0.0)             # (r1, 240)

    # ---- 2x2/2 max-pool: width pairs here (lane-neighbour max); the height
    #      pairs are fused into the conv2 row shifts below --------------------
    m1 = jnp.maximum(y1[:, :-1], y1[:, 1:])               # (r1, 239)

    # ---- conv2 (10->20, 3x3) as 3 banded MXU matmuls + bias + ReLU ----------
    acc2 = jnp.zeros((r2, 200), jnp.float32)
    for i2 in range(3):
        a = jnp.maximum(m1[2 * i2:2 * i2 + r2, :],          # height-pool pair
                        m1[2 * i2 + 1:2 * i2 + 1 + r2, :])
        acc2 = acc2 + jnp.dot(a, w2b_ref[i2],
                              preferred_element_type=jnp.float32)
    y2 = jnp.maximum(acc2 + b2_ref[...], 0.0)             # (r2, 200)

    # ---- fc1 (2000->500, padded to 512) + ReLU ------------------------------
    # The PyTorch NCHW flatten + valid-row gather are folded into 10 selection
    # matmuls (one per conv2 output row oh2) against per-row weight slabs.
    row_id = jax.lax.broadcasted_iota(jnp.int32, (tb, r2), 1)
    img_id = jax.lax.broadcasted_iota(jnp.int32, (tb, r2), 0)
    acc3 = jnp.zeros((tb, 512), jnp.float32)
    for oh2 in range(10):
        sel = (row_id == img_id * 28 + 2 * oh2).astype(jnp.float32)  # (tb, r2)
        t = jnp.dot(sel, y2, preferred_element_type=jnp.float32)     # (tb, 200)
        acc3 = acc3 + jnp.dot(t, wfc1_ref[oh2],
                              preferred_element_type=jnp.float32)
    h1 = jnp.maximum(acc3 + bfc1_ref[...], 0.0)           # (tb, 512)

    # ---- fc2 (500->10, padded to 128 lanes) + log_softmax -------------------
    # Padded logits get a -1e30 bias so exp() underflows to exactly 0.
    logits = (jnp.dot(h1, wfc2_ref[...], preferred_element_type=jnp.float32)
              + bfc2_ref[...])                            # (tb, 128)
    mx = jnp.max(logits, axis=-1, keepdims=True)
    z = logits - mx
    lse = jnp.log(jnp.sum(jnp.exp(z), axis=-1, keepdims=True))
    out_ref[...] = z - lse


# --------------------------------------------------------------------------
# Host-side (one-time) weight preparation: build the banded conv matrices,
# per-channel lane-broadcast biases, flatten-folded fc1 slabs and padded fc2.
# --------------------------------------------------------------------------
def prep_params(params):
    w1 = np.asarray(params["conv1_w"], np.float32)     # (10, 1, 5, 5)
    b1 = np.asarray(params["conv1_b"], np.float32)     # (10,)
    w2 = np.asarray(params["conv2_w"], np.float32)     # (20, 10, 3, 3)
    b2 = np.asarray(params["conv2_b"], np.float32)     # (20,)
    fc1w = np.asarray(params["fc1_w"], np.float32)     # (2000, 500)  (in, out)
    fc1b = np.asarray(params["fc1_b"], np.float32)     # (500,)
    fc2w = np.asarray(params["fc2_w"], np.float32)     # (500, 10)    (in, out)
    fc2b = np.asarray(params["fc2_b"], np.float32)     # (10,)

    C1, C2, OW1, OW2 = 10, 20, 24, 10
    L1, L2, NF1, NF2 = C1 * OW1, C2 * OW2, 512, 128    # 240, 200

    # conv1: W1B[i][w, co*24+ow] = w1[co,0,i, w-ow]  for 0 <= w-ow <= 4
    w1b = np.zeros((5, 28, L1), np.float32)
    co, j, ow = np.meshgrid(np.arange(C1), np.arange(5), np.arange(OW1),
                            indexing="ij")
    for i in range(5):
        w1b[i, ow + j, co * OW1 + ow] = w1[co, 0, i, j]
    b1_lane = np.repeat(b1, OW1)[None, :]               # (1, 240)

    # conv2 consumes the width-pair-pooled conv1 lanes (valid at even offsets):
    # W2B[i2][c1*24 + 2*(ow2+j2), c2*10 + ow2] = w2[c2, c1, i2, j2]
    w2b = np.zeros((3, L1 - 1, L2), np.float32)         # (3, 239, 200)
    c2, c1, j2, ow2 = np.meshgrid(np.arange(C2), np.arange(C1), np.arange(3),
                                  np.arange(OW2), indexing="ij")
    for i2 in range(3):
        w2b[i2, c1 * OW1 + 2 * (ow2 + j2), c2 * OW2 + ow2] = w2[c2, c1, i2, j2]
    b2_lane = np.repeat(b2, OW2)[None, :]               # (1, 200)

    # fc1: fold PyTorch's NCHW flatten (f = c2*100 + oh2*10 + ow2) into
    # 10 per-oh2 weight slabs indexed by the conv2 lane layout c2*10+ow2.
    wfc1 = fc1w.reshape(C2, OW2, OW2, 500)              # (c2, oh2, ow2, n)
    wfc1 = np.transpose(wfc1, (1, 0, 2, 3)).reshape(OW2, L2, 500)
    wfc1 = np.pad(wfc1, ((0, 0), (0, 0), (0, NF1 - 500)))        # (10,200,512)
    bfc1 = np.pad(fc1b, (0, NF1 - 500))[None, :]        # (1, 512)

    # fc2: pad to 128 output lanes; padded logits pushed to -1e30 via the bias.
    wfc2 = np.zeros((NF1, NF2), np.float32)
    wfc2[:500, :10] = fc2w
    bfc2 = np.full((1, NF2), -1e30, np.float32)
    bfc2[0, :10] = fc2b

    arrs = dict(w1b=w1b, b1=b1_lane, w2b=w2b, b2=b2_lane,
                wfc1=wfc1, bfc1=bfc1, wfc2=wfc2, bfc2=bfc2)
    return {k: jnp.asarray(v) for k, v in arrs.items()}


def _round_up(a, b):
    return (a + b - 1) // b * b


def convnet_forward(x_nchw, prepped, *, block_b=32):
    """x_nchw: (N, 1, 28, 28) float -> (N, 10) log-probabilities."""
    n = x_nchw.shape[0]
    tb = min(block_b, _round_up(max(n, 1), 8))          # batch tile (mult. of 8)
    npad = _round_up(n, tb)

    x = x_nchw.astype(jnp.float32).reshape(n, 28, 28)
    if npad != n:
        x = jnp.concatenate(
            [x, jnp.zeros((npad - n, 28, 28), jnp.float32)], axis=0)
    x2d = x.reshape(npad * 28, 28)                      # rows = (image, h)

    weights = [prepped[k] for k in
               ("w1b", "b1", "w2b", "b2", "wfc1", "bfc1", "wfc2", "bfc2")]

    def _full_spec(a):
        nd = a.ndim

        def imap(b):
            return (0,) * nd

        return pl.BlockSpec(a.shape, imap)              # resident, fetched once

    out = pl.pallas_call(
        _convnet_kernel,
        out_shape=jax.ShapeDtypeStruct((npad, 128), jnp.float32),
        grid=(npad // tb,),
        in_specs=[pl.BlockSpec((tb * 28, 28), lambda b: (b, 0))]
                 + [_full_spec(a) for a in weights],
        out_specs=pl.BlockSpec((tb, 128), lambda b: (b, 0)),
        compiler_params=pltpu.CompilerParams(
            dimension_semantics=("parallel",),
            vmem_limit_bytes=48 * 1024 * 1024,
        ),
    )(x2d, *weights)
    return out[:n, :10]


# --------------------------------------------------------------------------
# Plain-XLA reference of the same network (for a numerical cross-check).
# --------------------------------------------------------------------------
def convnet_reference(x_nchw, params):
    x = x_nchw.astype(jnp.float32)
    y = jax.lax.conv_general_dilated(
        x, params["conv1_w"], (1, 1), "VALID",
        dimension_numbers=("NCHW", "OIHW", "NCHW"))
    y = jax.nn.relu(y + params["conv1_b"][None, :, None, None])
    y = jax.lax.reduce_window(y, -jnp.inf, jax.lax.max,
                              (1, 1, 2, 2), (1, 1, 2, 2), "VALID")
    y = jax.lax.conv_general_dilated(
        y, params["conv2_w"], (1, 1), "VALID",
        dimension_numbers=("NCHW", "OIHW", "NCHW"))
    y = jax.nn.relu(y + params["conv2_b"][None, :, None, None])
    flat = y.reshape(x.shape[0], -1)
    h = jax.nn.relu(flat @ params["fc1_w"] + params["fc1_b"])
    logits = h @ params["fc2_w"] + params["fc2_b"]
    return jax.nn.log_softmax(logits, axis=-1)


# --------------------------------------------------------------------------
# Parameter init (PyTorch-style uniform; Linear weights stored as (in, out)).
# --------------------------------------------------------------------------
def init_params(key):
    ks = jax.random.split(key, 8)

    def u(k, shape, fan_in):
        bound = 1.0 / jnp.sqrt(jnp.float32(fan_in))
        return jax.random.uniform(k, shape, jnp.float32, -bound, bound)

    return {
        "conv1_w": u(ks[0], (10, 1, 5, 5), 1 * 5 * 5),
        "conv1_b": u(ks[1], (10,), 1 * 5 * 5),
        "conv2_w": u(ks[2], (20, 10, 3, 3), 10 * 3 * 3),
        "conv2_b": u(ks[3], (20,), 10 * 3 * 3),
        "fc1_w": u(ks[4], (2000, 500), 2000),
        "fc1_b": u(ks[5], (500,), 2000),
        "fc2_w": u(ks[6], (500, 10), 500),
        "fc2_b": u(ks[7], (10,), 500),
    }


# ---------------------------------- main ------------------------------------
if __name__ == "__main__":
    key = jax.random.PRNGKey(0)
    kx, kp = jax.random.split(key)

    # MNIST-shaped input (fc1's 20*10*10 fan-in fixes the 1x28x28 geometry)
    x = jax.random.normal(kx, (2, 1, 28, 28), jnp.float32)
    params = init_params(kp)
    prepped = prep_params(params)

    out = convnet_forward(x, prepped)
    out = jax.block_until_ready(out)

    assert out.shape == (2, 10)
    # log_softmax rows should sum (in prob space) to ~1
    assert bool(jnp.all(jnp.abs(jnp.sum(jnp.exp(out), axis=1) - 1.0) < 1e-3))
    # cross-check against the plain-XLA reference (tolerance covers MXU f32
    # default-precision rounding; structural errors would be O(1) or larger)
    ref = convnet_reference(x, params)
    assert bool(jnp.max(jnp.abs(out - ref)) < 0.3), "mismatch vs XLA reference"

    print("KERNEL_OK")
</pallas_src>

<mosaic_0001>
module attributes {stable_mosaic.version = 11 : i64} {
  func.func @_convnet_kernel(%arg0: i32, %arg1: memref<224x28xf32, #tpu.memory_space<vmem>>, %arg2: memref<5x28x240xf32, #tpu.memory_space<vmem>>, %arg3: memref<1x240xf32, #tpu.memory_space<vmem>>, %arg4: memref<3x239x200xf32, #tpu.memory_space<vmem>>, %arg5: memref<1x200xf32, #tpu.memory_space<vmem>>, %arg6: memref<10x200x512xf32, #tpu.memory_space<vmem>>, %arg7: memref<1x512xf32, #tpu.memory_space<vmem>>, %arg8: memref<512x128xf32, #tpu.memory_space<vmem>>, %arg9: memref<1x128xf32, #tpu.memory_space<vmem>>, %arg10: memref<8x128xf32, #tpu.memory_space<vmem>>) attributes {dimension_semantics = [#tpu.dimension_semantics<parallel>], iteration_bounds = array<i64: 1>, scalar_prefetch = 0 : i64, scratch_operands = 0 : i64, tpu.core_type = #tpu.core_type<tc>, window_params = [{transform_indices = @transform_0, window_bounds = array<i64: 224, 28>}, {pipeline_mode = #tpu.pipeline_mode<synchronous>, transform_indices = @transform_1, window_bounds = array<i64: 5, 28, 240>}, {pipeline_mode = #tpu.pipeline_mode<synchronous>, transform_indices = @transform_2, window_bounds = array<i64: 1, 240>}, {pipeline_mode = #tpu.pipeline_mode<synchronous>, transform_indices = @transform_3, window_bounds = array<i64: 3, 239, 200>}, {pipeline_mode = #tpu.pipeline_mode<synchronous>, transform_indices = @transform_4, window_bounds = array<i64: 1, 200>}, {pipeline_mode = #tpu.pipeline_mode<synchronous>, transform_indices = @transform_5, window_bounds = array<i64: 10, 200, 512>}, {pipeline_mode = #tpu.pipeline_mode<synchronous>, transform_indices = @transform_6, window_bounds = array<i64: 1, 512>}, {pipeline_mode = #tpu.pipeline_mode<synchronous>, transform_indices = @transform_7, window_bounds = array<i64: 512, 128>}, {pipeline_mode = #tpu.pipeline_mode<synchronous>, transform_indices = @transform_8, window_bounds = array<i64: 1, 128>}, {transform_indices = @transform_9, window_bounds = array<i64: 8, 128>}]} {
    %c0 = arith.constant 0 : index
    %c0_0 = arith.constant 0 : index
    %0 = vector.load %arg1[%c0, %c0_0] : memref<224x28xf32, #tpu.memory_space<vmem>>, vector<224x28xf32>
    %cst = arith.constant 0.000000e+00 : f32
    %1 = vector.broadcast %cst : f32 to vector<220x240xf32>
    %2 = vector.extract_strided_slice %0 {offsets = [0, 0], sizes = [220, 28], strides = [1, 1]} : vector<224x28xf32> to vector<220x28xf32>
    %c0_1 = arith.constant 0 : index
    %c0_2 = arith.constant 0 : index
    %c0_3 = arith.constant 0 : index
    %3 = vector.load %arg2[%c0_1, %c0_2, %c0_3] : memref<5x28x240xf32, #tpu.memory_space<vmem>>, vector<1x28x240xf32>
    %4 = vector.shape_cast %3 : vector<1x28x240xf32> to vector<28x240xf32>
    %cst_4 = arith.constant dense<0.000000e+00> : vector<220x240xf32>
    %5 = tpu.matmul %2, %4, %cst_4 {dimension_numbers = #tpu.dot_dimension_numbers<[1], [0], [0], [1], [0, 0, 1, 1], [], []>} : vector<220x28xf32>, vector<28x240xf32>, vector<220x240xf32> -> vector<220x240xf32>
    %6 = arith.addf %1, %5 : vector<220x240xf32>
    %7 = vector.extract_strided_slice %0 {offsets = [1, 0], sizes = [220, 28], strides = [1, 1]} : vector<224x28xf32> to vector<220x28xf32>
    %c1 = arith.constant 1 : index
    %c0_5 = arith.constant 0 : index
    %c0_6 = arith.constant 0 : index
    %8 = vector.load %arg2[%c1, %c0_5, %c0_6] : memref<5x28x240xf32, #tpu.memory_space<vmem>>, vector<1x28x240xf32>
    %9 = vector.shape_cast %8 : vector<1x28x240xf32> to vector<28x240xf32>
    %cst_7 = arith.constant dense<0.000000e+00> : vector<220x240xf32>
    %10 = tpu.matmul %7, %9, %cst_7 {dimension_numbers = #tpu.dot_dimension_numbers<[1], [0], [0], [1], [0, 0, 1, 1], [], []>} : vector<220x28xf32>, vector<28x240xf32>, vector<220x240xf32> -> vector<220x240xf32>
    %11 = arith.addf %6, %10 : vector<220x240xf32>
    %12 = vector.extract_strided_slice %0 {offsets = [2, 0], sizes = [220, 28], strides = [1, 1]} : vector<224x28xf32> to vector<220x28xf32>
    %c2 = arith.constant 2 : index
    %c0_8 = arith.constant 0 : index
    %c0_9 = arith.constant 0 : index
    %13 = vector.load %arg2[%c2, %c0_8, %c0_9] : memref<5x28x240xf32, #tpu.memory_space<vmem>>, vector<1x28x240xf32>
    %14 = vector.shape_cast %13 : vector<1x28x240xf32> to vector<28x240xf32>
    %cst_10 = arith.constant dense<0.000000e+00> : vector<220x240xf32>
    %15 = tpu.matmul %12, %14, %cst_10 {dimension_numbers = #tpu.dot_dimension_numbers<[1], [0], [0], [1], [0, 0, 1, 1], [], []>} : vector<220x28xf32>, vector<28x240xf32>, vector<220x240xf32> -> vector<220x240xf32>
    %16 = arith.addf %11, %15 : vector<220x240xf32>
    %17 = vector.extract_strided_slice %0 {offsets = [3, 0], sizes = [220, 28], strides = [1, 1]} : vector<224x28xf32> to vector<220x28xf32>
    %c3 = arith.constant 3 : index
    %c0_11 = arith.constant 0 : index
    %c0_12 = arith.constant 0 : index
    %18 = vector.load %arg2[%c3, %c0_11, %c0_12] : memref<5x28x240xf32, #tpu.memory_space<vmem>>, vector<1x28x240xf32>
    %19 = vector.shape_cast %18 : vector<1x28x240xf32> to vector<28x240xf32>
    %cst_13 = arith.constant dense<0.000000e+00> : vector<220x240xf32>
    %20 = tpu.matmul %17, %19, %cst_13 {dimension_numbers = #tpu.dot_dimension_numbers<[1], [0], [0], [1], [0, 0, 1, 1], [], []>} : vector<220x28xf32>, vector<28x240xf32>, vector<220x240xf32> -> vector<220x240xf32>
    %21 = arith.addf %16, %20 : vector<220x240xf32>
    %22 = vector.extract_strided_slice %0 {offsets = [4, 0], sizes = [220, 28], strides = [1, 1]} : vector<224x28xf32> to vector<220x28xf32>
    %c4 = arith.constant 4 : index
    %c0_14 = arith.constant 0 : index
    %c0_15 = arith.constant 0 : index
    %23 = vector.load %arg2[%c4, %c0_14, %c0_15] : memref<5x28x240xf32, #tpu.memory_space<vmem>>, vector<1x28x240xf32>
    %24 = vector.shape_cast %23 : vector<1x28x240xf32> to vector<28x240xf32>
    %cst_16 = arith.constant dense<0.000000e+00> : vector<220x240xf32>
    %25 = tpu.matmul %22, %24, %cst_16 {dimension_numbers = #tpu.dot_dimension_numbers<[1], [0], [0], [1], [0, 0, 1, 1], [], []>} : vector<220x28xf32>, vector<28x240xf32>, vector<220x240xf32> -> vector<220x240xf32>
    %26 = arith.addf %21, %25 : vector<220x240xf32>
    %c0_17 = arith.constant 0 : index
    %c0_18 = arith.constant 0 : index
    %27 = vector.load %arg3[%c0_17, %c0_18] : memref<1x240xf32, #tpu.memory_space<vmem>>, vector<1x240xf32>
    %28 = vector.broadcast %27 : vector<1x240xf32> to vector<220x240xf32>
    %29 = arith.addf %26, %28 : vector<220x240xf32>
    %cst_19 = arith.constant 0.000000e+00 : f32
    %30 = vector.broadcast %cst_19 : f32 to vector<220x240xf32>
    %31 = arith.maximumf %29, %30 : vector<220x240xf32>
    %32 = vector.extract_strided_slice %31 {offsets = [0, 0], sizes = [220, 239], strides = [1, 1]} : vector<220x240xf32> to vector<220x239xf32>
    %33 = vector.extract_strided_slice %31 {offsets = [0, 1], sizes = [220, 239], strides = [1, 1]} : vector<220x240xf32> to vector<220x239xf32>
    %34 = arith.maximumf %32, %33 : vector<220x239xf32>
    %cst_20 = arith.constant 0.000000e+00 : f32
    %35 = vector.broadcast %cst_20 : f32 to vector<215x200xf32>
    %36 = vector.extract_strided_slice %34 {offsets = [0, 0], sizes = [215, 239], strides = [1, 1]} : vector<220x239xf32> to vector<215x239xf32>
    %37 = vector.extract_strided_slice %34 {offsets = [1, 0], sizes = [215, 239], strides = [1, 1]} : vector<220x239xf32> to vector<215x239xf32>
    %38 = arith.maximumf %36, %37 : vector<215x239xf32>
    %c0_21 = arith.constant 0 : index
    %c0_22 = arith.constant 0 : index
    %c0_23 = arith.constant 0 : index
    %39 = vector.load %arg4[%c0_21, %c0_22, %c0_23] : memref<3x239x200xf32, #tpu.memory_space<vmem>>, vector<1x239x200xf32>
    %40 = vector.shape_cast %39 : vector<1x239x200xf32> to vector<239x200xf32>
    %cst_24 = arith.constant dense<0.000000e+00> : vector<215x200xf32>
    %41 = tpu.matmul %38, %40, %cst_24 {dimension_numbers = #tpu.dot_dimension_numbers<[1], [0], [0], [1], [0, 0, 1, 1], [], []>} : vector<215x239xf32>, vector<239x200xf32>, vector<215x200xf32> -> vector<215x200xf32>
    %42 = arith.addf %35, %41 : vector<215x200xf32>
    %43 = vector.extract_strided_slice %34 {offsets = [2, 0], sizes = [215, 239], strides = [1, 1]} : vector<220x239xf32> to vector<215x239xf32>
    %44 = vector.extract_strided_slice %34 {offsets = [3, 0], sizes = [215, 239], strides = [1, 1]} : vector<220x239xf32> to vector<215x239xf32>
    %45 = arith.maximumf %43, %44 : vector<215x239xf32>
    %c1_25 = arith.constant 1 : index
    %c0_26 = arith.constant 0 : index
    %c0_27 = arith.constant 0 : index
    %46 = vector.load %arg4[%c1_25, %c0_26, %c0_27] : memref<3x239x200xf32, #tpu.memory_space<vmem>>, vector<1x239x200xf32>
    %47 = vector.shape_cast %46 : vector<1x239x200xf32> to vector<239x200xf32>
    %cst_28 = arith.constant dense<0.000000e+00> : vector<215x200xf32>
    %48 = tpu.matmul %45, %47, %cst_28 {dimension_numbers = #tpu.dot_dimension_numbers<[1], [0], [0], [1], [0, 0, 1, 1], [], []>} : vector<215x239xf32>, vector<239x200xf32>, vector<215x200xf32> -> vector<215x200xf32>
    %49 = arith.addf %42, %48 : vector<215x200xf32>
    %50 = vector.extract_strided_slice %34 {offsets = [4, 0], sizes = [215, 239], strides = [1, 1]} : vector<220x239xf32> to vector<215x239xf32>
    %51 = vector.extract_strided_slice %34 {offsets = [5, 0], sizes = [215, 239], strides = [1, 1]} : vector<220x239xf32> to vector<215x239xf32>
    %52 = arith.maximumf %50, %51 : vector<215x239xf32>
    %c2_29 = arith.constant 2 : index
    %c0_30 = arith.constant 0 : index
    %c0_31 = arith.constant 0 : index
    %53 = vector.load %arg4[%c2_29, %c0_30, %c0_31] : memref<3x239x200xf32, #tpu.memory_space<vmem>>, vector<1x239x200xf32>
    %54 = vector.shape_cast %53 : vector<1x239x200xf32> to vector<239x200xf32>
    %cst_32 = arith.constant dense<0.000000e+00> : vector<215x200xf32>
    %55 = tpu.matmul %52, %54, %cst_32 {dimension_numbers = #tpu.dot_dimension_numbers<[1], [0], [0], [1], [0, 0, 1, 1], [], []>} : vector<215x239xf32>, vector<239x200xf32>, vector<215x200xf32> -> vector<215x200xf32>
    %56 = arith.addf %49, %55 : vector<215x200xf32>
    %c0_33 = arith.constant 0 : index
    %c0_34 = arith.constant 0 : index
    %57 = vector.load %arg5[%c0_33, %c0_34] : memref<1x200xf32, #tpu.memory_space<vmem>>, vector<1x200xf32>
    %58 = vector.broadcast %57 : vector<1x200xf32> to vector<215x200xf32>
    %59 = arith.addf %56, %58 : vector<215x200xf32>
    %cst_35 = arith.constant 0.000000e+00 : f32
    %60 = vector.broadcast %cst_35 : f32 to vector<215x200xf32>
    %61 = arith.maximumf %59, %60 : vector<215x200xf32>
    %62 = tpu.iota {dimensions = array<i32: 1>} : vector<8x215xi32>
    %63 = tpu.iota {dimensions = array<i32: 0>} : vector<8x215xi32>
    %cst_36 = arith.constant 0.000000e+00 : f32
    %64 = vector.broadcast %cst_36 : f32 to vector<8x512xf32>
    %c28_i32 = arith.constant 28 : i32
    %65 = vector.broadcast %c28_i32 : i32 to vector<8x215xi32>
    %66 = arith.muli %63, %65 : vector<8x215xi32>
    %c0_i32 = arith.constant 0 : i32
    %67 = vector.broadcast %c0_i32 : i32 to vector<8x215xi32>
    %68 = arith.addi %66, %67 : vector<8x215xi32>
    %69 = arith.cmpi eq, %62, %68 : vector<8x215xi32>
    %70 = arith.extui %69 : vector<8x215xi1> to vector<8x215xi32>
    %71 = arith.sitofp %70 : vector<8x215xi32> to vector<8x215xf32>
    %cst_37 = arith.constant dense<0.000000e+00> : vector<8x200xf32>
    %72 = tpu.matmul %71, %61, %cst_37 {dimension_numbers = #tpu.dot_dimension_numbers<[1], [0], [0], [1], [0, 0, 1, 1], [], []>} : vector<8x215xf32>, vector<215x200xf32>, vector<8x200xf32> -> vector<8x200xf32>
    %c0_38 = arith.constant 0 : index
    %c0_39 = arith.constant 0 : index
    %c0_40 = arith.constant 0 : index
    %73 = vector.load %arg6[%c0_38, %c0_39, %c0_40] : memref<10x200x512xf32, #tpu.memory_space<vmem>>, vector<1x200x512xf32>
    %74 = vector.shape_cast %73 : vector<1x200x512xf32> to vector<200x512xf32>
    %cst_41 = arith.constant dense<0.000000e+00> : vector<8x512xf32>
    %75 = tpu.matmul %72, %74, %cst_41 {dimension_numbers = #tpu.dot_dimension_numbers<[1], [0], [0], [1], [0, 0, 1, 1], [], []>} : vector<8x200xf32>, vector<200x512xf32>, vector<8x512xf32> -> vector<8x512xf32>
    %76 = arith.addf %64, %75 : vector<8x512xf32>
    %c28_i32_42 = arith.constant 28 : i32
    %77 = vector.broadcast %c28_i32_42 : i32 to vector<8x215xi32>
    %78 = arith.muli %63, %77 : vector<8x215xi32>
    %c2_i32 = arith.constant 2 : i32
    %79 = vector.broadcast %c2_i32 : i32 to vector<8x215xi32>
    %80 = arith.addi %78, %79 : vector<8x215xi32>
    %81 = arith.cmpi eq, %62, %80 : vector<8x215xi32>
    %82 = arith.extui %81 : vector<8x215xi1> to vector<8x215xi32>
    %83 = arith.sitofp %82 : vector<8x215xi32> to vector<8x215xf32>
    %cst_43 = arith.constant dense<0.000000e+00> : vector<8x200xf32>
    %84 = tpu.matmul %83, %61, %cst_43 {dimension_numbers = #tpu.dot_dimension_numbers<[1], [0], [0], [1], [0, 0, 1, 1], [], []>} : vector<8x215xf32>, vector<215x200xf32>, vector<8x200xf32> -> vector<8x200xf32>
    %c1_44 = arith.constant 1 : index
    %c0_45 = arith.constant 0 : index
    %c0_46 = arith.constant 0 : index
    %85 = vector.load %arg6[%c1_44, %c0_45, %c0_46] : memref<10x200x512xf32, #tpu.memory_space<vmem>>, vector<1x200x512xf32>
    %86 = vector.shape_cast %85 : vector<1x200x512xf32> to vector<200x512xf32>
    %cst_47 = arith.constant dense<0.000000e+00> : vector<8x512xf32>
    %87 = tpu.matmul %84, %86, %cst_47 {dimension_numbers = #tpu.dot_dimension_numbers<[1], [0], [0], [1], [0, 0, 1, 1], [], []>} : vector<8x200xf32>, vector<200x512xf32>, vector<8x512xf32> -> vector<8x512xf32>
    %88 = arith.addf %76, %87 : vector<8x512xf32>
    %c28_i32_48 = arith.constant 28 : i32
    %89 = vector.broadcast %c28_i32_48 : i32 to vector<8x215xi32>
    %90 = arith.muli %63, %89 : vector<8x215xi32>
    %c4_i32 = arith.constant 4 : i32
    %91 = vector.broadcast %c4_i32 : i32 to vector<8x215xi32>
    %92 = arith.addi %90, %91 : vector<8x215xi32>
    %93 = arith.cmpi eq, %62, %92 : vector<8x215xi32>
    %94 = arith.extui %93 : vector<8x215xi1> to vector<8x215xi32>
    %95 = arith.sitofp %94 : vector<8x215xi32> to vector<8x215xf32>
    %cst_49 = arith.constant dense<0.000000e+00> : vector<8x200xf32>
    %96 = tpu.matmul %95, %61, %cst_49 {dimension_numbers = #tpu.dot_dimension_numbers<[1], [0], [0], [1], [0, 0, 1, 1], [], []>} : vector<8x215xf32>, vector<215x200xf32>, vector<8x200xf32> -> vector<8x200xf32>
    %c2_50 = arith.constant 2 : index
    %c0_51 = arith.constant 0 : index
    %c0_52 = arith.constant 0 : index
    %97 = vector.load %arg6[%c2_50, %c0_51, %c0_52] : memref<10x200x512xf32, #tpu.memory_space<vmem>>, vector<1x200x512xf32>
    %98 = vector.shape_cast %97 : vector<1x200x512xf32> to vector<200x512xf32>
    %cst_53 = arith.constant dense<0.000000e+00> : vector<8x512xf32>
    %99 = tpu.matmul %96, %98, %cst_53 {dimension_numbers = #tpu.dot_dimension_numbers<[1], [0], [0], [1], [0, 0, 1, 1], [], []>} : vector<8x200xf32>, vector<200x512xf32>, vector<8x512xf32> -> vector<8x512xf32>
    %100 = arith.addf %88, %99 : vector<8x512xf32>
    %c28_i32_54 = arith.constant 28 : i32
    %101 = vector.broadcast %c28_i32_54 : i32 to vector<8x215xi32>
    %102 = arith.muli %63, %101 : vector<8x215xi32>
    %c6_i32 = arith.constant 6 : i32
    %103 = vector.broadcast %c6_i32 : i32 to vector<8x215xi32>
    %104 = arith.addi %102, %103 : vector<8x215xi32>
    %105 = arith.cmpi eq, %62, %104 : vector<8x215xi32>
    %106 = arith.extui %105 : vector<8x215xi1> to vector<8x215xi32>
    %107 = arith.sitofp %106 : vector<8x215xi32> to vector<8x215xf32>
    %cst_55 = arith.constant dense<0.000000e+00> : vector<8x200xf32>
    %108 = tpu.matmul %107, %61, %cst_55 {dimension_numbers = #tpu.dot_dimension_numbers<[1], [0], [0], [1], [0, 0, 1, 1], [], []>} : vector<8x215xf32>, vector<215x200xf32>, vector<8x200xf32> -> vector<8x200xf32>
    %c3_56 = arith.constant 3 : index
    %c0_57 = arith.constant 0 : index
    %c0_58 = arith.constant 0 : index
    %109 = vector.load %arg6[%c3_56, %c0_57, %c0_58] : memref<10x200x512xf32, #tpu.memory_space<vmem>>, vector<1x200x512xf32>
    %110 = vector.shape_cast %109 : vector<1x200x512xf32> to vector<200x512xf32>
    %cst_59 = arith.constant dense<0.000000e+00> : vector<8x512xf32>
    %111 = tpu.matmul %108, %110, %cst_59 {dimension_numbers = #tpu.dot_dimension_numbers<[1], [0], [0], [1], [0, 0, 1, 1], [], []>} : vector<8x200xf32>, vector<200x512xf32>, vector<8x512xf32> -> vector<8x512xf32>
    %112 = arith.addf %100, %111 : vector<8x512xf32>
    %c28_i32_60 = arith.constant 28 : i32
    %113 = vector.broadcast %c28_i32_60 : i32 to vector<8x215xi32>
    %114 = arith.muli %63, %113 : vector<8x215xi32>
    %c8_i32 = arith.constant 8 : i32
    %115 = vector.broadcast %c8_i32 : i32 to vector<8x215xi32>
    %116 = arith.addi %114, %115 : vector<8x215xi32>
    %117 = arith.cmpi eq, %62, %116 : vector<8x215xi32>
    %118 = arith.extui %117 : vector<8x215xi1> to vector<8x215xi32>
    %119 = arith.sitofp %118 : vector<8x215xi32> to vector<8x215xf32>
    %cst_61 = arith.constant dense<0.000000e+00> : vector<8x200xf32>
    %120 = tpu.matmul %119, %61, %cst_61 {dimension_numbers = #tpu.dot_dimension_numbers<[1], [0], [0], [1], [0, 0, 1, 1], [], []>} : vector<8x215xf32>, vector<215x200xf32>, vector<8x200xf32> -> vector<8x200xf32>
    %c4_62 = arith.constant 4 : index
    %c0_63 = arith.constant 0 : index
    %c0_64 = arith.constant 0 : index
    %121 = vector.load %arg6[%c4_62, %c0_63, %c0_64] : memref<10x200x512xf32, #tpu.memory_space<vmem>>, vector<1x200x512xf32>
    %122 = vector.shape_cast %121 : vector<1x200x512xf32> to vector<200x512xf32>
    %cst_65 = arith.constant dense<0.000000e+00> : vector<8x512xf32>
    %123 = tpu.matmul %120, %122, %cst_65 {dimension_numbers = #tpu.dot_dimension_numbers<[1], [0], [0], [1], [0, 0, 1, 1], [], []>} : vector<8x200xf32>, vector<200x512xf32>, vector<8x512xf32> -> vector<8x512xf32>
    %124 = arith.addf %112, %123 : vector<8x512xf32>
    %c28_i32_66 = arith.constant 28 : i32
    %125 = vector.broadcast %c28_i32_66 : i32 to vector<8x215xi32>
    %126 = arith.muli %63, %125 : vector<8x215xi32>
    %c10_i32 = arith.constant 10 : i32
    %127 = vector.broadcast %c10_i32 : i32 to vector<8x215xi32>
    %128 = arith.addi %126, %127 : vector<8x215xi32>
    %129 = arith.cmpi eq, %62, %128 : vector<8x215xi32>
    %130 = arith.extui %129 : vector<8x215xi1> to vector<8x215xi32>
    %131 = arith.sitofp %130 : vector<8x215xi32> to vector<8x215xf32>
    %cst_67 = arith.constant dense<0.000000e+00> : vector<8x200xf32>
    %132 = tpu.matmul %131, %61, %cst_67 {dimension_numbers = #tpu.dot_dimension_numbers<[1], [0], [0], [1], [0, 0, 1, 1], [], []>} : vector<8x215xf32>, vector<215x200xf32>, vector<8x200xf32> -> vector<8x200xf32>
    %c5 = arith.constant 5 : index
    %c0_68 = arith.constant 0 : index
    %c0_69 = arith.constant 0 : index
    %133 = vector.load %arg6[%c5, %c0_68, %c0_69] : memref<10x200x512xf32, #tpu.memory_space<vmem>>, vector<1x200x512xf32>
    %134 = vector.shape_cast %133 : vector<1x200x512xf32> to vector<200x512xf32>
    %cst_70 = arith.constant dense<0.000000e+00> : vector<8x512xf32>
    %135 = tpu.matmul %132, %134, %cst_70 {dimension_numbers = #tpu.dot_dimension_numbers<[1], [0], [0], [1], [0, 0, 1, 1], [], []>} : vector<8x200xf32>, vector<200x512xf32>, vector<8x512xf32> -> vector<8x512xf32>
    %136 = arith.addf %124, %135 : vector<8x512xf32>
    %c28_i32_71 = arith.constant 28 : i32
    %137 = vector.broadcast %c28_i32_71 : i32 to vector<8x215xi32>
    %138 = arith.muli %63, %137 : vector<8x215xi32>
    %c12_i32 = arith.constant 12 : i32
    %139 = vector.broadcast %c12_i32 : i32 to vector<8x215xi32>
    %140 = arith.addi %138, %139 : vector<8x215xi32>
    %141 = arith.cmpi eq, %62, %140 : vector<8x215xi32>
    %142 = arith.extui %141 : vector<8x215xi1> to vector<8x215xi32>
    %143 = arith.sitofp %142 : vector<8x215xi32> to vector<8x215xf32>
    %cst_72 = arith.constant dense<0.000000e+00> : vector<8x200xf32>
    %144 = tpu.matmul %143, %61, %cst_72 {dimension_numbers = #tpu.dot_dimension_numbers<[1], [0], [0], [1], [0, 0, 1, 1], [], []>} : vector<8x215xf32>, vector<215x200xf32>, vector<8x200xf32> -> vector<8x200xf32>
    %c6 = arith.constant 6 : index
    %c0_73 = arith.constant 0 : index
    %c0_74 = arith.constant 0 : index
    %145 = vector.load %arg6[%c6, %c0_73, %c0_74] : memref<10x200x512xf32, #tpu.memory_space<vmem>>, vector<1x200x512xf32>
    %146 = vector.shape_cast %145 : vector<1x200x512xf32> to vector<200x512xf32>
    %cst_75 = arith.constant dense<0.000000e+00> : vector<8x512xf32>
    %147 = tpu.matmul %144, %146, %cst_75 {dimension_numbers = #tpu.dot_dimension_numbers<[1], [0], [0], [1], [0, 0, 1, 1], [], []>} : vector<8x200xf32>, vector<200x512xf32>, vector<8x512xf32> -> vector<8x512xf32>
    %148 = arith.addf %136, %147 : vector<8x512xf32>
    %c28_i32_76 = arith.constant 28 : i32
    %149 = vector.broadcast %c28_i32_76 : i32 to vector<8x215xi32>
    %150 = arith.muli %63, %149 : vector<8x215xi32>
    %c14_i32 = arith.constant 14 : i32
    %151 = vector.broadcast %c14_i32 : i32 to vector<8x215xi32>
    %152 = arith.addi %150, %151 : vector<8x215xi32>
    %153 = arith.cmpi eq, %62, %152 : vector<8x215xi32>
    %154 = arith.extui %153 : vector<8x215xi1> to vector<8x215xi32>
    %155 = arith.sitofp %154 : vector<8x215xi32> to vector<8x215xf32>
    %cst_77 = arith.constant dense<0.000000e+00> : vector<8x200xf32>
    %156 = tpu.matmul %155, %61, %cst_77 {dimension_numbers = #tpu.dot_dimension_numbers<[1], [0], [0], [1], [0, 0, 1, 1], [], []>} : vector<8x215xf32>, vector<215x200xf32>, vector<8x200xf32> -> vector<8x200xf32>
    %c7 = arith.constant 7 : index
    %c0_78 = arith.constant 0 : index
    %c0_79 = arith.constant 0 : index
    %157 = vector.load %arg6[%c7, %c0_78, %c0_79] : memref<10x200x512xf32, #tpu.memory_space<vmem>>, vector<1x200x512xf32>
    %158 = vector.shape_cast %157 : vector<1x200x512xf32> to vector<200x512xf32>
    %cst_80 = arith.constant dense<0.000000e+00> : vector<8x512xf32>
    %159 = tpu.matmul %156, %158, %cst_80 {dimension_numbers = #tpu.dot_dimension_numbers<[1], [0], [0], [1], [0, 0, 1, 1], [], []>} : vector<8x200xf32>, vector<200x512xf32>, vector<8x512xf32> -> vector<8x512xf32>
    %160 = arith.addf %148, %159 : vector<8x512xf32>
    %c28_i32_81 = arith.constant 28 : i32
    %161 = vector.broadcast %c28_i32_81 : i32 to vector<8x215xi32>
    %162 = arith.muli %63, %161 : vector<8x215xi32>
    %c16_i32 = arith.constant 16 : i32
    %163 = vector.broadcast %c16_i32 : i32 to vector<8x215xi32>
    %164 = arith.addi %162, %163 : vector<8x215xi32>
    %165 = arith.cmpi eq, %62, %164 : vector<8x215xi32>
    %166 = arith.extui %165 : vector<8x215xi1> to vector<8x215xi32>
    %167 = arith.sitofp %166 : vector<8x215xi32> to vector<8x215xf32>
    %cst_82 = arith.constant dense<0.000000e+00> : vector<8x200xf32>
    %168 = tpu.matmul %167, %61, %cst_82 {dimension_numbers = #tpu.dot_dimension_numbers<[1], [0], [0], [1], [0, 0, 1, 1], [], []>} : vector<8x215xf32>, vector<215x200xf32>, vector<8x200xf32> -> vector<8x200xf32>
    %c8 = arith.constant 8 : index
    %c0_83 = arith.constant 0 : index
    %c0_84 = arith.constant 0 : index
    %169 = vector.load %arg6[%c8, %c0_83, %c0_84] : memref<10x200x512xf32, #tpu.memory_space<vmem>>, vector<1x200x512xf32>
    %170 = vector.shape_cast %169 : vector<1x200x512xf32> to vector<200x512xf32>
    %cst_85 = arith.constant dense<0.000000e+00> : vector<8x512xf32>
    %171 = tpu.matmul %168, %170, %cst_85 {dimension_numbers = #tpu.dot_dimension_numbers<[1], [0], [0], [1], [0, 0, 1, 1], [], []>} : vector<8x200xf32>, vector<200x512xf32>, vector<8x512xf32> -> vector<8x512xf32>
    %172 = arith.addf %160, %171 : vector<8x512xf32>
    %c28_i32_86 = arith.constant 28 : i32
    %173 = vector.broadcast %c28_i32_86 : i32 to vector<8x215xi32>
    %174 = arith.muli %63, %173 : vector<8x215xi32>
    %c18_i32 = arith.constant 18 : i32
    %175 = vector.broadcast %c18_i32 : i32 to vector<8x215xi32>
    %176 = arith.addi %174, %175 : vector<8x215xi32>
    %177 = arith.cmpi eq, %62, %176 : vector<8x215xi32>
    %178 = arith.extui %177 : vector<8x215xi1> to vector<8x215xi32>
    %179 = arith.sitofp %178 : vector<8x215xi32> to vector<8x215xf32>
    %cst_87 = arith.constant dense<0.000000e+00> : vector<8x200xf32>
    %180 = tpu.matmul %179, %61, %cst_87 {dimension_numbers = #tpu.dot_dimension_numbers<[1], [0], [0], [1], [0, 0, 1, 1], [], []>} : vector<8x215xf32>, vector<215x200xf32>, vector<8x200xf32> -> vector<8x200xf32>
    %c9 = arith.constant 9 : index
    %c0_88 = arith.constant 0 : index
    %c0_89 = arith.constant 0 : index
    %181 = vector.load %arg6[%c9, %c0_88, %c0_89] : memref<10x200x512xf32, #tpu.memory_space<vmem>>, vector<1x200x512xf32>
    %182 = vector.shape_cast %181 : vector<1x200x512xf32> to vector<200x512xf32>
    %cst_90 = arith.constant dense<0.000000e+00> : vector<8x512xf32>
    %183 = tpu.matmul %180, %182, %cst_90 {dimension_numbers = #tpu.dot_dimension_numbers<[1], [0], [0], [1], [0, 0, 1, 1], [], []>} : vector<8x200xf32>, vector<200x512xf32>, vector<8x512xf32> -> vector<8x512xf32>
    %184 = arith.addf %172, %183 : vector<8x512xf32>
    %c0_91 = arith.constant 0 : index
    %c0_92 = arith.constant 0 : index
    %185 = vector.load %arg7[%c0_91, %c0_92] : memref<1x512xf32, #tpu.memory_space<vmem>>, vector<1x512xf32>
    %186 = vector.broadcast %185 : vector<1x512xf32> to vector<8x512xf32>
    %187 = arith.addf %184, %186 : vector<8x512xf32>
    %cst_93 = arith.constant 0.000000e+00 : f32
    %188 = vector.broadcast %cst_93 : f32 to vector<8x512xf32>
    %189 = arith.maximumf %187, %188 : vector<8x512xf32>
    %c0_94 = arith.constant 0 : index
    %c0_95 = arith.constant 0 : index
    %190 = vector.load %arg8[%c0_94, %c0_95] : memref<512x128xf32, #tpu.memory_space<vmem>>, vector<512x128xf32>
    %cst_96 = arith.constant dense<0.000000e+00> : vector<8x128xf32>
    %191 = tpu.matmul %189, %190, %cst_96 {dimension_numbers = #tpu.dot_dimension_numbers<[1], [0], [0], [1], [0, 0, 1, 1], [], []>} : vector<8x512xf32>, vector<512x128xf32>, vector<8x128xf32> -> vector<8x128xf32>
    %c0_97 = arith.constant 0 : index
    %c0_98 = arith.constant 0 : index
    %192 = vector.load %arg9[%c0_97, %c0_98] : memref<1x128xf32, #tpu.memory_space<vmem>>, vector<1x128xf32>
    %193 = vector.broadcast %192 : vector<1x128xf32> to vector<8x128xf32>
    %194 = arith.addf %191, %193 : vector<8x128xf32>
    %cst_99 = arith.constant dense<0xFF800000> : vector<8xf32>
    %195 = vector.multi_reduction <maximumf>, %194, %cst_99 [1] : vector<8x128xf32> to vector<8xf32>
    %196 = vector.shape_cast %195 : vector<8xf32> to vector<8x1xf32>
    %197 = vector.broadcast %196 : vector<8x1xf32> to vector<8x128xf32>
    %198 = arith.subf %194, %197 : vector<8x128xf32>
    %199 = math.exp %198 : vector<8x128xf32>
    %cst_100 = arith.constant dense<0.000000e+00> : vector<8xf32>
    %200 = vector.multi_reduction <add>, %199, %cst_100 [1] : vector<8x128xf32> to vector<8xf32>
    %201 = vector.shape_cast %200 : vector<8xf32> to vector<8x1xf32>
    %202 = math.log %201 : vector<8x1xf32>
    %203 = vector.broadcast %202 : vector<8x1xf32> to vector<8x128xf32>
    %204 = arith.subf %198, %203 : vector<8x128xf32>
    %c0_101 = arith.constant 0 : index
    %c0_102 = arith.constant 0 : index
    %205 = vector.load %arg10[%c0_101, %c0_102] : memref<8x128xf32, #tpu.memory_space<vmem>>, vector<8x128xf32>
    tpu.vector_store %arg10[%c0_101, %c0_102], %204 {strides = array<i32>} : memref<8x128xf32, #tpu.memory_space<vmem>>, vector<8x128xf32>,
    return
  }
  func.func @transform_0(%arg0: i32) -> (i32, i32) {
    %c0_i32 = arith.constant 0 : i32
    %c0_i32_0 = arith.constant 0 : i32
    return %arg0, %c0_i32 : i32, i32
  }
  func.func @transform_1(%arg0: i32) -> (i32, i32, i32) {
    %c0_i32 = arith.constant 0 : i32
    %c0_i32_0 = arith.constant 0 : i32
    %c0_i32_1 = arith.constant 0 : i32
    %c0_i32_2 = arith.constant 0 : i32
    return %c0_i32, %c0_i32_0, %c0_i32_1 : i32, i32, i32
  }
  func.func @transform_2(%arg0: i32) -> (i32, i32) {
    %c0_i32 = arith.constant 0 : i32
    %c0_i32_0 = arith.constant 0 : i32
    %c0_i32_1 = arith.constant 0 : i32
    return %c0_i32, %c0_i32_0 : i32, i32
  }
  func.func @transform_3(%arg0: i32) -> (i32, i32, i32) {
    %c0_i32 = arith.constant 0 : i32
    %c0_i32_0 = arith.constant 0 : i32
    %c0_i32_1 = arith.constant 0 : i32
    %c0_i32_2 = arith.constant 0 : i32
    return %c0_i32, %c0_i32_0, %c0_i32_1 : i32, i32, i32
  }
  func.func @transform_4(%arg0: i32) -> (i32, i32) {
    %c0_i32 = arith.constant 0 : i32
    %c0_i32_0 = arith.constant 0 : i32
    %c0_i32_1 = arith.constant 0 : i32
    return %c0_i32, %c0_i32_0 : i32, i32
  }
  func.func @transform_5(%arg0: i32) -> (i32, i32, i32) {
    %c0_i32 = arith.constant 0 : i32
    %c0_i32_0 = arith.constant 0 : i32
    %c0_i32_1 = arith.constant 0 : i32
    %c0_i32_2 = arith.constant 0 : i32
    return %c0_i32, %c0_i32_0, %c0_i32_1 : i32, i32, i32
  }
  func.func @transform_6(%arg0: i32) -> (i32, i32) {
    %c0_i32 = arith.constant 0 : i32
    %c0_i32_0 = arith.constant 0 : i32
    %c0_i32_1 = arith.constant 0 : i32
    return %c0_i32, %c0_i32_0 : i32, i32
  }
  func.func @transform_7(%arg0: i32) -> (i32, i32) {
    %c0_i32 = arith.constant 0 : i32
    %c0_i32_0 = arith.constant 0 : i32
    %c0_i32_1 = arith.constant 0 : i32
    return %c0_i32, %c0_i32_0 : i32, i32
  }
  func.func @transform_8(%arg0: i32) -> (i32, i32) {
    %c0_i32 = arith.constant 0 : i32
    %c0_i32_0 = arith.constant 0 : i32
    %c0_i32_1 = arith.constant 0 : i32
    return %c0_i32, %c0_i32_0 : i32, i32
  }
  func.func @transform_9(%arg0: i32) -> (i32, i32) {
    %c0_i32 = arith.constant 0 : i32
    %c0_i32_0 = arith.constant 0 : i32
    return %arg0, %c0_i32 : i32, i32
  }
}

</mosaic_0001>

<bundles_post_ra>
// kernel: tpu_custom_call.1
= control target key start
LH: loop header
LB: loop body
LE: loop exit
PB: predicated region body
PF: predicated region fallthrough
CT: control target
= control target key end

     0   :  { %14 = vsyncpa [#allocation3], 0  ;;  %s14354_s0 = inlined_call_operand.vmem [shape: f32[224,28], index: 0, kind: input, shape index: {}]   ;;  %s14355_s1 = inlined_call_operand.hbm [shape: f32[5,28,240], index: 1, kind: input, shape index: {}]   ;;  %s14356_s2 = inlined_call_operand.hbm [shape: f32[1,240], index: 2, kind: input, shape index: {}]   ;;  %s14357_s3 = inlined_call_operand.vmem [shape: f32[3,239,200], index: 3, kind: input, shape index: {}]   ;;  %s14358_s4 = inlined_call_operand.hbm [shape: f32[1,200], index: 4, kind: input, shape index: {}]   ;;  %s14359_s5 = inlined_call_operand.hbm [shape: f32[10,200,512], index: 5, kind: input, shape index: {}]   ;;  %s14360_s6 = inlined_call_operand.hbm [shape: f32[1,512], index: 6, kind: input, shape index: {}]   ;;  %s14361_s7 = inlined_call_operand.hbm [shape: f32[512,128], index: 7, kind: input, shape index: {}]   ;;  %s14362_s8 = inlined_call_operand.hbm [shape: f32[1,128], index: 8, kind: input, shape index: {}]   ;;  %s14363_s9 = inlined_call_operand.hbm [shape: f32[8,128], index: 9, kind: output, shape index: {}]  }
   0x1   :  { %15 = vsyncpa [#allocation6], 0 }
   0x2   :  { %16 = vsyncpa [#allocation9], 0 }
   0x3   :  { %17 = vsyncpa [#allocation12], 0 }
   0x4   :  { %18 = vsyncpa [#allocation4], 0  ;;  %s10805_s30 = smov [#allocation5]   ;;  %s10806_s11 = smov [#allocation8]  }
   0x5   :  { %s39_s10 = sshll.u32 %s10805_s30, 4  ;;  %s60_s12 = sshll.u32 %s10806_s11, 4  ;;  %s40_s10 = int_to_ptr.vmem [resolvable:$true] %s39_s10  ;;  %s10873_s12 = int_to_ptr.vmem [resolvable:$true] %s60_s12 }
   0x6   :  { %s10619_s15 = scalar_lea.hbm %s14356_s2, 32 }
   0x7   :  { %p10620_p0 = scmp.ne.s32.totalorder %s14356_s2, %s10619_s15  ;;  %p10623_p1 = scmp.lt.u32.totalorder %s10619_s15, %s14356_s2 }
   0x9   :  { %p10625_p2 = pnand %p10623_p1, %p10620_p0 }
   0xb   :  { %10628 = shalt.err (!%p10625_p2)
}
   0xc   :  { %s10629_s20 = scalar_lea.vmem %s40_s10, 32  ;;  %p10634_p4 = scmp.lt.s32.totalorder %s40_s10, %s40_s10 }
   0xd   :  { %p10630_p3 = scmp.ne.s32.totalorder %s40_s10, %s10629_s20  ;;  %p10635_p5 = scmp.lt.s32.totalorder %s10629_s20, %s10629_s20 }
   0xf   :  { %p10636_p6 = por %p10635_p5, %p10634_p4 }
  0x11   :  { %p10637_p7 = pnand %p10636_p6, %p10630_p3 }
  0x13   :  { %10640 = shalt.err (!%p10637_p7)
}
  0x14   :  { %42 = dma.hbm_to_vmem [thread:$0]  %s14356_s2, 32, %s40_s10, [#allocation6]  }
  0x15   :  { %s10641_s25 = scalar_lea.hbm %s14359_s5, 128000 }
  0x16   :  { %p10642_p8 = scmp.ne.s32.totalorder %s14359_s5, %s10641_s25  ;;  %p10645_p9 = scmp.lt.u32.totalorder %s10641_s25, %s14359_s5 }
  0x18   :  { %p10647_p10 = pnand %p10645_p9, %p10642_p8 }
  0x1a   :  { %10650 = shalt.err (!%p10647_p10)
}
  0x1b   :  { %s10651_s30 = scalar_lea.vmem %s10873_s12, 128000  ;;  %p10656_p12 = scmp.lt.s32.totalorder %s10873_s12, %s10873_s12 }
  0x1c   :  { %p10652_p11 = scmp.ne.s32.totalorder %s10873_s12, %s10651_s30  ;;  %p10657_p13 = scmp.lt.s32.totalorder %s10651_s30, %s10651_s30 }
  0x1e   :  { %p10658_p0 = por %p10657_p13, %p10656_p12 }
  0x20   :  { %p10659_p1 = pnand %p10658_p0, %p10652_p11 }
  0x22   :  { %10662 = shalt.err (!%p10659_p1)
}
  0x23   :  { %s10807_s2 = smov 512   ;;  %s10808_s10 = smov 32  }
  0x24   :  { %66 = dma.hbm_to_vmem [thread:$0]  %s14359_s5, 128000, %s10873_s12, [#allocation9], %s10807_s2, %s10807_s2, %s10808_s10  }
  0x25   :  { %s10809_s14 = smov [#allocation11]   ;;  %s10663_s18 = scalar_lea.hbm %s14361_s7, 8192 }
  0x26   :  { %s82_s15 = sshll.u32 %s10809_s14, 4  ;;  %p10664_p2 = scmp.ne.s32.totalorder %s14361_s7, %s10663_s18  ;;  %s83_s15 = int_to_ptr.vmem [resolvable:$true] %s82_s15 }
  0x27   :  { %p10667_p3 = scmp.lt.u32.totalorder %s10663_s18, %s14361_s7 }
  0x29   :  { %p10669_p4 = pnand %p10667_p3, %p10664_p2 }
  0x2b   :  { %10672 = shalt.err (!%p10669_p4)
}
  0x2c   :  { %s10673_s23 = scalar_lea.vmem %s83_s15, 8192  ;;  %p10678_p6 = scmp.lt.s32.totalorder %s83_s15, %s83_s15 }
  0x2d   :  { %p10674_p5 = scmp.ne.s32.totalorder %s83_s15, %s10673_s23  ;;  %p10679_p7 = scmp.lt.s32.totalorder %s10673_s23, %s10673_s23 }
  0x2f   :  { %p10680_p8 = por %p10679_p7, %p10678_p6 }
  0x31   :  { %p10681_p9 = pnand %p10680_p8, %p10674_p5 }
  0x33   :  { %10684 = shalt.err (!%p10681_p9)
}
  0x34   :  { %s10810_s5 = smov 128   ;;  %s10811_s12 = smov 8  }
  0x35   :  { %88 = dma.hbm_to_vmem [thread:$0]  %s14361_s7, 8192, %s83_s15, [#allocation12], %s10810_s5, %s10810_s5, %s10811_s12  }
  0x36   :  { %s10812_s26 = smov [#allocation2]   ;;  %s10685_s30 = scalar_lea.hbm %s14355_s1, 5120 }
  0x37   :  { %s26_s27 = sshll.u32 %s10812_s26, 4  ;;  %p10686_p10 = scmp.ne.s32.totalorder %s14355_s1, %s10685_s30  ;;  %s27_s27 = int_to_ptr.vmem [resolvable:$true] %s26_s27 }
  0x38   :  { %p10689_p11 = scmp.lt.u32.totalorder %s10685_s30, %s14355_s1 }
  0x3a   :  { %p10691_p12 = pnand %p10689_p11, %p10686_p10 }
  0x3c   :  { %10694 = shalt.err (!%p10691_p12)
}
  0x3d   :  { %s10695_s14 = scalar_lea.vmem %s27_s27, 5120  ;;  %p10700_p0 = scmp.lt.s32.totalorder %s27_s27, %s27_s27 }
  0x3e   :  { %p10696_p13 = scmp.ne.s32.totalorder %s27_s27, %s10695_s14  ;;  %p10701_p1 = scmp.lt.s32.totalorder %s10695_s14, %s10695_s14 }
  0x40   :  { %p10702_p2 = por %p10701_p1, %p10700_p0 }
  0x42   :  { %p10703_p3 = pnand %p10702_p2, %p10696_p13 }
  0x44   :  { %10706 = shalt.err (!%p10703_p3)
}
  0x45   :  { %s10813_s7 = smov 256   ;;  %s10814_s15 = smov 16  }
  0x46   :  { %32 = dma.hbm_to_vmem [thread:$0]  %s14355_s1, 5120, %s27_s27, [#allocation3], %s10813_s7, %s10813_s7, %s10814_s15  }
  0x47   :  { %s10815_s18 = smov [#allocation7]   ;;  %s10816_s20 = smov [#allocation10]  }
  0x48   :  { %s51_s19 = sshll.u32 %s10815_s18, 4  ;;  %s73_s21 = sshll.u32 %s10816_s20, 4  ;;  %s52_s19 = int_to_ptr.vmem [resolvable:$true] %s51_s19  ;;  %s74_s21 = int_to_ptr.vmem [resolvable:$true] %s73_s21 }
  0x49   :  { %s10707_s5 = scalar_lea.hbm %s14358_s4, 32 }
  0x4a   :  { %p10708_p4 = scmp.ne.s32.totalorder %s14358_s4, %s10707_s5  ;;  %p10711_p5 = scmp.lt.u32.totalorder %s10707_s5, %s14358_s4 }
  0x4c   :  { %p10713_p6 = pnand %p10711_p5, %p10708_p4 }
  0x4e   :  { %10716 = shalt.err (!%p10713_p6)
}
  0x4f   :  { %s10717_s1 = scalar_lea.vmem %s52_s19, 32  ;;  %p10722_p8 = scmp.lt.s32.totalorder %s52_s19, %s52_s19 }
  0x50   :  { %p10718_p7 = scmp.ne.s32.totalorder %s52_s19, %s10717_s1  ;;  %p10723_p9 = scmp.lt.s32.totalorder %s10717_s1, %s10717_s1 }
  0x52   :  { %p10724_p10 = por %p10723_p9, %p10722_p8 }
  0x54   :  { %p10725_p11 = pnand %p10724_p10, %p10718_p7 }
  0x56   :  { %10728 = shalt.err (!%p10725_p11)
}
  0x57   :  { %54 = dma.hbm_to_vmem [thread:$0]  %s14358_s4, 32, %s52_s19, [#allocation6]  }
  0x58   :  { %s10729_s2 = scalar_lea.hbm %s14360_s6, 64 }
  0x59   :  { %p10730_p12 = scmp.ne.s32.totalorder %s14360_s6, %s10729_s2  ;;  %p10733_p13 = scmp.lt.u32.totalorder %s10729_s2, %s14360_s6 }
  0x5b   :  { %p10735_p0 = pnand %p10733_p13, %p10730_p12 }
  0x5d   :  { %10738 = shalt.err (!%p10735_p0)
}
  0x5e   :  { %s10739_s7 = scalar_lea.vmem %s74_s21, 64  ;;  %p10744_p2 = scmp.lt.s32.totalorder %s74_s21, %s74_s21 }
  0x5f   :  { %p10740_p1 = scmp.ne.s32.totalorder %s74_s21, %s10739_s7  ;;  %p10745_p3 = scmp.lt.s32.totalorder %s10739_s7, %s10739_s7 }
  0x61   :  { %p10746_p4 = por %p10745_p3, %p10744_p2 }
  0x63   :  { %p10747_p5 = pnand %p10746_p4, %p10740_p1 }
  0x65   :  { %10750 = shalt.err (!%p10747_p5)
}
  0x66   :  { %76 = dma.hbm_to_vmem [thread:$0]  %s14360_s6, 64, %s74_s21, [#allocation9]  }
  0x67   :  { %s10817_s16 = smov [#allocation13]   ;;  %s10751_s20 = scalar_lea.hbm %s14362_s8, 16 }
  0x68   :  { %s95_s17 = sshll.u32 %s10817_s16, 4  ;;  %p10752_p6 = scmp.ne.s32.totalorder %s14362_s8, %s10751_s20  ;;  %s96_s17 = int_to_ptr.vmem [resolvable:$true] %s95_s17 }
  0x69   :  { %p10755_p7 = scmp.lt.u32.totalorder %s10751_s20, %s14362_s8 }
  0x6b   :  { %p10757_p8 = pnand %p10755_p7, %p10752_p6 }
  0x6d   :  { %10760 = shalt.err (!%p10757_p8)
}
  0x6e   :  { %s10761_s24 = scalar_lea.vmem %s96_s17, 16  ;;  %s10765_s6 = scalar_lea.vmem %s96_s17, 32 }
  0x6f   :  { %p10762_p9 = scmp.ne.s32.totalorder %s96_s17, %s10761_s24  ;;  %p10766_p10 = scmp.lt.s32.totalorder %s96_s17, %s96_s17 }
  0x70   :  { %p10767_p11 = scmp.lt.s32.totalorder %s10765_s6, %s10761_s24 }
  0x72   :  { %p10768_p12 = por %p10767_p11, %p10766_p10 }
  0x74   :  { %p10769_p13 = pnand %p10768_p12, %p10762_p9 }
  0x76   :  { %10772 = shalt.err (!%p10769_p13)
}
  0x77   :  { %98 = dma.hbm_to_vmem [thread:$0]  %s14362_s8, 16, %s96_s17, [#allocation12]  }
  0x78   :  { %10795 = dma.done.wait [#allocation3], 5120  }
  0x79   :  { %10796 = vsyncadd [#allocation3], 4294962176 }
  0x7a   :  { %10797 = dma.done.wait [#allocation6], 64  }
  0x7b   :  { %10798 = vsyncadd [#allocation6], 4294967232 }
  0x7c   :  { %10799 = dma.done.wait [#allocation9], 128064  }
  0x7d   :  { %10800 = vsyncadd [#allocation9], 4294839232 }
  0x7e   :  { %10801 = dma.done.wait [#allocation12], 8208  }
  0x7f   :  { %10802 = vsyncadd [#allocation12], 4294959088  ;;  %v14364_v0 = vmov 0.0   ;;  %vm306_vm0 = vcmask 1043456   ;;  %vm10819_vm1 = vmmov 1   ;;  %v158_v2 = vld [vmem:[#allocation2 + $0x48] sm:$0xff] }
  0x80   :  { %377 = vmatprep.mubr.f32.mxu0 %v14364_v0  ;;  %vm10967_vm2 = vmpackc.low %vm306_vm0, %vm10819_vm1  ;;  %v160_v3 = vld [vmem:[#allocation2 + $0x58] sm:$0xff]  ;;  %v157_v4 = vld [vmem:[#allocation2 + $0x40] sm:$0xff]  ;;  %vm193_vm3 = vcmask 1046528   ;;  %vm249_vm4 = vcmask 228352   ;;  %vm850_vm5 = vcmask 1045504   ;;  %vm1266_vm6 = vcmask 1044480  }
  0x81   :  { %v8444_v5 = vpack.c.bf16 %v160_v3, %v158_v2  ;;  %v159_v6 = vld [vmem:[#allocation2 + $0x50] sm:$0xff]  ;;  %v162_v7 = vld [vmem:[#allocation2 + $0x68] sm:$0xff]  ;;  %v164_v8 = vld [vmem:[#allocation2 + $0x78] sm:$0xf]  ;;  %s10820_s22 = smov 127   ;;  %vm2380_vm8 = vcmask 1039360  }
  0x82   :  { %v8446_v9 = vpack.c.bf16 %v159_v6, %v157_v4  ;;  %v8448_v10 = vpack.c.bf16 %v164_v8, %v162_v7  ;;  %v161_v11 = vld [vmem:[#allocation2 + $0x60] sm:$0xff]  ;;  %v163_v12 = vld [vmem:[#allocation2 + $0x70] sm:$0xf]  ;;  %v10979_v14 = vld [vmem:[%s14354_s0 + $0x8] sm:$0xff]  ;;  %vm3117_vm9 = vcmask 908288   ;;  %vm4364_vm10 = vcmask 711680  }
  0x83   :  { %v10974_v13 = vld [vmem:[%s14354_s0] sm:$0xff]  ;;  %8445 = vmatprep.subr.bf16.mxu0 %v8444_v5  ;;  %v8451_v15 = vpack.c.bf16 %v163_v12, %v161_v11  ;;  %v195_v17 = vrot.slane %v10979_v14, 1  ;;  %v149_v18 = vld [vmem:[#allocation2 + $0x8] sm:$0xff]  ;;  %v151_v19 = vld [vmem:[#allocation2 + $0x18] sm:$0xff] }
  0x84   :  { %8447 = vmatpush1.bf16.msra.mxu0 %v8446_v9  ;;  %v194_v16 = vrot.slane %v10974_v13, 1  ;;  %v10988_v20 = vld [vmem:[%s14354_s0 + $0x10] sm:$0xff]  ;;  %v8454_v21 = vpack.c.bf16 %v151_v19, %v149_v18  ;;  %v148_v22 = vld [vmem:[#allocation2] sm:$0xff]  ;;  %v10997_v27 = vld [vmem:[%s14354_s0 + $0x18] sm:$0xff] }
  0x85   :  { %8450 = vmatprep.subr.msk.bf16.mxu0 %vm10967_vm2, %v8448_v10  ;;  %v150_v23 = vld [vmem:[#allocation2 + $0x10] sm:$0xff]  ;;  %v197_v25 = vrot.slane %v10988_v20, 1  ;;  %v153_v28 = vld [vmem:[#allocation2 + $0x28] sm:$0xff]  ;;  %v155_v29 = vld [vmem:[#allocation2 + $0x38] sm:$0xf]  ;;  %v199_v32 = vrot.slane %v10997_v27, 1 }
  0x86   :  { %v196_v24 = vsel %vm193_vm3, %v194_v16, %v195_v17  ;;  %v8456_v26 = vpack.c.bf16 %v150_v23, %v148_v22  ;;  %v152_v30 = vld [vmem:[#allocation2 + $0x20] sm:$0xff]  ;;  %v8458_v33 = vpack.c.bf16 %v155_v29, %v153_v28  ;;  %v154_v34 = vld [vmem:[#allocation2 + $0x30] sm:$0xf]  ;;  %v843_v39 = vld [vmem:[#allocation2 + $0x88] sm:$0xff] }
  0x87   :  { %v198_v31 = vsel %vm193_vm3, %v195_v17, %v197_v25  ;;  %v11006_v35 = vld [vmem:[%s14354_s0 + $0x20] sm:$0xff]  ;;  %v8461_v36 = vpack.c.bf16 %v154_v34, %v152_v30  ;;  %v200_v37 = vsel %vm193_vm3, %v197_v25, %v199_v32  ;;  %v845_v40 = vld [vmem:[#allocation2 + $0x98] sm:$0xff]  ;;  %v11019_v41 = vld [vmem:[%s14354_s0 + $0x28] sm:$0xff] }
  0x88   :  { %8453 = vmatpush1.bf16.msk.msra.mxu0 %vm10967_vm2, %v8451_v15  ;;  %v201_v38 = vrot.slane %v11006_v35, 1  ;;  %v8464_v42 = vpack.c.bf16 %v845_v40, %v843_v39  ;;  %v203_v44 = vrot.slane %v11019_v41, 1  ;;  %v11028_v45 = vld [vmem:[%s14354_s0 + $0x30] sm:$0xff]  ;;  %v11037_v48 = vld [vmem:[%s14354_s0 + $0x38] sm:$0xff]  ;;  %v11046_v51 = vld [vmem:[%s14354_s0 + $0x40] sm:$0xff] }
  0x89   :  { %8455 = vmatprep.subr.bf16.mxu0 %v8454_v21  ;;  %v205_v47 = vrot.slane %v11028_v45, 1  ;;  %v207_v50 = vrot.slane %v11037_v48, 1  ;;  %v209_v53 = vrot.slane %v11046_v51, 1  ;;  %v11055_v54 = vld [vmem:[%s14354_s0 + $0x48] sm:$0xff]  ;;  %v11064_v57 = vld [vmem:[%s14354_s0 + $0x50] sm:$0xff]  ;;  %v11073_v60 = vld [vmem:[%s14354_s0 + $0x58] sm:$0xff] }
  0x8a   :  { %v202_v43 = vsel %vm193_vm3, %v199_v32, %v201_v38  ;;  %v204_v46 = vsel %vm193_vm3, %v201_v38, %v203_v44  ;;  %v211_v56 = vrot.slane %v11055_v54, 1  ;;  %v213_v59 = vrot.slane %v11064_v57, 1  ;;  %v11082_v63 = vld [vmem:[%s14354_s0 + $0x60] sm:$0xff]  ;;  %v11091_v4 = vld [vmem:[%s14354_s0 + $0x68] sm:$0xff]  ;;  %v11100_v7 = vld [vmem:[%s14354_s0 + $0x70] sm:$0xff] }
  0x8b   :  { %7938 = vmatmul.mubr.msk.f32.vlgmr.msra.gmra.mrb[0].mxu0 %vm249_vm4, %v196_v24  ;;  %v206_v49 = vsel %vm193_vm3, %v203_v44, %v205_v47  ;;  %v208_v52 = vsel %vm193_vm3, %v205_v47, %v207_v50  ;;  %v210_v55 = vsel %vm193_vm3, %v207_v50, %v209_v53  ;;  %v215_v62 = vrot.slane %v11073_v60, 1  ;;  %v11109_v10 = vld [vmem:[%s14354_s0 + $0x78] sm:$0xff]  ;;  %v11118_v15 = vld [vmem:[%s14354_s0 + $0x80] sm:$0xff]  ;;  %v11127_v18 = vld [vmem:[%s14354_s0 + $0x88] sm:$0xff] }
  0x8c   :  { %383 = vmatprep.mubr.f32.mxu0 %v14364_v0  ;;  %8457 = vmatpush1.bf16.msra.mxu0 %v8456_v26  ;;  %v212_v58 = vsel %vm193_vm3, %v209_v53, %v211_v56  ;;  %v214_v61 = vsel %vm193_vm3, %v211_v56, %v213_v59  ;;  %v217_v3 = vrot.slane %v11082_v63, 1  ;;  %v219_v6 = vrot.slane %v11091_v4, 1  ;;  %v11136_v22 = vld [vmem:[%s14354_s0 + $0x90] sm:$0xff]  ;;  %v11145_v25 = vld [vmem:[%s14354_s0 + $0x98] sm:$0xff]  ;;  %v11154_v29 = vld [vmem:[%s14354_s0 + $0xa0] sm:$0xff] }
  0x8d   :  { %8460 = vmatprep.subr.msk.bf16.mxu0 %vm10967_vm2, %v8458_v33  ;;  %v216_v2 = vsel %vm193_vm3, %v213_v59, %v215_v62  ;;  %v221_v9 = vrot.slane %v11100_v7, 1  ;;  %v223_v12 = vrot.slane %v11109_v10, 1  ;;  %v225_v17 = vrot.slane %v11118_v15, 1  ;;  %v11163_v32 = vld [vmem:[%s14354_s0 + $0xa8] sm:$0xff]  ;;  %v11181_v39 = vld [vmem:[%s14354_s0 + $0xb8] sm:$0xff]  ;;  %vm12048_vm7 = vmpackc.low %vm193_vm3, %vm10819_vm1 }
  0x8e   :  { %v218_v5 = vsel %vm193_vm3, %v215_v62, %v217_v3  ;;  %v220_v8 = vsel %vm193_vm3, %v217_v3, %v219_v6  ;;  %v227_v21 = vrot.slane %v11127_v18, 1  ;;  %v229_v24 = vrot.slane %v11136_v22, 1  ;;  %v11199_v47 = vld [vmem:[%s14354_s0 + $0xc8] sm:$0xff]  ;;  %v11217_v56 = vld [vmem:[%s14354_s0 + $0xd8] sm:$0xff]  ;;  %v842_v62 = vld [vmem:[#allocation2 + $0x80] sm:$0xff] }
  0x8f   :  { %7939 = vmatmul.mubr.msk.f32.gmra.mrb[2].mxu0 %vm249_vm4, %v198_v31  ;;  %v222_v11 = vsel %vm193_vm3, %v219_v6, %v221_v9  ;;  %v224_v16 = vsel %vm193_vm3, %v221_v9, %v223_v12  ;;  %v226_v19 = vsel %vm193_vm3, %v223_v12, %v225_v17  ;;  %v231_v28 = vrot.slane %v11145_v25, 1  ;;  %v847_v3 = vld [vmem:[#allocation2 + $0xa8] sm:$0xff]  ;;  %v846_v9 = vld [vmem:[#allocation2 + $0xa0] sm:$0xff] }
  0x90   :  { %389 = vmatprep.mubr.f32.mxu0 %v14364_v0  ;;  %8463 = vmatpush1.bf16.msk.msra.mxu0 %vm10967_vm2, %v8461_v36  ;;  %v228_v23 = vsel %vm193_vm3, %v225_v17, %v227_v21  ;;  %v230_v26 = vsel %vm193_vm3, %v227_v21, %v229_v24  ;;  %v233_v31 = vrot.slane %v11154_v29, 1  ;;  %v235_v34 = vrot.slane %v11163_v32, 1  ;;  %v11172_v36 = vld [vmem:[%s14354_s0 + $0xb0] sm:$0xff]  ;;  %v1259_v12 = vld [vmem:[#allocation2 + $0xc8] sm:$0xff] }
  0x91   :  { %8465 = vmatprep.subr.bf16.mxu0 %v8464_v42  ;;  %v232_v30 = vsel %vm193_vm3, %v229_v24, %v231_v28  ;;  %v237_v38 = vrot.slane %v11172_v36, 1  ;;  %v239_v42 = vrot.slane %v11181_v39, 1  ;;  %v243_v50 = vrot.slane %v11199_v47, 1  ;;  %v1258_v24 = vld [vmem:[#allocation2 + $0xc0] sm:$0xff] }
  0x92   :  { %v234_v33 = vsel %vm193_vm3, %v231_v28, %v233_v31  ;;  %v247_v59 = vrot.slane %v11217_v56, 1  ;;  %v851_v21 = vrot.slane %v10974_v13, 2  ;;  %v1263_v28 = vld [vmem:[#allocation2 + $0xe8] sm:$0xff] }
  0x93   :  { %7940 = vmatmul.mubr.msk.f32.gmra.mrb[4].mxu0 %vm249_vm4, %v200_v37  ;;  %v236_v37 = vsel %vm193_vm3, %v233_v31, %v235_v34  ;;  %v238_v40 = vsel %vm193_vm3, %v235_v34, %v237_v38  ;;  %v240_v44 = vsel %vm193_vm3, %v237_v38, %v239_v42  ;;  %v1262_v38 = vld [vmem:[#allocation2 + $0xe0] sm:$0xff] }
  0x94   :  { %395 = vmatprep.mubr.f32.mxu0 %v14364_v0 }
  0x97   :  { %7941 = vmatmul.mubr.msk.f32.gmra.mrb[6].mxu0 %vm249_vm4, %v202_v43  ;;  %v11190_v43 = vld [vmem:[%s14354_s0 + $0xc0] sm:$0xff] }
  0x98   :  { %401 = vmatprep.mubr.f32.mxu0 %v14364_v0 }
  0x9b   :  { %7942 = vmatmul.mubr.msk.f32.gmra.mrb[8].mxu0 %vm249_vm4, %v204_v46  ;;  %v241_v46 = vrot.slane %v11190_v43, 1 }
  0x9c   :  { %407 = vmatprep.mubr.f32.mxu0 %v14364_v0 }
  0x9d   :  { %v244_v53 = vsel %vm193_vm3, %v241_v46, %v243_v50 }
  0x9f   :  { %7943 = vmatmul.mubr.msk.f32.gmra.mrb[10].mxu0 %vm249_vm4, %v206_v49  ;;  %v242_v49 = vsel %vm193_vm3, %v239_v42, %v241_v46  ;;  %v1675_v42 = vld [vmem:[#allocation2 + $0x108] sm:$0xff] }
  0xa0   :  { %413 = vmatprep.mubr.f32.mxu0 %v14364_v0 }
  0xa3   :  { %7944 = vmatmul.mubr.msk.f32.gmra.mrb[12].mxu0 %vm249_vm4, %v208_v52  ;;  %v11208_v52 = vld [vmem:[%s14354_s0 + $0xd0] sm:$0xff] }
  0xa4   :  { %419 = vmatprep.mubr.f32.mxu0 %v14364_v0 }
  0xa7   :  { %7945 = vmatmul.mubr.msk.f32.gmra.mrb[14].mxu0 %vm249_vm4, %v210_v55  ;;  %v245_v55 = vrot.slane %v11208_v52, 1 }
  0xa8   :  { %425 = vmatprep.mubr.f32.mxu0 %v14364_v0 }
  0xab   :  { %7946 = vmatmul.mubr.msk.f32.gmra.mrb[16].mxu0 %vm249_vm4, %v212_v58  ;;  %v246_v58 = vsel %vm193_vm3, %v243_v50, %v245_v55 }
  0xac   :  { %431 = vmatprep.mubr.f32.mxu0 %v14364_v0 }
  0xaf   :  { %7947 = vmatmul.mubr.msk.f32.gmra.mrb[18].mxu0 %vm249_vm4, %v214_v61  ;;  %v248_v61 = vsel %vm193_vm3, %v245_v55, %v247_v59 }
  0xb0   :  { %437 = vmatprep.mubr.f32.mxu0 %v14364_v0 }
  0xb3   :  { %7948 = vmatmul.mubr.msk.f32.gmra.mrb[20].mxu0 %vm249_vm4, %v216_v2  ;;  %v844_v2 = vld [vmem:[#allocation2 + $0x90] sm:$0xff] }
  0xb4   :  { %443 = vmatprep.mubr.f32.mxu0 %v14364_v0  ;;  %v8466_v6 = vpack.c.bf16 %v844_v2, %v842_v62  ;;  %v862_v2 = vrot.slane %v11028_v45, 2 }
  0xb7   :  { %7949 = vmatmul.mubr.msk.f32.gmra.mrb[22].mxu0 %vm249_vm4, %v218_v5  ;;  %v849_v5 = vld [vmem:[#allocation2 + $0xb8] sm:$0xf] }
  0xb8   :  { %449 = vmatprep.mubr.f32.mxu0 %v14364_v0 }
  0xbb   :  { %7950 = vmatmul.mubr.msk.f32.gmra.mrb[24].mxu0 %vm249_vm4, %v220_v8  ;;  %v8468_v8 = vpack.c.bf16 %v849_v5, %v847_v3  ;;  %v864_v5 = vrot.slane %v11037_v48, 2 }
  0xbc   :  { %455 = vmatprep.mubr.f32.mxu0 %v14364_v0 }
  0xbf   :  { %7951 = vmatmul.mubr.msk.f32.gmra.mrb[26].mxu0 %vm249_vm4, %v222_v11  ;;  %v848_v11 = vld [vmem:[#allocation2 + $0xb0] sm:$0xf] }
  0xc0   :  { %461 = vmatprep.mubr.f32.mxu0 %v14364_v0  ;;  %v8471_v17 = vpack.c.bf16 %v848_v11, %v846_v9  ;;  %v868_v11 = vrot.slane %v11055_v54, 2 }
  0xc3   :  { %7952 = vmatmul.mubr.msk.f32.gmra.mrb[28].mxu0 %vm249_vm4, %v224_v16  ;;  %v1261_v16 = vld [vmem:[#allocation2 + $0xd8] sm:$0xff] }
  0xc4   :  { %467 = vmatprep.mubr.f32.mxu0 %v14364_v0 }
  0xc7   :  { %7953 = vmatmul.mubr.msk.f32.gmra.mrb[30].mxu0 %vm249_vm4, %v226_v19  ;;  %v8474_v19 = vpack.c.bf16 %v1261_v16, %v1259_v12  ;;  %v870_v16 = vrot.slane %v11064_v57, 2 }
  0xc8   :  { %473 = vmatprep.mubr.f32.mxu0 %v14364_v0 }
  0xcb   :  { %7954 = vmatmul.mubr.msk.f32.gmra.mrb[32].mxu0 %vm249_vm4, %v228_v23  ;;  %v852_v23 = vrot.slane %v10979_v14, 2 }
  0xcc   :  { %479 = vmatprep.mubr.f32.mxu0 %v14364_v0 }
  0xcd   :  { %v853_v31 = vsel %vm850_vm5, %v851_v21, %v852_v23 }
  0xcf   :  { %7955 = vmatmul.mubr.msk.f32.gmra.mrb[34].mxu0 %vm249_vm4, %v230_v26  ;;  %v1260_v26 = vld [vmem:[#allocation2 + $0xd0] sm:$0xff] }
  0xd0   :  { %485 = vmatprep.mubr.f32.mxu0 %v14364_v0  ;;  %v8476_v34 = vpack.c.bf16 %v1260_v26, %v1258_v24  ;;  %v876_v26 = vrot.slane %v11091_v4, 2 }
  0xd3   :  { %7956 = vmatmul.mubr.msk.f32.gmra.mrb[36].mxu0 %vm249_vm4, %v232_v30  ;;  %v1265_v30 = vld [vmem:[#allocation2 + $0xf8] sm:$0xf] }
  0xd4   :  { %491 = vmatprep.mubr.f32.mxu0 %v14364_v0 }
  0xd7   :  { %7957 = vmatmul.mubr.msk.f32.gmra.mrb[38].mxu0 %vm249_vm4, %v234_v33  ;;  %v854_v33 = vrot.slane %v10988_v20, 2 }
  0xd8   :  { %497 = vmatprep.mubr.f32.mxu0 %v14364_v0 }
  0xd9   :  { %v855_v46 = vsel %vm850_vm5, %v852_v23, %v854_v33  ;;  %v874_v23 = vrot.slane %v11082_v63, 2 }
  0xdb   :  { %7958 = vmatmul.mubr.msk.f32.gmra.mrb[40].mxu0 %vm249_vm4, %v236_v37  ;;  %v8478_v37 = vpack.c.bf16 %v1265_v30, %v1263_v28  ;;  %v877_v28 = vsel %vm850_vm5, %v874_v23, %v876_v26  ;;  %v878_v30 = vrot.slane %v11100_v7, 2 }
  0xdc   :  { %503 = vmatprep.mubr.f32.mxu0 %v14364_v0 }
  0xdf   :  { %7959 = vmatmul.mubr.msk.f32.gmra.mrb[42].mxu0 %vm249_vm4, %v238_v40  ;;  %v1264_v40 = vld [vmem:[#allocation2 + $0xf0] sm:$0xf] }
  0xe0   :  { %509 = vmatprep.mubr.f32.mxu0 %v14364_v0  ;;  %v8481_v50 = vpack.c.bf16 %v1264_v40, %v1262_v38  ;;  %v884_v40 = vrot.slane %v11127_v18, 2 }
  0xe3   :  { %7960 = vmatmul.mubr.msk.f32.gmra.mrb[44].mxu0 %vm249_vm4, %v240_v44  ;;  %v1677_v44 = vld [vmem:[#allocation2 + $0x118] sm:$0xff] }
  0xe4   :  { %515 = vmatprep.mubr.f32.mxu0 %v14364_v0 }
  0xe7   :  { %7961 = vmatmul.mubr.msk.f32.gmra.mrb[46].mxu0 %vm249_vm4, %v242_v49  ;;  %v856_v49 = vrot.slane %v10997_v27, 2 }
  0xe8   :  { %521 = vmatprep.mubr.f32.mxu0 %v14364_v0 }
  0xe9   :  { %v857_v55 = vsel %vm850_vm5, %v854_v33, %v856_v49  ;;  %v880_v33 = vrot.slane %v11109_v10, 2 }
  0xeb   :  { %7962 = vmatmul.mubr.msk.f32.gmra.mrb[48].mxu0 %vm249_vm4, %v244_v53  ;;  %v8484_v53 = vpack.c.bf16 %v1677_v44, %v1675_v42  ;;  %v886_v44 = vrot.slane %v11136_v22, 2 }
  0xec   :  { %527 = vmatprep.mubr.f32.mxu0 %v14364_v0 }
  0xef   :  { %7963 = vmatmul.mubr.msk.f32.gmra.mrb[50].mxu0 %vm249_vm4, %v246_v58  ;;  %v858_v58 = vrot.slane %v11006_v35, 2 }
  0xf0   :  { %533 = vmatprep.mubr.f32.mxu0 %v14364_v0 }
  0xf3   :  { %7964 = vmatmul.mubr.msk.f32.gmra.mrb[52].mxu0 %vm249_vm4, %v248_v61  ;;  %v860_v61 = vrot.slane %v11019_v41, 2 }
  0xf4   :  { %539 = vmatprep.mubr.f32.mxu0 %v14364_v0 }
  0xf5   :  { %v861_v62 = vsel %vm850_vm5, %v858_v58, %v860_v61  ;;  %v863_v3 = vsel %vm850_vm5, %v860_v61, %v862_v2  ;;  %v894_v61 = vrot.slane %v11172_v36, 2 }
  0xf7   :  { %7965 = vmatmul.mubr.msk.f32.gmra.mrb[54].mxu0 %vm249_vm4, %v247_v59  ;;  %v859_v59 = vsel %vm850_vm5, %v856_v49, %v858_v58  ;;  %v888_v49 = vrot.slane %v11145_v25, 2  ;;  %v892_v58 = vrot.slane %v11163_v32, 2 }
  0xf8   :  { %672 = vmatprep.mubr.f32.mxu0 %v14364_v0 }
  0xfb   :  { %7968 = vmatmul.mubr.msk.f32.vlgmr.msra.gmra.mrb[0].mxu0 %vm249_vm4, %v10974_v13 }
  0xfc   :  { %678 = vmatprep.mubr.f32.mxu0 %v14364_v0  ;;  %8467 = vmatpush1.bf16.msra.mxu0 %v8466_v6  ;;  %v865_v6 = vsel %vm850_vm5, %v862_v2, %v864_v5  ;;  %v896_v2 = vrot.slane %v11181_v39, 2 }
  0xfd   :  { %8470 = vmatprep.subr.msk.bf16.mxu0 %vm10967_vm2, %v8468_v8  ;;  %v866_v8 = vrot.slane %v11046_v51, 2 }
  0xff   :  { %7969 = vmatmul.mubr.msk.f32.gmra.mrb[2].mxu0 %vm249_vm4, %v10979_v14  ;;  %v867_v9 = vsel %vm850_vm5, %v864_v5, %v866_v8  ;;  %v869_v12 = vsel %vm850_vm5, %v866_v8, %v868_v11  ;;  %v898_v5 = vrot.slane %v11190_v43, 2  ;;  %v900_v8 = vrot.slane %v11199_v47, 2 }
 0x100   :  { %684 = vmatprep.mubr.f32.mxu0 %v14364_v0  ;;  %8473 = vmatpush1.bf16.msk.msra.mxu0 %vm10967_vm2, %v8471_v17  ;;  %v871_v17 = vsel %vm850_vm5, %v868_v11, %v870_v16  ;;  %v902_v11 = vrot.slane %v11208_v52, 2 }
 0x101   :  { %8475 = vmatprep.subr.bf16.mxu0 %v8474_v19  ;;  %v872_v19 = vrot.slane %v11073_v60, 2 }
 0x103   :  { %7970 = vmatmul.mubr.msk.f32.gmra.mrb[4].mxu0 %vm249_vm4, %v10988_v20  ;;  %v873_v21 = vsel %vm850_vm5, %v870_v16, %v872_v19  ;;  %v875_v24 = vsel %vm850_vm5, %v872_v19, %v874_v23  ;;  %v904_v16 = vrot.slane %v11217_v56, 2  ;;  %v1267_v19 = vrot.slane %v10974_v13, 3  ;;  %v1674_v23 = vld [vmem:[#allocation2 + $0x100] sm:$0xff] }
 0x104   :  { %690 = vmatprep.mubr.f32.mxu0 %v14364_v0 }
 0x107   :  { %7971 = vmatmul.mubr.msk.f32.gmra.mrb[6].mxu0 %vm249_vm4, %v10997_v27 }
 0x108   :  { %696 = vmatprep.mubr.f32.mxu0 %v14364_v0 }
 0x10b   :  { %7972 = vmatmul.mubr.msk.f32.gmra.mrb[8].mxu0 %vm249_vm4, %v11006_v35 }
 0x10c   :  { %702 = vmatprep.mubr.f32.mxu0 %v14364_v0 }
 0x10f   :  { %7973 = vmatmul.mubr.msk.f32.gmra.mrb[10].mxu0 %vm249_vm4, %v11019_v41 }
 0x110   :  { %708 = vmatprep.mubr.f32.mxu0 %v14364_v0 }
 0x113   :  { %7974 = vmatmul.mubr.msk.f32.gmra.mrb[12].mxu0 %vm249_vm4, %v11028_v45 }
 0x114   :  { %714 = vmatprep.mubr.f32.mxu0 %v14364_v0 }
 0x117   :  { %7975 = vmatmul.mubr.msk.f32.gmra.mrb[14].mxu0 %vm249_vm4, %v11037_v48 }
 0x118   :  { %720 = vmatprep.mubr.f32.mxu0 %v14364_v0 }
 0x11b   :  { %7976 = vmatmul.mubr.msk.f32.gmra.mrb[16].mxu0 %vm249_vm4, %v11046_v51 }
 0x11c   :  { %726 = vmatprep.mubr.f32.mxu0 %v14364_v0 }
 0x11f   :  { %7977 = vmatmul.mubr.msk.f32.gmra.mrb[18].mxu0 %vm249_vm4, %v11055_v54 }
 0x120   :  { %732 = vmatprep.mubr.f32.mxu0 %v14364_v0 }
 0x123   :  { %7978 = vmatmul.mubr.msk.f32.gmra.mrb[20].mxu0 %vm249_vm4, %v11064_v57 }
 0x124   :  { %738 = vmatprep.mubr.f32.mxu0 %v14364_v0 }
 0x127   :  { %7979 = vmatmul.mubr.msk.f32.gmra.mrb[22].mxu0 %vm249_vm4, %v11073_v60 }
 0x128   :  { %744 = vmatprep.mubr.f32.mxu0 %v14364_v0 }
 0x12b   :  { %7980 = vmatmul.mubr.msk.f32.gmra.mrb[24].mxu0 %vm249_vm4, %v11082_v63 }
 0x12c   :  { %750 = vmatprep.mubr.f32.mxu0 %v14364_v0 }
 0x12f   :  { %7981 = vmatmul.mubr.msk.f32.gmra.mrb[26].mxu0 %vm249_vm4, %v11091_v4 }
 0x130   :  { %756 = vmatprep.mubr.f32.mxu0 %v14364_v0 }
 0x133   :  { %7982 = vmatmul.mubr.msk.f32.gmra.mrb[28].mxu0 %vm249_vm4, %v11100_v7 }
 0x134   :  { %762 = vmatprep.mubr.f32.mxu0 %v14364_v0 }
 0x137   :  { %7983 = vmatmul.mubr.msk.f32.gmra.mrb[30].mxu0 %vm249_vm4, %v11109_v10 }
 0x138   :  { %768 = vmatprep.mubr.f32.mxu0 %v14364_v0 }
 0x13b   :  { %7984 = vmatmul.mubr.msk.f32.gmra.mrb[32].mxu0 %vm249_vm4, %v11118_v15 }
 0x13c   :  { %774 = vmatprep.mubr.f32.mxu0 %v14364_v0 }
 0x13f   :  { %7985 = vmatmul.mubr.msk.f32.gmra.mrb[34].mxu0 %vm249_vm4, %v11127_v18 }
 0x140   :  { %780 = vmatprep.mubr.f32.mxu0 %v14364_v0 }
 0x143   :  { %7986 = vmatmul.mubr.msk.f32.gmra.mrb[36].mxu0 %vm249_vm4, %v11136_v22 }
 0x144   :  { %786 = vmatprep.mubr.f32.mxu0 %v14364_v0 }
 0x147   :  { %7987 = vmatmul.mubr.msk.f32.gmra.mrb[38].mxu0 %vm249_vm4, %v11145_v25 }
 0x148   :  { %792 = vmatprep.mubr.f32.mxu0 %v14364_v0 }
 0x14b   :  { %7988 = vmatmul.mubr.msk.f32.gmra.mrb[40].mxu0 %vm249_vm4, %v11154_v29 }
 0x14c   :  { %798 = vmatprep.mubr.f32.mxu0 %v14364_v0 }
 0x14f   :  { %7989 = vmatmul.mubr.msk.f32.gmra.mrb[42].mxu0 %vm249_vm4, %v11163_v32 }
 0x150   :  { %804 = vmatprep.mubr.f32.mxu0 %v14364_v0 }
 0x153   :  { %7990 = vmatmul.mubr.msk.f32.gmra.mrb[44].mxu0 %vm249_vm4, %v11172_v36 }
 0x154   :  { %810 = vmatprep.mubr.f32.mxu0 %v14364_v0 }
 0x157   :  { %7991 = vmatmul.mubr.msk.f32.gmra.mrb[46].mxu0 %vm249_vm4, %v11181_v39 }
 0x158   :  { %816 = vmatprep.mubr.f32.mxu0 %v14364_v0 }
 0x15b   :  { %7992 = vmatmul.mubr.msk.f32.gmra.mrb[48].mxu0 %vm249_vm4, %v11190_v43 }
 0x15c   :  { %822 = vmatprep.mubr.f32.mxu0 %v14364_v0 }
 0x15f   :  { %7993 = vmatmul.mubr.msk.f32.gmra.mrb[50].mxu0 %vm249_vm4, %v11199_v47 }
 0x160   :  { %828 = vmatprep.mubr.f32.mxu0 %v14364_v0 }
 0x163   :  { %7994 = vmatmul.mubr.msk.f32.gmra.mrb[52].mxu0 %vm249_vm4, %v11208_v52 }
 0x164   :  { %834 = vmatprep.mubr.f32.mxu0 %v14364_v0 }
 0x167   :  { %7995 = vmatmul.mubr.msk.f32.gmra.mrb[54].mxu0 %vm249_vm4, %v11217_v56 }
 0x168   :  { %1032 = vmatprep.mubr.f32.mxu0 %v14364_v0 }
 0x16b   :  { %7998 = vmatmul.mubr.msk.f32.vlgmr.msra.gmra.mrb[0].mxu0 %vm249_vm4, %v853_v31  ;;  %v879_v31 = vsel %vm850_vm5, %v876_v26, %v878_v30  ;;  %v1679_v26 = vld [vmem:[#allocation2 + $0x128] sm:$0xff] }
 0x16c   :  { %1038 = vmatprep.mubr.f32.mxu0 %v14364_v0  ;;  %8477 = vmatpush1.bf16.msra.mxu0 %v8476_v34  ;;  %v881_v34 = vsel %vm850_vm5, %v878_v30, %v880_v33 }
 0x16d   :  { %8480 = vmatprep.subr.msk.bf16.mxu0 %vm10967_vm2, %v8478_v37  ;;  %v882_v37 = vrot.slane %v11118_v15, 2 }
 0x16f   :  { %7999 = vmatmul.mubr.msk.f32.gmra.mrb[2].mxu0 %vm249_vm4, %v855_v46  ;;  %v883_v38 = vsel %vm850_vm5, %v880_v33, %v882_v37  ;;  %v885_v42 = vsel %vm850_vm5, %v882_v37, %v884_v40  ;;  %v887_v46 = vsel %vm850_vm5, %v884_v40, %v886_v44  ;;  %v1678_v37 = vld [vmem:[#allocation2 + $0x120] sm:$0xff] }
 0x170   :  { %1044 = vmatprep.mubr.f32.mxu0 %v14364_v0  ;;  %8483 = vmatpush1.bf16.msk.msra.mxu0 %vm10967_vm2, %v8481_v50  ;;  %v889_v50 = vsel %vm850_vm5, %v886_v44, %v888_v49 }
 0x171   :  { %8485 = vmatprep.subr.bf16.mxu0 %v8484_v53  ;;  %v890_v53 = vrot.slane %v11154_v29, 2 }
 0x173   :  { %8000 = vmatmul.mubr.msk.f32.gmra.mrb[4].mxu0 %vm249_vm4, %v857_v55  ;;  %v891_v55 = vsel %vm850_vm5, %v888_v49, %v890_v53  ;;  %v1274_v49 = vrot.slane %v11006_v35, 3 }
 0x174   :  { %1050 = vmatprep.mubr.f32.mxu0 %v14364_v0 }
 0x177   :  { %8001 = vmatmul.mubr.msk.f32.gmra.mrb[6].mxu0 %vm249_vm4, %v859_v59  ;;  %v893_v59 = vsel %vm850_vm5, %v890_v53, %v892_v58  ;;  %v1276_v53 = vrot.slane %v11019_v41, 3 }
 0x178   :  { %1056 = vmatprep.mubr.f32.mxu0 %v14364_v0 }
 0x17b   :  { %8002 = vmatmul.mubr.msk.f32.gmra.mrb[8].mxu0 %vm249_vm4, %v861_v62  ;;  %v895_v62 = vsel %vm850_vm5, %v892_v58, %v894_v61  ;;  %v1278_v58 = vrot.slane %v11028_v45, 3 }
 0x17c   :  { %1062 = vmatprep.mubr.f32.mxu0 %v14364_v0 }
 0x17d   :  { %v1279_v1 = vsel %vm1266_vm6, %v1276_v53, %v1278_v58 }
 0x17f   :  { %8003 = vmatmul.mubr.msk.f32.gmra.mrb[10].mxu0 %vm249_vm4, %v863_v3  ;;  %v897_v3 = vsel %vm850_vm5, %v894_v61, %v896_v2 }
 0x180   :  { %1068 = vmatprep.mubr.f32.mxu0 %v14364_v0 }
 0x183   :  { %8004 = vmatmul.mubr.msk.f32.gmra.mrb[12].mxu0 %vm249_vm4, %v865_v6  ;;  %v899_v6 = vsel %vm850_vm5, %v896_v2, %v898_v5 }
 0x184   :  { %1074 = vmatprep.mubr.f32.mxu0 %v14364_v0 }
 0x187   :  { %8005 = vmatmul.mubr.msk.f32.gmra.mrb[14].mxu0 %vm249_vm4, %v867_v9  ;;  %v901_v9 = vsel %vm850_vm5, %v898_v5, %v900_v8 }
 0x188   :  { %1080 = vmatprep.mubr.f32.mxu0 %v14364_v0 }
 0x18b   :  { %8006 = vmatmul.mubr.msk.f32.gmra.mrb[16].mxu0 %vm249_vm4, %v869_v12  ;;  %v903_v12 = vsel %vm850_vm5, %v900_v8, %v902_v11 }
 0x18c   :  { %1086 = vmatprep.mubr.f32.mxu0 %v14364_v0 }
 0x18f   :  { %8007 = vmatmul.mubr.msk.f32.gmra.mrb[18].mxu0 %vm249_vm4, %v871_v17  ;;  %v905_v17 = vsel %vm850_vm5, %v902_v11, %v904_v16 }
 0x190   :  { %1092 = vmatprep.mubr.f32.mxu0 %v14364_v0 }
 0x193   :  { %8008 = vmatmul.mubr.msk.f32.gmra.mrb[20].mxu0 %vm249_vm4, %v873_v21  ;;  %v1268_v21 = vrot.slane %v10979_v14, 3 }
 0x194   :  { %1098 = vmatprep.mubr.f32.mxu0 %v14364_v0 }
 0x195   :  { %v1269_v30 = vsel %vm1266_vm6, %v1267_v19, %v1268_v21 }
 0x197   :  { %8009 = vmatmul.mubr.msk.f32.gmra.mrb[22].mxu0 %vm249_vm4, %v875_v24  ;;  %v1676_v24 = vld [vmem:[#allocation2 + $0x110] sm:$0xff] }
 0x198   :  { %1104 = vmatprep.mubr.f32.mxu0 %v14364_v0  ;;  %v8486_v33 = vpack.c.bf16 %v1676_v24, %v1674_v23  ;;  %v1296_v24 = vrot.slane %v11109_v10, 3 }
 0x19b   :  { %8010 = vmatmul.mubr.msk.f32.gmra.mrb[24].mxu0 %vm249_vm4, %v877_v28  ;;  %v1681_v28 = vld [vmem:[#allocation2 + $0x138] sm:$0xf] }
 0x19c   :  { %1110 = vmatprep.mubr.f32.mxu0 %v14364_v0 }
 0x19f   :  { %8011 = vmatmul.mubr.msk.f32.gmra.mrb[26].mxu0 %vm249_vm4, %v879_v31  ;;  %v1270_v31 = vrot.slane %v10988_v20, 3 }
 0x1a0   :  { %1116 = vmatprep.mubr.f32.mxu0 %v14364_v0 }
 0x1a1   :  { %v1271_v40 = vsel %vm1266_vm6, %v1268_v21, %v1270_v31  ;;  %v1294_v21 = vrot.slane %v11100_v7, 3 }
 0x1a3   :  { %8012 = vmatmul.mubr.msk.f32.gmra.mrb[28].mxu0 %vm249_vm4, %v881_v34  ;;  %v8488_v34 = vpack.c.bf16 %v1681_v28, %v1679_v26  ;;  %v1297_v26 = vsel %vm1266_vm6, %v1294_v21, %v1296_v24  ;;  %v1298_v28 = vrot.slane %v11118_v15, 3 }
 0x1a4   :  { %1122 = vmatprep.mubr.f32.mxu0 %v14364_v0 }
 0x1a7   :  { %8013 = vmatmul.mubr.msk.f32.gmra.mrb[30].mxu0 %vm249_vm4, %v883_v38  ;;  %v1680_v38 = vld [vmem:[#allocation2 + $0x130] sm:$0xf] }
 0x1a8   :  { %1128 = vmatprep.mubr.f32.mxu0 %v14364_v0  ;;  %v8491_v44 = vpack.c.bf16 %v1680_v38, %v1678_v37  ;;  %v1304_v38 = vrot.slane %v11145_v25, 3 }
 0x1ab   :  { %8014 = vmatmul.mubr.msk.f32.gmra.mrb[32].mxu0 %vm249_vm4, %v885_v42  ;;  %v1272_v42 = vrot.slane %v10997_v27, 3 }
 0x1ac   :  { %1134 = vmatprep.mubr.f32.mxu0 %v14364_v0 }
 0x1af   :  { %8015 = vmatmul.mubr.msk.f32.gmra.mrb[34].mxu0 %vm249_vm4, %v887_v46  ;;  %v1273_v46 = vsel %vm1266_vm6, %v1270_v31, %v1272_v42  ;;  %v1300_v31 = vrot.slane %v11127_v18, 3 }
 0x1b0   :  { %1140 = vmatprep.mubr.f32.mxu0 %v14364_v0 }
 0x1b3   :  { %8016 = vmatmul.mubr.msk.f32.gmra.mrb[36].mxu0 %vm249_vm4, %v889_v50  ;;  %v1275_v50 = vsel %vm1266_vm6, %v1272_v42, %v1274_v49  ;;  %v1306_v42 = vrot.slane %v11154_v29, 3 }
 0x1b4   :  { %1146 = vmatprep.mubr.f32.mxu0 %v14364_v0 }
 0x1b7   :  { %8017 = vmatmul.mubr.msk.f32.gmra.mrb[38].mxu0 %vm249_vm4, %v891_v55  ;;  %v1277_v55 = vsel %vm1266_vm6, %v1274_v49, %v1276_v53 }
 0x1b8   :  { %1152 = vmatprep.mubr.f32.mxu0 %v14364_v0 }
 0x1bb   :  { %8018 = vmatmul.mubr.msk.f32.gmra.mrb[40].mxu0 %vm249_vm4, %v893_v59  ;;  %v1280_v59 = vrot.slane %v11037_v48, 3 }
 0x1bc   :  { %1158 = vmatprep.mubr.f32.mxu0 %v14364_v0 }
 0x1bd   :  { %v1281_v61 = vsel %vm1266_vm6, %v1278_v58, %v1280_v59 }
 0x1bf   :  { %8019 = vmatmul.mubr.msk.f32.gmra.mrb[42].mxu0 %vm249_vm4, %v895_v62  ;;  %v1282_v62 = vrot.slane %v11046_v51, 3 }
 0x1c0   :  { %1164 = vmatprep.mubr.f32.mxu0 %v14364_v0 }
 0x1c1   :  { %v1283_v2 = vsel %vm1266_vm6, %v1280_v59, %v1282_v62 }
 0x1c3   :  { %8020 = vmatmul.mubr.msk.f32.gmra.mrb[44].mxu0 %vm249_vm4, %v897_v3  ;;  %v1284_v3 = vrot.slane %v11055_v54, 3 }
 0x1c4   :  { %1170 = vmatprep.mubr.f32.mxu0 %v14364_v0 }
 0x1c5   :  { %v1285_v5 = vsel %vm1266_vm6, %v1282_v62, %v1284_v3 }
 0x1c7   :  { %8021 = vmatmul.mubr.msk.f32.gmra.mrb[46].mxu0 %vm249_vm4, %v899_v6  ;;  %v1286_v6 = vrot.slane %v11064_v57, 3 }
 0x1c8   :  { %1176 = vmatprep.mubr.f32.mxu0 %v14364_v0 }
 0x1c9   :  { %v1287_v8 = vsel %vm1266_vm6, %v1284_v3, %v1286_v6 }
 0x1cb   :  { %8022 = vmatmul.mubr.msk.f32.gmra.mrb[48].mxu0 %vm249_vm4, %v901_v9  ;;  %v1288_v9 = vrot.slane %v11073_v60, 3 }
 0x1cc   :  { %1182 = vmatprep.mubr.f32.mxu0 %v14364_v0 }
 0x1cd   :  { %v1289_v11 = vsel %vm1266_vm6, %v1286_v6, %v1288_v9 }
 0x1cf   :  { %8023 = vmatmul.mubr.msk.f32.gmra.mrb[50].mxu0 %vm249_vm4, %v903_v12  ;;  %v1290_v12 = vrot.slane %v11082_v63, 3 }
 0x1d0   :  { %1188 = vmatprep.mubr.f32.mxu0 %v14364_v0 }
 0x1d3   :  { %8024 = vmatmul.mubr.msk.f32.gmra.mrb[52].mxu0 %vm249_vm4, %v905_v17  ;;  %v1292_v17 = vrot.slane %v11091_v4, 3 }
 0x1d4   :  { %1194 = vmatprep.mubr.f32.mxu0 %v14364_v0 }
 0x1d5   :  { %v1293_v19 = vsel %vm1266_vm6, %v1290_v12, %v1292_v17  ;;  %v1295_v23 = vsel %vm1266_vm6, %v1292_v17, %v1294_v21  ;;  %v1687_v17 = vrot.slane %v10997_v27, 4  ;;  %v1693_v21 = vrot.slane %v11028_v45, 4 }
 0x1d7   :  { %8025 = vmatmul.mubr.msk.f32.gmra.mrb[54].mxu0 %vm249_vm4, %v904_v16  ;;  %v1291_v16 = vsel %vm1266_vm6, %v1288_v9, %v1290_v12  ;;  %v1683_v9 = vrot.slane %v10979_v14, 4  ;;  %v1685_v12 = vrot.slane %v10988_v20, 4  ;;  %v1689_v14 = vrot.slane %v11006_v35, 4 }
 0x1d8   :  { %1448 = vmatprep.mubr.f32.mxu0 %v14364_v0 }
 0x1d9   :  { %v1690_v20 = vsel %vm306_vm0, %v1687_v17, %v1689_v14 }
 0x1db   :  { %8028 = vmatmul.mubr.msk.f32.vlgmr.msra.gmra.mrb[0].mxu0 %vm249_vm4, %v1269_v30  ;;  %v1299_v30 = vsel %vm1266_vm6, %v1296_v24, %v1298_v28  ;;  %v1697_v24 = vrot.slane %v11046_v51, 4 }
 0x1dc   :  { %1454 = vmatprep.mubr.f32.mxu0 %v14364_v0  ;;  %8487 = vmatpush1.bf16.msra.mxu0 %v8486_v33  ;;  %v1301_v33 = vsel %vm1266_vm6, %v1298_v28, %v1300_v31  ;;  %v1701_v28 = vrot.slane %v11064_v57, 4 }
 0x1dd   :  { %8490 = vmatprep.subr.msk.bf16.mxu0 %vm10967_vm2, %v8488_v34  ;;  %v1302_v34 = vrot.slane %v11136_v22, 3 }
 0x1df   :  { %8029 = vmatmul.mubr.msk.f32.gmra.mrb[2].mxu0 %vm249_vm4, %v1271_v40  ;;  %v1303_v37 = vsel %vm1266_vm6, %v1300_v31, %v1302_v34  ;;  %v1305_v40 = vsel %vm1266_vm6, %v1302_v34, %v1304_v38  ;;  %v1705_v31 = vrot.slane %v11082_v63, 4  ;;  %v1709_v34 = vrot.slane %v11100_v7, 4 }
 0x1e0   :  { %1460 = vmatprep.mubr.f32.mxu0 %v14364_v0  ;;  %8493 = vmatpush1.bf16.msk.msra.mxu0 %vm10967_vm2, %v8491_v44  ;;  %v1307_v44 = vsel %vm1266_vm6, %v1304_v38, %v1306_v42  ;;  %v1713_v38 = vrot.slane %v11118_v15, 4 }
 0x1e3   :  { %8030 = vmatmul.mubr.msk.f32.gmra.mrb[4].mxu0 %vm249_vm4, %v1273_v46  ;;  %v1308_v46 = vrot.slane %v11163_v32, 3 }
 0x1e4   :  { %1466 = vmatprep.mubr.f32.mxu0 %v14364_v0 }
 0x1e5   :  { %v1309_v49 = vsel %vm1266_vm6, %v1306_v42, %v1308_v46  ;;  %v1717_v42 = vrot.slane %v11136_v22, 4 }
 0x1e7   :  { %8031 = vmatmul.mubr.msk.f32.gmra.mrb[6].mxu0 %vm249_vm4, %v1275_v50  ;;  %v1310_v50 = vrot.slane %v11172_v36, 3 }
 0x1e8   :  { %1472 = vmatprep.mubr.f32.mxu0 %v14364_v0 }
 0x1e9   :  { %v1311_v53 = vsel %vm1266_vm6, %v1308_v46, %v1310_v50  ;;  %v1721_v46 = vrot.slane %v11154_v29, 4 }
 0x1eb   :  { %8032 = vmatmul.mubr.msk.f32.gmra.mrb[8].mxu0 %vm249_vm4, %v1277_v55  ;;  %v1312_v55 = vrot.slane %v11181_v39, 3 }
 0x1ec   :  { %1478 = vmatprep.mubr.f32.mxu0 %v14364_v0 }
 0x1ed   :  { %v1313_v58 = vsel %vm1266_vm6, %v1310_v50, %v1312_v55  ;;  %v1725_v50 = vrot.slane %v11172_v36, 4 }
 0x1ef   :  { %8033 = vmatmul.mubr.msk.f32.gmra.mrb[10].mxu0 %vm249_vm4, %v1279_v1  ;;  %v1314_v1 = vrot.slane %v11190_v43, 3 }
 0x1f0   :  { %1484 = vmatprep.mubr.f32.mxu0 %v14364_v0 }
 0x1f1   :  { %v1315_v59 = vsel %vm1266_vm6, %v1312_v55, %v1314_v1  ;;  %v1729_v55 = vrot.slane %v11190_v43, 4 }
 0x1f3   :  { %8034 = vmatmul.mubr.msk.f32.gmra.mrb[12].mxu0 %vm249_vm4, %v1281_v61  ;;  %v1316_v61 = vrot.slane %v11199_v47, 3 }
 0x1f4   :  { %1490 = vmatprep.mubr.f32.mxu0 %v14364_v0 }
 0x1f5   :  { %v1317_v62 = vsel %vm1266_vm6, %v1314_v1, %v1316_v61  ;;  %v1733_v1 = vrot.slane %v11208_v52, 4 }
 0x1f7   :  { %8035 = vmatmul.mubr.msk.f32.gmra.mrb[14].mxu0 %vm249_vm4, %v1283_v2  ;;  %v1318_v2 = vrot.slane %v11208_v52, 3  ;;  %v8087_v52 = vld [vmem:[%s14357_s3 + $0x1e8] sm:$0xff] }
 0x1f8   :  { %1496 = vmatprep.mubr.f32.mxu0 %v14364_v0 }
 0x1f9   :  { %v1319_v3 = vsel %vm1266_vm6, %v1316_v61, %v1318_v2  ;;  %v8086_v61 = vld [vmem:[%s14357_s3 + $0x1e0] sm:$0xff] }
 0x1fb   :  { %8036 = vmatmul.mubr.msk.f32.gmra.mrb[16].mxu0 %vm249_vm4, %v1285_v5  ;;  %v1320_v5 = vrot.slane %v11217_v56, 3 }
 0x1fc   :  { %1502 = vmatprep.mubr.f32.mxu0 %v14364_v0 }
 0x1fd   :  { %v1321_v6 = vsel %vm1266_vm6, %v1318_v2, %v1320_v5  ;;  %v8088_v2 = vld [vmem:[%s14357_s3 + $0x1f0] sm:$0xff] }
 0x1ff   :  { %8037 = vmatmul.mubr.msk.f32.gmra.mrb[18].mxu0 %vm249_vm4, %v1287_v8  ;;  %v1682_v8 = vrot.slane %v10974_v13, 4  ;;  %v1688_v13 = vsel %vm306_vm0, %v1685_v12, %v1687_v17  ;;  %v8097_v17 = vld [vmem:[%s14357_s3 + $0x238] sm:$0xff] }
 0x200   :  { %1508 = vmatprep.mubr.f32.mxu0 %v14364_v0 }
 0x203   :  { %8038 = vmatmul.mubr.msk.f32.gmra.mrb[20].mxu0 %vm249_vm4, %v1289_v11  ;;  %v1684_v11 = vsel %vm306_vm0, %v1682_v8, %v1683_v9  ;;  %v8090_v8 = vld [vmem:[%s14357_s3 + $0x200] sm:$0xff] }
 0x204   :  { %1514 = vmatprep.mubr.f32.mxu0 %v14364_v0 }
 0x207   :  { %8039 = vmatmul.mubr.msk.f32.gmra.mrb[22].mxu0 %vm249_vm4, %v1291_v16  ;;  %v1686_v16 = vsel %vm306_vm0, %v1683_v9, %v1685_v12 }
 0x208   :  { %1520 = vmatprep.mubr.f32.mxu0 %v14364_v0 }
 0x20b   :  { %8040 = vmatmul.mubr.msk.f32.gmra.mrb[24].mxu0 %vm249_vm4, %v1293_v19  ;;  %v1691_v19 = vrot.slane %v11019_v41, 4 }
 0x20c   :  { %1526 = vmatprep.mubr.f32.mxu0 %v14364_v0 }
 0x20d   :  { %v1692_v27 = vsel %vm306_vm0, %v1689_v14, %v1691_v19  ;;  %v1694_v35 = vsel %vm306_vm0, %v1691_v19, %v1693_v21  ;;  %v8094_v14 = vld [vmem:[%s14357_s3 + $0x220] sm:$0xff] }
 0x20f   :  { %8041 = vmatmul.mubr.msk.f32.gmra.mrb[26].mxu0 %vm249_vm4, %v1295_v23  ;;  %v1695_v23 = vrot.slane %v11037_v48, 4 }
 0x210   :  { %1532 = vmatprep.mubr.f32.mxu0 %v14364_v0 }
 0x211   :  { %v1696_v41 = vsel %vm306_vm0, %v1693_v21, %v1695_v23  ;;  %v1698_v45 = vsel %vm306_vm0, %v1695_v23, %v1697_v24  ;;  %v8101_v21 = vld [vmem:[%s14357_s3 + $0x258] sm:$0xff]  ;;  %v8098_v23 = vld [vmem:[%s14357_s3 + $0x240] sm:$0xff] }
 0x213   :  { %8042 = vmatmul.mubr.msk.f32.gmra.mrb[28].mxu0 %vm249_vm4, %v1297_v26  ;;  %v1699_v26 = vrot.slane %v11055_v54, 4 }
 0x214   :  { %1538 = vmatprep.mubr.f32.mxu0 %v14364_v0 }
 0x215   :  { %v1700_v48 = vsel %vm306_vm0, %v1697_v24, %v1699_v26  ;;  %v1702_v51 = vsel %vm306_vm0, %v1699_v26, %v1701_v28  ;;  %v8105_v26 = vld [vmem:[%s14357_s3 + $0x278] sm:$0xff] }
 0x217   :  { %8043 = vmatmul.mubr.msk.f32.gmra.mrb[30].mxu0 %vm249_vm4, %v1299_v30  ;;  %v1703_v30 = vrot.slane %v11073_v60, 4 }
 0x218   :  { %1544 = vmatprep.mubr.f32.mxu0 %v14364_v0 }
 0x219   :  { %v1704_v54 = vsel %vm306_vm0, %v1701_v28, %v1703_v30  ;;  %v1706_v57 = vsel %vm306_vm0, %v1703_v30, %v1705_v31  ;;  %v8102_v28 = vld [vmem:[%s14357_s3 + $0x260] sm:$0xff] }
 0x21b   :  { %8044 = vmatmul.mubr.msk.f32.gmra.mrb[32].mxu0 %vm249_vm4, %v1301_v33  ;;  %v1707_v33 = vrot.slane %v11091_v4, 4 }
 0x21c   :  { %1550 = vmatprep.mubr.f32.mxu0 %v14364_v0 }
 0x21d   :  { %v1708_v60 = vsel %vm306_vm0, %v1705_v31, %v1707_v33  ;;  %v1710_v63 = vsel %vm306_vm0, %v1707_v33, %v1709_v34  ;;  %v8109_v31 = vld [vmem:[%s14357_s3 + $0x298] sm:$0xff]  ;;  %v8205_v33 = vld [vmem:[%s14357_s3 + $0x3c8] sm:$0xff] }
 0x21f   :  { %8045 = vmatmul.mubr.msk.f32.gmra.mrb[34].mxu0 %vm249_vm4, %v1303_v37  ;;  %v1711_v37 = vrot.slane %v11109_v10, 4 }
 0x220   :  { %1556 = vmatprep.mubr.f32.mxu0 %v14364_v0 }
 0x221   :  { %v1712_v4 = vsel %vm306_vm0, %v1709_v34, %v1711_v37  ;;  %v1714_v7 = vsel %vm306_vm0, %v1711_v37, %v1713_v38  ;;  %v8106_v34 = vld [vmem:[%s14357_s3 + $0x280] sm:$0xff] }
 0x223   :  { %8046 = vmatmul.mubr.msk.f32.gmra.mrb[36].mxu0 %vm249_vm4, %v1305_v40  ;;  %v1715_v40 = vrot.slane %v11127_v18, 4 }
 0x224   :  { %1562 = vmatprep.mubr.f32.mxu0 %v14364_v0 }
 0x225   :  { %v1716_v10 = vsel %vm306_vm0, %v1713_v38, %v1715_v40  ;;  %v1718_v15 = vsel %vm306_vm0, %v1715_v40, %v1717_v42 }
 0x227   :  { %8047 = vmatmul.mubr.msk.f32.gmra.mrb[38].mxu0 %vm249_vm4, %v1307_v44  ;;  %v1719_v44 = vrot.slane %v11145_v25, 4 }
 0x228   :  { %1568 = vmatprep.mubr.f32.mxu0 %v14364_v0 }
 0x229   :  { %v1720_v18 = vsel %vm306_vm0, %v1717_v42, %v1719_v44  ;;  %v1722_v22 = vsel %vm306_vm0, %v1719_v44, %v1721_v46  ;;  %v8211_v42 = vld [vmem:[%s14357_s3 + $0x3f8] sm:$0xff]  ;;  %v8208_v44 = vld [vmem:[%s14357_s3 + $0x3e0] sm:$0xff] }
 0x22b   :  { %8048 = vmatmul.mubr.msk.f32.gmra.mrb[40].mxu0 %vm249_vm4, %v1309_v49  ;;  %v1723_v49 = vrot.slane %v11163_v32, 4 }
 0x22c   :  { %1574 = vmatprep.mubr.f32.mxu0 %v14364_v0 }
 0x22d   :  { %v1724_v25 = vsel %vm306_vm0, %v1721_v46, %v1723_v49  ;;  %v1726_v29 = vsel %vm306_vm0, %v1723_v49, %v1725_v50  ;;  %v8111_v46 = vld [vmem:[%s14357_s3 + $0x2a8] sm:$0xff]  ;;  %v8110_v49 = vld [vmem:[%s14357_s3 + $0x2a0] sm:$0xff] }
 0x22f   :  { %8049 = vmatmul.mubr.msk.f32.gmra.mrb[42].mxu0 %vm249_vm4, %v1311_v53  ;;  %v1727_v53 = vrot.slane %v11181_v39, 4 }
 0x230   :  { %1580 = vmatprep.mubr.f32.mxu0 %v14364_v0 }
 0x231   :  { %v1728_v32 = vsel %vm306_vm0, %v1725_v50, %v1727_v53  ;;  %v1730_v36 = vsel %vm306_vm0, %v1727_v53, %v1729_v55 }
 0x233   :  { %8050 = vmatmul.mubr.msk.f32.gmra.mrb[44].mxu0 %vm249_vm4, %v1313_v58  ;;  %v1731_v58 = vrot.slane %v11199_v47, 4 }
 0x234   :  { %1586 = vmatprep.mubr.f32.mxu0 %v14364_v0 }
 0x235   :  { %v1732_v39 = vsel %vm306_vm0, %v1729_v55, %v1731_v58  ;;  %v1734_v43 = vsel %vm306_vm0, %v1731_v58, %v1733_v1  ;;  %v8215_v55 = vld [vmem:[%s14357_s3 + $0x418] sm:$0xff]  ;;  %v8212_v58 = vld [vmem:[%s14357_s3 + $0x400] sm:$0xff] }
 0x237   :  { %8051 = vmatmul.mubr.msk.f32.gmra.mrb[46].mxu0 %vm249_vm4, %v1315_v59  ;;  %v1735_v59 = vrot.slane %v11217_v56, 4  ;;  %v8089_v56 = vld [vmem:[%s14357_s3 + $0x1f8] sm:$0xff] }
 0x238   :  { %1592 = vmatprep.mubr.f32.mxu0 %v14364_v0 }
 0x239   :  { %v1736_v47 = vsel %vm306_vm0, %v1733_v1, %v1735_v59 }
 0x23b   :  { %8052 = vmatmul.mubr.msk.f32.gmra.mrb[48].mxu0 %vm249_vm4, %v1317_v62  ;;  %v8494_v62 = vpack.c.bf16 %v8089_v56, %v8087_v52  ;;  %v8216_v52 = vld [vmem:[%s14357_s3 + $0x420] sm:$0xff]  ;;  %v8218_v56 = vld [vmem:[%s14357_s3 + $0x430] sm:$0xff] }
 0x23c   :  { %1598 = vmatprep.mubr.f32.mxu0 %v14364_v0 }
 0x23d   :  { %8495 = vmatprep.subr.bf16.mxu0 %v8494_v62  ;;  %v8117_v62 = vld [vmem:[%s14357_s3 + $0x2d8] sm:$0xff] }
 0x23f   :  { %8053 = vmatmul.mubr.msk.f32.gmra.mrb[50].mxu0 %vm249_vm4, %v1319_v3  ;;  %v8496_v3 = vpack.c.bf16 %v8088_v2, %v8086_v61  ;;  %v8115_v61 = vld [vmem:[%s14357_s3 + $0x2c8] sm:$0xff]  ;;  %v8114_v2 = vld [vmem:[%s14357_s3 + $0x2c0] sm:$0xff] }
 0x240   :  { %1604 = vmatprep.mubr.f32.mxu0 %v14364_v0 }
 0x243   :  { %8054 = vmatmul.mubr.msk.f32.gmra.mrb[52].mxu0 %vm249_vm4, %v1321_v6  ;;  %v8093_v6 = vld [vmem:[%s14357_s3 + $0x218] sm:$0xff] }
 0x244   :  { %1610 = vmatprep.mubr.f32.mxu0 %v14364_v0 }
 0x247   :  { %8055 = vmatmul.mubr.msk.f32.gmra.mrb[54].mxu0 %vm249_vm4, %v1320_v5  ;;  %v8091_v5 = vld [vmem:[%s14357_s3 + $0x208] sm:$0xff] }
 0x248   :  { %1863 = vmatprep.mubr.f32.mxu0 %v14364_v0  ;;  %v8498_v9 = vpack.c.bf16 %v8093_v6, %v8091_v5  ;;  %v8522_v5 = vpack.c.bf16 %v8117_v62, %v8115_v61  ;;  %v8116_v6 = vld [vmem:[%s14357_s3 + $0x2d0] sm:$0xff]  ;;  %v8133_v61 = vld [vmem:[%s14357_s3 + $0x358] sm:$0xff] }
 0x24b   :  { %8058 = vmatmul.mubr.msk.f32.vlgmr.msra.gmra.mrb[0].mxu0 %vm249_vm4, %v1684_v11  ;;  %v8092_v11 = vld [vmem:[%s14357_s3 + $0x210] sm:$0xff] }
 0x24c   :  { %1869 = vmatprep.mubr.f32.mxu0 %v14364_v0  ;;  %8497 = vmatpush1.bf16.msra.mxu0 %v8496_v3  ;;  %v8500_v12 = vpack.c.bf16 %v8092_v11, %v8090_v8  ;;  %v8632_v3 = vpack.c.bf16 %v8218_v56, %v8216_v52  ;;  %v8524_v8 = vpack.c.bf16 %v8116_v6, %v8114_v2  ;;  %v8223_v11 = vld [vmem:[%s14357_s3 + $0x458] sm:$0xff]  ;;  %v8131_v52 = vld [vmem:[%s14357_s3 + $0x348] sm:$0xff] }
 0x24d   :  { %8499 = vmatprep.subr.bf16.mxu0 %v8498_v9  ;;  %v8221_v9 = vld [vmem:[%s14357_s3 + $0x448] sm:$0xff]  ;;  %v8538_v62 = vpack.c.bf16 %v8133_v61, %v8131_v52  ;;  %v8263_v61 = vld [vmem:[%s14357_s3 + $0x598] sm:$0x7f] }
 0x24f   :  { %8059 = vmatmul.mubr.msk.f32.gmra.mrb[2].mxu0 %vm249_vm4, %v1686_v16  ;;  %v8095_v16 = vld [vmem:[%s14357_s3 + $0x228] sm:$0xff] }
 0x250   :  { %1875 = vmatprep.mubr.f32.mxu0 %v14364_v0  ;;  %8501 = vmatpush1.bf16.msra.mxu0 %v8500_v12  ;;  %v8634_v12 = vpack.c.bf16 %v8223_v11, %v8221_v9  ;;  %v8246_v9 = vld [vmem:[%s14357_s3 + $0x510] sm:$0xff] }
 0x253   :  { %8060 = vmatmul.mubr.msk.f32.gmra.mrb[4].mxu0 %vm249_vm4, %v1688_v13  ;;  %v8502_v13 = vpack.c.bf16 %v8097_v17, %v8095_v16  ;;  %v8220_v16 = vld [vmem:[%s14357_s3 + $0x440] sm:$0xff]  ;;  %v8222_v17 = vld [vmem:[%s14357_s3 + $0x450] sm:$0xff] }
 0x254   :  { %1881 = vmatprep.mubr.f32.mxu0 %v14364_v0 }
 0x255   :  { %8503 = vmatprep.subr.bf16.mxu0 %v8502_v13  ;;  %v8636_v13 = vpack.c.bf16 %v8222_v17, %v8220_v16 }
 0x257   :  { %8061 = vmatmul.mubr.msk.f32.gmra.mrb[6].mxu0 %vm249_vm4, %v1690_v20  ;;  %v8096_v20 = vld [vmem:[%s14357_s3 + $0x230] sm:$0xff] }
 0x258   :  { %1887 = vmatprep.mubr.f32.mxu0 %v14364_v0  ;;  %v8504_v19 = vpack.c.bf16 %v8096_v20, %v8094_v14  ;;  %v8225_v14 = vld [vmem:[%s14357_s3 + $0x468] sm:$0xff]  ;;  %v8227_v20 = vld [vmem:[%s14357_s3 + $0x478] sm:$0xff] }
 0x25a   :  { %8505 = vmatpush1.bf16.msra.mxu0 %v8504_v19  ;;  %v8638_v19 = vpack.c.bf16 %v8227_v20, %v8225_v14  ;;  %v8251_v14 = vld [vmem:[%s14357_s3 + $0x538] sm:$0xff]  ;;  %v8130_v20 = vld [vmem:[%s14357_s3 + $0x340] sm:$0xff] }
 0x25b   :  { %8062 = vmatmul.mubr.msk.f32.gmra.mrb[8].mxu0 %vm249_vm4, %v1692_v27  ;;  %v8099_v27 = vld [vmem:[%s14357_s3 + $0x248] sm:$0xff] }
 0x25c   :  { %1893 = vmatprep.mubr.f32.mxu0 %v14364_v0 }
 0x25f   :  { %8063 = vmatmul.mubr.msk.f32.gmra.mrb[10].mxu0 %vm249_vm4, %v1694_v35  ;;  %v8506_v35 = vpack.c.bf16 %v8101_v21, %v8099_v27  ;;  %v8224_v27 = vld [vmem:[%s14357_s3 + $0x460] sm:$0xff]  ;;  %v8226_v21 = vld [vmem:[%s14357_s3 + $0x470] sm:$0xff] }
 0x260   :  { %1899 = vmatprep.mubr.f32.mxu0 %v14364_v0 }
 0x261   :  { %8507 = vmatprep.subr.bf16.mxu0 %v8506_v35  ;;  %v8119_v35 = vld [vmem:[%s14357_s3 + $0x2e8] sm:$0xff] }
 0x263   :  { %8064 = vmatmul.mubr.msk.f32.gmra.mrb[12].mxu0 %vm249_vm4, %v1696_v41  ;;  %v8100_v41 = vld [vmem:[%s14357_s3 + $0x250] sm:$0xff] }
 0x264   :  { %1905 = vmatprep.mubr.f32.mxu0 %v14364_v0  ;;  %v8508_v24 = vpack.c.bf16 %v8100_v41, %v8098_v23  ;;  %v8121_v23 = vld [vmem:[%s14357_s3 + $0x2f8] sm:$0xff]  ;;  %v8118_v41 = vld [vmem:[%s14357_s3 + $0x2e0] sm:$0xff] }
 0x266   :  { %8509 = vmatpush1.bf16.msra.mxu0 %v8508_v24  ;;  %v8640_v24 = vpack.c.bf16 %v8226_v21, %v8224_v27  ;;  %v8248_v21 = vld [vmem:[%s14357_s3 + $0x520] sm:$0xff] }
 0x267   :  { %8065 = vmatmul.mubr.msk.f32.gmra.mrb[14].mxu0 %vm249_vm4, %v1698_v45  ;;  %v8103_v45 = vld [vmem:[%s14357_s3 + $0x268] sm:$0xff] }
 0x268   :  { %1911 = vmatprep.mubr.f32.mxu0 %v14364_v0 }
 0x26b   :  { %8066 = vmatmul.mubr.msk.f32.gmra.mrb[16].mxu0 %vm249_vm4, %v1700_v48  ;;  %v8510_v48 = vpack.c.bf16 %v8105_v26, %v8103_v45  ;;  %v8526_v45 = vpack.c.bf16 %v8121_v23, %v8119_v35  ;;  %v8120_v26 = vld [vmem:[%s14357_s3 + $0x2f0] sm:$0xff] }
 0x26c   :  { %1917 = vmatprep.mubr.f32.mxu0 %v14364_v0  ;;  %v8250_v23 = vld [vmem:[%s14357_s3 + $0x530] sm:$0xff] }
 0x26d   :  { %8511 = vmatprep.subr.bf16.mxu0 %v8510_v48  ;;  %v8528_v48 = vpack.c.bf16 %v8120_v26, %v8118_v41  ;;  %v8664_v41 = vpack.c.bf16 %v8250_v23, %v8248_v21  ;;  %v8135_v26 = vld [vmem:[%s14357_s3 + $0x368] sm:$0xff] }
 0x26f   :  { %8067 = vmatmul.mubr.msk.f32.gmra.mrb[18].mxu0 %vm249_vm4, %v1702_v51  ;;  %v8104_v51 = vld [vmem:[%s14357_s3 + $0x270] sm:$0xff] }
 0x270   :  { %1923 = vmatprep.mubr.f32.mxu0 %v14364_v0  ;;  %v8512_v30 = vpack.c.bf16 %v8104_v51, %v8102_v28  ;;  %v8229_v28 = vld [vmem:[%s14357_s3 + $0x488] sm:$0xff]  ;;  %v8231_v51 = vld [vmem:[%s14357_s3 + $0x498] sm:$0xff] }
 0x272   :  { %8513 = vmatpush1.bf16.msra.mxu0 %v8512_v30  ;;  %v8642_v30 = vpack.c.bf16 %v8231_v51, %v8229_v28  ;;  %v8253_v28 = vld [vmem:[%s14357_s3 + $0x548] sm:$0xff] }
 0x273   :  { %8068 = vmatmul.mubr.msk.f32.gmra.mrb[20].mxu0 %vm249_vm4, %v1704_v54  ;;  %v8107_v54 = vld [vmem:[%s14357_s3 + $0x288] sm:$0xff] }
 0x274   :  { %1929 = vmatprep.mubr.f32.mxu0 %v14364_v0 }
 0x277   :  { %8069 = vmatmul.mubr.msk.f32.gmra.mrb[22].mxu0 %vm249_vm4, %v1706_v57  ;;  %v8514_v57 = vpack.c.bf16 %v8109_v31, %v8107_v54  ;;  %v8228_v54 = vld [vmem:[%s14357_s3 + $0x480] sm:$0xff]  ;;  %v8230_v31 = vld [vmem:[%s14357_s3 + $0x490] sm:$0xff] }
 0x278   :  { %1935 = vmatprep.mubr.f32.mxu0 %v14364_v0 }
 0x279   :  { %8515 = vmatprep.subr.bf16.mxu0 %v8514_v57  ;;  %v8644_v57 = vpack.c.bf16 %v8230_v31, %v8228_v54  ;;  %v8136_v54 = vld [vmem:[%s14357_s3 + $0x370] sm:$0xff]  ;;  %v8255_v31 = vld [vmem:[%s14357_s3 + $0x558] sm:$0xff] }
 0x27b   :  { %8070 = vmatmul.mubr.msk.f32.gmra.mrb[24].mxu0 %vm249_vm4, %v1708_v60  ;;  %v8207_v60 = vld [vmem:[%s14357_s3 + $0x3d8] sm:$0xff] }
 0x27c   :  { %1941 = vmatprep.mubr.f32.mxu0 %v14364_v0  ;;  %v8618_v37 = vpack.c.bf16 %v8207_v60, %v8205_v33  ;;  %v8233_v33 = vld [vmem:[%s14357_s3 + $0x4a8] sm:$0xff]  ;;  %v8235_v60 = vld [vmem:[%s14357_s3 + $0x4b8] sm:$0xff] }
 0x27e   :  { %8619 = vmatprep.subr.bf16.mxu1 %v8618_v37  ;;  %v8234_v37 = vld [vmem:[%s14357_s3 + $0x4b0] sm:$0xff] }
 0x27f   :  { %8071 = vmatmul.mubr.msk.f32.gmra.mrb[26].mxu0 %vm249_vm4, %v1710_v63  ;;  %v8108_v63 = vld [vmem:[%s14357_s3 + $0x290] sm:$0xff] }
 0x280   :  { %1947 = vmatprep.mubr.f32.mxu0 %v14364_v0  ;;  %v8516_v38 = vpack.c.bf16 %v8108_v63, %v8106_v34  ;;  %v8646_v34 = vpack.c.bf16 %v8235_v60, %v8233_v33  ;;  %v8232_v63 = vld [vmem:[%s14357_s3 + $0x4a0] sm:$0xff]  ;;  %v8666_v60 = vpack.c.bf16 %v8255_v31, %v8253_v28 }
 0x282   :  { %8517 = vmatpush1.bf16.msra.mxu0 %v8516_v38  ;;  %v8125_v38 = vld [vmem:[%s14357_s3 + $0x318] sm:$0xff] }
 0x283   :  { %8072 = vmatmul.mubr.msk.f32.gmra.mrb[28].mxu0 %vm249_vm4, %v1712_v4  ;;  %v8204_v4 = vld [vmem:[%s14357_s3 + $0x3c0] sm:$0xff] }
 0x284   :  { %1953 = vmatprep.mubr.f32.mxu0 %v14364_v0 }
 0x287   :  { %8073 = vmatmul.mubr.msk.f32.gmra.mrb[30].mxu0 %vm249_vm4, %v1714_v7  ;;  %v8206_v7 = vld [vmem:[%s14357_s3 + $0x3d0] sm:$0xff] }
 0x288   :  { %1959 = vmatprep.mubr.f32.mxu0 %v14364_v0  ;;  %v8620_v40 = vpack.c.bf16 %v8206_v7, %v8204_v4  ;;  %v8123_v4 = vld [vmem:[%s14357_s3 + $0x308] sm:$0xff]  ;;  %v8122_v7 = vld [vmem:[%s14357_s3 + $0x300] sm:$0xff] }
 0x28a   :  { %8621 = vmatpush1.bf16.msra.mxu1 %v8620_v40  ;;  %v8648_v40 = vpack.c.bf16 %v8234_v37, %v8232_v63  ;;  %v8254_v63 = vld [vmem:[%s14357_s3 + $0x550] sm:$0xff] }
 0x28b   :  { %8074 = vmatmul.mubr.msk.f32.gmra.mrb[32].mxu0 %vm249_vm4, %v1716_v10  ;;  %v8209_v10 = vld [vmem:[%s14357_s3 + $0x3e8] sm:$0xff] }
 0x28c   :  { %1965 = vmatprep.mubr.f32.mxu0 %v14364_v0 }
 0x28f   :  { %8075 = vmatmul.mubr.msk.f32.gmra.mrb[34].mxu0 %vm249_vm4, %v1718_v15  ;;  %v8622_v15 = vpack.c.bf16 %v8211_v42, %v8209_v10  ;;  %v8530_v10 = vpack.c.bf16 %v8125_v38, %v8123_v4  ;;  %v8124_v42 = vld [vmem:[%s14357_s3 + $0x310] sm:$0xff] }
 0x290   :  { %1971 = vmatprep.mubr.f32.mxu0 %v14364_v0 }
 0x291   :  { %8623 = vmatprep.subr.bf16.mxu1 %v8622_v15  ;;  %v8532_v15 = vpack.c.bf16 %v8124_v42, %v8122_v7  ;;  %v8257_v42 = vld [vmem:[%s14357_s3 + $0x568] sm:$0xff] }
 0x293   :  { %8076 = vmatmul.mubr.msk.f32.gmra.mrb[36].mxu0 %vm249_vm4, %v1720_v18  ;;  %v8210_v18 = vld [vmem:[%s14357_s3 + $0x3f0] sm:$0xff] }
 0x294   :  { %1977 = vmatprep.mubr.f32.mxu0 %v14364_v0 }
 0x297   :  { %8077 = vmatmul.mubr.msk.f32.gmra.mrb[38].mxu0 %vm249_vm4, %v1722_v22  ;;  %v8113_v22 = vld [vmem:[%s14357_s3 + $0x2b8] sm:$0xff] }
 0x298   :  { %1983 = vmatprep.mubr.f32.mxu0 %v14364_v0  ;;  %v8518_v50 = vpack.c.bf16 %v8113_v22, %v8111_v46  ;;  %v8236_v22 = vld [vmem:[%s14357_s3 + $0x4c0] sm:$0xff] }
 0x29a   :  { %8519 = vmatprep.subr.bf16.mxu0 %v8518_v50  ;;  %v8129_v50 = vld [vmem:[%s14357_s3 + $0x338] sm:$0xff] }
 0x29b   :  { %8078 = vmatmul.mubr.msk.f32.gmra.mrb[40].mxu0 %vm249_vm4, %v1724_v25  ;;  %v8624_v25 = vpack.c.bf16 %v8210_v18, %v8208_v44  ;;  %v8237_v44 = vld [vmem:[%s14357_s3 + $0x4c8] sm:$0xff]  ;;  %v8239_v18 = vld [vmem:[%s14357_s3 + $0x4d8] sm:$0xff] }
 0x29c   :  { %1989 = vmatprep.mubr.f32.mxu0 %v14364_v0  ;;  %v8650_v46 = vpack.c.bf16 %v8239_v18, %v8237_v44  ;;  %v8259_v44 = vld [vmem:[%s14357_s3 + $0x578] sm:$0xff]  ;;  %v8138_v18 = vld [vmem:[%s14357_s3 + $0x380] sm:$0xff] }
 0x29d   :  { %8625 = vmatpush1.bf16.msra.mxu1 %v8624_v25  ;;  %v8127_v25 = vld [vmem:[%s14357_s3 + $0x328] sm:$0xff] }
 0x29f   :  { %8079 = vmatmul.mubr.msk.f32.gmra.mrb[42].mxu0 %vm249_vm4, %v1726_v29  ;;  %v8112_v29 = vld [vmem:[%s14357_s3 + $0x2b0] sm:$0xff] }
 0x2a0   :  { %1995 = vmatprep.mubr.f32.mxu0 %v14364_v0  ;;  %v8520_v53 = vpack.c.bf16 %v8112_v29, %v8110_v49  ;;  %v8238_v49 = vld [vmem:[%s14357_s3 + $0x4d0] sm:$0xff]  ;;  %v8126_v29 = vld [vmem:[%s14357_s3 + $0x320] sm:$0xff] }
 0x2a2   :  { %8521 = vmatpush1.bf16.msra.mxu0 %v8520_v53  ;;  %v8652_v53 = vpack.c.bf16 %v8238_v49, %v8236_v22 }
 0x2a3   :  { %8080 = vmatmul.mubr.msk.f32.gmra.mrb[44].mxu0 %vm249_vm4, %v1728_v32  ;;  %v8213_v32 = vld [vmem:[%s14357_s3 + $0x408] sm:$0xff]  ;;  %8523 = vmatprep.subr.bf16.mxu0 %v8522_v5  ;;  %v8247_v5 = vld [vmem:[%s14357_s3 + $0x518] sm:$0xff] }
 0x2a4   :  { %2001 = vmatprep.mubr.f32.mxu0 %v14364_v0 }
 0x2a6   :  { %8525 = vmatpush1.bf16.msra.mxu0 %v8524_v8  ;;  %v8244_v8 = vld [vmem:[%s14357_s3 + $0x500] sm:$0xff] }
 0x2a7   :  { %8081 = vmatmul.mubr.msk.f32.gmra.mrb[46].mxu0 %vm249_vm4, %v1730_v36  ;;  %v8626_v36 = vpack.c.bf16 %v8215_v55, %v8213_v32  ;;  %8527 = vmatprep.subr.bf16.mxu0 %v8526_v45  ;;  %v8534_v32 = vpack.c.bf16 %v8129_v50, %v8127_v25  ;;  %v8128_v55 = vld [vmem:[%s14357_s3 + $0x330] sm:$0xff]  ;;  %v8660_v11 = vpack.c.bf16 %v8246_v9, %v8244_v8  ;;  %v14530_v8 = vmov 0 }
 0x2a8   :  { %2007 = vmatprep.mubr.f32.mxu0 %v14364_v0  ;;  %v8670_v25 = vpack.c.bf16 %v8259_v44, %v8257_v42  ;;  %v14531_v8 = vsel %vm12048_vm7, 4294967295, %v14530_v8  ;;  %v2790_v44 = vld [vmem:[%s14357_s3 + $0x8] sm:$0xff] }
 0x2a9   :  { %8627 = vmatprep.subr.bf16.mxu1 %v8626_v36  ;;  %v14366_v36 = vlaneseq  ;;  %14532 = vst [vmem:[#allocation23_spill] sm:$0xff] %v14531_v8  ;;  %v12562_v8 = vld [vmem:[%s14357_s3 + $0xd8] sm:$0xff] }
 0x2aa   :  { %8529 = vmatpush1.bf16.msra.mxu0 %v8528_v48  ;;  %v8137_v48 = vld [vmem:[%s14357_s3 + $0x378] sm:$0xff]  ;;  %14573 = vst [vmem:[#allocation64_spill] sm:$0xff] %v12562_v8 }
 0x2ab   :  { %8082 = vmatmul.mubr.msk.f32.gmra.mrb[48].mxu0 %vm249_vm4, %v1732_v39  ;;  %v8214_v39 = vld [vmem:[%s14357_s3 + $0x410] sm:$0xff]  ;;  %8531 = vmatprep.subr.bf16.mxu0 %v8530_v10  ;;  %v11917_v2 = vshrl.u32 %v14366_v36, 7  ;;  %v8542_v51 = vpack.c.bf16 %v8137_v48, %v8135_v26  ;;  %v8141_v10 = vld [vmem:[%s14357_s3 + $0x398] sm:$0xff] }
 0x2ac   :  { %2013 = vmatprep.mubr.f32.mxu0 %v14364_v0  ;;  %v8628_v1 = vpack.c.bf16 %v8214_v39, %v8212_v58  ;;  %v8536_v58 = vpack.c.bf16 %v8128_v55, %v8126_v29  ;;  %v8241_v39 = vld [vmem:[%s14357_s3 + $0x4e8] sm:$0xff]  ;;  %v8256_v29 = vld [vmem:[%s14357_s3 + $0x560] sm:$0xff] }
 0x2ad   :  { %14527 = vst [vmem:[#allocation20_spill] sm:$0xff] %v11917_v2  ;;  %v11932_v16 = vsub.s32 0, %v11917_v2  ;;  %v11935_v17 = vsub.s32 1, %v11917_v2 }
 0x2ae   :  { %8629 = vmatpush1.bf16.msra.mxu1 %v8628_v1  ;;  %8533 = vmatpush1.bf16.msra.mxu0 %v8532_v15  ;;  %v8243_v1 = vld [vmem:[%s14357_s3 + $0x4f8] sm:$0xff] }
 0x2af   :  { %8083 = vmatmul.mubr.msk.f32.gmra.mrb[50].mxu0 %vm249_vm4, %v1734_v43  ;;  %v8217_v43 = vld [vmem:[%s14357_s3 + $0x428] sm:$0xff]  ;;  %8535 = vmatprep.subr.bf16.mxu0 %v8534_v32  ;;  %14528 = vst [vmem:[#allocation21_spill] sm:$0xff] %v11932_v16  ;;  %14529 = vst [vmem:[#allocation22_spill] sm:$0xff] %v11935_v17 }
 0x2b0   :  { %2019 = vmatprep.mubr.f32.mxu0 %v14364_v0 }
 0x2b2   :  { %8537 = vmatpush1.bf16.msra.mxu0 %v8536_v58 }
 0x2b3   :  { %8084 = vmatmul.mubr.msk.f32.gmra.mrb[52].mxu0 %vm249_vm4, %v1736_v47  ;;  %8539 = vmatprep.subr.bf16.mxu0 %v8538_v62  ;;  %v8142_v62 = vld [vmem:[%s14357_s3 + $0x3a0] sm:$0xff] }
 0x2b4   :  { %2025 = vmatprep.mubr.f32.mxu0 %v14364_v0 }
 0x2b7   :  { %8085 = vmatmul.mubr.msk.f32.gmra.mrb[54].mxu0 %vm249_vm4, %v1735_v59  ;;  %v8219_v59 = vld [vmem:[%s14357_s3 + $0x438] sm:$0xff] }
 0x2b8   :  { %v8630_v47 = vpack.c.bf16 %v8219_v59, %v8217_v43  ;;  %v8654_v43 = vpack.c.bf16 %v8243_v1, %v8241_v39  ;;  %v8240_v59 = vld [vmem:[%s14357_s3 + $0x4e0] sm:$0xff] }
 0x2ba   :  { %8631 = vmatprep.subr.bf16.mxu1 %v8630_v47  ;;  %v8242_v47 = vld [vmem:[%s14357_s3 + $0x4f0] sm:$0xff] }
 0x2bb   :  { %8633 = vmatpush1.bf16.msra.mxu1 %v8632_v3  ;;  %v8656_v56 = vpack.c.bf16 %v8242_v47, %v8240_v59  ;;  %v8245_v3 = vld [vmem:[%s14357_s3 + $0x508] sm:$0xff]  ;;  %v8145_v59 = vld [vmem:[%s14357_s3 + $0x3b8] sm:$0x7f] }
 0x2bc   :  { %8635 = vmatprep.subr.bf16.mxu1 %v8634_v12  ;;  %v8658_v6 = vpack.c.bf16 %v8247_v5, %v8245_v3  ;;  %v2088_v12 = vld [vmem:[#allocation5] sm:$0x3]  ;;  %v8261_v47 = vld [vmem:[%s14357_s3 + $0x588] sm:$0xff]  ;;  %v8144_v3 = vld [vmem:[%s14357_s3 + $0x3b0] sm:$0x7f] }
 0x2bd   :  { %v11959_v45 = vrot.slane %v2088_v12, %v11935_v17  ;;  %v8674_v9 = vpack.c.bf16 %v8263_v61, %v8261_v47 }
 0x2bf   :  { %8637 = vmatpush1.bf16.msra.mxu1 %v8636_v13  ;;  %v8249_v13 = vld [vmem:[%s14357_s3 + $0x528] sm:$0xff] }
 0x2c0   :  { %8639 = vmatprep.subr.bf16.mxu1 %v8638_v19  ;;  %v8132_v19 = vld [vmem:[%s14357_s3 + $0x350] sm:$0xff]  ;;  %v8662_v27 = vpack.c.bf16 %v8251_v14, %v8249_v13 }
 0x2c1   :  { %v8540_v35 = vpack.c.bf16 %v8132_v19, %v8130_v20  ;;  %v8262_v13 = vld [vmem:[%s14357_s3 + $0x590] sm:$0x7f] }
 0x2c3   :  { %8641 = vmatpush1.bf16.msra.mxu1 %v8640_v24  ;;  %v11956_v24 = vrot.slane %v2088_v12, %v11932_v16  ;;  %8541 = vmatpush1.bf16.msra.mxu0 %v8540_v35  ;;  %v8260_v12 = vld [vmem:[%s14357_s3 + $0x580] sm:$0xff] }
 0x2c4   :  { %8643 = vmatprep.subr.bf16.mxu1 %v8642_v30  ;;  %v8134_v30 = vld [vmem:[%s14357_s3 + $0x360] sm:$0xff]  ;;  %8543 = vmatprep.subr.bf16.mxu0 %v8542_v51 }
 0x2c5   :  { %v8544_v33 = vpack.c.bf16 %v8136_v54, %v8134_v30 }
 0x2c7   :  { %8645 = vmatpush1.bf16.msra.mxu1 %v8644_v57  ;;  %8545 = vmatpush1.bf16.msra.mxu0 %v8544_v33 }
 0x2c8   :  { %8647 = vmatprep.subr.bf16.mxu1 %v8646_v34  ;;  %v8252_v34 = vld [vmem:[%s14357_s3 + $0x540] sm:$0xff] }
 0x2c9   :  { %v8668_v4 = vpack.c.bf16 %v8254_v63, %v8252_v34 }
 0x2cb   :  { %8649 = vmatpush1.bf16.msra.mxu1 %v8648_v40  ;;  %v8139_v40 = vld [vmem:[%s14357_s3 + $0x388] sm:$0xff] }
 0x2cc   :  { %8651 = vmatprep.subr.bf16.mxu1 %v8650_v46  ;;  %v8546_v15 = vpack.c.bf16 %v8141_v10, %v8139_v40  ;;  %v8140_v46 = vld [vmem:[%s14357_s3 + $0x390] sm:$0xff] }
 0x2cd   :  { %v8548_v50 = vpack.c.bf16 %v8140_v46, %v8138_v18  ;;  %v2792_v18 = vld [vmem:[%s14357_s3 + $0x18] sm:$0xff] }
 0x2ce   :  { %8547 = vmatprep.subr.bf16.mxu0 %v8546_v15 }
 0x2cf   :  { %8653 = vmatpush1.bf16.msra.mxu1 %v8652_v53  ;;  %v8258_v53 = vld [vmem:[%s14357_s3 + $0x570] sm:$0xff]  ;;  %8549 = vmatpush1.bf16.msra.mxu0 %v8548_v50 }
 0x2d0   :  { %8655 = vmatprep.subr.bf16.mxu1 %v8654_v43  ;;  %v8672_v58 = vpack.c.bf16 %v8258_v53, %v8256_v29  ;;  %v8143_v43 = vld [vmem:[%s14357_s3 + $0x3a8] sm:$0xff] }
 0x2d3   :  { %8657 = vmatpush1.bf16.msra.mxu1 %v8656_v56  ;;  %v8550_v56 = vpack.c.bf16 %v8145_v59, %v8143_v43 }
 0x2d4   :  { %8659 = vmatprep.subr.bf16.mxu1 %v8658_v6 }
 0x2d5   :  { %8552 = vmatprep.subr.msk.bf16.mxu0 %vm12048_vm7, %v8550_v56 }
 0x2d7   :  { %8661 = vmatpush1.bf16.msra.mxu1 %v8660_v11  ;;  %v8553_v11 = vpack.c.bf16 %v8144_v3, %v8142_v62 }
 0x2d8   :  { %8663 = vmatprep.subr.bf16.mxu1 %v8662_v27  ;;  %v8677_v27 = vpack.c.bf16 %v8262_v13, %v8260_v12 }
 0x2d9   :  { %8555 = vmatpush1.bf16.msk.msra.mxu0 %vm12048_vm7, %v8553_v11 }
 0x2db   :  { %8665 = vmatpush1.bf16.msra.mxu1 %v8664_v41 }
 0x2dc   :  { %8667 = vmatprep.subr.bf16.mxu1 %v8666_v60 }
 0x2df   :  { %8669 = vmatpush1.bf16.msra.mxu1 %v8668_v4 }
 0x2e0   :  { %8671 = vmatprep.subr.bf16.mxu1 %v8670_v25  ;;  %v8556_v25 = vpack.c.bf16 %v2792_v18, %v2790_v44 }
 0x2e2   :  { %8557 = vmatprep.subr.bf16.mxu0 %v8556_v25 }
 0x2e3   :  { %8673 = vmatpush1.bf16.msra.mxu1 %v8672_v58 }
 0x2e4   :  { %8676 = vmatprep.subr.msk.bf16.mxu1 %vm12048_vm7, %v8674_v9 }
 0x2e7   :  { %8679 = vmatpush1.bf16.msk.msra.mxu1 %vm12048_vm7, %v8677_v27 }
 0x31e   :  { %v1865_v57 = vpop.f32.mrb[0].mxu0 }
 0x31f   :  { %v1867_v37 = vpop.f32.mrb[1].mxu0  ;;  %v11986_v38 = vadd.f32 %v11956_v24, %v1865_v57 }
 0x320   :  { %v11989_v7 = vadd.f32 %v11959_v45, %v1867_v37 }
 0x321   :  { %v14408_v39 = vmax.f32 %v11986_v38, 0.0 }
 0x322   :  { %v14412_v22 = vmax.f32 %v11989_v7, 0.0  ;;  %v1871_v49 = vpop.f32.mrb[2].mxu0 }
 0x323   :  { %v12017_v32 = vadd.f32 %v11956_v24, %v1871_v49  ;;  %v1873_v55 = vpop.f32.mrb[3].mxu0 }
 0x324   :  { %v12021_v1 = vadd.f32 %v11959_v45, %v1873_v55  ;;  %2270 = vrot.lane.b32.xlu0 %v14412_v22, %s10820_s22 }
 0x325   :  { %v14407_v52 = vmax.f32 %v12017_v32, 0.0 }
 0x326   :  { %v14411_v5 = vmax.f32 %v12021_v1, 0.0  ;;  %v1877_v6 = vpop.f32.mrb[4].mxu0 }
 0x327   :  { %v10610_v14 = vpack.i.bf16 %v14407_v52, %v14408_v39  ;;  %v12063_v20 = vadd.f32 %v11956_v24, %v1877_v6  ;;  %v1879_v19 = vpop.f32.mrb[5].mxu0 }
 0x328   :  { %v12068_v21 = vadd.f32 %v11959_v45, %v1879_v19  ;;  %2274 = vrot.lane.b32.xlu1 %v14411_v5, %s10820_s22 }
 0x329   :  { %v14403_v35 = vmax.f32 %v12063_v20, 0.0  ;;  %10611 = vrot.lane.b32.xlu0 %v10610_v14, %s10820_s22 }
 0x32a   :  { %v14404_v23 = vmax.f32 %v12068_v21, 0.0  ;;  %v1883_v41 = vpop.f32.mrb[6].mxu0 }
 0x32b   :  { %v12083_v26 = vadd.f32 %v11956_v24, %v1883_v41  ;;  %v1885_v48 = vpop.f32.mrb[7].mxu0 }
 0x32c   :  { %v12086_v28 = vadd.f32 %v11959_v45, %v1885_v48  ;;  %2276 = vrot.lane.b32.xlu1 %v14403_v35, %s10820_s22 }
 0x32d   :  { %v14399_v51 = vmax.f32 %v12083_v26, 0.0  ;;  %2278 = vrot.lane.b32.xlu0 %v14404_v23, %s10820_s22 }
 0x32e   :  { %v14400_v30 = vmax.f32 %v12086_v28, 0.0  ;;  %v1889_v54 = vpop.f32.mrb[8].mxu0 }
 0x32f   :  { %v12097_v31 = vadd.f32 %v11956_v24, %v1889_v54  ;;  %v1891_v57 = vpop.f32.mrb[9].mxu0 }
 0x330   :  { %v12100_v33 = vadd.f32 %v11959_v45, %v1891_v57  ;;  %2280 = vrot.lane.b32.xlu1 %v14399_v51, %s10820_s22 }
 0x331   :  { %v14395_v60 = vmax.f32 %v12097_v31, 0.0  ;;  %2282 = vrot.lane.b32.xlu0 %v14400_v30, %s10820_s22 }
 0x332   :  { %v14396_v34 = vmax.f32 %v12100_v33, 0.0  ;;  %v1895_v63 = vpop.f32.mrb[10].mxu0 }
 0x333   :  { %v12111_v37 = vadd.f32 %v11956_v24, %v1895_v63  ;;  %v1897_v4 = vpop.f32.mrb[11].mxu0 }
 0x334   :  { %v12114_v40 = vadd.f32 %v11959_v45, %v1897_v4  ;;  %2284 = vrot.lane.b32.xlu1 %v14395_v60, %s10820_s22 }
 0x335   :  { %v14391_v10 = vmax.f32 %v12111_v37, 0.0  ;;  %2286 = vrot.lane.b32.xlu0 %v14396_v34, %s10820_s22 }
 0x336   :  { %v14392_v42 = vmax.f32 %v12114_v40, 0.0  ;;  %v1901_v15 = vpop.f32.mrb[12].mxu0 }
 0x337   :  { %v12131_v46 = vadd.f32 %v11956_v24, %v1901_v15  ;;  %v1903_v49 = vpop.f32.mrb[13].mxu0 }
 0x338   :  { %v12134_v50 = vadd.f32 %v11959_v45, %v1903_v49  ;;  %2288 = vrot.lane.b32.xlu1 %v14391_v10, %s10820_s22 }
 0x339   :  { %v14387_v29 = vmax.f32 %v12131_v46, 0.0  ;;  %2290 = vrot.lane.b32.xlu0 %v14392_v42, %s10820_s22 }
 0x33a   :  { %v14388_v53 = vmax.f32 %v12134_v50, 0.0  ;;  %v1907_v55 = vpop.f32.mrb[14].mxu0 }
 0x33b   :  { %v12145_v58 = vadd.f32 %v11956_v24, %v1907_v55  ;;  %v1909_v43 = vpop.f32.mrb[15].mxu0 }
 0x33c   :  { %v12148_v59 = vadd.f32 %v11959_v45, %v1909_v43  ;;  %2292 = vrot.lane.b32.xlu1 %v14387_v29, %s10820_s22 }
 0x33d   :  { %v14383_v47 = vmax.f32 %v12145_v58, 0.0  ;;  %2294 = vrot.lane.b32.xlu0 %v14388_v53, %s10820_s22 }
 0x33e   :  { %v14384_v56 = vmax.f32 %v12148_v59, 0.0  ;;  %v1913_v61 = vpop.f32.mrb[16].mxu0 }
 0x33f   :  { %v12159_v62 = vadd.f32 %v11956_v24, %v1913_v61  ;;  %v1915_v3 = vpop.f32.mrb[17].mxu0 }
 0x340   :  { %v12162_v6 = vadd.f32 %v11959_v45, %v1915_v3  ;;  %2296 = vrot.lane.b32.xlu1 %v14383_v47, %s10820_s22 }
 0x341   :  { %v14379_v9 = vmax.f32 %v12159_v62, 0.0  ;;  %2298 = vrot.lane.b32.xlu0 %v14384_v56, %s10820_s22 }
 0x342   :  { %v14380_v11 = vmax.f32 %v12162_v6, 0.0  ;;  %v1919_v12 = vpop.f32.mrb[18].mxu0 }
 0x343   :  { %v12173_v13 = vadd.f32 %v11956_v24, %v1919_v12  ;;  %v1921_v14 = vpop.f32.mrb[19].mxu0 }
 0x344   :  { %v12176_v19 = vadd.f32 %v11959_v45, %v1921_v14  ;;  %2300 = vrot.lane.b32.xlu1 %v14379_v9, %s10820_s22 }
 0x345   :  { %14533 = vst [vmem:[#allocation24_spill] sm:$0xff] %v12173_v13  ;;  %v14375_v27 = vmax.f32 %v12173_v13, 0.0  ;;  %2302 = vrot.lane.b32.xlu0 %v14380_v11, %s10820_s22  ;;  %v12663_v13 = vld [vmem:[%s14357_s3 + $0x148] sm:$0xff] }
 0x346   :  { %v14376_v41 = vmax.f32 %v12176_v19, 0.0  ;;  %v1925_v48 = vpop.f32.mrb[20].mxu0  ;;  %14589 = vst [vmem:[#allocation79_spill] sm:$0xff] %v12663_v13  ;;  %v12765_v13 = vld [vmem:[%s14357_s3 + $0x1a0] sm:$0xff] }
 0x347   :  { %v12187_v54 = vadd.f32 %v11956_v24, %v1925_v48  ;;  %v1927_v57 = vpop.f32.mrb[21].mxu0  ;;  %14603 = vst [vmem:[#allocation90_spill] sm:$0xff] %v12765_v13  ;;  %v14614_v13 = vmax.f32 %v12083_v26, 0.0 }
 0x348   :  { %v12190_v63 = vadd.f32 %v11959_v45, %v1927_v57  ;;  %2304 = vrot.lane.b32.xlu1 %v14375_v27, %s10820_s22 }
 0x349   :  { %14534 = vst [vmem:[#allocation25_spill] sm:$0xff] %v12187_v54  ;;  %v14372_v4 = vmax.f32 %v12187_v54, 0.0  ;;  %2306 = vrot.lane.b32.xlu0 %v14376_v41, %s10820_s22  ;;  %v12658_v54 = vld [vmem:[%s14357_s3 + $0x130] sm:$0xff] }
 0x34a   :  { %14535 = vst [vmem:[#allocation26_spill] sm:$0xff] %v12190_v63  ;;  %v14371_v15 = vmax.f32 %v12190_v63, 0.0  ;;  %v1931_v44 = vpop.f32.mrb[22].mxu0  ;;  %14588 = vst [vmem:[#allocation78_spill] sm:$0xff] %v12658_v54  ;;  %v14602_v54 = vmax.f32 %v12017_v32, 0.0 }
 0x34b   :  { %v12201_v18 = vadd.f32 %v11956_v24, %v1931_v44  ;;  %v1933_v49 = vpop.f32.mrb[23].mxu0 }
 0x34c   :  { %v12204_v25 = vadd.f32 %v11959_v45, %v1933_v49  ;;  %2308 = vrot.lane.b32.xlu1 %v14372_v4, %s10820_s22 }
 0x34d   :  { %14536 = vst [vmem:[#allocation27_spill] sm:$0xff] %v12201_v18  ;;  %v14368_v55 = vmax.f32 %v12201_v18, 0.0  ;;  %2310 = vrot.lane.b32.xlu0 %v14371_v15, %s10820_s22  ;;  %v12640_v18 = vld [vmem:[%s14357_s3 + $0x138] sm:$0xff] }
 0x34e   :  { %14537 = vst [vmem:[#allocation28_spill] sm:$0xff] %v12204_v25  ;;  %v14367_v43 = vmax.f32 %v12204_v25, 0.0  ;;  %v1937_v61 = vpop.f32.mrb[24].mxu0  ;;  %v12635_v25 = vld [vmem:[%s14357_s3 + $0x128] sm:$0xff]  ;;  %14586 = vst [vmem:[#allocation76_spill] sm:$0xff] %v12640_v18  ;;  %v12743_v18 = vld [vmem:[%s14357_s3 + $0x190] sm:$0xff] }
 0x34f   :  { %v12215_v3 = vadd.f32 %v11956_v24, %v1937_v61  ;;  %v1939_v12 = vpop.f32.mrb[25].mxu0  ;;  %14585 = vst [vmem:[#allocation75_spill] sm:$0xff] %v12635_v25 }
 0x350   :  { %v12218_v14 = vadd.f32 %v11959_v45, %v1939_v12  ;;  %2312 = vrot.lane.b32.xlu1 %v14368_v55, %s10820_s22 }
 0x351   :  { %14538 = vst [vmem:[#allocation29_spill] sm:$0xff] %v12215_v3  ;;  %v14369_v48 = vmax.f32 %v12215_v3, 0.0  ;;  %2314 = vrot.lane.b32.xlu0 %v14367_v43, %s10820_s22  ;;  %v12668_v3 = vld [vmem:[%s14357_s3 + $0x158] sm:$0xff] }
 0x352   :  { %14539 = vst [vmem:[#allocation30_spill] sm:$0xff] %v12218_v14  ;;  %v14370_v57 = vmax.f32 %v12218_v14, 0.0  ;;  %v1943_v44 = vpop.f32.mrb[26].mxu0  ;;  %14590 = vst [vmem:[#allocation80_spill] sm:$0xff] %v12668_v3 }
 0x353   :  { %v12229_v49 = vadd.f32 %v11956_v24, %v1943_v44  ;;  %v1945_v61 = vpop.f32.mrb[27].mxu0 }
 0x354   :  { %v12232_v12 = vadd.f32 %v11959_v45, %v1945_v61  ;;  %2316 = vrot.lane.b32.xlu1 %v14369_v48, %s10820_s22 }
 0x355   :  { %14540 = vst [vmem:[#allocation31_spill] sm:$0xff] %v12229_v49  ;;  %v14373_v0 = vmax.f32 %v12229_v49, 0.0  ;;  %2318 = vrot.lane.b32.xlu0 %v14370_v57, %s10820_s22  ;;  %v12612_v49 = vld [vmem:[%s14357_s3 + $0x118] sm:$0xff] }
 0x356   :  { %14541 = vst [vmem:[#allocation32_spill] sm:$0xff] %v12232_v12  ;;  %v14374_v36 = vmax.f32 %v12232_v12, 0.0  ;;  %v1949_v43 = vpop.f32.mrb[28].mxu0  ;;  %14581 = vst [vmem:[#allocation72_spill] sm:$0xff] %v12612_v49  ;;  %v12617_v12 = vld [vmem:[%s14357_s3 + $0x100] sm:$0xff] }
 0x357   :  { %v12243_v44 = vadd.f32 %v11956_v24, %v1949_v43  ;;  %v1951_v55 = vpop.f32.mrb[29].mxu0  ;;  %14582 = vst [vmem:[#allocation73_spill] sm:$0xff] %v12617_v12  ;;  %v12732_v49 = vld [vmem:[%s14357_s3 + $0x180] sm:$0xff] }
 0x358   :  { %v12246_v61 = vadd.f32 %v11959_v45, %v1951_v55  ;;  %2320 = vrot.lane.b32.xlu1 %v14373_v0, %s10820_s22 }
 0x359   :  { %14542 = vst [vmem:[#allocation33_spill] sm:$0xff] %v12243_v44  ;;  %v14377_v48 = vmax.f32 %v12243_v44, 0.0  ;;  %2322 = vrot.lane.b32.xlu0 %v14374_v36, %s10820_s22  ;;  %v14584_v44 = vmax.f32 %v11989_v7, 0.0  ;;  %v12645_v7 = vld [vmem:[%s14357_s3 + $0x120] sm:$0xff] }
 0x35a   :  { %14543 = vst [vmem:[#allocation34_spill] sm:$0xff] %v12246_v61  ;;  %v14378_v57 = vmax.f32 %v12246_v61, 0.0  ;;  %v1955_v15 = vpop.f32.mrb[30].mxu0  ;;  %14587 = vst [vmem:[#allocation77_spill] sm:$0xff] %v12645_v7  ;;  %v14591_v61 = vmax.f32 %v12021_v1, 0.0  ;;  %v12688_v1 = vld [vmem:[%s14357_s3 + $0x150] sm:$0xff] }
 0x35b   :  { %v12257_v43 = vadd.f32 %v11956_v24, %v1955_v15  ;;  %v1957_v4 = vpop.f32.mrb[31].mxu0  ;;  %14593 = vst [vmem:[#allocation82_spill] sm:$0xff] %v12688_v1  ;;  %v12787_v1 = vld [vmem:[%s14357_s3 + $0x1d8] sm:$0x7f] }
 0x35c   :  { %v12260_v55 = vadd.f32 %v11959_v45, %v1957_v4  ;;  %2324 = vrot.lane.b32.xlu1 %v14377_v48, %s10820_s22  ;;  %14606 = vst [vmem:[#allocation92_spill] sm:$0xff] %v12787_v1 }
 0x35d   :  { %14544 = vst [vmem:[#allocation35_spill] sm:$0xff] %v12257_v43  ;;  %v14381_v0 = vmax.f32 %v12257_v43, 0.0  ;;  %2326 = vrot.lane.b32.xlu0 %v14378_v57, %s10820_s22 }
 0x35e   :  { %14545 = vst [vmem:[#allocation36_spill] sm:$0xff] %v12260_v55  ;;  %v14382_v36 = vmax.f32 %v12260_v55, 0.0  ;;  %v1961_v27 = vpop.f32.mrb[32].mxu0  ;;  %v12599_v55 = vld [vmem:[%s14357_s3 + $0x108] sm:$0xff] }
 0x35f   :  { %v12271_v15 = vadd.f32 %v11956_v24, %v1961_v27  ;;  %v1963_v41 = vpop.f32.mrb[33].mxu0  ;;  %14580 = vst [vmem:[#allocation71_spill] sm:$0xff] %v12599_v55  ;;  %v12727_v55 = vld [vmem:[%s14357_s3 + $0x198] sm:$0xff] }
 0x360   :  { %v12274_v4 = vadd.f32 %v11959_v45, %v1963_v41  ;;  %2328 = vrot.lane.b32.xlu1 %v14381_v0, %s10820_s22  ;;  %14599 = vst [vmem:[#allocation88_spill] sm:$0xff] %v12727_v55 }
 0x361   :  { %14546 = vst [vmem:[#allocation37_spill] sm:$0xff] %v12271_v15  ;;  %v14385_v48 = vmax.f32 %v12271_v15, 0.0  ;;  %2330 = vrot.lane.b32.xlu0 %v14382_v36, %s10820_s22  ;;  %v12594_v15 = vld [vmem:[%s14357_s3 + $0xf0] sm:$0xff] }
 0x362   :  { %14547 = vst [vmem:[#allocation38_spill] sm:$0xff] %v12274_v4  ;;  %v14386_v57 = vmax.f32 %v12274_v4, 0.0  ;;  %v1967_v9 = vpop.f32.mrb[34].mxu0  ;;  %v12589_v4 = vld [vmem:[%s14357_s3 + $0xe0] sm:$0xff]  ;;  %14579 = vst [vmem:[#allocation70_spill] sm:$0xff] %v12594_v15  ;;  %v12702_v15 = vld [vmem:[%s14357_s3 + $0x178] sm:$0xff] }
 0x363   :  { %v12285_v27 = vadd.f32 %v11956_v24, %v1967_v9  ;;  %v1969_v11 = vpop.f32.mrb[35].mxu0  ;;  %14578 = vst [vmem:[#allocation69_spill] sm:$0xff] %v12589_v4  ;;  %14595 = vst [vmem:[#allocation84_spill] sm:$0xff] %v12702_v15 }
 0x364   :  { %v12288_v41 = vadd.f32 %v11959_v45, %v1969_v11  ;;  %2332 = vrot.lane.b32.xlu1 %v14385_v48, %s10820_s22 }
 0x365   :  { %14548 = vst [vmem:[#allocation39_spill] sm:$0xff] %v12285_v27  ;;  %v14389_v0 = vmax.f32 %v12285_v27, 0.0  ;;  %2334 = vrot.lane.b32.xlu0 %v14386_v57, %s10820_s22  ;;  %v12582_v27 = vld [vmem:[%s14357_s3 + $0xf8] sm:$0xff] }
 0x366   :  { %14549 = vst [vmem:[#allocation40_spill] sm:$0xff] %v12288_v41  ;;  %v14390_v36 = vmax.f32 %v12288_v41, 0.0  ;;  %v1973_v47 = vpop.f32.mrb[36].mxu0  ;;  %14577 = vst [vmem:[#allocation68_spill] sm:$0xff] %v12582_v27  ;;  %v12622_v41 = vld [vmem:[%s14357_s3 + $0x110] sm:$0xff] }
 0x367   :  { %v12299_v9 = vadd.f32 %v11956_v24, %v1973_v47  ;;  %v1975_v56 = vpop.f32.mrb[37].mxu0  ;;  %14583 = vst [vmem:[#allocation74_spill] sm:$0xff] %v12622_v41  ;;  %v12722_v41 = vld [vmem:[%s14357_s3 + $0x188] sm:$0xff] }
 0x368   :  { %v12302_v11 = vadd.f32 %v11959_v45, %v1975_v56  ;;  %2336 = vrot.lane.b32.xlu1 %v14389_v0, %s10820_s22  ;;  %14598 = vst [vmem:[#allocation87_spill] sm:$0xff] %v12722_v41 }
 0x369   :  { %14550 = vst [vmem:[#allocation41_spill] sm:$0xff] %v12299_v9  ;;  %v14393_v48 = vmax.f32 %v12299_v9, 0.0  ;;  %2338 = vrot.lane.b32.xlu0 %v14390_v36, %s10820_s22  ;;  %v12577_v9 = vld [vmem:[%s14357_s3 + $0xe8] sm:$0xff] }
 0x36a   :  { %14551 = vst [vmem:[#allocation42_spill] sm:$0xff] %v12302_v11  ;;  %v14394_v57 = vmax.f32 %v12302_v11, 0.0  ;;  %v1979_v29 = vpop.f32.mrb[38].mxu0  ;;  %v12572_v11 = vld [vmem:[%s14357_s3 + $0xd0] sm:$0xff]  ;;  %14576 = vst [vmem:[#allocation67_spill] sm:$0xff] %v12577_v9  ;;  %v12707_v9 = vld [vmem:[%s14357_s3 + $0x160] sm:$0xff] }
 0x36b   :  { %v12313_v47 = vadd.f32 %v11956_v24, %v1979_v29  ;;  %v1981_v53 = vpop.f32.mrb[39].mxu0  ;;  %14575 = vst [vmem:[#allocation66_spill] sm:$0xff] %v12572_v11  ;;  %14596 = vst [vmem:[#allocation85_spill] sm:$0xff] %v12707_v9 }
 0x36c   :  { %v12316_v56 = vadd.f32 %v11959_v45, %v1981_v53  ;;  %2340 = vrot.lane.b32.xlu1 %v14393_v48, %s10820_s22 }
 0x36d   :  { %14552 = vst [vmem:[#allocation43_spill] sm:$0xff] %v12313_v47  ;;  %v14397_v0 = vmax.f32 %v12313_v47, 0.0  ;;  %2342 = vrot.lane.b32.xlu0 %v14394_v57, %s10820_s22  ;;  %v12567_v47 = vld [vmem:[%s14357_s3 + $0xc0] sm:$0xff] }
 0x36e   :  { %14553 = vst [vmem:[#allocation44_spill] sm:$0xff] %v12316_v56  ;;  %v14398_v36 = vmax.f32 %v12316_v56, 0.0  ;;  %v1985_v10 = vpop.f32.mrb[40].mxu0  ;;  %14574 = vst [vmem:[#allocation65_spill] sm:$0xff] %v12567_v47  ;;  %v12748_v47 = vld [vmem:[%s14357_s3 + $0x1a8] sm:$0xff] }
 0x36f   :  { %v12327_v29 = vadd.f32 %v11956_v24, %v1985_v10  ;;  %v1987_v42 = vpop.f32.mrb[41].mxu0  ;;  %14600 = vst [vmem:[#allocation89_spill] sm:$0xff] %v12748_v47 }
 0x370   :  { %v12330_v53 = vadd.f32 %v11959_v45, %v1987_v42  ;;  %2344 = vrot.lane.b32.xlu1 %v14397_v0, %s10820_s22 }
 0x371   :  { %14554 = vst [vmem:[#allocation45_spill] sm:$0xff] %v12327_v29  ;;  %v14401_v48 = vmax.f32 %v12327_v29, 0.0  ;;  %2346 = vrot.lane.b32.xlu0 %v14398_v36, %s10820_s22  ;;  %v12557_v29 = vld [vmem:[%s14357_s3 + $0xc8] sm:$0xff] }
 0x372   :  { %14555 = vst [vmem:[#allocation46_spill] sm:$0xff] %v12330_v53  ;;  %v14402_v57 = vmax.f32 %v12330_v53, 0.0  ;;  %v1991_v60 = vpop.f32.mrb[42].mxu0  ;;  %v12552_v53 = vld [vmem:[%s14357_s3 + $0xb0] sm:$0xff]  ;;  %14572 = vst [vmem:[#allocation63_spill] sm:$0xff] %v12557_v29 }
 0x373   :  { %v12341_v10 = vadd.f32 %v11956_v24, %v1991_v60  ;;  %v1993_v34 = vpop.f32.mrb[43].mxu0  ;;  %14571 = vst [vmem:[#allocation62_spill] sm:$0xff] %v12552_v53  ;;  %v12683_v53 = vld [vmem:[%s14357_s3 + $0x140] sm:$0xff] }
 0x374   :  { %v12344_v42 = vadd.f32 %v11959_v45, %v1993_v34  ;;  %2348 = vrot.lane.b32.xlu1 %v14401_v48, %s10820_s22  ;;  %14592 = vst [vmem:[#allocation81_spill] sm:$0xff] %v12683_v53 }
 0x375   :  { %14556 = vst [vmem:[#allocation47_spill] sm:$0xff] %v12341_v10  ;;  %v14405_v0 = vmax.f32 %v12341_v10, 0.0  ;;  %2350 = vrot.lane.b32.xlu0 %v14402_v57, %s10820_s22  ;;  %v12542_v10 = vld [vmem:[%s14357_s3 + $0xb8] sm:$0xff] }
 0x376   :  { %14557 = vst [vmem:[#allocation48_spill] sm:$0xff] %v12344_v42  ;;  %v14406_v36 = vmax.f32 %v12344_v42, 0.0  ;;  %v1997_v51 = vpop.f32.mrb[44].mxu0  ;;  %v12547_v42 = vld [vmem:[%s14357_s3 + $0xa0] sm:$0xff] }
 0x377   :  { %v12355_v60 = vadd.f32 %v11956_v24, %v1997_v51  ;;  %v1999_v30 = vpop.f32.mrb[45].mxu0  ;;  %14570 = vst [vmem:[#allocation61_spill] sm:$0xff] %v12547_v42 }
 0x378   :  { %v12358_v34 = vadd.f32 %v11959_v45, %v1999_v30  ;;  %2352 = vrot.lane.b32.xlu1 %v14405_v0, %s10820_s22 }
 0x379   :  { %14558 = vst [vmem:[#allocation49_spill] sm:$0xff] %v12355_v60  ;;  %v14409_v48 = vmax.f32 %v12355_v60, 0.0  ;;  %2354 = vrot.lane.b32.xlu0 %v14406_v36, %s10820_s22  ;;  %v12537_v60 = vld [vmem:[%s14357_s3 + $0xa8] sm:$0xff] }
 0x37a   :  { %14559 = vst [vmem:[#allocation50_spill] sm:$0xff] %v12358_v34  ;;  %v14410_v57 = vmax.f32 %v12358_v34, 0.0  ;;  %v2003_v35 = vpop.f32.mrb[46].mxu0  ;;  %v12532_v34 = vld [vmem:[%s14357_s3 + $0x90] sm:$0xff] }
 0x37b   :  { %v12369_v51 = vadd.f32 %v11956_v24, %v2003_v35  ;;  %v2005_v23 = vpop.f32.mrb[47].mxu0 }
 0x37c   :  { %v12372_v30 = vadd.f32 %v11959_v45, %v2005_v23  ;;  %2356 = vrot.lane.b32.xlu1 %v14409_v48, %s10820_s22 }
 0x37d   :  { %14560 = vst [vmem:[#allocation51_spill] sm:$0xff] %v12369_v51  ;;  %v14413_v0 = vmax.f32 %v12369_v51, 0.0  ;;  %2358 = vrot.lane.b32.xlu0 %v14410_v57, %s10820_s22  ;;  %v12527_v51 = vld [vmem:[%s14357_s3 + $0x80] sm:$0xff] }
 0x37e   :  { %14561 = vst [vmem:[#allocation52_spill] sm:$0xff] %v12372_v30  ;;  %v14414_v36 = vmax.f32 %v12372_v30, 0.0  ;;  %v2009_v52 = vpop.f32.mrb[48].mxu0  ;;  %v12522_v30 = vld [vmem:[%s14357_s3 + $0x98] sm:$0xff] }
 0x37f   :  { %v12383_v35 = vadd.f32 %v11956_v24, %v2009_v52  ;;  %v2011_v39 = vpop.f32.mrb[49].mxu0 }
 0x380   :  { %v12386_v23 = vadd.f32 %v11959_v45, %v2011_v39  ;;  %2360 = vrot.lane.b32.xlu1 %v14413_v0, %s10820_s22 }
 0x381   :  { %14562 = vst [vmem:[#allocation53_spill] sm:$0xff] %v12383_v35  ;;  %v14419_v48 = vmax.f32 %v12383_v35, 0.0  ;;  %2362 = vrot.lane.b32.xlu0 %v14414_v36, %s10820_s22  ;;  %v12517_v35 = vld [vmem:[%s14357_s3 + $0x88] sm:$0xff] }
 0x382   :  { %14563 = vst [vmem:[#allocation54_spill] sm:$0xff] %v12386_v23  ;;  %v14420_v57 = vmax.f32 %v12386_v23, 0.0  ;;  %v2015_v5 = vpop.f32.mrb[50].mxu0 }
 0x383   :  { %v12397_v52 = vadd.f32 %v11956_v24, %v2015_v5  ;;  %v2017_v22 = vpop.f32.mrb[51].mxu0 }
 0x384   :  { %v12400_v39 = vadd.f32 %v11959_v45, %v2017_v22  ;;  %2364 = vrot.lane.b32.xlu1 %v14419_v48, %s10820_s22 }
 0x385   :  { %14564 = vst [vmem:[#allocation55_spill] sm:$0xff] %v12397_v52  ;;  %v14424_v0 = vmax.f32 %v12397_v52, 0.0  ;;  %2366 = vrot.lane.b32.xlu0 %v14420_v57, %s10820_s22  ;;  %v12507_v52 = vld [vmem:[%s14357_s3 + $0x60] sm:$0xff] }
 0x386   :  { %14565 = vst [vmem:[#allocation56_spill] sm:$0xff] %v12400_v39  ;;  %v14425_v36 = vmax.f32 %v12400_v39, 0.0  ;;  %v2021_v17 = vpop.f32.mrb[52].mxu0  ;;  %v12512_v39 = vld [vmem:[%s14357_s3 + $0x70] sm:$0xff] }
 0x387   :  { %v12411_v5 = vadd.f32 %v11956_v24, %v2021_v17  ;;  %v2023_v16 = vpop.f32.mrb[53].mxu0 }
 0x388   :  { %v12414_v22 = vadd.f32 %v11959_v45, %v2023_v16  ;;  %2368 = vrot.lane.b32.xlu1 %v14424_v0, %s10820_s22 }
 0x389   :  { %14566 = vst [vmem:[#allocation57_spill] sm:$0xff] %v12411_v5  ;;  %v14429_v48 = vmax.f32 %v12411_v5, 0.0  ;;  %2370 = vrot.lane.b32.xlu0 %v14425_v36, %s10820_s22  ;;  %v12502_v5 = vld [vmem:[%s14357_s3 + $0x78] sm:$0xff] }
 0x38a   :  { %14567 = vst [vmem:[#allocation58_spill] sm:$0xff] %v12414_v22  ;;  %v14428_v57 = vmax.f32 %v12414_v22, 0.0  ;;  %v2027_v2 = vpop.f32.mrb[54].mxu0  ;;  %v12497_v22 = vld [vmem:[%s14357_s3 + $0x68] sm:$0xff] }
 0x38b   :  { %v12425_v17 = vadd.f32 %v11956_v24, %v2027_v2  ;;  %v2029_v23 = vpop.f32.mrb[55].mxu0  ;;  %v12447_v2 = vld [vmem:[%s14357_s3] sm:$0xff]  ;;  %v12452_v24 = vld [vmem:[%s14357_s3 + $0x10] sm:$0xff] }
 0x38c   :  { %v12428_v16 = vadd.f32 %v11959_v45, %v2029_v23  ;;  %2372 = vrot.lane.b32.xlu1 %v14429_v48, %s10820_s22  ;;  %v12457_v45 = vld [vmem:[%s14357_s3 + $0x28] sm:$0xff]  ;;  %v12462_v23 = vld [vmem:[%s14357_s3 + $0x38] sm:$0xff] }
 0x38d   :  { %14568 = vst [vmem:[#allocation59_spill] sm:$0xff] %v12425_v17  ;;  %v14426_v0 = vmax.f32 %v12425_v17, 0.0  ;;  %2374 = vrot.lane.b32.xlu0 %v14428_v57, %s10820_s22  ;;  %v12477_v57 = vld [vmem:[%s14357_s3 + $0x48] sm:$0xff]  ;;  %v12482_v48 = vld [vmem:[%s14357_s3 + $0x58] sm:$0xff]  ;;  %v12487_v17 = vld [vmem:[%s14357_s3 + $0x40] sm:$0xff] }
 0x38e   :  { %14569 = vst [vmem:[#allocation60_spill] sm:$0xff] %v12428_v16  ;;  %v14427_v36 = vmax.f32 %v12428_v16, 0.0  ;;  %v12492_v16 = vld [vmem:[%s14357_s3 + $0x50] sm:$0xff] }
 0x390   :  { %2376 = vrot.lane.b32.xlu1 %v14426_v0, %s10820_s22  ;;  %v12467_v0 = vld [vmem:[%s14357_s3 + $0x20] sm:$0xff] }
 0x391   :  { %2378 = vrot.lane.b32.xlu0 %v14427_v36, %s10820_s22  ;;  %v12472_v36 = vld [vmem:[%s14357_s3 + $0x30] sm:$0xff] }
 0x396   :  { %v2271_v56 = vpop.permute.xlu0 %2270 }
 0x397   :  { %v2466_v43 = vmax.f32 %v14584_v44, %v2271_v56 }
 0x399   :  { %v2578_v27 = vrot.slane %v2466_v43, 1 }
 0x39a   :  { %v2275_v44 = vpop.permute.xlu1 %2274 }
 0x39b   :  { %v12672_v14 = vmax.f32 %v14591_v61, %v2275_v44  ;;  %v10612_v63 = vpop.permute.xlu0 %10611  ;;  %v12693_v61 = vld [vmem:[%s14357_s3 + $0x168] sm:$0xff] }
 0x39c   :  { %14594 = vst [vmem:[#allocation83_spill] sm:$0xff] %v12693_v61  ;;  %v10614_v29 = vunpack.i.h.bf16 %v10612_v63  ;;  %v10613_v8 = vunpack.i.l.bf16 %v10612_v63  ;;  %v12712_v63 = vld [vmem:[%s14357_s3 + $0x170] sm:$0xff]  ;;  %v12792_v61 = vld [vmem:[%s14357_s3 + $0x1c0] sm:$0xff] }
 0x39d   :  { %14597 = vst [vmem:[#allocation86_spill] sm:$0xff] %v12712_v63  ;;  %v2579_v42 = vrot.slane %v12672_v14, 1  ;;  %14607 = vst [vmem:[#allocation93_spill] sm:$0xff] %v12792_v61  ;;  %v14612_v63 = vmax.f32 %v12086_v28, 0.0  ;;  %v14616_v61 = vmax.f32 %v12097_v31, 0.0 }
 0x39e   :  { %v2381_v4 = vsel %vm2380_vm8, %v10613_v8, %v2271_v56  ;;  %v2382_v25 = vsel %vm2380_vm8, %v10614_v29, %v2275_v44  ;;  %v2277_v12 = vpop.permute.xlu1 %2276  ;;  %v12753_v8 = vld [vmem:[%s14357_s3 + $0x1b8] sm:$0xff]  ;;  %v14601_v29 = vmax.f32 %v11986_v38, 0.0  ;;  %v12775_v38 = vld [vmem:[%s14357_s3 + $0x1c8] sm:$0xff] }
 0x39f   :  { %v2580_v56 = vsel %vm193_vm3, %v2578_v27, %v2579_v42  ;;  %v2467_v7 = vmax.f32 %v14602_v54, %v2382_v25  ;;  %v2279_v53 = vpop.permute.xlu0 %2278  ;;  %v12770_v27 = vld [vmem:[%s14357_s3 + $0x1b0] sm:$0xff]  ;;  %14604 = vst [vmem:[#allocation91_spill] sm:$0xff] %v12775_v38  ;;  %v14605_v54 = vmax.f32 %v12068_v21, 0.0 }
 0x3a0   :  { %v2465_v44 = vmax.f32 %v14601_v29, %v2381_v4  ;;  %v2383_v32 = vsel %vm2380_vm8, %v2277_v12, %v2279_v53  ;;  %v12797_v21 = vld [vmem:[%s14357_s3 + $0x1d0] sm:$0x7f]  ;;  %v12799_v12 = vmax.f32 %v2466_v43, %v2580_v56  ;;  %v14610_v29 = vmax.f32 %v12063_v20, 0.0  ;;  %s10822_s3 = smov [#allocation14]  }
 0x3a1   :  { %v2470_v25 = vmax.f32 %v14605_v54, %v2279_v53  ;;  %14608 = vst [vmem:[#allocation94_spill] sm:$0xff] %v12797_v21  ;;  %v2576_v54 = vrot.slane %v2467_v7, 1  ;;  %s7924_s7 = sshll.u32 %s10822_s3, 4  ;;  %s7925_s7 = int_to_ptr.vmem [resolvable:$true] %s7924_s7 }
 0x3a2   :  { %14609 = vst [vmem:[#allocation95_spill] sm:$0xff] %v12799_v12  ;;  %v2575_v53 = vrot.slane %v2465_v44, 1  ;;  %v2469_v4 = vmax.f32 %v14610_v29, %v2383_v32  ;;  %v2281_v55 = vpop.permute.xlu1 %2280  ;;  %v2983_v38 = vrot.slane %v12799_v12, 2  ;;  %s10773_s4 = scalar_lea.vmem %s7925_s7, 128  ;;  %p10778_p1 = scmp.lt.s32.totalorder %s7925_s7, %s7925_s7 }
 0x3a3   :  { %v2583_v41 = vrot.slane %v2470_v25, 1  ;;  %v2283_v56 = vpop.permute.xlu0 %2282  ;;  %p10774_p0 = scmp.ne.s32.totalorder %s7925_s7, %s10773_s4  ;;  %p10779_p2 = scmp.lt.s32.totalorder %s10773_s4, %s10773_s4 }
 0x3a4   :  { %v2577_v3 = vsel %vm193_vm3, %v2575_v53, %v2576_v54  ;;  %v2581_v43 = vrot.slane %v2469_v4, 1  ;;  %v2384_v9 = vsel %vm2380_vm8, %v2281_v55, %v2283_v56  ;;  %v2472_v47 = vmax.f32 %v14612_v63, %v2283_v56 }
 0x3a5   :  { %v12814_v32 = vmax.f32 %v2465_v44, %v2577_v3  ;;  %v2584_v29 = vsel %vm193_vm3, %v2579_v42, %v2583_v41  ;;  %v2471_v11 = vmax.f32 %v14614_v13, %v2384_v9  ;;  %v3757_v42 = vrot.slane %v12799_v12, 4  ;;  %p10780_p3 = por %p10779_p2, %p10778_p1 }
 0x3a6   :  { %v2582_v15 = vsel %vm193_vm3, %v2576_v54, %v2581_v43  ;;  %v12822_v53 = vmax.f32 %v12672_v14, %v2584_v29  ;;  %v2587_v3 = vrot.slane %v2472_v47, 1  ;;  %v2285_v44 = vpop.permute.xlu1 %2284 }
 0x3a7   :  { %14611 = vst [vmem:[#allocation96_spill] sm:$0xff] %v12814_v32  ;;  %v12827_v20 = vmax.f32 %v2467_v7, %v2582_v15  ;;  %v2980_v55 = vrot.slane %v12814_v32, 2  ;;  %v2585_v28 = vrot.slane %v2471_v11, 1  ;;  %v2287_v63 = vpop.permute.xlu0 %2286  ;;  %v3754_v56 = vrot.slane %v12814_v32, 4  ;;  %p10781_p4 = pnand %p10780_p3, %p10774_p0 }
 0x3a8   :  { %14613 = vst [vmem:[#allocation97_spill] sm:$0xff] %v12822_v53  ;;  %v2984_v54 = vrot.slane %v12822_v53, 2  ;;  %v3758_v14 = vrot.slane %v12822_v53, 4  ;;  %v2588_v26 = vsel %vm193_vm3, %v2583_v41, %v2587_v3  ;;  %v2385_v13 = vsel %vm2380_vm8, %v2285_v44, %v2287_v63 }
 0x3a9   :  { %v14615_v15 = vmax.f32 %v12100_v33, 0.0  ;;  %v2981_v7 = vrot.slane %v12827_v20, 2  ;;  %v2586_v29 = vsel %vm193_vm3, %v2581_v43, %v2585_v28  ;;  %v12840_v12 = vmax.f32 %v2470_v25, %v2588_v26 }
 0x3aa   :  { %v2473_v21 = vmax.f32 %v14616_v61, %v2385_v13  ;;  %v2985_v53 = vsel %vm850_vm5, %v2983_v38, %v2984_v54  ;;  %v12845_v1 = vmax.f32 %v2469_v4, %v2586_v29  ;;  %v3759_v41 = vsel %vm306_vm0, %v3757_v42, %v3758_v14  ;;  %v2289_v33 = vpop.permute.xlu1 %2288 }
 0x3ab   :  { %v2474_v9 = vmax.f32 %v14615_v15, %v2287_v63  ;;  %8148 = vmatprep.mubr.msk.f32.mxu0 %vm3117_vm9, %v2985_v53  ;;  %v2982_v44 = vsel %vm850_vm5, %v2980_v55, %v2981_v7  ;;  %8266 = vmatprep.mubr.msk.f32.mxu1 %vm3117_vm9, %v3759_v41  ;;  %v3755_v25 = vrot.slane %v12827_v20, 4  ;;  %v2291_v31 = vpop.permute.xlu0 %2290  ;;  %v2988_v61 = vrot.slane %v12840_v12, 2 }
 0x3ac   :  { %v2589_v63 = vrot.slane %v2473_v21, 1  ;;  %3243 = vmatmul.mubr.f32.vlgmr.msra.gmra.mrb[56].mxu0 %v2982_v44  ;;  %v3762_v38 = vrot.slane %v12840_v12, 4  ;;  %v2386_v43 = vsel %vm2380_vm8, %v2289_v33, %v2291_v31  ;;  %v14617_v53 = vmax.f32 %v12114_v40, 0.0 }
 0x3ad   :  { %v2591_v32 = vrot.slane %v2474_v9, 1  ;;  %v2986_v55 = vrot.slane %v12845_v1, 2  ;;  %v14618_v26 = vpack.c.bf16 %v12452_v24, %v12447_v2  ;;  %v3756_v29 = vsel %vm306_vm0, %v3754_v56, %v3755_v25 }
 0x3ae   :  { %v2476_v42 = vmax.f32 %v14617_v53, %v2291_v31  ;;  %v2590_v13 = vsel %vm193_vm3, %v2585_v28, %v2589_v63  ;;  %v14619_v41 = vmax.f32 %v12111_v37, 0.0  ;;  %v14620_v33 = vpack.c.bf16 %v12462_v23, %v12457_v45  ;;  %4016 = vmatmul.mubr.f32.vlgmr.msra.gmra.mrb[0].mxu1 %v3756_v29  ;;  %v2293_v28 = vpop.permute.xlu1 %2292 }
 0x3af   :  { %v2592_v4 = vsel %vm193_vm3, %v2587_v3, %v2591_v32  ;;  %8559 = vmatpush1.bf16.msra.mxu0 %v14618_v26  ;;  %v12871_v40 = vmax.f32 %v2471_v11, %v2590_v13  ;;  %v2989_v2 = vsel %vm850_vm5, %v2984_v54, %v2988_v61  ;;  %v3763_v24 = vsel %vm306_vm0, %v3758_v14, %v3762_v38  ;;  %v2295_v45 = vpop.permute.xlu0 %2294 }
 0x3b0   :  { %v12863_v15 = vmax.f32 %v2472_v47, %v2592_v4  ;;  %v2475_v3 = vmax.f32 %v14619_v41, %v2386_v43  ;;  %8561 = vmatprep.subr.bf16.mxu0 %v14620_v33  ;;  %v2595_v44 = vrot.slane %v2476_v42, 1  ;;  %8149 = vmatprep.mubr.msk.f32.mxu0 %vm3117_vm9, %v2989_v2  ;;  %v2987_v37 = vsel %vm850_vm5, %v2981_v7, %v2986_v55 }
 0x3b1   :  { %8267 = vmatprep.mubr.msk.f32.mxu1 %vm3117_vm9, %v3763_v24  ;;  %v3760_v56 = vrot.slane %v12845_v1, 4  ;;  %3249 = vmatmul.mubr.f32.gmra.mrb[58].mxu0 %v2987_v37  ;;  %v2387_v54 = vsel %vm2380_vm8, %v2293_v28, %v2295_v45  ;;  %v14621_v14 = vmax.f32 %v12134_v50, 0.0  ;;  %v14622_v26 = vmax.f32 %v12131_v46, 0.0 }
 0x3b2   :  { %v2593_v47 = vrot.slane %v2475_v3, 1  ;;  %v2992_v11 = vrot.slane %v12863_v15, 2  ;;  %v2596_v23 = vsel %vm193_vm3, %v2591_v32, %v2595_v44  ;;  %v3766_v4 = vrot.slane %v12863_v15, 4 }
 0x3b3   :  { %v2478_v31 = vmax.f32 %v14621_v14, %v2295_v45  ;;  %v12886_v53 = vmax.f32 %v2474_v9, %v2596_v23  ;;  %v3761_v7 = vsel %vm306_vm0, %v3755_v25, %v3760_v56  ;;  %v2477_v13 = vmax.f32 %v14622_v26, %v2387_v54  ;;  %v2299_v46 = vpop.permute.xlu0 %2298 }
 0x3b4   :  { %v2594_v43 = vsel %vm193_vm3, %v2589_v63, %v2593_v47  ;;  %v14623_v32 = vpack.c.bf16 %v12472_v36, %v12467_v0  ;;  %4022 = vmatmul.mubr.f32.gmra.mrb[2].mxu1 %v3761_v7  ;;  %v2993_v41 = vsel %vm850_vm5, %v2988_v61, %v2992_v11  ;;  %v3767_v33 = vsel %vm306_vm0, %v3762_v38, %v3766_v4  ;;  %v2297_v63 = vpop.permute.xlu1 %2296 }
 0x3b5   :  { %v12894_v29 = vmax.f32 %v2473_v21, %v2594_v43  ;;  %v2599_v50 = vrot.slane %v2478_v31, 1  ;;  %v14624_v9 = vpack.c.bf16 %v12482_v48, %v12477_v57  ;;  %v2597_v25 = vrot.slane %v2477_v13, 1  ;;  %8150 = vmatprep.mubr.msk.f32.mxu0 %vm3117_vm9, %v2993_v41  ;;  %8268 = vmatprep.mubr.msk.f32.mxu1 %vm3117_vm9, %v3767_v33 }
 0x3b6   :  { %8563 = vmatpush1.bf16.msra.mxu0 %v14623_v32  ;;  %v2990_v0 = vrot.slane %v12871_v40, 2  ;;  %v3764_v36 = vrot.slane %v12871_v40, 4  ;;  %v2996_v21 = vrot.slane %v12886_v53, 2  ;;  %v2388_v38 = vsel %vm2380_vm8, %v2297_v63, %v2299_v46 }
 0x3b7   :  { %8565 = vmatprep.subr.bf16.mxu0 %v14624_v9  ;;  %v2600_v61 = vsel %vm193_vm3, %v2595_v44, %v2599_v50  ;;  %v14625_v2 = vmax.f32 %v12148_v59, 0.0  ;;  %v3770_v57 = vrot.slane %v12886_v53, 4  ;;  %v2598_v24 = vsel %vm193_vm3, %v2593_v47, %v2597_v25 }
 0x3b8   :  { %v12912_v28 = vmax.f32 %v2476_v42, %v2600_v61  ;;  %v2991_v37 = vsel %vm850_vm5, %v2986_v55, %v2990_v0  ;;  %v3765_v45 = vsel %vm306_vm0, %v3760_v56, %v3764_v36  ;;  %v14626_v23 = vpack.c.bf16 %v12492_v16, %v12487_v17  ;;  %v2301_v42 = vpop.permute.xlu1 %2300  ;;  %v2303_v16 = vpop.permute.xlu0 %2302 }
 0x3b9   :  { %v2480_v48 = vmax.f32 %v14625_v2, %v2299_v46  ;;  %v12919_v44 = vmax.f32 %v2475_v3, %v2598_v24  ;;  %3255 = vmatmul.mubr.f32.gmra.mrb[60].mxu0 %v2991_v37  ;;  %4028 = vmatmul.mubr.f32.gmra.mrb[4].mxu1 %v3765_v45  ;;  %v14627_v59 = vmax.f32 %v12145_v58, 0.0  ;;  %v2997_v47 = vsel %vm850_vm5, %v2992_v11, %v2996_v21 }
 0x3ba   :  { %8567 = vmatpush1.bf16.msra.mxu0 %v14626_v23  ;;  %8151 = vmatprep.mubr.msk.f32.mxu0 %vm3117_vm9, %v2997_v47  ;;  %v3771_v55 = vsel %vm306_vm0, %v3766_v4, %v3770_v57  ;;  %v2994_v56 = vrot.slane %v12894_v29, 2  ;;  %v3768_v17 = vrot.slane %v12894_v29, 4  ;;  %v3000_v3 = vrot.slane %v12912_v28, 2 }
 0x3bb   :  { %v2479_v54 = vmax.f32 %v14627_v59, %v2388_v38  ;;  %v2603_v14 = vrot.slane %v2480_v48, 1  ;;  %v14628_v43 = vpack.c.bf16 %v12502_v5, %v12497_v22  ;;  %8269 = vmatprep.mubr.msk.f32.mxu1 %vm3117_vm9, %v3771_v55  ;;  %v2389_v11 = vsel %vm2380_vm8, %v2301_v42, %v2303_v16 }
 0x3bc   :  { %v14629_v4 = vmax.f32 %v12162_v6, 0.0  ;;  %v2995_v41 = vsel %vm850_vm5, %v2990_v0, %v2994_v56  ;;  %v3769_v33 = vsel %vm306_vm0, %v3764_v36, %v3768_v17  ;;  %v14630_v63 = vmax.f32 %v12159_v62, 0.0  ;;  %v2305_v46 = vpop.permute.xlu1 %2304 }
 0x3bd   :  { %8569 = vmatprep.subr.bf16.mxu0 %v14628_v43  ;;  %v2601_v58 = vrot.slane %v2479_v54, 1  ;;  %v2604_v7 = vsel %vm193_vm3, %v2599_v50, %v2603_v14  ;;  %v14631_v22 = vpack.c.bf16 %v12512_v39, %v12507_v52  ;;  %3261 = vmatmul.mubr.f32.gmra.mrb[62].mxu0 %v2995_v41  ;;  %v3001_v6 = vsel %vm850_vm5, %v2996_v21, %v3000_v3  ;;  %v2307_v39 = vpop.permute.xlu0 %2306 }
 0x3be   :  { %v2482_v26 = vmax.f32 %v14629_v4, %v2303_v16  ;;  %v12937_v32 = vmax.f32 %v2478_v31, %v2604_v7  ;;  %v2481_v5 = vmax.f32 %v14630_v63, %v2389_v11  ;;  %4034 = vmatmul.mubr.f32.gmra.mrb[6].mxu1 %v3769_v33  ;;  %v3774_v31 = vrot.slane %v12912_v28, 4  ;;  %8152 = vmatprep.mubr.msk.f32.mxu0 %vm3117_vm9, %v3001_v6 }
 0x3bf   :  { %8571 = vmatpush1.bf16.msra.mxu0 %v14631_v22  ;;  %v2602_v50 = vsel %vm193_vm3, %v2597_v25, %v2601_v58  ;;  %v2998_v62 = vrot.slane %v12919_v44, 2  ;;  %v3772_v52 = vrot.slane %v12919_v44, 4  ;;  %v14632_v25 = vpack.c.bf16 %v12522_v30, %v12517_v35 }
 0x3c0   :  { %v2607_v9 = vrot.slane %v2482_v26, 1  ;;  %v12949_v0 = vmax.f32 %v2477_v13, %v2602_v50  ;;  %v2605_v36 = vrot.slane %v2481_v5, 1  ;;  %v3775_v21 = vsel %vm306_vm0, %v3770_v57, %v3774_v31  ;;  %v14634_v57 = vld [vmem:[#allocation24_spill] sm:$0xff]  ;;  %v2309_v47 = vpop.permute.xlu1 %2308 }
 0x3c1   :  { %8573 = vmatprep.subr.bf16.mxu0 %v14632_v25  ;;  %v2390_v38 = vsel %vm2380_vm8, %v2305_v46, %v2307_v39  ;;  %v14633_v13 = vmax.f32 %v12176_v19, 0.0  ;;  %8270 = vmatprep.mubr.msk.f32.mxu1 %vm3117_vm9, %v3775_v21  ;;  %v2999_v45 = vsel %vm850_vm5, %v2994_v56, %v2998_v62  ;;  %v3773_v30 = vsel %vm306_vm0, %v3768_v17, %v3772_v52  ;;  %v2311_v56 = vpop.permute.xlu0 %2310 }
 0x3c2   :  { %v2608_v61 = vsel %vm193_vm3, %v2603_v14, %v2607_v9  ;;  %v2606_v24 = vsel %vm193_vm3, %v2601_v58, %v2605_v36  ;;  %3267 = vmatmul.mubr.f32.gmra.mrb[64].mxu0 %v2999_v45  ;;  %4040 = vmatmul.mubr.f32.gmra.mrb[8].mxu1 %v3773_v30  ;;  %v14635_v23 = vmax.f32 %v14634_v57, 0.0  ;;  %v3004_v19 = vrot.slane %v12937_v32, 2 }
 0x3c3   :  { %v2484_v2 = vmax.f32 %v14633_v13, %v2307_v39  ;;  %v12963_v37 = vmax.f32 %v2480_v48, %v2608_v61  ;;  %v12968_v35 = vmax.f32 %v2479_v54, %v2606_v24  ;;  %v3778_v48 = vrot.slane %v12937_v32, 4  ;;  %v14643_v39 = vld [vmem:[#allocation61_spill] sm:$0xff]  ;;  %v14645_v13 = vld [vmem:[#allocation64_spill] sm:$0xff]  ;;  %v14646_v24 = vld [vmem:[#allocation63_spill] sm:$0xff] }
 0x3c4   :  { %v2483_v59 = vmax.f32 %v14635_v23, %v2390_v38  ;;  %v3002_v42 = vrot.slane %v12949_v0, 2  ;;  %v3776_v55 = vrot.slane %v12949_v0, 4  ;;  %v14636_v54 = vpack.c.bf16 %v12532_v34, %v12527_v51  ;;  %v14648_v23 = vld [vmem:[#allocation27_spill] sm:$0xff] }
 0x3c5   :  { %v2611_v14 = vrot.slane %v2484_v2, 1  ;;  %v3008_v17 = vrot.slane %v12963_v37, 2  ;;  %v3005_v58 = vsel %vm850_vm5, %v3000_v3, %v3004_v19  ;;  %v2391_v7 = vsel %vm2380_vm8, %v2309_v47, %v2311_v56  ;;  %v14638_v3 = vld [vmem:[#allocation25_spill] sm:$0xff] }
 0x3c6   :  { %8575 = vmatpush1.bf16.msra.mxu0 %v14636_v54  ;;  %v2609_v16 = vrot.slane %v2483_v59, 1  ;;  %v14637_v11 = vpack.c.bf16 %v12542_v10, %v12537_v60  ;;  %8153 = vmatprep.mubr.msk.f32.mxu0 %vm3117_vm9, %v3005_v58  ;;  %v3779_v41 = vsel %vm306_vm0, %v3774_v31, %v3778_v48  ;;  %v3003_v34 = vsel %vm850_vm5, %v2998_v62, %v3002_v42  ;;  %v14640_v10 = vld [vmem:[#allocation26_spill] sm:$0xff]  ;;  %v2315_v62 = vpop.permute.xlu0 %2314 }
 0x3c7   :  { %v2612_v43 = vsel %vm193_vm3, %v2607_v9, %v2611_v14  ;;  %v3777_v51 = vsel %vm306_vm0, %v3772_v52, %v3776_v55  ;;  %8271 = vmatprep.mubr.msk.f32.mxu1 %vm3117_vm9, %v3779_v41  ;;  %3273 = vmatmul.mubr.f32.gmra.mrb[66].mxu0 %v3003_v34  ;;  %v14639_v63 = vmax.f32 %v14638_v3, 0.0  ;;  %v14641_v60 = vmax.f32 %v14640_v10, 0.0  ;;  %v2313_v9 = vpop.permute.xlu1 %2312  ;;  %v14642_v52 = vld [vmem:[#allocation62_spill] sm:$0xff] }
 0x3c8   :  { %8577 = vmatprep.subr.bf16.mxu0 %v14637_v11  ;;  %v12986_v4 = vmax.f32 %v2482_v26, %v2612_v43  ;;  %v2610_v33 = vsel %vm193_vm3, %v2605_v36, %v2609_v16  ;;  %v3782_v50 = vrot.slane %v12963_v37, 4  ;;  %4046 = vmatmul.mubr.f32.gmra.mrb[10].mxu1 %v3777_v51  ;;  %v3009_v31 = vsel %vm850_vm5, %v3004_v19, %v3008_v17  ;;  %v14652_v3 = vld [vmem:[#allocation66_spill] sm:$0xff] }
 0x3c9   :  { %v2485_v22 = vmax.f32 %v14639_v63, %v2391_v7  ;;  %v2486_v26 = vmax.f32 %v14641_v60, %v2311_v56  ;;  %v12999_v6 = vmax.f32 %v2481_v5, %v2610_v33  ;;  %v3006_v46 = vrot.slane %v12968_v35, 2  ;;  %8154 = vmatprep.mubr.msk.f32.mxu0 %vm3117_vm9, %v3009_v31  ;;  %v14650_v56 = vld [vmem:[#allocation28_spill] sm:$0xff]  ;;  %v14653_v63 = vld [vmem:[#allocation65_spill] sm:$0xff]  ;;  %v14656_v31 = vld [vmem:[#allocation67_spill] sm:$0xff] }
 0x3ca   :  { %v3780_v36 = vrot.slane %v12968_v35, 4  ;;  %v14644_v25 = vpack.c.bf16 %v14642_v52, %v14643_v39  ;;  %v3783_v38 = vsel %vm306_vm0, %v3778_v48, %v3782_v50  ;;  %v2392_v5 = vsel %vm2380_vm8, %v2313_v9, %v2315_v62  ;;  %v2319_v33 = vpop.permute.xlu0 %2318 }
 0x3cb   :  { %v2613_v61 = vrot.slane %v2485_v22, 1  ;;  %v2615_v21 = vrot.slane %v2486_v26, 1  ;;  %v14647_v45 = vpack.c.bf16 %v14645_v13, %v14646_v24  ;;  %8272 = vmatprep.mubr.msk.f32.mxu1 %vm3117_vm9, %v3783_v38  ;;  %v3007_v30 = vsel %vm850_vm5, %v3002_v42, %v3006_v46  ;;  %v2317_v41 = vpop.permute.xlu1 %2316 }
 0x3cc   :  { %8579 = vmatpush1.bf16.msra.mxu0 %v14644_v25  ;;  %v3781_v57 = vsel %vm306_vm0, %v3776_v55, %v3780_v36  ;;  %v14649_v19 = vmax.f32 %v14648_v23, 0.0  ;;  %v14651_v54 = vmax.f32 %v14650_v56, 0.0  ;;  %v3012_v7 = vrot.slane %v12986_v4, 2  ;;  %v14662_v56 = vld [vmem:[#allocation32_spill] sm:$0xff] }
 0x3cd   :  { %8581 = vmatprep.subr.bf16.mxu0 %v14647_v45  ;;  %v2614_v48 = vsel %vm193_vm3, %v2609_v16, %v2613_v61  ;;  %v2616_v58 = vsel %vm193_vm3, %v2611_v14, %v2615_v21  ;;  %3279 = vmatmul.mubr.f32.gmra.mrb[68].mxu0 %v3007_v30  ;;  %v3786_v11 = vrot.slane %v12986_v4, 4  ;;  %v14654_v10 = vpack.c.bf16 %v14652_v3, %v14653_v63  ;;  %v14660_v45 = vld [vmem:[#allocation30_spill] sm:$0xff] }
 0x3ce   :  { %v2487_v47 = vmax.f32 %v14649_v19, %v2392_v5  ;;  %v2488_v43 = vmax.f32 %v14651_v54, %v2315_v62  ;;  %v13024_v34 = vmax.f32 %v2483_v59, %v2614_v48  ;;  %v13026_v42 = vmax.f32 %v2484_v2, %v2616_v58  ;;  %4052 = vmatmul.mubr.f32.gmra.mrb[12].mxu1 %v3781_v57  ;;  %v14655_v59 = vld [vmem:[#allocation68_spill] sm:$0xff]  ;;  %v2323_v19 = vpop.permute.xlu0 %2322  ;;  %v14664_v58 = vld [vmem:[#allocation70_spill] sm:$0xff] }
 0x3cf   :  { %v3013_v14 = vsel %vm850_vm5, %v3008_v17, %v3012_v7  ;;  %v3787_v16 = vsel %vm306_vm0, %v3782_v50, %v3786_v11  ;;  %v3010_v60 = vrot.slane %v12999_v6, 2  ;;  %v3784_v9 = vrot.slane %v12999_v6, 4  ;;  %v2321_v13 = vpop.permute.xlu1 %2320 }
 0x3d0   :  { %v2617_v55 = vrot.slane %v2487_v47, 1  ;;  %v2619_v51 = vrot.slane %v2488_v43, 1  ;;  %8583 = vmatpush1.bf16.msra.mxu0 %v14654_v10  ;;  %v14657_v2 = vpack.c.bf16 %v14655_v59, %v14656_v31  ;;  %8155 = vmatprep.mubr.msk.f32.mxu0 %vm3117_vm9, %v3013_v14  ;;  %v2393_v17 = vsel %vm2380_vm8, %v2317_v41, %v2319_v33  ;;  %v14665_v41 = vld [vmem:[#allocation69_spill] sm:$0xff]  ;;  %v14667_v10 = vld [vmem:[#allocation31_spill] sm:$0xff]  ;;  %v14669_v59 = vld [vmem:[#allocation72_spill] sm:$0xff] }
 0x3d1   :  { %8273 = vmatprep.mubr.msk.f32.mxu1 %vm3117_vm9, %v3787_v16  ;;  %v3016_v50 = vrot.slane %v13026_v42, 2  ;;  %v3011_v38 = vsel %vm850_vm5, %v3006_v46, %v3010_v60  ;;  %v3785_v5 = vsel %vm306_vm0, %v3780_v36, %v3784_v9  ;;  %v14661_v30 = vmax.f32 %v14660_v45, 0.0  ;;  %v14670_v31 = vld [vmem:[#allocation71_spill] sm:$0xff] }
 0x3d2   :  { %8585 = vmatprep.subr.bf16.mxu0 %v14657_v2  ;;  %v2618_v62 = vsel %vm193_vm3, %v2613_v61, %v2617_v55  ;;  %v2620_v52 = vsel %vm193_vm3, %v2615_v21, %v2619_v51  ;;  %3285 = vmatmul.mubr.f32.gmra.mrb[70].mxu0 %v3011_v38  ;;  %v14658_v61 = vld [vmem:[#allocation29_spill] sm:$0xff]  ;;  %v3788_v46 = vrot.slane %v13024_v34, 4  ;;  %v2394_v36 = vsel %vm2380_vm8, %v2321_v13, %v2323_v19  ;;  %v2327_v45 = vpop.permute.xlu0 %2326 }
 0x3d3   :  { %v13044_v39 = vmax.f32 %v2485_v22, %v2618_v62  ;;  %v13046_v25 = vmax.f32 %v2486_v26, %v2620_v52  ;;  %4058 = vmatmul.mubr.f32.gmra.mrb[14].mxu1 %v3785_v5  ;;  %v14659_v21 = vmax.f32 %v14658_v61, 0.0  ;;  %v2490_v57 = vmax.f32 %v14661_v30, %v2319_v33  ;;  %v2325_v5 = vpop.permute.xlu1 %2324 }
 0x3d4   :  { %v3017_v23 = vsel %vm850_vm5, %v3012_v7, %v3016_v50  ;;  %v3790_v22 = vrot.slane %v13026_v42, 4  ;;  %v3014_v26 = vrot.slane %v13024_v34, 2  ;;  %v14663_v54 = vmax.f32 %v14662_v56, 0.0 }
 0x3d5   :  { %v2489_v24 = vmax.f32 %v14659_v21, %v2393_v17  ;;  %8156 = vmatprep.mubr.msk.f32.mxu0 %vm3117_vm9, %v3017_v23  ;;  %v14666_v3 = vpack.c.bf16 %v14664_v58, %v14665_v41  ;;  %v2623_v7 = vrot.slane %v2490_v57, 1  ;;  %v14668_v14 = vmax.f32 %v14667_v10, 0.0  ;;  %v14676_v58 = vld [vmem:[#allocation75_spill] sm:$0xff] }
 0x3d6   :  { %v2492_v48 = vmax.f32 %v14663_v54, %v2323_v19  ;;  %v3791_v63 = vsel %vm306_vm0, %v3786_v11, %v3790_v22  ;;  %v14671_v2 = vpack.c.bf16 %v14669_v59, %v14670_v31  ;;  %v3015_v62 = vsel %vm850_vm5, %v3010_v60, %v3014_v26  ;;  %v14672_v19 = vld [vmem:[#allocation74_spill] sm:$0xff] }
 0x3d7   :  { %8587 = vmatpush1.bf16.msra.mxu0 %v14666_v3  ;;  %v2621_v33 = vrot.slane %v2489_v24, 1  ;;  %v2491_v16 = vmax.f32 %v14668_v14, %v2394_v36  ;;  %8274 = vmatprep.mubr.msk.f32.mxu1 %vm3117_vm9, %v3791_v63  ;;  %v3789_v52 = vsel %vm306_vm0, %v3784_v9, %v3788_v46  ;;  %v3020_v38 = vrot.slane %v13046_v25, 2  ;;  %v14673_v36 = vld [vmem:[#allocation73_spill] sm:$0xff]  ;;  %v2329_v10 = vpop.permute.xlu1 %2328 }
 0x3d8   :  { %8589 = vmatprep.subr.bf16.mxu0 %v14671_v2  ;;  %v2627_v17 = vrot.slane %v2492_v48, 1  ;;  %v2624_v11 = vsel %vm193_vm3, %v2619_v51, %v2623_v7  ;;  %3291 = vmatmul.mubr.f32.gmra.mrb[72].mxu0 %v3015_v62  ;;  %v3794_v21 = vrot.slane %v13046_v25, 4  ;;  %v14674_v56 = vpack.c.bf16 %v14672_v19, %v14673_v36  ;;  %v14680_v14 = vld [vmem:[#allocation33_spill] sm:$0xff]  ;;  %v2331_v62 = vpop.permute.xlu0 %2330  ;;  %v14682_v19 = vld [vmem:[#allocation78_spill] sm:$0xff] }
 0x3d9   :  { %v2622_v13 = vsel %vm193_vm3, %v2617_v55, %v2621_v33  ;;  %4064 = vmatmul.mubr.f32.gmra.mrb[16].mxu1 %v3789_v52  ;;  %v2625_v61 = vrot.slane %v2491_v16, 1  ;;  %v13080_v23 = vmax.f32 %v2488_v43, %v2624_v11  ;;  %v3021_v9 = vsel %vm850_vm5, %v3016_v50, %v3020_v38  ;;  %v14675_v43 = vld [vmem:[#allocation76_spill] sm:$0xff]  ;;  %v14683_v36 = vld [vmem:[#allocation77_spill] sm:$0xff] }
 0x3da   :  { %v13078_v30 = vmax.f32 %v2487_v47, %v2622_v13  ;;  %v2628_v60 = vsel %vm193_vm3, %v2623_v7, %v2627_v17  ;;  %8157 = vmatprep.mubr.msk.f32.mxu0 %vm3117_vm9, %v3021_v9  ;;  %v3795_v54 = vsel %vm306_vm0, %v3790_v22, %v3794_v21  ;;  %v3018_v47 = vrot.slane %v13044_v39, 2 }
 0x3db   :  { %8591 = vmatpush1.bf16.msra.mxu0 %v14674_v56  ;;  %v2626_v55 = vsel %vm193_vm3, %v2621_v33, %v2625_v61  ;;  %v13088_v51 = vmax.f32 %v2490_v57, %v2628_v60  ;;  %v14677_v41 = vpack.c.bf16 %v14675_v43, %v14676_v58  ;;  %8275 = vmatprep.mubr.msk.f32.mxu1 %vm3117_vm9, %v3795_v54  ;;  %v3792_v50 = vrot.slane %v13044_v39, 4  ;;  %v14678_v57 = vld [vmem:[#allocation34_spill] sm:$0xff]  ;;  %v2333_v43 = vpop.permute.xlu1 %2332 }
 0x3dc   :  { %v13096_v3 = vmax.f32 %v2489_v24, %v2626_v55  ;;  %v2395_v33 = vsel %vm2380_vm8, %v2325_v5, %v2327_v45  ;;  %v14679_v7 = vmax.f32 %v14678_v57, 0.0  ;;  %v3019_v22 = vsel %vm850_vm5, %v3014_v26, %v3018_v47 }
 0x3dd   :  { %8593 = vmatprep.subr.bf16.mxu0 %v14677_v41  ;;  %v14681_v59 = vmax.f32 %v14680_v14, 0.0  ;;  %v3024_v2 = vrot.slane %v13080_v23, 2  ;;  %v3798_v24 = vrot.slane %v13080_v23, 4  ;;  %3297 = vmatmul.mubr.f32.gmra.mrb[74].mxu0 %v3019_v22  ;;  %v3793_v52 = vsel %vm306_vm0, %v3788_v46, %v3792_v50  ;;  %v14685_v41 = vld [vmem:[#allocation35_spill] sm:$0xff]  ;;  %v2335_v22 = vpop.permute.xlu0 %2334  ;;  %v14689_v14 = vld [vmem:[#allocation80_spill] sm:$0xff] }
 0x3de   :  { %v2494_v63 = vmax.f32 %v14679_v7, %v2327_v45  ;;  %v3022_v5 = vrot.slane %v13078_v30, 2  ;;  %v3796_v11 = vrot.slane %v13078_v30, 4  ;;  %4070 = vmatmul.mubr.f32.gmra.mrb[18].mxu1 %v3793_v52  ;;  %v2396_v9 = vsel %vm2380_vm8, %v2329_v10, %v2331_v62  ;;  %v14687_v7 = vld [vmem:[#allocation36_spill] sm:$0xff] }
 0x3df   :  { %v2493_v31 = vmax.f32 %v14681_v59, %v2395_v33  ;;  %v3025_v26 = vsel %vm850_vm5, %v3020_v38, %v3024_v2  ;;  %v3799_v60 = vsel %vm306_vm0, %v3794_v21, %v3798_v24  ;;  %v14684_v56 = vpack.c.bf16 %v14682_v19, %v14683_v36  ;;  %v14690_v59 = vld [vmem:[#allocation79_spill] sm:$0xff]  ;;  %v14692_v36 = vld [vmem:[#allocation37_spill] sm:$0xff] }
 0x3e0   :  { %v2631_v13 = vrot.slane %v2494_v63, 1  ;;  %8158 = vmatprep.mubr.msk.f32.mxu0 %vm3117_vm9, %v3025_v26  ;;  %8276 = vmatprep.mubr.msk.f32.mxu1 %vm3117_vm9, %v3799_v60  ;;  %v3023_v46 = vsel %vm850_vm5, %v3018_v47, %v3022_v5  ;;  %v3797_v54 = vsel %vm306_vm0, %v3792_v50, %v3796_v11  ;;  %v3028_v38 = vrot.slane %v13088_v51, 2 }
 0x3e1   :  { %v2629_v45 = vrot.slane %v2493_v31, 1  ;;  %8595 = vmatpush1.bf16.msra.mxu0 %v14684_v56  ;;  %v14686_v33 = vmax.f32 %v14685_v41, 0.0  ;;  %v14691_v52 = vpack.c.bf16 %v14689_v14, %v14690_v59  ;;  %v14693_v56 = vmax.f32 %v14692_v36, 0.0  ;;  %v2337_v41 = vpop.permute.xlu1 %2336  ;;  %v14699_v59 = vld [vmem:[#allocation84_spill] sm:$0xff] }
 0x3e2   :  { %v2632_v55 = vsel %vm193_vm3, %v2627_v17, %v2631_v13  ;;  %v14688_v17 = vmax.f32 %v14687_v7, 0.0  ;;  %3303 = vmatmul.mubr.f32.gmra.mrb[76].mxu0 %v3023_v46  ;;  %v3029_v50 = vsel %vm850_vm5, %v3024_v2, %v3028_v38  ;;  %4076 = vmatmul.mubr.f32.gmra.mrb[20].mxu1 %v3797_v54  ;;  %v14696_v54 = vld [vmem:[#allocation82_spill] sm:$0xff] }
 0x3e3   :  { %v2630_v21 = vsel %vm193_vm3, %v2625_v61, %v2629_v45  ;;  %v13124_v58 = vmax.f32 %v2492_v48, %v2632_v55  ;;  %v2495_v57 = vmax.f32 %v14686_v33, %v2396_v9  ;;  %8597 = vmatprep.subr.bf16.mxu0 %v14691_v52  ;;  %v3802_v61 = vrot.slane %v13088_v51, 4  ;;  %8159 = vmatprep.mubr.msk.f32.mxu0 %vm3117_vm9, %v3029_v50  ;;  %v14694_v55 = vld [vmem:[#allocation38_spill] sm:$0xff]  ;;  %v14697_v33 = vld [vmem:[#allocation81_spill] sm:$0xff]  ;;  %v14700_v52 = vld [vmem:[#allocation83_spill] sm:$0xff] }
 0x3e4   :  { %v2496_v10 = vmax.f32 %v14688_v17, %v2331_v62  ;;  %v13133_v47 = vmax.f32 %v2491_v16, %v2630_v21  ;;  %v3026_v48 = vrot.slane %v13096_v3, 2  ;;  %v3800_v62 = vrot.slane %v13096_v3, 4 }
 0x3e5   :  { %v2633_v26 = vrot.slane %v2495_v57, 1  ;;  %v2397_v9 = vsel %vm2380_vm8, %v2333_v43, %v2335_v22  ;;  %v3803_v19 = vsel %vm306_vm0, %v3798_v24, %v3802_v61  ;;  %v14695_v46 = vmax.f32 %v14694_v55, 0.0  ;;  %v2339_v43 = vpop.permute.xlu0 %2338 }
 0x3e6   :  { %v2635_v60 = vrot.slane %v2496_v10, 1  ;;  %v3027_v16 = vsel %vm850_vm5, %v3022_v5, %v3026_v48  ;;  %v2497_v2 = vmax.f32 %v14693_v56, %v2397_v9  ;;  %v14698_v7 = vpack.c.bf16 %v14696_v54, %v14697_v33  ;;  %8277 = vmatprep.mubr.msk.f32.mxu1 %vm3117_vm9, %v3803_v19  ;;  %v2341_v33 = vpop.permute.xlu1 %2340 }
 0x3e7   :  { %v2498_v21 = vmax.f32 %v14695_v46, %v2335_v22  ;;  %v2634_v17 = vsel %vm193_vm3, %v2629_v45, %v2633_v26  ;;  %v3801_v24 = vsel %vm306_vm0, %v3796_v11, %v3800_v62  ;;  %v3032_v5 = vrot.slane %v13124_v58, 2  ;;  %3309 = vmatmul.mubr.f32.gmra.mrb[78].mxu0 %v3027_v16 }
 0x3e8   :  { %8599 = vmatpush1.bf16.msra.mxu0 %v14698_v7  ;;  %v2636_v14 = vsel %vm193_vm3, %v2631_v13, %v2635_v60  ;;  %v14701_v50 = vpack.c.bf16 %v14699_v59, %v14700_v52  ;;  %v13158_v22 = vmax.f32 %v2493_v31, %v2634_v17  ;;  %v2637_v36 = vrot.slane %v2497_v2, 1  ;;  %4082 = vmatmul.mubr.f32.gmra.mrb[22].mxu1 %v3801_v24  ;;  %v14702_v31 = vld [vmem:[#allocation40_spill] sm:$0xff]  ;;  %v14705_v59 = vld [vmem:[#allocation85_spill] sm:$0xff] }
 0x3e9   :  { %v13160_v9 = vmax.f32 %v2494_v63, %v2636_v14  ;;  %v2639_v45 = vrot.slane %v2498_v21, 1  ;;  %v3033_v13 = vsel %vm850_vm5, %v3028_v38, %v3032_v5  ;;  %v3806_v19 = vrot.slane %v13124_v58, 4  ;;  %v2343_v24 = vpop.permute.xlu0 %2342 }
 0x3ea   :  { %8601 = vmatprep.subr.bf16.mxu0 %v14701_v50  ;;  %v3030_v11 = vrot.slane %v13133_v47, 2  ;;  %v3804_v56 = vrot.slane %v13133_v47, 4  ;;  %v2638_v55 = vsel %vm193_vm3, %v2633_v26, %v2637_v36  ;;  %8160 = vmatprep.mubr.msk.f32.mxu0 %vm3117_vm9, %v3033_v13  ;;  %v2398_v63 = vsel %vm2380_vm8, %v2337_v41, %v2339_v43  ;;  %v14704_v26 = vld [vmem:[#allocation86_spill] sm:$0xff] }
 0x3eb   :  { %v2640_v46 = vsel %vm193_vm3, %v2635_v60, %v2639_v45  ;;  %v14703_v16 = vmax.f32 %v14702_v31, 0.0  ;;  %v13172_v7 = vmax.f32 %v2495_v57, %v2638_v55  ;;  %v3807_v17 = vsel %vm306_vm0, %v3802_v61, %v3806_v19  ;;  %v14710_v31 = vld [vmem:[#allocation87_spill] sm:$0xff] }
 0x3ec   :  { %v13174_v38 = vmax.f32 %v2496_v10, %v2640_v46  ;;  %v3031_v14 = vsel %vm850_vm5, %v3026_v48, %v3030_v11  ;;  %v14706_v60 = vpack.c.bf16 %v14704_v26, %v14705_v59  ;;  %8278 = vmatprep.mubr.msk.f32.mxu1 %vm3117_vm9, %v3807_v17  ;;  %v3805_v41 = vsel %vm306_vm0, %v3800_v62, %v3804_v56  ;;  %v14709_v46 = vld [vmem:[#allocation88_spill] sm:$0xff] }
 0x3ed   :  { %v2500_v54 = vmax.f32 %v14703_v16, %v2339_v43  ;;  %3315 = vmatmul.mubr.f32.gmra.mrb[80].mxu0 %v3031_v14  ;;  %v14707_v43 = vld [vmem:[#allocation39_spill] sm:$0xff]  ;;  %v3036_v10 = vrot.slane %v13160_v9, 2  ;;  %4088 = vmatmul.mubr.f32.gmra.mrb[24].mxu1 %v3805_v41  ;;  %v3810_v61 = vrot.slane %v13160_v9, 4  ;;  %v3034_v48 = vrot.slane %v13158_v22, 2  ;;  %v14712_v14 = vld [vmem:[#allocation41_spill] sm:$0xff] }
 0x3ee   :  { %8603 = vmatpush1.bf16.msra.mxu0 %v14706_v60  ;;  %v14708_v52 = vmax.f32 %v14707_v43, 0.0  ;;  %v3808_v13 = vrot.slane %v13158_v22, 4  ;;  %v2399_v55 = vsel %vm2380_vm8, %v2341_v33, %v2343_v24  ;;  %v14711_v16 = vpack.c.bf16 %v14709_v46, %v14710_v31  ;;  %v2345_v60 = vpop.permute.xlu1 %2344  ;;  %v2347_v46 = vpop.permute.xlu0 %2346 }
 0x3ef   :  { %v2643_v50 = vrot.slane %v2500_v54, 1  ;;  %v14713_v26 = vmax.f32 %v14712_v14, 0.0  ;;  %v3811_v43 = vsel %vm306_vm0, %v3806_v19, %v3810_v61  ;;  %v3035_v33 = vsel %vm850_vm5, %v3030_v11, %v3034_v48 }
 0x3f0   :  { %v2499_v57 = vmax.f32 %v14708_v52, %v2398_v63  ;;  %8605 = vmatprep.subr.bf16.mxu0 %v14711_v16  ;;  %v3037_v63 = vsel %vm850_vm5, %v3032_v5, %v3036_v10  ;;  %v3809_v52 = vsel %vm306_vm0, %v3804_v56, %v3808_v13  ;;  %8279 = vmatprep.mubr.msk.f32.mxu1 %vm3117_vm9, %v3811_v43  ;;  %v14714_v5 = vld [vmem:[#allocation42_spill] sm:$0xff]  ;;  %v3814_v19 = vrot.slane %v13174_v38, 4  ;;  %v14718_v43 = vld [vmem:[#allocation89_spill] sm:$0xff] }
 0x3f1   :  { %v2644_v17 = vsel %vm193_vm3, %v2639_v45, %v2643_v50  ;;  %v2501_v59 = vmax.f32 %v14713_v26, %v2399_v55  ;;  %8161 = vmatprep.mubr.msk.f32.mxu0 %vm3117_vm9, %v3037_v63  ;;  %v14715_v45 = vmax.f32 %v14714_v5, 0.0  ;;  %4094 = vmatmul.mubr.f32.gmra.mrb[26].mxu1 %v3809_v52  ;;  %v3038_v11 = vrot.slane %v13172_v7, 2 }
 0x3f2   :  { %v2641_v62 = vrot.slane %v2499_v57, 1  ;;  %v13197_v41 = vmax.f32 %v2498_v21, %v2644_v17  ;;  %3321 = vmatmul.mubr.f32.gmra.mrb[82].mxu0 %v3035_v33  ;;  %v3040_v21 = vrot.slane %v13174_v38, 2  ;;  %v3812_v56 = vrot.slane %v13172_v7, 4 }
 0x3f3   :  { %v2502_v55 = vmax.f32 %v14715_v45, %v2343_v24  ;;  %v2645_v16 = vrot.slane %v2501_v59, 1  ;;  %v2400_v26 = vsel %vm2380_vm8, %v2345_v60, %v2347_v46  ;;  %v14719_v33 = vpack.c.bf16 %v12753_v8, %v14718_v43  ;;  %v14721_v60 = vld [vmem:[#allocation43_spill] sm:$0xff]  ;;  %v14723_v45 = vld [vmem:[#allocation44_spill] sm:$0xff] }
 0x3f4   :  { %v2642_v31 = vsel %vm193_vm3, %v2637_v36, %v2641_v62  ;;  %v14717_v36 = vpack.c.bf16 %v12743_v18, %v12732_v49  ;;  %v3041_v24 = vsel %vm850_vm5, %v3036_v10, %v3040_v21  ;;  %v3039_v18 = vsel %vm850_vm5, %v3034_v48, %v3038_v11 }
 0x3f5   :  { %v13208_v17 = vmax.f32 %v2497_v2, %v2642_v31  ;;  %v2646_v63 = vsel %vm193_vm3, %v2641_v62, %v2645_v16  ;;  %v2647_v14 = vrot.slane %v2502_v55, 1  ;;  %v2349_v2 = vpop.permute.xlu1 %2348  ;;  %8162 = vmatprep.mubr.msk.f32.mxu0 %vm3117_vm9, %v3041_v24  ;;  %v3815_v31 = vsel %vm306_vm0, %v3810_v61, %v3814_v19  ;;  %v2351_v62 = vpop.permute.xlu0 %2350 }
 0x3f6   :  { %8607 = vmatpush1.bf16.msra.mxu0 %v14717_v36  ;;  %v13222_v52 = vmax.f32 %v2499_v57, %v2646_v63  ;;  %v3813_v49 = vsel %vm306_vm0, %v3808_v13, %v3812_v56  ;;  %8280 = vmatprep.mubr.msk.f32.mxu1 %vm3117_vm9, %v3815_v31  ;;  %v14722_v5 = vmax.f32 %v14721_v60, 0.0  ;;  %v14724_v57 = vmax.f32 %v14723_v45, 0.0  ;;  %v14725_v13 = vld [vmem:[#allocation90_spill] sm:$0xff] }
 0x3f7   :  { %14716 = vst [vmem:[#allocation24_spill] sm:$0xff] %v13208_v17  ;;  %8609 = vmatprep.subr.bf16.mxu0 %v14719_v33  ;;  %v2648_v10 = vsel %vm193_vm3, %v2643_v50, %v2647_v14  ;;  %3327 = vmatmul.mubr.f32.gmra.mrb[84].mxu0 %v3039_v18  ;;  %v3044_v63 = vrot.slane %v13197_v41, 2  ;;  %v3818_v61 = vrot.slane %v13197_v41, 4  ;;  %v3042_v48 = vrot.slane %v13208_v17, 2 }
 0x3f8   :  { %14720 = vst [vmem:[#allocation25_spill] sm:$0xff] %v13222_v52  ;;  %v2503_v8 = vmax.f32 %v14722_v5, %v2400_v26  ;;  %v2504_v36 = vmax.f32 %v14724_v57, %v2347_v46  ;;  %v13235_v24 = vmax.f32 %v2500_v54, %v2648_v10  ;;  %4100 = vmatmul.mubr.f32.gmra.mrb[28].mxu1 %v3813_v49  ;;  %v3816_v50 = vrot.slane %v13208_v17, 4  ;;  %v14727_v54 = vld [vmem:[#allocation92_spill] sm:$0xff]  ;;  %v14728_v10 = vld [vmem:[#allocation91_spill] sm:$0xff]  ;;  %v14731_v57 = vld [vmem:[#allocation45_spill] sm:$0xff] }
 0x3f9   :  { %v14726_v43 = vpack.c.bf16 %v12770_v27, %v14725_v13  ;;  %v3045_v31 = vsel %vm850_vm5, %v3040_v21, %v3044_v63  ;;  %v2401_v46 = vsel %vm2380_vm8, %v2349_v2, %v2351_v62  ;;  %v2353_v18 = vpop.permute.xlu1 %2352  ;;  %v14729_v49 = vpack.c.bf16 %v14727_v54, %v14728_v10  ;;  %v14733_v54 = vld [vmem:[#allocation46_spill] sm:$0xff] }
 0x3fa   :  { %v2649_v33 = vrot.slane %v2503_v8, 1  ;;  %v2651_v26 = vrot.slane %v2504_v36, 1  ;;  %8163 = vmatprep.mubr.msk.f32.mxu0 %vm3117_vm9, %v3045_v31  ;;  %v3819_v5 = vsel %vm306_vm0, %v3814_v19, %v3818_v61  ;;  %v3043_v27 = vsel %vm850_vm5, %v3038_v11, %v3042_v48 }
 0x3fb   :  { %8611 = vmatpush1.bf16.msra.mxu0 %v14726_v43  ;;  %v3817_v45 = vsel %vm306_vm0, %v3812_v56, %v3816_v50  ;;  %v14732_v13 = vmax.f32 %v14731_v57, 0.0  ;;  %v2355_v43 = vpop.permute.xlu0 %2354  ;;  %8281 = vmatprep.mubr.msk.f32.mxu1 %vm3117_vm9, %v3819_v5  ;;  %v14734_v10 = vmax.f32 %v14733_v54, 0.0  ;;  %v3048_v19 = vrot.slane %v13235_v24, 2  ;;  %v14737_v57 = vld [vmem:[#allocation94_spill] sm:$0xff] }
 0x3fc   :  { %8614 = vmatprep.subr.msk.bf16.mxu0 %vm12048_vm7, %v14729_v49  ;;  %v2650_v2 = vsel %vm193_vm3, %v2645_v16, %v2649_v33  ;;  %v2652_v17 = vsel %vm193_vm3, %v2647_v14, %v2651_v26  ;;  %3333 = vmatmul.mubr.f32.gmra.mrb[86].mxu0 %v3043_v27  ;;  %v14738_v16 = vld [vmem:[#allocation93_spill] sm:$0xff] }
 0x3fd   :  { %v2505_v21 = vmax.f32 %v14732_v13, %v2401_v46  ;;  %v2506_v31 = vmax.f32 %v14734_v10, %v2351_v62  ;;  %v13262_v49 = vmax.f32 %v2501_v59, %v2650_v2  ;;  %v13264_v11 = vmax.f32 %v2502_v55, %v2652_v17  ;;  %4106 = vmatmul.mubr.f32.gmra.mrb[30].mxu1 %v3817_v45  ;;  %v2357_v27 = vpop.permute.xlu1 %2356  ;;  %v14740_v2 = vld [vmem:[#allocation48_spill] sm:$0xff] }
 0x3fe   :  { %v3822_v46 = vrot.slane %v13235_v24, 4  ;;  %v14739_v13 = vpack.c.bf16 %v14737_v57, %v14738_v16  ;;  %v3049_v5 = vsel %vm850_vm5, %v3044_v63, %v3048_v19  ;;  %v3046_v62 = vrot.slane %v13222_v52, 2 }
 0x3ff   :  { %14735 = vst [vmem:[#allocation26_spill] sm:$0xff] %v13262_v49  ;;  %14736 = vst [vmem:[#allocation62_spill] sm:$0xff] %v13264_v11  ;;  %v2653_v56 = vrot.slane %v2505_v21, 1  ;;  %v2655_v14 = vrot.slane %v2506_v31, 1  ;;  %v3820_v59 = vrot.slane %v13222_v52, 4  ;;  %8164 = vmatprep.mubr.msk.f32.mxu0 %vm3117_vm9, %v3049_v5  ;;  %v2402_v45 = vsel %vm2380_vm8, %v2353_v18, %v2355_v43  ;;  %v2359_v10 = vpop.permute.xlu0 %2358 }
 0x400   :  { %8617 = vmatpush1.bf16.msk.msra.mxu0 %vm12048_vm7, %v14739_v13  ;;  %v3823_v17 = vsel %vm306_vm0, %v3818_v61, %v3822_v46  ;;  %v14741_v54 = vmax.f32 %v14740_v2, 0.0  ;;  %v3047_v16 = vsel %vm850_vm5, %v3042_v48, %v3046_v62  ;;  %v14744_v61 = vld [vmem:[#allocation47_spill] sm:$0xff]  ;;  %v2403_v48 = vsel %vm2380_vm8, %v2357_v27, %v2359_v10 }
 0x401   :  { %v2654_v55 = vsel %vm193_vm3, %v2649_v33, %v2653_v56  ;;  %v2656_v57 = vsel %vm193_vm3, %v2651_v26, %v2655_v14  ;;  %8282 = vmatprep.mubr.msk.f32.mxu1 %vm3117_vm9, %v3823_v17  ;;  %v3821_v33 = vsel %vm306_vm0, %v3816_v50, %v3820_v59  ;;  %3339 = vmatmul.mubr.f32.gmra.mrb[88].mxu0 %v3047_v16  ;;  %v14745_v18 = vmax.f32 %v14744_v61, 0.0  ;;  %v2361_v17 = vpop.permute.xlu1 %2360 }
 0x402   :  { %v2508_v60 = vmax.f32 %v14741_v54, %v2355_v43  ;;  %v13282_v63 = vmax.f32 %v2503_v8, %v2654_v55  ;;  %v13287_v13 = vmax.f32 %v2504_v36, %v2656_v57  ;;  %4112 = vmatmul.mubr.f32.gmra.mrb[32].mxu1 %v3821_v33  ;;  %v3052_v43 = vrot.slane %v13264_v11, 2  ;;  %v14746_v57 = vld [vmem:[#allocation49_spill] sm:$0xff] }
 0x403   :  { %v2507_v5 = vmax.f32 %v14745_v18, %v2402_v45  ;;  %v3826_v26 = vrot.slane %v13264_v11, 4  ;;  %v3050_v8 = vrot.slane %v13262_v49, 2  ;;  %v3824_v55 = vrot.slane %v13262_v49, 4  ;;  %v2363_v33 = vpop.permute.xlu0 %2362 }
 0x404   :  { %14742 = vst [vmem:[#allocation61_spill] sm:$0xff] %v13282_v63  ;;  %14743 = vst [vmem:[#allocation64_spill] sm:$0xff] %v13287_v13  ;;  %v2659_v2 = vrot.slane %v2508_v60, 1  ;;  %v3053_v54 = vsel %vm850_vm5, %v3048_v19, %v3052_v43  ;;  %v14747_v16 = vmax.f32 %v14746_v57, 0.0  ;;  %v14749_v19 = vld [vmem:[#allocation50_spill] sm:$0xff] }
 0x405   :  { %v2657_v50 = vrot.slane %v2507_v5, 1  ;;  %8165 = vmatprep.mubr.msk.f32.mxu0 %vm3117_vm9, %v3053_v54  ;;  %v3827_v18 = vsel %vm306_vm0, %v3822_v46, %v3826_v26  ;;  %v3051_v49 = vsel %vm850_vm5, %v3046_v62, %v3050_v8  ;;  %v3825_v27 = vsel %vm306_vm0, %v3820_v59, %v3824_v55  ;;  %v2365_v54 = vpop.permute.xlu1 %2364 }
 0x406   :  { %v2660_v36 = vsel %vm193_vm3, %v2655_v14, %v2659_v2  ;;  %v2509_v45 = vmax.f32 %v14747_v16, %v2403_v48  ;;  %8283 = vmatprep.mubr.msk.f32.mxu1 %vm3117_vm9, %v3827_v18  ;;  %3345 = vmatmul.mubr.f32.gmra.mrb[90].mxu0 %v3051_v49  ;;  %v14750_v14 = vmax.f32 %v14749_v19, 0.0  ;;  %v3830_v46 = vrot.slane %v13287_v13, 4 }
 0x407   :  { %v13300_v61 = vmax.f32 %v2506_v31, %v2660_v36  ;;  %v2658_v11 = vsel %vm193_vm3, %v2653_v56, %v2657_v50  ;;  %v3056_v31 = vrot.slane %v13287_v13, 2  ;;  %4118 = vmatmul.mubr.f32.gmra.mrb[34].mxu1 %v3825_v27  ;;  %v3054_v62 = vrot.slane %v13282_v63, 2  ;;  %v2367_v18 = vpop.permute.xlu0 %2366 }
 0x408   :  { %v2510_v57 = vmax.f32 %v14750_v14, %v2359_v10  ;;  %v2661_v48 = vrot.slane %v2509_v45, 1  ;;  %v13311_v36 = vmax.f32 %v2505_v21, %v2658_v11  ;;  %v3828_v59 = vrot.slane %v13282_v63, 4 }
 0x409   :  { %14748 = vst [vmem:[#allocation63_spill] sm:$0xff] %v13300_v61  ;;  %v3057_v49 = vsel %vm850_vm5, %v3052_v43, %v3056_v31  ;;  %v2404_v10 = vsel %vm2380_vm8, %v2361_v17, %v2363_v33  ;;  %v3831_v21 = vsel %vm306_vm0, %v3826_v26, %v3830_v46  ;;  %v3055_v11 = vsel %vm850_vm5, %v3050_v8, %v3054_v62  ;;  %v14755_v17 = vld [vmem:[#allocation52_spill] sm:$0xff] }
 0x40a   :  { %14751 = vst [vmem:[#allocation27_spill] sm:$0xff] %v13311_v36  ;;  %v2662_v56 = vsel %vm193_vm3, %v2657_v50, %v2661_v48  ;;  %v2663_v16 = vrot.slane %v2510_v57, 1  ;;  %8166 = vmatprep.mubr.msk.f32.mxu0 %vm3117_vm9, %v3057_v49  ;;  %v3829_v27 = vsel %vm306_vm0, %v3824_v55, %v3828_v59  ;;  %8284 = vmatprep.mubr.msk.f32.mxu1 %vm3117_vm9, %v3831_v21  ;;  %v14753_v50 = vld [vmem:[#allocation51_spill] sm:$0xff]  ;;  %v14756_v13 = vmax.f32 %v14755_v17, 0.0  ;;  %v2369_v55 = vpop.permute.xlu1 %2368 }
 0x40b   :  { %v13319_v19 = vmax.f32 %v2507_v5, %v2662_v56  ;;  %3351 = vmatmul.mubr.f32.gmra.mrb[92].mxu0 %v3055_v11  ;;  %v14754_v43 = vmax.f32 %v14753_v50, 0.0  ;;  %v3060_v56 = vrot.slane %v13300_v61, 2  ;;  %4124 = vmatmul.mubr.f32.gmra.mrb[36].mxu1 %v3829_v27  ;;  %v3834_v26 = vrot.slane %v13300_v61, 4  ;;  %v14757_v27 = vld [vmem:[#allocation53_spill] sm:$0xff] }
 0x40c   :  { %v2664_v14 = vsel %vm193_vm3, %v2659_v2, %v2663_v16  ;;  %v2512_v5 = vmax.f32 %v14756_v13, %v2363_v33  ;;  %v3058_v8 = vrot.slane %v13311_v36, 2  ;;  %v3832_v2 = vrot.slane %v13311_v36, 4 }
 0x40d   :  { %14752 = vst [vmem:[#allocation28_spill] sm:$0xff] %v13319_v19  ;;  %v2511_v63 = vmax.f32 %v14754_v43, %v2404_v10  ;;  %v13332_v49 = vmax.f32 %v2508_v60, %v2664_v14  ;;  %v3061_v50 = vsel %vm850_vm5, %v3056_v31, %v3060_v56  ;;  %v2405_v10 = vsel %vm2380_vm8, %v2365_v54, %v2367_v18  ;;  %v2371_v43 = vpop.permute.xlu0 %2370  ;;  %v14759_v31 = vld [vmem:[#allocation54_spill] sm:$0xff] }
 0x40e   :  { %v2667_v11 = vrot.slane %v2512_v5, 1  ;;  %8167 = vmatprep.mubr.msk.f32.mxu0 %vm3117_vm9, %v3061_v50  ;;  %v3835_v60 = vsel %vm306_vm0, %v3830_v46, %v3834_v26  ;;  %v3059_v13 = vsel %vm850_vm5, %v3054_v62, %v3058_v8  ;;  %v3833_v33 = vsel %vm306_vm0, %v3828_v59, %v3832_v2 }
 0x40f   :  { %v2665_v21 = vrot.slane %v2511_v63, 1  ;;  %v14758_v14 = vmax.f32 %v14757_v27, 0.0  ;;  %8285 = vmatprep.mubr.msk.f32.mxu1 %vm3117_vm9, %v3835_v60  ;;  %3357 = vmatmul.mubr.f32.gmra.mrb[94].mxu0 %v3059_v13  ;;  %v14760_v54 = vmax.f32 %v14759_v31, 0.0  ;;  %v3064_v50 = vrot.slane %v13332_v49, 2  ;;  %v2373_v13 = vpop.permute.xlu1 %2372 }
 0x410   :  { %v2668_v61 = vsel %vm193_vm3, %v2663_v16, %v2667_v11  ;;  %4130 = vmatmul.mubr.f32.gmra.mrb[38].mxu1 %v3833_v33  ;;  %v3062_v16 = vrot.slane %v13319_v19, 2  ;;  %v3836_v60 = vrot.slane %v13319_v19, 4 }
 0x411   :  { %v2513_v17 = vmax.f32 %v14758_v14, %v2405_v10  ;;  %v2666_v36 = vsel %vm193_vm3, %v2661_v48, %v2665_v21  ;;  %v2514_v52 = vmax.f32 %v14760_v54, %v2367_v18  ;;  %v13353_v62 = vmax.f32 %v2510_v57, %v2668_v61  ;;  %v2375_v14 = vpop.permute.xlu0 %2374  ;;  %v14763_v57 = vld [vmem:[#allocation56_spill] sm:$0xff] }
 0x412   :  { %v13351_v46 = vmax.f32 %v2509_v45, %v2666_v36  ;;  %v3838_v10 = vrot.slane %v13332_v49, 4  ;;  %v3065_v48 = vsel %vm850_vm5, %v3060_v56, %v3064_v50  ;;  %v2406_v61 = vsel %vm2380_vm8, %v2369_v55, %v2371_v43 }
 0x413   :  { %14762 = vst [vmem:[#allocation65_spill] sm:$0xff] %v13353_v62  ;;  %v2669_v59 = vrot.slane %v2513_v17, 1  ;;  %v2671_v27 = vrot.slane %v2514_v52, 1  ;;  %8168 = vmatprep.mubr.msk.f32.mxu0 %vm3117_vm9, %v3065_v48  ;;  %v14764_v36 = vmax.f32 %v14763_v57, 0.0  ;;  %v3063_v54 = vsel %vm850_vm5, %v3058_v8, %v3062_v16 }
 0x414   :  { %14761 = vst [vmem:[#allocation66_spill] sm:$0xff] %v13351_v46  ;;  %v3839_v45 = vsel %vm306_vm0, %v3834_v26, %v3838_v10  ;;  %v3837_v19 = vsel %vm306_vm0, %v3832_v2, %v3836_v60  ;;  %3363 = vmatmul.mubr.f32.gmra.mrb[96].mxu0 %v3063_v54  ;;  %v14766_v26 = vld [vmem:[#allocation55_spill] sm:$0xff]  ;;  %v2407_v8 = vsel %vm2380_vm8, %v2373_v13, %v2375_v14 }
 0x415   :  { %v2670_v18 = vsel %vm193_vm3, %v2665_v21, %v2669_v59  ;;  %v2516_v33 = vmax.f32 %v14764_v36, %v2371_v43  ;;  %v2672_v31 = vsel %vm193_vm3, %v2667_v11, %v2671_v27  ;;  %8286 = vmatprep.mubr.msk.f32.mxu1 %vm3117_vm9, %v3839_v45  ;;  %v14767_v48 = vmax.f32 %v14766_v26, 0.0  ;;  %v2379_v13 = vpop.permute.xlu0 %2378 }
 0x416   :  { %v13366_v56 = vmax.f32 %v2511_v63, %v2670_v18  ;;  %v13371_v21 = vmax.f32 %v2512_v5, %v2672_v31  ;;  %4136 = vmatmul.mubr.f32.gmra.mrb[40].mxu1 %v3837_v19  ;;  %v3068_v43 = vrot.slane %v13353_v62, 2  ;;  %v3842_v63 = vrot.slane %v13353_v62, 4  ;;  %v14768_v31 = vld [vmem:[#allocation57_spill] sm:$0xff] }
 0x417   :  { %v13375_v55 = vmax.f32 %v14767_v48, %v2406_v61  ;;  %v2675_v57 = vrot.slane %v2516_v33, 1  ;;  %v3066_v11 = vrot.slane %v13351_v46, 2  ;;  %v3840_v18 = vrot.slane %v13351_v46, 4  ;;  %v2377_v48 = vpop.permute.xlu1 %2376 }
 0x418   :  { %14765 = vst [vmem:[#allocation68_spill] sm:$0xff] %v13366_v56  ;;  %v3069_v19 = vsel %vm850_vm5, %v3064_v50, %v3068_v43  ;;  %v3843_v45 = vsel %vm306_vm0, %v3838_v10, %v3842_v63  ;;  %v14769_v54 = vmax.f32 %v14768_v31, 0.0  ;;  %v14770_v50 = vld [vmem:[#allocation58_spill] sm:$0xff] }
 0x419   :  { %v2673_v5 = vrot.slane %v13375_v55, 1  ;;  %v2676_v2 = vsel %vm193_vm3, %v2671_v27, %v2675_v57  ;;  %8169 = vmatprep.mubr.msk.f32.mxu0 %vm3117_vm9, %v3069_v19  ;;  %v3067_v61 = vsel %vm850_vm5, %v3062_v16, %v3066_v11  ;;  %v3841_v36 = vsel %vm306_vm0, %v3836_v60, %v3840_v18  ;;  %8287 = vmatprep.mubr.msk.f32.mxu1 %vm3117_vm9, %v3843_v45 }
 0x41a   :  { %v13391_v26 = vmax.f32 %v14769_v54, %v2407_v8  ;;  %v13394_v62 = vmax.f32 %v2514_v52, %v2676_v2  ;;  %3369 = vmatmul.mubr.f32.gmra.mrb[98].mxu0 %v3067_v61  ;;  %v14771_v27 = vmax.f32 %v14770_v50, 0.0  ;;  %v3072_v16 = vrot.slane %v13371_v21, 2  ;;  %4142 = vmatmul.mubr.f32.gmra.mrb[42].mxu1 %v3841_v36  ;;  %v14774_v54 = vld [vmem:[#allocation59_spill] sm:$0xff] }
 0x41b   :  { %v2674_v46 = vsel %vm193_vm3, %v2669_v59, %v2673_v5  ;;  %v3846_v8 = vrot.slane %v13371_v21, 4  ;;  %v3070_v19 = vrot.slane %v13366_v56, 2  ;;  %v3844_v59 = vrot.slane %v13366_v56, 4 }
 0x41c   :  { %v13399_v10 = vmax.f32 %v14771_v27, %v2375_v14  ;;  %v13402_v60 = vmax.f32 %v2513_v17, %v2674_v46  ;;  %v3073_v2 = vsel %vm850_vm5, %v3068_v43, %v3072_v16  ;;  %v2408_v45 = vsel %vm2380_vm8, %v2377_v48, %v2379_v13  ;;  %v14772_v14 = vld [vmem:[#allocation60_spill] sm:$0xff] }
 0x41d   :  { %v14773_v61 = vmax.f32 %v14772_v14, 0.0  ;;  %8170 = vmatprep.mubr.msk.f32.mxu0 %vm3117_vm9, %v3073_v2  ;;  %v3847_v17 = vsel %vm306_vm0, %v3842_v63, %v3846_v8  ;;  %v3071_v46 = vsel %vm850_vm5, %v3066_v11, %v3070_v19  ;;  %v3845_v36 = vsel %vm306_vm0, %v3840_v18, %v3844_v59 }
 0x41e   :  { %v13408_v52 = vrot.slane %v13399_v10, 1  ;;  %v14775_v50 = vmax.f32 %v14774_v54, 0.0  ;;  %8288 = vmatprep.mubr.msk.f32.mxu1 %vm3117_vm9, %v3847_v17  ;;  %3375 = vmatmul.mubr.f32.gmra.mrb[100].mxu0 %v3071_v46  ;;  %v13427_v63 = vrot.slane %v13391_v26, 1  ;;  %v3850_v18 = vrot.slane %v13394_v62, 4 }
 0x41f   :  { %v2520_v31 = vmax.f32 %v14773_v61, %v2379_v13  ;;  %v3076_v13 = vrot.slane %v13394_v62, 2  ;;  %4148 = vmatmul.mubr.f32.gmra.mrb[44].mxu1 %v3845_v36  ;;  %v3074_v2 = vrot.slane %v13402_v60, 2  ;;  %v3848_v61 = vrot.slane %v13402_v60, 4 }
 0x420   :  { %v2519_v27 = vmax.f32 %v14775_v50, %v2408_v45  ;;  %v2680_v56 = vsel %vm193_vm3, %v2675_v57, %v13408_v52  ;;  %v2678_v54 = vsel %vm193_vm3, %v2673_v5, %v13427_v63 }
 0x421   :  { %v2853_v48 = vrot.slane %v2520_v31, 1  ;;  %v13429_v11 = vmax.f32 %v2516_v33, %v2680_v56  ;;  %v3077_v14 = vsel %vm850_vm5, %v3072_v16, %v3076_v13  ;;  %v3851_v33 = vsel %vm306_vm0, %v3846_v8, %v3850_v18 }
 0x422   :  { %v2851_v57 = vrot.slane %v2519_v27, 1  ;;  %8171 = vmatprep.mubr.msk.f32.mxu0 %vm3117_vm9, %v3077_v14  ;;  %v3075_v56 = vsel %vm850_vm5, %v3070_v19, %v3074_v2  ;;  %8289 = vmatprep.mubr.msk.f32.mxu1 %vm3117_vm9, %v3851_v33  ;;  %v3849_v46 = vsel %vm306_vm0, %v3844_v59, %v3848_v61  ;;  %v13449_v8 = vmax.f32 %v13375_v55, %v2678_v54 }
 0x423   :  { %v2854_v45 = vsel %vm193_vm3, %v13408_v52, %v2853_v48  ;;  %3381 = vmatmul.mubr.f32.gmra.mrb[102].mxu0 %v3075_v56  ;;  %v3080_v36 = vrot.slane %v13429_v11, 2  ;;  %4154 = vmatmul.mubr.f32.gmra.mrb[46].mxu1 %v3849_v46  ;;  %v3854_v16 = vrot.slane %v13429_v11, 4  ;;  %v2862_v33 = vmax.f32 %v2520_v31, %v2853_v48 }
 0x424   :  { %v2860_v17 = vmax.f32 %v13399_v10, %v2854_v45  ;;  %v2852_v19 = vsel %vm193_vm3, %v13427_v63, %v2851_v57  ;;  %v3078_v5 = vrot.slane %v13449_v8, 2  ;;  %v2787_v31 = vmax.f32 %v13391_v26, %v13427_v63 }
 0x425   :  { %v3081_v14 = vsel %vm850_vm5, %v3076_v13, %v3080_v36  ;;  %v3855_v59 = vsel %vm306_vm0, %v3850_v18, %v3854_v16  ;;  %v2859_v56 = vmax.f32 %v13391_v26, %v2852_v19  ;;  %v2861_v48 = vmax.f32 %v2519_v27, %v2851_v57 }
 0x426   :  { %v3084_v50 = vrot.slane %v2860_v17, 2  ;;  %v3858_v45 = vrot.slane %v2860_v17, 4  ;;  %8172 = vmatprep.mubr.msk.f32.mxu0 %vm3117_vm9, %v3081_v14  ;;  %8290 = vmatprep.mubr.msk.f32.mxu1 %vm3117_vm9, %v3855_v59  ;;  %v3852_v17 = vrot.slane %v13449_v8, 4  ;;  %v3079_v18 = vsel %vm850_vm5, %v3074_v2, %v3078_v5 }
 0x427   :  { %v3082_v46 = vrot.slane %v2859_v56, 2  ;;  %v3856_v54 = vrot.slane %v2859_v56, 4  ;;  %v3088_v19 = vrot.slane %v2862_v33, 2  ;;  %v3862_v59 = vrot.slane %v2862_v33, 4  ;;  %3387 = vmatmul.mubr.f32.gmra.mrb[104].mxu0 %v3079_v18  ;;  %v14776_v33 = vld [vmem:[#allocation95_spill] sm:$0xff] }
 0x428   :  { %v3085_v13 = vsel %vm850_vm5, %v3080_v36, %v3084_v50  ;;  %v3859_v55 = vsel %vm306_vm0, %v3854_v16, %v3858_v45  ;;  %v3853_v14 = vsel %vm306_vm0, %v3848_v61, %v3852_v17  ;;  %v3086_v56 = vrot.slane %v2861_v48, 2 }
 0x429   :  { %4160 = vmatmul.mubr.f32.gmra.mrb[48].mxu1 %v3853_v14  ;;  %8173 = vmatprep.mubr.msk.f32.mxu0 %vm3117_vm9, %v3085_v13  ;;  %v3083_v36 = vsel %vm850_vm5, %v3078_v5, %v3082_v46  ;;  %v3857_v16 = vsel %vm306_vm0, %v3852_v17, %v3856_v54  ;;  %v3860_v43 = vrot.slane %v2861_v48, 4  ;;  %v3089_v27 = vsel %vm850_vm5, %v3084_v50, %v3088_v19  ;;  %v14777_v5 = vld [vmem:[#allocation96_spill] sm:$0xff]  ;;  %v14778_v17 = vld [vmem:[#allocation97_spill] sm:$0xff] }
 0x42a   :  { %8291 = vmatprep.mubr.msk.f32.mxu1 %vm3117_vm9, %v3859_v55  ;;  %v3863_v2 = vsel %vm306_vm0, %v3858_v45, %v3862_v59  ;;  %v3087_v57 = vsel %vm850_vm5, %v3082_v46, %v3086_v56 }
 0x42b   :  { %3393 = vmatmul.mubr.f32.gmra.mrb[106].mxu0 %v3083_v36  ;;  %v3861_v61 = vsel %vm306_vm0, %v3856_v54, %v3860_v43 }
 0x42c   :  { %8174 = vmatprep.mubr.msk.f32.mxu0 %vm3117_vm9, %v3089_v27 }
 0x42d   :  { %4166 = vmatmul.mubr.f32.gmra.mrb[50].mxu1 %v3857_v16 }
 0x42e   :  { %8292 = vmatprep.mubr.msk.f32.mxu1 %vm3117_vm9, %v3863_v2 }
 0x42f   :  { %3399 = vmatmul.mubr.f32.gmra.mrb[108].mxu0 %v3087_v57 }
 0x430   :  { %8177 = vmatprep.mubr.msk.f32.mxu0 %vm3117_vm9, %v14776_v33  ;;  %v14793_v33 = vlaneseq }
 0x431   :  { %4172 = vmatmul.mubr.f32.gmra.mrb[52].mxu1 %v3861_v61 }
 0x433   :  { %3531 = vmatmul.mubr.f32.vlgmr.msra.gmra.mrb[56].mxu0 %v14777_v5  ;;  %v13657_v5 = vand.u32 127, %v14793_v33 }
 0x434   :  { %8178 = vmatprep.mubr.msk.f32.mxu0 %vm3117_vm9, %v14778_v17  ;;  %v14795_v17 = vld [vmem:[#allocation20_spill] sm:$0xff] }
 0x435   :  { %14794 = vst [vmem:[#allocation29_spill] sm:$0xff] %v13657_v5 }
 0x437   :  { %3537 = vmatmul.mubr.f32.gmra.mrb[58].mxu0 %v12827_v20  ;;  %v14781_v20 = vld [vmem:[#allocation62_spill] sm:$0xff] }
 0x438   :  { %8179 = vmatprep.mubr.msk.f32.mxu0 %vm3117_vm9, %v12840_v12  ;;  %v14780_v12 = vld [vmem:[#allocation25_spill] sm:$0xff] }
 0x43b   :  { %3543 = vmatmul.mubr.f32.gmra.mrb[60].mxu0 %v12845_v1  ;;  %v14779_v1 = vld [vmem:[#allocation24_spill] sm:$0xff] }
 0x43c   :  { %8180 = vmatprep.mubr.msk.f32.mxu0 %vm3117_vm9, %v12863_v15  ;;  %v14782_v15 = vld [vmem:[#allocation26_spill] sm:$0xff] }
 0x43f   :  { %3549 = vmatmul.mubr.f32.gmra.mrb[62].mxu0 %v12871_v40  ;;  %v14783_v40 = vld [vmem:[#allocation64_spill] sm:$0xff] }
 0x440   :  { %8181 = vmatprep.mubr.msk.f32.mxu0 %vm3117_vm9, %v12886_v53  ;;  %v14784_v53 = vld [vmem:[#allocation61_spill] sm:$0xff] }
 0x443   :  { %3555 = vmatmul.mubr.f32.gmra.mrb[64].mxu0 %v12894_v29  ;;  %v14785_v29 = vld [vmem:[#allocation63_spill] sm:$0xff] }
 0x444   :  { %8182 = vmatprep.mubr.msk.f32.mxu0 %vm3117_vm9, %v12912_v28  ;;  %v14786_v28 = vld [vmem:[#allocation27_spill] sm:$0xff] }
 0x447   :  { %3561 = vmatmul.mubr.f32.gmra.mrb[66].mxu0 %v12919_v44  ;;  %v14787_v44 = vld [vmem:[#allocation28_spill] sm:$0xff] }
 0x448   :  { %8183 = vmatprep.mubr.msk.f32.mxu0 %vm3117_vm9, %v12937_v32  ;;  %v14788_v32 = vld [vmem:[#allocation65_spill] sm:$0xff] }
 0x44b   :  { %3567 = vmatmul.mubr.f32.gmra.mrb[68].mxu0 %v12949_v0  ;;  %v14789_v0 = vld [vmem:[#allocation66_spill] sm:$0xff] }
 0x44c   :  { %8184 = vmatprep.mubr.msk.f32.mxu0 %vm3117_vm9, %v12963_v37  ;;  %v14790_v37 = vld [vmem:[#allocation68_spill] sm:$0xff] }
 0x44f   :  { %3573 = vmatmul.mubr.f32.gmra.mrb[70].mxu0 %v12968_v35 }
 0x450   :  { %8185 = vmatprep.mubr.msk.f32.mxu0 %vm3117_vm9, %v12986_v4 }
 0x453   :  { %3579 = vmatmul.mubr.f32.gmra.mrb[72].mxu0 %v12999_v6 }
 0x454   :  { %8186 = vmatprep.mubr.msk.f32.mxu0 %vm3117_vm9, %v13026_v42 }
 0x457   :  { %3585 = vmatmul.mubr.f32.gmra.mrb[74].mxu0 %v13024_v34  ;;  %v14791_v34 = vmax.f32 %v13399_v10, %v13408_v52 }
 0x458   :  { %8187 = vmatprep.mubr.msk.f32.mxu0 %vm3117_vm9, %v13046_v25 }
 0x45b   :  { %3591 = vmatmul.mubr.f32.gmra.mrb[76].mxu0 %v13044_v39 }
 0x45c   :  { %8188 = vmatprep.mubr.msk.f32.mxu0 %vm3117_vm9, %v13080_v23 }
 0x45f   :  { %3597 = vmatmul.mubr.f32.gmra.mrb[78].mxu0 %v13078_v30 }
 0x460   :  { %8189 = vmatprep.mubr.msk.f32.mxu0 %vm3117_vm9, %v13088_v51 }
 0x463   :  { %3603 = vmatmul.mubr.f32.gmra.mrb[80].mxu0 %v13096_v3 }
 0x464   :  { %8190 = vmatprep.mubr.msk.f32.mxu0 %vm3117_vm9, %v13124_v58 }
 0x467   :  { %3609 = vmatmul.mubr.f32.gmra.mrb[82].mxu0 %v13133_v47 }
 0x468   :  { %8191 = vmatprep.mubr.msk.f32.mxu0 %vm3117_vm9, %v13160_v9 }
 0x46b   :  { %3615 = vmatmul.mubr.f32.gmra.mrb[84].mxu0 %v13158_v22 }
 0x46c   :  { %8192 = vmatprep.mubr.msk.f32.mxu0 %vm3117_vm9, %v13174_v38 }
 0x46f   :  { %3621 = vmatmul.mubr.f32.gmra.mrb[86].mxu0 %v13172_v7 }
 0x470   :  { %8193 = vmatprep.mubr.msk.f32.mxu0 %vm3117_vm9, %v13197_v41 }
 0x473   :  { %3627 = vmatmul.mubr.f32.gmra.mrb[88].mxu0 %v14779_v1  ;;  %v13660_v1 = vmul.u32 28, %v14795_v17 }
 0x474   :  { %8194 = vmatprep.mubr.msk.f32.mxu0 %vm3117_vm9, %v13235_v24 }
 0x475   :  { %14796 = vst [vmem:[#allocation30_spill] sm:$0xff] %v13660_v1 }
 0x477   :  { %3633 = vmatmul.mubr.f32.gmra.mrb[90].mxu0 %v14780_v12  ;;  %v13663_v12 = vadd.s32 128, %v13657_v5  ;;  %v14806_v5 = vld [vmem:[#allocation21_spill] sm:$0xff] }
 0x478   :  { %8195 = vmatprep.mubr.msk.f32.mxu0 %vm3117_vm9, %v14781_v20 }
 0x479   :  { %14797 = vst [vmem:[#allocation32_spill] sm:$0xff] %v13663_v12  ;;  %vm4359_vm11 = vcmp.eq.s32.totalorder %v13663_v12, %v13660_v1 }
 0x47b   :  { %3639 = vmatmul.mubr.f32.gmra.mrb[92].mxu0 %v14782_v15  ;;  %v13668_v15 = vadd.s32 4, %v13660_v1 }
 0x47c   :  { %8196 = vmatprep.mubr.msk.f32.mxu0 %vm3117_vm9, %v14783_v40 }
 0x47d   :  { %14799 = vst [vmem:[#allocation69_spill] sm:$0xff] %v13668_v15  ;;  %vm5020_vm12 = vcmp.eq.s32.totalorder %v13663_v12, %v13668_v15  ;;  %v14807_v15 = vld [vmem:[#allocation22_spill] sm:$0xff] }
 0x47f   :  { %3645 = vmatmul.mubr.f32.gmra.mrb[94].mxu0 %v14784_v53  ;;  %v14801_v53 = vmov 0.0  }
 0x480   :  { %8197 = vmatprep.mubr.msk.f32.mxu0 %vm3117_vm9, %v14785_v29  ;;  %v8294_v29 = vsel %vm4359_vm11, 1.0, %v14801_v53 }
 0x481   :  { %v13550_v35 = vpop.f32.mrb[0].mxu1  ;;  %8297 = vmatprep.mubr.msk.f32.mxu1 %vm4364_vm10, %v8294_v29 }
 0x482   :  { %v13554_v4 = vpop.f32.mrb[1].mxu1 }
 0x483   :  { %3651 = vmatmul.mubr.f32.gmra.mrb[96].mxu0 %v14786_v28  ;;  %v8310_v28 = vsel %vm5020_vm12, 1.0, %v14801_v53  ;;  %vm4727_vm12 = vcmask 588800  }
 0x484   :  { %8198 = vmatprep.mubr.msk.f32.mxu0 %vm3117_vm9, %v13332_v49 }
 0x487   :  { %3657 = vmatmul.mubr.f32.gmra.mrb[98].mxu0 %v14787_v44  ;;  %v13557_v6 = vpop.f32.mrb[2].mxu1 }
 0x488   :  { %8199 = vmatprep.mubr.msk.f32.mxu0 %vm3117_vm9, %v14788_v32  ;;  %v13563_v42 = vpop.f32.mrb[3].mxu1 }
 0x48b   :  { %3663 = vmatmul.mubr.f32.gmra.mrb[100].mxu0 %v14789_v0 }
 0x48c   :  { %8200 = vmatprep.mubr.msk.f32.mxu0 %vm3117_vm9, %v13371_v21  ;;  %v13568_v39 = vpop.f32.mrb[4].mxu1 }
 0x48d   :  { %v13570_v25 = vpop.f32.mrb[5].mxu1 }
 0x48f   :  { %3669 = vmatmul.mubr.f32.gmra.mrb[102].mxu0 %v14790_v37 }
 0x490   :  { %8201 = vmatprep.mubr.msk.f32.mxu0 %vm3117_vm9, %v13394_v62 }
 0x491   :  { %v13572_v30 = vpop.f32.mrb[6].mxu1 }
 0x492   :  { %v13574_v23 = vpop.f32.mrb[7].mxu1 }
 0x493   :  { %3675 = vmatmul.mubr.f32.gmra.mrb[104].mxu0 %v13402_v60 }
 0x494   :  { %8202 = vmatprep.mubr.msk.f32.mxu0 %vm3117_vm9, %v13429_v11 }
 0x495   :  { %v13576_v51 = vpop.f32.mrb[8].mxu1 }
 0x496   :  { %v13578_v3 = vpop.f32.mrb[9].mxu1 }
 0x497   :  { %3681 = vmatmul.mubr.f32.gmra.mrb[106].mxu0 %v13449_v8 }
 0x498   :  { %8203 = vmatprep.mubr.msk.f32.mxu0 %vm3117_vm9, %v14791_v34  ;;  %v4232_v34 = vld [vmem:[#allocation7] sm:$0x3] }
 0x499   :  { %v13690_v12 = vrot.slane %v4232_v34, %v14806_v5  ;;  %v13694_v1 = vrot.slane %v4232_v34, %v14807_v15 }
 0x49b   :  { %3687 = vmatmul.mubr.f32.gmra.mrb[108].mxu0 %v2787_v31  ;;  %v13580_v58 = vpop.f32.mrb[10].mxu1 }
 0x49c   :  { %v13582_v47 = vpop.f32.mrb[11].mxu1  ;;  %8313 = vmatprep.mubr.msk.f32.mxu0 %vm4364_vm10, %v8310_v28 }
 0x4a1   :  { %v13584_v22 = vpop.f32.mrb[12].mxu1 }
 0x4a2   :  { %v13586_v9 = vpop.f32.mrb[13].mxu1 }
 0x4a6   :  { %v13588_v7 = vpop.f32.mrb[14].mxu1 }
 0x4a7   :  { %v13590_v38 = vpop.f32.mrb[15].mxu1 }
 0x4ac   :  { %v13592_v41 = vpop.f32.mrb[16].mxu1 }
 0x4ad   :  { %v13594_v24 = vpop.f32.mrb[17].mxu1 }
 0x4b1   :  { %v13596_v49 = vpop.f32.mrb[18].mxu1 }
 0x4b2   :  { %v13598_v62 = vpop.f32.mrb[19].mxu1 }
 0x4b5   :  { %v13600_v21 = vpop.f32.mrb[20].mxu1 }
 0x4b6   :  { %v13602_v26 = vpop.f32.mrb[21].mxu1 }
 0x4bb   :  { %v13604_v10 = vpop.f32.mrb[22].mxu1 }
 0x4bc   :  { %v13606_v60 = vpop.f32.mrb[23].mxu1 }
 0x4c0   :  { %v13608_v52 = vpop.f32.mrb[24].mxu1 }
 0x4c1   :  { %v13610_v43 = vpop.f32.mrb[25].mxu1 }
 0x4c4   :  { %v13612_v63 = vpop.f32.mrb[26].mxu1 }
 0x4c5   :  { %v13614_v11 = vpop.f32.mrb[27].mxu1 }
 0x4cb   :  { %v13616_v50 = vpop.f32.mrb[28].mxu1 }
 0x4cc   :  { %v13618_v45 = vpop.f32.mrb[29].mxu1 }
 0x4d0   :  { %v13620_v8 = vpop.f32.mrb[30].mxu1 }
 0x4d1   :  { %v13622_v13 = vpop.f32.mrb[31].mxu1 }
 0x4d5   :  { %v13624_v55 = vpop.f32.mrb[32].mxu1 }
 0x4d6   :  { %v13626_v46 = vpop.f32.mrb[33].mxu1 }
 0x4da   :  { %v13628_v54 = vpop.f32.mrb[34].mxu1 }
 0x4db   :  { %v13630_v31 = vpop.f32.mrb[35].mxu1 }
 0x4de   :  { %v13632_v48 = vpop.f32.mrb[36].mxu1 }
 0x4df   :  { %v13634_v18 = vpop.f32.mrb[37].mxu1 }
 0x4e3   :  { %v13636_v14 = vpop.f32.mrb[38].mxu1 }
 0x4e4   :  { %v13638_v19 = vpop.f32.mrb[39].mxu1 }
 0x4e9   :  { %v13640_v59 = vpop.f32.mrb[40].mxu1 }
 0x4ea   :  { %v13642_v36 = vpop.f32.mrb[41].mxu1 }
 0x4ed   :  { %v13644_v16 = vpop.f32.mrb[42].mxu1 }
 0x4ee   :  { %v13646_v56 = vpop.f32.mrb[43].mxu1 }
 0x4f2   :  { %v13648_v27 = vpop.f32.mrb[44].mxu1 }
 0x4f3   :  { %v13650_v2 = vpop.f32.mrb[45].mxu1 }
 0x4f6   :  { %v13652_v57 = vpop.f32.mrb[46].mxu1 }
 0x4f7   :  { %v13654_v61 = vpop.f32.mrb[47].mxu1 }
 0x4f8   :  { %14792 = vst [vmem:[#allocation67_spill] sm:$0xff] %v13654_v61 }
 0x4fc   :  { %v13665_v20 = vpop.f32.mrb[48].mxu1 }
 0x4fd   :  { %14798 = vst [vmem:[#allocation70_spill] sm:$0xff] %v13665_v20  ;;  %v13670_v40 = vpop.f32.mrb[49].mxu1 }
 0x4fe   :  { %14800 = vst [vmem:[#allocation31_spill] sm:$0xff] %v13670_v40 }
 0x500   :  { %v13679_v44 = vpop.f32.mrb[50].mxu1 }
 0x501   :  { %14802 = vst [vmem:[#allocation72_spill] sm:$0xff] %v13679_v44  ;;  %v13682_v32 = vpop.f32.mrb[51].mxu1 }
 0x502   :  { %14803 = vst [vmem:[#allocation71_spill] sm:$0xff] %v13682_v32 }
 0x504   :  { %v13684_v0 = vpop.f32.mrb[52].mxu1 }
 0x505   :  { %14804 = vst [vmem:[#allocation74_spill] sm:$0xff] %v13684_v0  ;;  %v13686_v37 = vpop.f32.mrb[53].mxu1 }
 0x506   :  { %14805 = vst [vmem:[#allocation73_spill] sm:$0xff] %v13686_v37  ;;  %v3532_v33 = vpop.f32.mrb[56].mxu0 }
 0x507   :  { %v10224_v17 = vadd.f32 %v13550_v35, %v3532_v33  ;;  %v3534_v29 = vpop.f32.mrb[57].mxu0 }
 0x508   :  { %v10225_v53 = vadd.f32 %v13554_v4, %v3534_v29 }
 0x509   :  { %v4244_v32 = vadd.f32 %v10224_v17, %v13690_v12 }
 0x50a   :  { %v3538_v28 = vpop.f32.mrb[58].mxu0  ;;  %v4245_v37 = vadd.f32 %v10225_v53, %v13694_v1 }
 0x50b   :  { %v10226_v0 = vadd.f32 %v13557_v6, %v3538_v28  ;;  %v3540_v44 = vpop.f32.mrb[59].mxu0  ;;  %v4298_v20 = vmax.f32 %v4244_v32, 0.0 }
 0x50c   :  { %v10227_v40 = vadd.f32 %v13563_v42, %v3540_v44  ;;  %v4299_v15 = vmax.f32 %v4245_v37, 0.0 }
 0x50d   :  { %v4246_v35 = vadd.f32 %v10226_v0, %v13690_v12 }
 0x50e   :  { %v4247_v33 = vadd.f32 %v10227_v40, %v13694_v1  ;;  %v3544_v5 = vpop.f32.mrb[60].mxu0 }
 0x50f   :  { %v4300_v4 = vmax.f32 %v4246_v35, 0.0  ;;  %v10228_v34 = vadd.f32 %v13568_v39, %v3544_v5  ;;  %v3546_v29 = vpop.f32.mrb[61].mxu0 }
 0x510   :  { %v4301_v61 = vmax.f32 %v4247_v33, 0.0  ;;  %v10229_v17 = vadd.f32 %v13570_v25, %v3546_v29 }
 0x511   :  { %v13704_v6 = vpack.c.bf16 %v4300_v4, %v4298_v20  ;;  %v4248_v42 = vadd.f32 %v10228_v34, %v13690_v12 }
 0x512   :  { %v13706_v28 = vpack.c.bf16 %v4301_v61, %v4299_v15  ;;  %v3550_v53 = vpop.f32.mrb[62].mxu0  ;;  %v4249_v32 = vadd.f32 %v10229_v17, %v13694_v1 }
 0x513   :  { %v10230_v44 = vadd.f32 %v13572_v30, %v3550_v53  ;;  %v3552_v40 = vpop.f32.mrb[63].mxu0  ;;  %v4302_v5 = vmax.f32 %v4248_v42, 0.0 }
 0x514   :  { %v10231_v0 = vadd.f32 %v13574_v23, %v3552_v40  ;;  %8681 = vmatprep.subr.bf16.mxu1 %v13706_v28  ;;  %8977 = vmatprep.subr.bf16.mxu0 %v13706_v28  ;;  %v4303_v37 = vmax.f32 %v4249_v32, 0.0 }
 0x515   :  { %v4250_v39 = vadd.f32 %v10230_v44, %v13690_v12  ;;  %8683 = vmatpush1.bf16.msra.mxu1 %v13704_v6  ;;  %8979 = vmatpush1.bf16.msra.mxu0 %v13704_v6 }
 0x516   :  { %v4251_v25 = vadd.f32 %v10231_v0, %v13694_v1  ;;  %v3556_v61 = vpop.f32.mrb[64].mxu0 }
 0x517   :  { %v4304_v30 = vmax.f32 %v4250_v39, 0.0  ;;  %v10232_v20 = vadd.f32 %v13576_v51, %v3556_v61  ;;  %v3558_v15 = vpop.f32.mrb[65].mxu0 }
 0x518   :  { %v4305_v23 = vmax.f32 %v4251_v25, 0.0  ;;  %v10233_v35 = vadd.f32 %v13578_v3, %v3558_v15 }
 0x519   :  { %v13720_v33 = vpack.c.bf16 %v4304_v30, %v4302_v5  ;;  %v4252_v29 = vadd.f32 %v10232_v20, %v13690_v12 }
 0x51a   :  { %v13722_v4 = vpack.c.bf16 %v4305_v23, %v4303_v37  ;;  %v3562_v34 = vpop.f32.mrb[66].mxu0  ;;  %v4253_v42 = vadd.f32 %v10233_v35, %v13694_v1 }
 0x51b   :  { %v10234_v17 = vadd.f32 %v13580_v58, %v3562_v34  ;;  %v3564_v53 = vpop.f32.mrb[67].mxu0  ;;  %v4306_v32 = vmax.f32 %v4252_v29, 0.0 }
 0x51c   :  { %v10235_v44 = vadd.f32 %v13582_v47, %v3564_v53  ;;  %8685 = vmatprep.subr.bf16.mxu1 %v13722_v4  ;;  %8981 = vmatprep.subr.bf16.mxu0 %v13722_v4  ;;  %v4307_v25 = vmax.f32 %v4253_v42, 0.0 }
 0x51d   :  { %v4254_v51 = vadd.f32 %v10234_v17, %v13690_v12  ;;  %8687 = vmatpush1.bf16.msra.mxu1 %v13720_v33  ;;  %8983 = vmatpush1.bf16.msra.mxu0 %v13720_v33 }
 0x51e   :  { %v4255_v3 = vadd.f32 %v10235_v44, %v13694_v1  ;;  %v3568_v40 = vpop.f32.mrb[68].mxu0 }
 0x51f   :  { %v4308_v58 = vmax.f32 %v4254_v51, 0.0  ;;  %v10236_v0 = vadd.f32 %v13584_v22, %v3568_v40  ;;  %v3570_v39 = vpop.f32.mrb[69].mxu0 }
 0x520   :  { %v4309_v47 = vmax.f32 %v4255_v3, 0.0  ;;  %v10237_v61 = vadd.f32 %v13586_v9, %v3570_v39 }
 0x521   :  { %v13736_v5 = vpack.c.bf16 %v4308_v58, %v4306_v32  ;;  %v4256_v15 = vadd.f32 %v10236_v0, %v13690_v12 }
 0x522   :  { %v13738_v30 = vpack.c.bf16 %v4309_v47, %v4307_v25  ;;  %v3574_v20 = vpop.f32.mrb[70].mxu0  ;;  %v4257_v35 = vadd.f32 %v10237_v61, %v13694_v1 }
 0x523   :  { %v10238_v37 = vadd.f32 %v13588_v7, %v3574_v20  ;;  %v3576_v23 = vpop.f32.mrb[71].mxu0  ;;  %v4310_v17 = vmax.f32 %v4256_v15, 0.0 }
 0x524   :  { %v10239_v34 = vadd.f32 %v13590_v38, %v3576_v23  ;;  %8689 = vmatprep.subr.bf16.mxu1 %v13738_v30  ;;  %8985 = vmatprep.subr.bf16.mxu0 %v13738_v30  ;;  %v4311_v44 = vmax.f32 %v4257_v35, 0.0 }
 0x525   :  { %v4258_v22 = vadd.f32 %v10238_v37, %v13690_v12  ;;  %8691 = vmatpush1.bf16.msra.mxu1 %v13736_v5  ;;  %8987 = vmatpush1.bf16.msra.mxu0 %v13736_v5 }
 0x526   :  { %v4259_v9 = vadd.f32 %v10239_v34, %v13694_v1  ;;  %v3580_v29 = vpop.f32.mrb[72].mxu0 }
 0x527   :  { %v4312_v7 = vmax.f32 %v4258_v22, 0.0  ;;  %v10240_v53 = vadd.f32 %v13592_v41, %v3580_v29  ;;  %v3582_v42 = vpop.f32.mrb[73].mxu0 }
 0x528   :  { %v4313_v38 = vmax.f32 %v4259_v9, 0.0  ;;  %v10241_v51 = vadd.f32 %v13594_v24, %v3582_v42 }
 0x529   :  { %v13752_v3 = vpack.c.bf16 %v4312_v7, %v4310_v17  ;;  %v4260_v58 = vadd.f32 %v10240_v53, %v13690_v12 }
 0x52a   :  { %v13754_v40 = vpack.c.bf16 %v4313_v38, %v4311_v44  ;;  %v3586_v32 = vpop.f32.mrb[74].mxu0  ;;  %v4261_v25 = vadd.f32 %v10241_v51, %v13694_v1 }
 0x52b   :  { %v10242_v0 = vadd.f32 %v13596_v49, %v3586_v32  ;;  %v3588_v39 = vpop.f32.mrb[75].mxu0  ;;  %v4314_v20 = vmax.f32 %v4260_v58, 0.0 }
 0x52c   :  { %v10243_v47 = vadd.f32 %v13598_v62, %v3588_v39  ;;  %8693 = vmatprep.subr.bf16.mxu1 %v13754_v40  ;;  %8989 = vmatprep.subr.bf16.mxu0 %v13754_v40  ;;  %v4315_v23 = vmax.f32 %v4261_v25, 0.0 }
 0x52d   :  { %v4262_v41 = vadd.f32 %v10242_v0, %v13690_v12  ;;  %8695 = vmatpush1.bf16.msra.mxu1 %v13752_v3  ;;  %8991 = vmatpush1.bf16.msra.mxu0 %v13752_v3 }
 0x52e   :  { %v4263_v24 = vadd.f32 %v10243_v47, %v13694_v1  ;;  %v3592_v61 = vpop.f32.mrb[76].mxu0 }
 0x52f   :  { %v4316_v49 = vmax.f32 %v4262_v41, 0.0  ;;  %v10244_v15 = vadd.f32 %v13600_v21, %v3592_v61  ;;  %v3594_v37 = vpop.f32.mrb[77].mxu0 }
 0x530   :  { %v4317_v62 = vmax.f32 %v4263_v24, 0.0  ;;  %v10245_v35 = vadd.f32 %v13602_v26, %v3594_v37 }
 0x531   :  { %v13768_v34 = vpack.c.bf16 %v4316_v49, %v4314_v20  ;;  %v4264_v29 = vadd.f32 %v10244_v15, %v13690_v12 }
 0x532   :  { %v13770_v22 = vpack.c.bf16 %v4317_v62, %v4315_v23  ;;  %v3598_v9 = vpop.f32.mrb[78].mxu0  ;;  %v4265_v53 = vadd.f32 %v10245_v35, %v13694_v1 }
 0x533   :  { %v10246_v17 = vadd.f32 %v13604_v10, %v3598_v9  ;;  %v3600_v7 = vpop.f32.mrb[79].mxu0  ;;  %v4318_v38 = vmax.f32 %v4264_v29, 0.0 }
 0x534   :  { %v10247_v42 = vadd.f32 %v13606_v60, %v3600_v7  ;;  %8697 = vmatprep.subr.bf16.mxu1 %v13770_v22  ;;  %8993 = vmatprep.subr.bf16.mxu0 %v13770_v22  ;;  %v4319_v58 = vmax.f32 %v4265_v53, 0.0 }
 0x535   :  { %v4266_v21 = vadd.f32 %v10246_v17, %v13690_v12  ;;  %8699 = vmatpush1.bf16.msra.mxu1 %v13768_v34  ;;  %8995 = vmatpush1.bf16.msra.mxu0 %v13768_v34 }
 0x536   :  { %v4267_v26 = vadd.f32 %v10247_v42, %v13694_v1  ;;  %v3604_v44 = vpop.f32.mrb[80].mxu0 }
 0x537   :  { %v4320_v10 = vmax.f32 %v4266_v21, 0.0  ;;  %v10248_v51 = vadd.f32 %v13608_v52, %v3604_v44  ;;  %v3606_v32 = vpop.f32.mrb[81].mxu0 }
 0x538   :  { %v4321_v60 = vmax.f32 %v4267_v26, 0.0  ;;  %v10249_v0 = vadd.f32 %v13610_v43, %v3606_v32 }
 0x539   :  { %v13784_v39 = vpack.c.bf16 %v4320_v10, %v4318_v38  ;;  %v4268_v41 = vadd.f32 %v10248_v51, %v13690_v12 }
 0x53a   :  { %v13786_v25 = vpack.c.bf16 %v4321_v60, %v4319_v58  ;;  %v3610_v47 = vpop.f32.mrb[82].mxu0  ;;  %v4269_v20 = vadd.f32 %v10249_v0, %v13694_v1 }
 0x53b   :  { %v10250_v24 = vadd.f32 %v13612_v63, %v3610_v47  ;;  %v3612_v61 = vpop.f32.mrb[83].mxu0  ;;  %v4322_v37 = vmax.f32 %v4268_v41, 0.0 }
 0x53c   :  { %v10251_v49 = vadd.f32 %v13614_v11, %v3612_v61  ;;  %8701 = vmatprep.subr.bf16.mxu1 %v13786_v25  ;;  %8997 = vmatprep.subr.bf16.mxu0 %v13786_v25  ;;  %v4323_v35 = vmax.f32 %v4269_v20, 0.0 }
 0x53d   :  { %v4270_v52 = vadd.f32 %v10250_v24, %v13690_v12  ;;  %8703 = vmatpush1.bf16.msra.mxu1 %v13784_v39  ;;  %8999 = vmatpush1.bf16.msra.mxu0 %v13784_v39 }
 0x53e   :  { %v4271_v43 = vadd.f32 %v10251_v49, %v13694_v1  ;;  %v3616_v15 = vpop.f32.mrb[84].mxu0 }
 0x53f   :  { %v4324_v63 = vmax.f32 %v4270_v52, 0.0  ;;  %v10252_v23 = vadd.f32 %v13616_v50, %v3616_v15  ;;  %v3618_v62 = vpop.f32.mrb[85].mxu0 }
 0x540   :  { %v4325_v11 = vmax.f32 %v4271_v43, 0.0  ;;  %v10253_v9 = vadd.f32 %v13618_v45, %v3618_v62 }
 0x541   :  { %v13800_v29 = vpack.c.bf16 %v4324_v63, %v4322_v37  ;;  %v4272_v53 = vadd.f32 %v10252_v23, %v13690_v12 }
 0x542   :  { %v13802_v17 = vpack.c.bf16 %v4325_v11, %v4323_v35  ;;  %v3622_v7 = vpop.f32.mrb[86].mxu0  ;;  %v4273_v26 = vadd.f32 %v10253_v9, %v13694_v1 }
 0x543   :  { %v10254_v42 = vadd.f32 %v13620_v8, %v3622_v7  ;;  %v3624_v21 = vpop.f32.mrb[87].mxu0  ;;  %v4326_v10 = vmax.f32 %v4272_v53, 0.0 }
 0x544   :  { %v10255_v44 = vadd.f32 %v13622_v13, %v3624_v21  ;;  %8705 = vmatprep.subr.bf16.mxu1 %v13802_v17  ;;  %9001 = vmatprep.subr.bf16.mxu0 %v13802_v17  ;;  %v4327_v58 = vmax.f32 %v4273_v26, 0.0 }
 0x545   :  { %v4274_v50 = vadd.f32 %v10254_v42, %v13690_v12  ;;  %8707 = vmatpush1.bf16.msra.mxu1 %v13800_v29  ;;  %9003 = vmatpush1.bf16.msra.mxu0 %v13800_v29 }
 0x546   :  { %v4275_v45 = vadd.f32 %v10255_v44, %v13694_v1  ;;  %v3628_v38 = vpop.f32.mrb[88].mxu0 }
 0x547   :  { %v4328_v8 = vmax.f32 %v4274_v50, 0.0  ;;  %v10256_v51 = vadd.f32 %v13624_v55, %v3628_v38  ;;  %v3630_v32 = vpop.f32.mrb[89].mxu0 }
 0x548   :  { %v4329_v13 = vmax.f32 %v4275_v45, 0.0  ;;  %v10257_v60 = vadd.f32 %v13626_v46, %v3630_v32 }
 0x549   :  { %v13816_v0 = vpack.c.bf16 %v4328_v8, %v4326_v10  ;;  %v4276_v24 = vadd.f32 %v10256_v51, %v13690_v12 }
 0x54a   :  { %v13818_v47 = vpack.c.bf16 %v4329_v13, %v4327_v58  ;;  %v3634_v41 = vpop.f32.mrb[90].mxu0  ;;  %v4277_v49 = vadd.f32 %v10257_v60, %v13694_v1 }
 0x54b   :  { %v10258_v61 = vadd.f32 %v13628_v54, %v3634_v41  ;;  %v3636_v20 = vpop.f32.mrb[91].mxu0  ;;  %v4330_v15 = vmax.f32 %v4276_v24, 0.0 }
 0x54c   :  { %v10259_v52 = vadd.f32 %v13630_v31, %v3636_v20  ;;  %8709 = vmatprep.subr.bf16.mxu1 %v13818_v47  ;;  %9005 = vmatprep.subr.bf16.mxu0 %v13818_v47  ;;  %v4331_v23 = vmax.f32 %v4277_v49, 0.0 }
 0x54d   :  { %v4278_v55 = vadd.f32 %v10258_v61, %v13690_v12  ;;  %8711 = vmatpush1.bf16.msra.mxu1 %v13816_v0  ;;  %9007 = vmatpush1.bf16.msra.mxu0 %v13816_v0 }
 0x54e   :  { %v4279_v46 = vadd.f32 %v10259_v52, %v13694_v1  ;;  %v3640_v43 = vpop.f32.mrb[92].mxu0 }
 0x54f   :  { %v4332_v54 = vmax.f32 %v4278_v55, 0.0  ;;  %v10260_v37 = vadd.f32 %v13632_v48, %v3640_v43  ;;  %v3642_v63 = vpop.f32.mrb[93].mxu0 }
 0x550   :  { %v4333_v31 = vmax.f32 %v4279_v46, 0.0  ;;  %v10261_v62 = vadd.f32 %v13634_v18, %v3642_v63 }
 0x551   :  { %v13832_v35 = vpack.c.bf16 %v4332_v54, %v4330_v15  ;;  %v4280_v7 = vadd.f32 %v10260_v37, %v13690_v12 }
 0x552   :  { %v13834_v11 = vpack.c.bf16 %v4333_v31, %v4331_v23  ;;  %v3646_v9 = vpop.f32.mrb[94].mxu0  ;;  %v4281_v21 = vadd.f32 %v10261_v62, %v13694_v1 }
 0x553   :  { %v10262_v53 = vadd.f32 %v13636_v14, %v3646_v9  ;;  %v3648_v42 = vpop.f32.mrb[95].mxu0  ;;  %v4334_v50 = vmax.f32 %v4280_v7, 0.0  ;;  %v14808_v9 = vld [vmem:[#allocation67_spill] sm:$0xff] }
 0x554   :  { %v10263_v26 = vadd.f32 %v13638_v19, %v3648_v42  ;;  %8713 = vmatprep.subr.bf16.mxu1 %v13834_v11  ;;  %9009 = vmatprep.subr.bf16.mxu0 %v13834_v11  ;;  %v4335_v10 = vmax.f32 %v4281_v21, 0.0  ;;  %v14809_v21 = vld [vmem:[#allocation70_spill] sm:$0xff] }
 0x555   :  { %v4282_v48 = vadd.f32 %v10262_v53, %v13690_v12  ;;  %8715 = vmatpush1.bf16.msra.mxu1 %v13832_v35  ;;  %9011 = vmatpush1.bf16.msra.mxu0 %v13832_v35 }
 0x556   :  { %v4283_v18 = vadd.f32 %v10263_v26, %v13694_v1  ;;  %v3652_v44 = vpop.f32.mrb[96].mxu0 }
 0x557   :  { %v4336_v14 = vmax.f32 %v4282_v48, 0.0  ;;  %v10264_v45 = vadd.f32 %v13640_v59, %v3652_v44  ;;  %v3654_v38 = vpop.f32.mrb[97].mxu0 }
 0x558   :  { %v4337_v19 = vmax.f32 %v4283_v18, 0.0  ;;  %v10265_v8 = vadd.f32 %v13642_v36, %v3654_v38 }
 0x559   :  { %v13848_v51 = vpack.c.bf16 %v4336_v14, %v4334_v50  ;;  %v4284_v13 = vadd.f32 %v10264_v45, %v13690_v12  ;;  %v14810_v50 = vld [vmem:[#allocation31_spill] sm:$0xff] }
 0x55a   :  { %v13850_v32 = vpack.c.bf16 %v4337_v19, %v4335_v10  ;;  %v3658_v58 = vpop.f32.mrb[98].mxu0  ;;  %v4285_v24 = vadd.f32 %v10265_v8, %v13694_v1  ;;  %v14811_v8 = vld [vmem:[#allocation72_spill] sm:$0xff] }
 0x55b   :  { %v10266_v60 = vadd.f32 %v13644_v16, %v3658_v58  ;;  %v3660_v41 = vpop.f32.mrb[99].mxu0  ;;  %v4338_v49 = vmax.f32 %v4284_v13, 0.0 }
 0x55c   :  { %v10267_v61 = vadd.f32 %v13646_v56, %v3660_v41  ;;  %8717 = vmatprep.subr.bf16.mxu1 %v13850_v32  ;;  %9013 = vmatprep.subr.bf16.mxu0 %v13850_v32  ;;  %v4339_v46 = vmax.f32 %v4285_v24, 0.0  ;;  %v14812_v41 = vld [vmem:[#allocation71_spill] sm:$0xff] }
 0x55d   :  { %v4286_v59 = vadd.f32 %v10266_v60, %v13690_v12  ;;  %8719 = vmatpush1.bf16.msra.mxu1 %v13848_v51  ;;  %9015 = vmatpush1.bf16.msra.mxu0 %v13848_v51 }
 0x55e   :  { %v4287_v36 = vadd.f32 %v10267_v61, %v13694_v1  ;;  %v3664_v20 = vpop.f32.mrb[100].mxu0 }
 0x55f   :  { %v4340_v16 = vmax.f32 %v4286_v59, 0.0  ;;  %v10268_v52 = vadd.f32 %v13648_v27, %v3664_v20  ;;  %v3666_v55 = vpop.f32.mrb[101].mxu0 }
 0x560   :  { %v4341_v56 = vmax.f32 %v4287_v36, 0.0  ;;  %v10269_v43 = vadd.f32 %v13650_v2, %v3666_v55 }
 0x561   :  { %v13864_v15 = vpack.c.bf16 %v4340_v16, %v4338_v49  ;;  %v4288_v63 = vadd.f32 %v10268_v52, %v13690_v12  ;;  %v14813_v16 = vld [vmem:[#allocation74_spill] sm:$0xff] }
 0x562   :  { %v13866_v54 = vpack.c.bf16 %v4341_v56, %v4339_v46  ;;  %v3670_v37 = vpop.f32.mrb[102].mxu0  ;;  %v4289_v62 = vadd.f32 %v10269_v43, %v13694_v1  ;;  %v14814_v43 = vld [vmem:[#allocation73_spill] sm:$0xff] }
 0x563   :  { %v10270_v23 = vadd.f32 %v13652_v57, %v3670_v37  ;;  %v3672_v31 = vpop.f32.mrb[103].mxu0  ;;  %v4342_v42 = vmax.f32 %v4288_v63, 0.0 }
 0x564   :  { %v10271_v7 = vadd.f32 %v14808_v9, %v3672_v31  ;;  %8721 = vmatprep.subr.bf16.mxu1 %v13866_v54  ;;  %9017 = vmatprep.subr.bf16.mxu0 %v13866_v54  ;;  %v4343_v18 = vmax.f32 %v4289_v62, 0.0 }
 0x565   :  { %v4290_v27 = vadd.f32 %v10270_v23, %v13690_v12  ;;  %8723 = vmatpush1.bf16.msra.mxu1 %v13864_v15  ;;  %9019 = vmatpush1.bf16.msra.mxu0 %v13864_v15 }
 0x566   :  { %v4291_v2 = vadd.f32 %v10271_v7, %v13694_v1  ;;  %v3676_v53 = vpop.f32.mrb[104].mxu0  ;;  %v14815_v7 = vld [vmem:[#allocation30_spill] sm:$0xff] }
 0x567   :  { %v4344_v57 = vmax.f32 %v4290_v27, 0.0  ;;  %v10272_v26 = vadd.f32 %v14809_v21, %v3676_v53  ;;  %v3678_v48 = vpop.f32.mrb[105].mxu0  ;;  %v13907_v27 = vadd.s32 2, %v14815_v7  ;;  %v14817_v53 = vld [vmem:[#allocation69_spill] sm:$0xff]  ;;  %v14819_v21 = vmov 0.0  }
 0x568   :  { %v4345_v44 = vmax.f32 %v4291_v2, 0.0  ;;  %v10273_v14 = vadd.f32 %v14810_v50, %v3678_v48  ;;  %v13910_v2 = vadd.s32 6, %v14815_v7  ;;  %v4628_v50 = vld [vmem:[#allocation8 + $0x328] sm:$0xff] }
 0x569   :  { %v13880_v45 = vpack.c.bf16 %v4344_v57, %v4342_v42  ;;  %v4292_v19 = vadd.f32 %v10272_v26, %v13690_v12  ;;  %v14818_v42 = vld [vmem:[#allocation32_spill] sm:$0xff]  ;;  %v10821_v57 = vmov 1.0  }
 0x56a   :  { %v13882_v38 = vpack.c.bf16 %v4345_v44, %v4343_v18  ;;  %v3682_v10 = vpop.f32.mrb[106].mxu0  ;;  %v4293_v60 = vadd.f32 %v10273_v14, %v13694_v1  ;;  %vm4547_vm15 = vcmp.eq.s32.totalorder %v14818_v42, %v13907_v27  ;;  %vm5351_vm0 = vcmp.eq.s32.totalorder %v14818_v42, %v13910_v2  ;;  %v4632_v14 = vld [vmem:[#allocation8 + $0x348] sm:$0xff] }
 0x56b   :  { %v10274_v58 = vadd.f32 %v14811_v8, %v3682_v10  ;;  %v3684_v13 = vpop.f32.mrb[107].mxu0  ;;  %v4346_v20 = vmax.f32 %v4292_v19, 0.0  ;;  %v8300_v26 = vsel %vm4547_vm15, 1.0, %v14819_v21  ;;  %v8318_v48 = vsel %vm5351_vm0, 1.0, %v14819_v21  ;;  %v4627_v19 = vld [vmem:[#allocation8 + $0x320] sm:$0xff] }
 0x56c   :  { %v10275_v24 = vadd.f32 %v14812_v41, %v3684_v13  ;;  %8725 = vmatprep.subr.bf16.mxu1 %v13882_v38  ;;  %9021 = vmatprep.subr.bf16.mxu0 %v13882_v38  ;;  %v4347_v46 = vmax.f32 %v4293_v60, 0.0  ;;  %v13989_v18 = vadd.s32 8, %v14815_v7  ;;  %v8784_v10 = vpack.c.bf16 %v4632_v14, %v4628_v50  ;;  %v4631_v8 = vld [vmem:[#allocation8 + $0x340] sm:$0xff]  ;;  %v4636_v13 = vld [vmem:[#allocation8 + $0x368] sm:$0xff] }
 0x56d   :  { %v4294_v61 = vadd.f32 %v10274_v58, %v13690_v12  ;;  %8727 = vmatpush1.bf16.msra.mxu1 %v13880_v45  ;;  %9023 = vmatpush1.bf16.msra.mxu0 %v13880_v45  ;;  %v8786_v58 = vpack.c.bf16 %v4631_v8, %v4627_v19  ;;  %v4640_v60 = vld [vmem:[#allocation8 + $0x388] sm:$0xff] }
 0x56e   :  { %v4295_v59 = vadd.f32 %v10275_v24, %v13694_v1  ;;  %v3688_v36 = vpop.f32.mrb[108].mxu0  ;;  %vm5682_vm1 = vcmp.eq.s32.totalorder %v14818_v42, %v13989_v18  ;;  %v8788_v41 = vpack.c.bf16 %v4640_v60, %v4636_v13  ;;  %v4635_v24 = vld [vmem:[#allocation8 + $0x360] sm:$0xff]  ;;  %v4672_v19 = vld [vmem:[#allocation8 + $0x488] sm:$0xff] }
 0x56f   :  { %v4348_v49 = vmax.f32 %v4294_v61, 0.0  ;;  %v10276_v52 = vadd.f32 %v14813_v16, %v3688_v36  ;;  %v3690_v55 = vpop.f32.mrb[109].mxu0  ;;  %v8326_v44 = vsel %vm5682_vm1, 1.0, %v14819_v21  ;;  %v4639_v61 = vld [vmem:[#allocation8 + $0x380] sm:$0xff]  ;;  %v4644_v36 = vld [vmem:[#allocation8 + $0x3a8] sm:$0xff] }
 0x570   :  { %v4349_v56 = vmax.f32 %v4295_v59, 0.0  ;;  %v10277_v37 = vadd.f32 %v14814_v43, %v3690_v55  ;;  %v8790_v59 = vpack.c.bf16 %v4639_v61, %v4635_v24  ;;  %v4643_v16 = vld [vmem:[#allocation8 + $0x3a0] sm:$0xff]  ;;  %v14036_v43 = vadd.s32 10, %v14815_v7  ;;  %v4676_v60 = vld [vmem:[#allocation8 + $0x4a8] sm:$0xff] }
 0x571   :  { %v13896_v63 = vpack.c.bf16 %v4348_v49, %v4346_v20  ;;  %v4296_v62 = vadd.f32 %v10276_v52, %v13690_v12  ;;  %v14816_v12 = vld [vmem:[#allocation29_spill] sm:$0xff]  ;;  %v4648_v20 = vld [vmem:[#allocation8 + $0x3c8] sm:$0xff]  ;;  %v4647_v52 = vld [vmem:[#allocation8 + $0x3c0] sm:$0xff] }
 0x572   :  { %v13898_v23 = vpack.c.bf16 %v4349_v56, %v4347_v46  ;;  %v4297_v31 = vadd.f32 %v10277_v37, %v13694_v1  ;;  %vm4358_vm13 = vcmp.eq.s32.totalorder %v14816_v12, %v14815_v7  ;;  %vm5019_vm14 = vcmp.eq.s32.totalorder %v14816_v12, %v14817_v53  ;;  %v4652_v46 = vld [vmem:[#allocation8 + $0x3e8] sm:$0xff]  ;;  %v4675_v61 = vld [vmem:[#allocation8 + $0x4a0] sm:$0xff] }
 0x573   :  { %v13918_v1 = vmax.f32 %v4296_v62, 0.0  ;;  %vm4546_vm2 = vcmp.eq.s32.totalorder %v14816_v12, %v13907_v27  ;;  %vm5350_vm4 = vcmp.eq.s32.totalorder %v14816_v12, %v13910_v2  ;;  %v8792_v49 = vpack.c.bf16 %v4648_v20, %v4644_v36  ;;  %v4656_v56 = vld [vmem:[#allocation8 + $0x408] sm:$0xff]  ;;  %v4655_v62 = vld [vmem:[#allocation8 + $0x400] sm:$0xff] }
 0x574   :  { %v13902_v9 = vmax.f32 %v4297_v31, 0.0  ;;  %8729 = vmatprep.subr.bf16.mxu1 %v13898_v23  ;;  %9025 = vmatprep.subr.bf16.mxu0 %v13898_v23  ;;  %v8794_v55 = vpack.c.bf16 %v4647_v52, %v4643_v16  ;;  %v8796_v37 = vpack.c.bf16 %v4656_v56, %v4652_v46  ;;  %v4651_v31 = vld [vmem:[#allocation8 + $0x3e0] sm:$0xff]  ;;  %v4660_v2 = vld [vmem:[#allocation8 + $0x428] sm:$0xff]  ;;  %vm6013_vm5 = vcmp.eq.s32.totalorder %v14818_v42, %v14036_v43 }
 0x575   :  { %8731 = vmatpush1.bf16.msra.mxu1 %v13896_v63  ;;  %9027 = vmatpush1.bf16.msra.mxu0 %v13896_v63  ;;  %v8798_v27 = vpack.c.bf16 %v4655_v62, %v4651_v31  ;;  %v4664_v53 = vld [vmem:[#allocation8 + $0x448] sm:$0xff]  ;;  %vm5681_vm6 = vcmp.eq.s32.totalorder %v14816_v12, %v13989_v18  ;;  %v8334_v50 = vsel %vm6013_vm5, 1.0, %v14819_v21  ;;  %v4667_v18 = vld [vmem:[#allocation8 + $0x460] sm:$0xff]  ;;  %vm6012_vm8 = vcmp.eq.s32.totalorder %v14816_v12, %v14036_v43 }
 0x576   :  { %8295 = vmatprep.subr.msk.mxu1 %vm193_vm3, %v13902_v9  ;;  %8311 = vmatprep.subr.msk.mxu0 %vm193_vm3, %v13902_v9  ;;  %v4684_v20 = vld [vmem:[#allocation8 + $0x4e8] sm:$0xff]  ;;  %v4683_v52 = vld [vmem:[#allocation8 + $0x4e0] sm:$0xff]  ;;  %v14113_v43 = vadd.s32 14, %v14815_v7 }
 0x577   :  { %v4692_v56 = vld [vmem:[#allocation8 + $0x528] sm:$0xff]  ;;  %v4691_v62 = vld [vmem:[#allocation8 + $0x520] sm:$0xff] }
 0x578   :  { %vm6675_vm9 = vcmp.eq.s32.totalorder %v14818_v42, %v14113_v43 }
 0x579   :  { %8296 = vmatpush1.msk.msra.mxu1 %vm193_vm3, %v13918_v1  ;;  %8312 = vmatpush1.msk.msra.mxu0 %vm193_vm3, %v13918_v1 }
 0x57a   :  { %8733 = vmatprep.subr.bf16.mxu1 %v13706_v28  ;;  %9125 = vmatprep.subr.bf16.mxu0 %v13706_v28 }
 0x57b   :  { %8298 = vmatmul.mubr.msk.f32.vlgmr.msra.gmra.mrb[54].mxu1 %vm4358_vm13, %v10821_v57  ;;  %8314 = vmatmul.mubr.msk.f32.vlgmr.msra.gmra.mrb[110].mxu0 %vm5019_vm14, %v10821_v57  ;;  %vm6674_vm14 = vcmp.eq.s32.totalorder %v14816_v12, %v14113_v43 }
 0x57c   :  { %8735 = vmatpush1.bf16.msra.mxu1 %v13704_v6  ;;  %9127 = vmatpush1.bf16.msra.mxu0 %v13704_v6 }
 0x57d   :  { %8737 = vmatprep.subr.bf16.mxu1 %v13722_v4  ;;  %9129 = vmatprep.subr.bf16.mxu0 %v13722_v4 }
 0x57e   :  { %8303 = vmatprep.mubr.msk.f32.mxu1 %vm4364_vm10, %v8300_v26  ;;  %8321 = vmatprep.mubr.msk.f32.mxu0 %vm4364_vm10, %v8318_v48  ;;  %v8800_v26 = vpack.c.bf16 %v4664_v53, %v4660_v2  ;;  %v4659_v48 = vld [vmem:[#allocation8 + $0x420] sm:$0xff]  ;;  %v4700_v53 = vld [vmem:[#allocation8 + $0x568] sm:$0xff] }
 0x580   :  { %8739 = vmatpush1.bf16.msra.mxu1 %v13720_v33  ;;  %9131 = vmatpush1.bf16.msra.mxu0 %v13720_v33 }
 0x581   :  { %8741 = vmatprep.subr.bf16.mxu1 %v13738_v30  ;;  %9133 = vmatprep.subr.bf16.mxu0 %v13738_v30 }
 0x584   :  { %8743 = vmatpush1.bf16.msra.mxu1 %v13736_v5  ;;  %9135 = vmatpush1.bf16.msra.mxu0 %v13736_v5 }
 0x585   :  { %8745 = vmatprep.subr.bf16.mxu1 %v13754_v40  ;;  %9137 = vmatprep.subr.bf16.mxu0 %v13754_v40 }
 0x588   :  { %8747 = vmatpush1.bf16.msra.mxu1 %v13752_v3  ;;  %9139 = vmatpush1.bf16.msra.mxu0 %v13752_v3 }
 0x589   :  { %8749 = vmatprep.subr.bf16.mxu1 %v13770_v22  ;;  %9141 = vmatprep.subr.bf16.mxu0 %v13770_v22 }
 0x58c   :  { %8751 = vmatpush1.bf16.msra.mxu1 %v13768_v34  ;;  %9143 = vmatpush1.bf16.msra.mxu0 %v13768_v34 }
 0x58d   :  { %8753 = vmatprep.subr.bf16.mxu1 %v13786_v25  ;;  %9145 = vmatprep.subr.bf16.mxu0 %v13786_v25 }
 0x590   :  { %8755 = vmatpush1.bf16.msra.mxu1 %v13784_v39  ;;  %9147 = vmatpush1.bf16.msra.mxu0 %v13784_v39 }
 0x591   :  { %8757 = vmatprep.subr.bf16.mxu1 %v13802_v17  ;;  %9149 = vmatprep.subr.bf16.mxu0 %v13802_v17 }
 0x594   :  { %8759 = vmatpush1.bf16.msra.mxu1 %v13800_v29  ;;  %9151 = vmatpush1.bf16.msra.mxu0 %v13800_v29 }
 0x595   :  { %8761 = vmatprep.subr.bf16.mxu1 %v13818_v47  ;;  %9153 = vmatprep.subr.bf16.mxu0 %v13818_v47 }
 0x598   :  { %8763 = vmatpush1.bf16.msra.mxu1 %v13816_v0  ;;  %9155 = vmatpush1.bf16.msra.mxu0 %v13816_v0 }
 0x599   :  { %8765 = vmatprep.subr.bf16.mxu1 %v13834_v11  ;;  %9157 = vmatprep.subr.bf16.mxu0 %v13834_v11 }
 0x59c   :  { %8767 = vmatpush1.bf16.msra.mxu1 %v13832_v35  ;;  %9159 = vmatpush1.bf16.msra.mxu0 %v13832_v35 }
 0x59d   :  { %8769 = vmatprep.subr.bf16.mxu1 %v13850_v32  ;;  %9161 = vmatprep.subr.bf16.mxu0 %v13850_v32 }
 0x5a0   :  { %8771 = vmatpush1.bf16.msra.mxu1 %v13848_v51  ;;  %9163 = vmatpush1.bf16.msra.mxu0 %v13848_v51 }
 0x5a1   :  { %8773 = vmatprep.subr.bf16.mxu1 %v13866_v54  ;;  %9165 = vmatprep.subr.bf16.mxu0 %v13866_v54 }
 0x5a4   :  { %8775 = vmatpush1.bf16.msra.mxu1 %v13864_v15  ;;  %9167 = vmatpush1.bf16.msra.mxu0 %v13864_v15 }
 0x5a5   :  { %8777 = vmatprep.subr.bf16.mxu1 %v13882_v38  ;;  %9169 = vmatprep.subr.bf16.mxu0 %v13882_v38 }
 0x5a8   :  { %8779 = vmatpush1.bf16.msra.mxu1 %v13880_v45  ;;  %9171 = vmatpush1.bf16.msra.mxu0 %v13880_v45 }
 0x5a9   :  { %8781 = vmatprep.subr.bf16.mxu1 %v13898_v23  ;;  %9173 = vmatprep.subr.bf16.mxu0 %v13898_v23 }
 0x5ac   :  { %8783 = vmatpush1.bf16.msra.mxu1 %v13896_v63  ;;  %9175 = vmatpush1.bf16.msra.mxu0 %v13896_v63 }
 0x5ad   :  { %8301 = vmatprep.subr.msk.mxu1 %vm193_vm3, %v13902_v9  ;;  %8319 = vmatprep.subr.msk.mxu0 %vm193_vm3, %v13902_v9 }
 0x5b0   :  { %8302 = vmatpush1.msk.msra.mxu1 %vm193_vm3, %v13918_v1  ;;  %8320 = vmatpush1.msk.msra.mxu0 %vm193_vm3, %v13918_v1 }
 0x5b1   :  { %8304 = vmatmul.mubr.msk.f32.vlgmr.msra.gmra.mrb[56].mxu1 %vm4546_vm2, %v10821_v57  ;;  %9273 = vmatprep.subr.bf16.mxu0 %v13706_v28 }
 0x5b2   :  { %8322 = vmatmul.mubr.msk.f32.vlgmr.msra.gmra.mrb[112].mxu0 %vm5350_vm4, %v10821_v57  ;;  %8785 = vmatprep.subr.bf16.mxu1 %v8784_v10  ;;  %v4668_v10 = vld [vmem:[#allocation8 + $0x468] sm:$0xff] }
 0x5b3   :  { %9275 = vmatpush1.bf16.msra.mxu0 %v13704_v6  ;;  %8329 = vmatprep.mubr.msk.f32.mxu0 %vm4364_vm10, %v8326_v44  ;;  %v4663_v44 = vld [vmem:[#allocation8 + $0x440] sm:$0xff]  ;;  %v8804_v8 = vpack.c.bf16 %v4672_v19, %v4668_v10  ;;  %v4708_v10 = vld [vmem:[#allocation8 + $0x5a8] sm:$0xff] }
 0x5b4   :  { %9277 = vmatprep.subr.bf16.mxu0 %v13722_v4  ;;  %8787 = vmatpush1.bf16.msra.mxu1 %v8786_v58  ;;  %v8802_v14 = vpack.c.bf16 %v4663_v44, %v4659_v48  ;;  %v4671_v58 = vld [vmem:[#allocation8 + $0x480] sm:$0xff]  ;;  %v4712_v19 = vld [vmem:[#allocation8 + $0x5c8] sm:$0xff] }
 0x5b5   :  { %8789 = vmatprep.subr.bf16.mxu1 %v8788_v41  ;;  %v8806_v13 = vpack.c.bf16 %v4671_v58, %v4667_v18  ;;  %v4680_v41 = vld [vmem:[#allocation8 + $0x4c8] sm:$0xff]  ;;  %v4699_v44 = vld [vmem:[#allocation8 + $0x560] sm:$0xff] }
 0x5b6   :  { %v8808_v24 = vpack.c.bf16 %v4680_v41, %v4676_v60  ;;  %v4707_v18 = vld [vmem:[#allocation8 + $0x5a0] sm:$0xff]  ;;  %v4716_v60 = vld [vmem:[#allocation8 + $0x5e8] sm:$0xff] }
 0x5b7   :  { %9279 = vmatpush1.bf16.msra.mxu0 %v13720_v33  ;;  %v4711_v58 = vld [vmem:[#allocation8 + $0x5c0] sm:$0xff]  ;;  %v4720_v41 = vld [vmem:[#allocation8 + $0x608] sm:$0xff] }
 0x5b8   :  { %9281 = vmatprep.subr.bf16.mxu0 %v13738_v30  ;;  %8791 = vmatpush1.bf16.msra.mxu1 %v8790_v59  ;;  %v4679_v59 = vld [vmem:[#allocation8 + $0x4c0] sm:$0xff] }
 0x5b9   :  { %8793 = vmatprep.subr.bf16.mxu1 %v8792_v49  ;;  %v8810_v36 = vpack.c.bf16 %v4679_v59, %v4675_v61  ;;  %v4688_v49 = vld [vmem:[#allocation8 + $0x508] sm:$0xff]  ;;  %v4715_v61 = vld [vmem:[#allocation8 + $0x5e0] sm:$0xff] }
 0x5ba   :  { %v8812_v16 = vpack.c.bf16 %v4688_v49, %v4684_v20  ;;  %v4719_v59 = vld [vmem:[#allocation8 + $0x600] sm:$0xff]  ;;  %v4724_v20 = vld [vmem:[#allocation8 + $0x628] sm:$0xff]  ;;  %v4630_v49 = vld [vmem:[#allocation8 + $0x338] sm:$0xff] }
 0x5bb   :  { %9283 = vmatpush1.bf16.msra.mxu0 %v13736_v5 }
 0x5bc   :  { %9285 = vmatprep.subr.bf16.mxu0 %v13754_v40  ;;  %8795 = vmatpush1.bf16.msra.mxu1 %v8794_v55  ;;  %v4687_v55 = vld [vmem:[#allocation8 + $0x500] sm:$0xff] }
 0x5bd   :  { %8797 = vmatprep.subr.bf16.mxu1 %v8796_v37  ;;  %v8814_v46 = vpack.c.bf16 %v4687_v55, %v4683_v52  ;;  %v4696_v37 = vld [vmem:[#allocation8 + $0x548] sm:$0xff]  ;;  %v4723_v52 = vld [vmem:[#allocation8 + $0x620] sm:$0xff] }
 0x5be   :  { %v8816_v31 = vpack.c.bf16 %v4696_v37, %v4692_v56 }
 0x5bf   :  { %9287 = vmatpush1.bf16.msra.mxu0 %v13752_v3 }
 0x5c0   :  { %9289 = vmatprep.subr.bf16.mxu0 %v13770_v22  ;;  %8799 = vmatpush1.bf16.msra.mxu1 %v8798_v27  ;;  %v4695_v27 = vld [vmem:[#allocation8 + $0x540] sm:$0xff] }
 0x5c1   :  { %8801 = vmatprep.subr.bf16.mxu1 %v8800_v26  ;;  %v8818_v2 = vpack.c.bf16 %v4695_v27, %v4691_v62  ;;  %v4704_v26 = vld [vmem:[#allocation8 + $0x588] sm:$0xff]  ;;  %v8350_v62 = vsel %vm6675_vm9, 1.0, %v14819_v21  ;;  %v4629_v27 = vld [vmem:[#allocation8 + $0x330] sm:$0xff] }
 0x5c2   :  { %v8820_v48 = vpack.c.bf16 %v4704_v26, %v4700_v53  ;;  %v14156_v53 = vadd.s32 16, %v14815_v7  ;;  %v4638_v26 = vld [vmem:[#allocation8 + $0x378] sm:$0xff] }
 0x5c3   :  { %9291 = vmatpush1.bf16.msra.mxu0 %v13768_v34 }
 0x5c4   :  { %9293 = vmatprep.subr.bf16.mxu0 %v13786_v25  ;;  %8803 = vmatpush1.bf16.msra.mxu1 %v8802_v14  ;;  %vm7006_vm13 = vcmp.eq.s32.totalorder %v14818_v42, %v14156_v53  ;;  %vm7005_vm15 = vcmp.eq.s32.totalorder %v14816_v12, %v14156_v53 }
 0x5c5   :  { %8805 = vmatprep.subr.bf16.mxu1 %v8804_v8  ;;  %v8824_v8 = vpack.c.bf16 %v4712_v19, %v4708_v10  ;;  %v4637_v19 = vld [vmem:[#allocation8 + $0x370] sm:$0xff] }
 0x5c7   :  { %9295 = vmatpush1.bf16.msra.mxu0 %v13784_v39 }
 0x5c8   :  { %9297 = vmatprep.subr.bf16.mxu0 %v13802_v17  ;;  %8807 = vmatpush1.bf16.msra.mxu1 %v8806_v13  ;;  %v8826_v13 = vpack.c.bf16 %v4711_v58, %v4707_v18  ;;  %v4646_v18 = vld [vmem:[#allocation8 + $0x3b8] sm:$0xff] }
 0x5c9   :  { %8809 = vmatprep.subr.bf16.mxu1 %v8808_v24  ;;  %v8828_v24 = vpack.c.bf16 %v4720_v41, %v4716_v60  ;;  %v4650_v58 = vld [vmem:[#allocation8 + $0x3d8] sm:$0xff]  ;;  %v8358_v60 = vsel %vm7006_vm13, 1.0, %v14819_v21 }
 0x5ca   :  { %v8840_v41 = vpack.c.bf16 %v4650_v58, %v4646_v18 }
 0x5cb   :  { %9299 = vmatpush1.bf16.msra.mxu0 %v13800_v29 }
 0x5cc   :  { %9301 = vmatprep.subr.bf16.mxu0 %v13818_v47  ;;  %8811 = vmatpush1.bf16.msra.mxu1 %v8810_v36  ;;  %v8830_v36 = vpack.c.bf16 %v4719_v59, %v4715_v61  ;;  %v4649_v61 = vld [vmem:[#allocation8 + $0x3d0] sm:$0xff]  ;;  %v4654_v59 = vld [vmem:[#allocation8 + $0x3f8] sm:$0xff] }
 0x5cd   :  { %8813 = vmatprep.subr.bf16.mxu1 %v8812_v16  ;;  %v4634_v16 = vld [vmem:[#allocation8 + $0x358] sm:$0xff] }
 0x5ce   :  { %v8832_v55 = vpack.c.bf16 %v4634_v16, %v4630_v49  ;;  %v4653_v16 = vld [vmem:[#allocation8 + $0x3f0] sm:$0xff] }
 0x5cf   :  { %9303 = vmatpush1.bf16.msra.mxu0 %v13816_v0 }
 0x5d0   :  { %9305 = vmatprep.subr.bf16.mxu0 %v13834_v11  ;;  %8815 = vmatpush1.bf16.msra.mxu1 %v8814_v46  ;;  %v6342_v46 = vadd.s32 12, %v14815_v7 }
 0x5d1   :  { %8817 = vmatprep.subr.bf16.mxu1 %v8816_v31 }
 0x5d2   :  { %vm6344_vm7 = vcmp.eq.s32.totalorder %v14818_v42, %v6342_v46  ;;  %vm6343_vm11 = vcmp.eq.s32.totalorder %v14816_v12, %v6342_v46  ;;  %v4666_v46 = vld [vmem:[#allocation8 + $0x458] sm:$0xff] }
 0x5d3   :  { %9307 = vmatpush1.bf16.msra.mxu0 %v13832_v35  ;;  %v8342_v56 = vsel %vm6344_vm7, 1.0, %v14819_v21 }
 0x5d4   :  { %9309 = vmatprep.subr.bf16.mxu0 %v13850_v32  ;;  %8819 = vmatpush1.bf16.msra.mxu1 %v8818_v2  ;;  %v4633_v2 = vld [vmem:[#allocation8 + $0x350] sm:$0xff] }
 0x5d5   :  { %8821 = vmatprep.subr.bf16.mxu1 %v8820_v48  ;;  %v4642_v48 = vld [vmem:[#allocation8 + $0x398] sm:$0xff] }
 0x5d6   :  { %v8836_v10 = vpack.c.bf16 %v4642_v48, %v4638_v26  ;;  %v4674_v26 = vld [vmem:[#allocation8 + $0x498] sm:$0xff] }
 0x5d7   :  { %9311 = vmatpush1.bf16.msra.mxu0 %v13848_v51 }
 0x5d8   :  { %9313 = vmatprep.subr.bf16.mxu0 %v13866_v54 }
 0x5db   :  { %9315 = vmatpush1.bf16.msra.mxu0 %v13864_v15 }
 0x5dc   :  { %9317 = vmatprep.subr.bf16.mxu0 %v13882_v38 }
 0x5df   :  { %9319 = vmatpush1.bf16.msra.mxu0 %v13880_v45 }
 0x5e0   :  { %9321 = vmatprep.subr.bf16.mxu0 %v13898_v23 }
 0x5e3   :  { %9323 = vmatpush1.bf16.msra.mxu0 %v13896_v63 }
 0x5e4   :  { %8327 = vmatprep.subr.msk.mxu0 %vm193_vm3, %v13902_v9 }
 0x5e7   :  { %8328 = vmatpush1.msk.msra.mxu0 %vm193_vm3, %v13918_v1 }
 0x5e8   :  { %9421 = vmatprep.subr.bf16.mxu0 %v13706_v28  ;;  %8330 = vmatmul.mubr.msk.f32.vlgmr.msra.gmra.mrb[114].mxu0 %vm5681_vm6, %v10821_v57 }
 0x5e9   :  { %9423 = vmatpush1.bf16.msra.mxu0 %v13704_v6  ;;  %8337 = vmatprep.mubr.msk.f32.mxu0 %vm4364_vm10, %v8334_v50  ;;  %v4703_v50 = vld [vmem:[#allocation8 + $0x580] sm:$0xff] }
 0x5ea   :  { %9425 = vmatprep.subr.bf16.mxu0 %v13722_v4  ;;  %v8822_v14 = vpack.c.bf16 %v4703_v50, %v4699_v44  ;;  %v8834_v50 = vpack.c.bf16 %v4633_v2, %v4629_v27  ;;  %v4665_v27 = vld [vmem:[#allocation8 + $0x450] sm:$0xff]  ;;  %v4670_v2 = vld [vmem:[#allocation8 + $0x478] sm:$0xff] }
 0x5ec   :  { %8823 = vmatpush1.bf16.msra.mxu1 %v8822_v14 }
 0x5ed   :  { %9427 = vmatpush1.bf16.msra.mxu0 %v13720_v33  ;;  %8825 = vmatprep.subr.bf16.mxu1 %v8824_v8  ;;  %v4641_v8 = vld [vmem:[#allocation8 + $0x390] sm:$0xff] }
 0x5ee   :  { %9429 = vmatprep.subr.bf16.mxu0 %v13738_v30 }
 0x5f0   :  { %8827 = vmatpush1.bf16.msra.mxu1 %v8826_v13  ;;  %v8838_v13 = vpack.c.bf16 %v4641_v8, %v4637_v19  ;;  %v4678_v19 = vld [vmem:[#allocation8 + $0x4b8] sm:$0xff] }
 0x5f1   :  { %9431 = vmatpush1.bf16.msra.mxu0 %v13736_v5  ;;  %8829 = vmatprep.subr.bf16.mxu1 %v8828_v24  ;;  %v4645_v24 = vld [vmem:[#allocation8 + $0x3b0] sm:$0xff]  ;;  %v4682_v8 = vld [vmem:[#allocation8 + $0x4d8] sm:$0xff] }
 0x5f2   :  { %9433 = vmatprep.subr.bf16.mxu0 %v13754_v40  ;;  %v8856_v58 = vpack.c.bf16 %v4682_v8, %v4678_v19  ;;  %v4709_v8 = vld [vmem:[#allocation8 + $0x5b0] sm:$0xff] }
 0x5f4   :  { %8831 = vmatpush1.bf16.msra.mxu1 %v8830_v36  ;;  %v4658_v36 = vld [vmem:[#allocation8 + $0x418] sm:$0xff] }
 0x5f5   :  { %9435 = vmatpush1.bf16.msra.mxu0 %v13752_v3  ;;  %4779 = vmatprep.subr.mxu1 %v4724_v20  ;;  %v8842_v20 = vpack.c.bf16 %v4649_v61, %v4645_v24  ;;  %v8844_v49 = vpack.c.bf16 %v4658_v36, %v4654_v59  ;;  %v4690_v24 = vld [vmem:[#allocation8 + $0x518] sm:$0xff]  ;;  %v4685_v36 = vld [vmem:[#allocation8 + $0x4f0] sm:$0xff] }
 0x5f6   :  { %9437 = vmatprep.subr.bf16.mxu0 %v13770_v22 }
 0x5f8   :  { %4780 = vmatpush1.msra.mxu1 %v4723_v52  ;;  %v4657_v52 = vld [vmem:[#allocation8 + $0x410] sm:$0xff] }
 0x5f9   :  { %9439 = vmatpush1.bf16.msra.mxu0 %v13768_v34  ;;  %8833 = vmatprep.subr.bf16.mxu1 %v8832_v55  ;;  %v4662_v55 = vld [vmem:[#allocation8 + $0x438] sm:$0xff] }
 0x5fa   :  { %9441 = vmatprep.subr.bf16.mxu0 %v13786_v25  ;;  %v8848_v43 = vpack.c.bf16 %v4666_v46, %v4662_v55  ;;  %v4693_v46 = vld [vmem:[#allocation8 + $0x530] sm:$0xff] }
 0x5fd   :  { %9443 = vmatpush1.bf16.msra.mxu0 %v13784_v39 }
 0x5fe   :  { %9445 = vmatprep.subr.bf16.mxu0 %v13802_v17 }
 0x601   :  { %9447 = vmatpush1.bf16.msra.mxu0 %v13800_v29 }
 0x602   :  { %9449 = vmatprep.subr.bf16.mxu0 %v13818_v47 }
 0x605   :  { %9451 = vmatpush1.bf16.msra.mxu0 %v13816_v0 }
 0x606   :  { %9453 = vmatprep.subr.bf16.mxu0 %v13834_v11 }
 0x609   :  { %9455 = vmatpush1.bf16.msra.mxu0 %v13832_v35 }
 0x60a   :  { %9457 = vmatprep.subr.bf16.mxu0 %v13850_v32 }
 0x60d   :  { %9459 = vmatpush1.bf16.msra.mxu0 %v13848_v51 }
 0x60e   :  { %9461 = vmatprep.subr.bf16.mxu0 %v13866_v54 }
 0x611   :  { %9463 = vmatpush1.bf16.msra.mxu0 %v13864_v15 }
 0x612   :  { %9465 = vmatprep.subr.bf16.mxu0 %v13882_v38 }
 0x615   :  { %9467 = vmatpush1.bf16.msra.mxu0 %v13880_v45 }
 0x616   :  { %9469 = vmatprep.subr.bf16.mxu0 %v13898_v23 }
 0x619   :  { %9471 = vmatpush1.bf16.msra.mxu0 %v13896_v63 }
 0x61a   :  { %8335 = vmatprep.subr.msk.mxu0 %vm193_vm3, %v13902_v9 }
 0x61d   :  { %8336 = vmatpush1.msk.msra.mxu0 %vm193_vm3, %v13918_v1 }
 0x61e   :  { %9569 = vmatprep.subr.bf16.mxu0 %v13706_v28  ;;  %8338 = vmatmul.mubr.msk.f32.vlgmr.msra.gmra.mrb[116].mxu0 %vm6012_vm8, %v10821_v57 }
 0x61f   :  { %9571 = vmatpush1.bf16.msra.mxu0 %v13704_v6  ;;  %8345 = vmatprep.mubr.msk.f32.mxu0 %vm4364_vm10, %v8342_v56  ;;  %v8846_v56 = vpack.c.bf16 %v4657_v52, %v4653_v16  ;;  %v4698_v16 = vld [vmem:[#allocation8 + $0x558] sm:$0xff] }
 0x620   :  { %9573 = vmatprep.subr.bf16.mxu0 %v13722_v4 }
 0x623   :  { %9575 = vmatpush1.bf16.msra.mxu0 %v13720_v33 }
 0x624   :  { %9577 = vmatprep.subr.bf16.mxu0 %v13738_v30 }
 0x627   :  { %9579 = vmatpush1.bf16.msra.mxu0 %v13736_v5 }
 0x628   :  { %9581 = vmatprep.subr.bf16.mxu0 %v13754_v40 }
 0x62b   :  { %9583 = vmatpush1.bf16.msra.mxu0 %v13752_v3 }
 0x62c   :  { %9585 = vmatprep.subr.bf16.mxu0 %v13770_v22 }
 0x62f   :  { %9587 = vmatpush1.bf16.msra.mxu0 %v13768_v34 }
 0x630   :  { %9589 = vmatprep.subr.bf16.mxu0 %v13786_v25 }
 0x633   :  { %9591 = vmatpush1.bf16.msra.mxu0 %v13784_v39 }
 0x634   :  { %9593 = vmatprep.subr.bf16.mxu0 %v13802_v17 }
 0x637   :  { %9595 = vmatpush1.bf16.msra.mxu0 %v13800_v29 }
 0x638   :  { %9597 = vmatprep.subr.bf16.mxu0 %v13818_v47 }
 0x63b   :  { %9599 = vmatpush1.bf16.msra.mxu0 %v13816_v0 }
 0x63c   :  { %9601 = vmatprep.subr.bf16.mxu0 %v13834_v11 }
 0x63f   :  { %9603 = vmatpush1.bf16.msra.mxu0 %v13832_v35 }
 0x640   :  { %9605 = vmatprep.subr.bf16.mxu0 %v13850_v32 }
 0x643   :  { %9607 = vmatpush1.bf16.msra.mxu0 %v13848_v51 }
 0x644   :  { %9609 = vmatprep.subr.bf16.mxu0 %v13866_v54 }
 0x647   :  { %9611 = vmatpush1.bf16.msra.mxu0 %v13864_v15 }
 0x648   :  { %9613 = vmatprep.subr.bf16.mxu0 %v13882_v38 }
 0x64b   :  { %9615 = vmatpush1.bf16.msra.mxu0 %v13880_v45 }
 0x64c   :  { %9617 = vmatprep.subr.bf16.mxu0 %v13898_v23 }
 0x64e   :  { %v14116_v37 = vpop.f32.mrb[54].mxu1 }
 0x64f   :  { %9619 = vmatpush1.bf16.msra.mxu0 %v13896_v63  ;;  %v14119_v31 = vpop.f32.mrb[55].mxu1 }
 0x650   :  { %8343 = vmatprep.subr.msk.mxu0 %vm193_vm3, %v13902_v9 }
 0x653   :  { %8344 = vmatpush1.msk.msra.mxu0 %vm193_vm3, %v13918_v1 }
 0x654   :  { %9717 = vmatprep.subr.bf16.mxu0 %v13706_v28  ;;  %8346 = vmatmul.mubr.msk.f32.vlgmr.msra.gmra.mrb[118].mxu0 %vm6343_vm11, %v10821_v57 }
 0x655   :  { %9719 = vmatpush1.bf16.msra.mxu0 %v13704_v6  ;;  %8353 = vmatprep.mubr.msk.f32.mxu0 %vm4364_vm10, %v8350_v62  ;;  %v4661_v62 = vld [vmem:[#allocation8 + $0x430] sm:$0xff] }
 0x656   :  { %9721 = vmatprep.subr.bf16.mxu0 %v13722_v4  ;;  %v8850_v48 = vpack.c.bf16 %v4665_v27, %v4661_v62  ;;  %v4706_v62 = vld [vmem:[#allocation8 + $0x598] sm:$0xff] }
 0x659   :  { %9723 = vmatpush1.bf16.msra.mxu0 %v13720_v33 }
 0x65a   :  { %9725 = vmatprep.subr.bf16.mxu0 %v13738_v30 }
 0x65d   :  { %9727 = vmatpush1.bf16.msra.mxu0 %v13736_v5 }
 0x65e   :  { %9729 = vmatprep.subr.bf16.mxu0 %v13754_v40 }
 0x661   :  { %9731 = vmatpush1.bf16.msra.mxu0 %v13752_v3 }
 0x662   :  { %9733 = vmatprep.subr.bf16.mxu0 %v13770_v22 }
 0x665   :  { %9735 = vmatpush1.bf16.msra.mxu0 %v13768_v34 }
 0x666   :  { %9737 = vmatprep.subr.bf16.mxu0 %v13786_v25 }
 0x669   :  { %9739 = vmatpush1.bf16.msra.mxu0 %v13784_v39 }
 0x66a   :  { %9741 = vmatprep.subr.bf16.mxu0 %v13802_v17 }
 0x66d   :  { %9743 = vmatpush1.bf16.msra.mxu0 %v13800_v29 }
 0x66e   :  { %9745 = vmatprep.subr.bf16.mxu0 %v13818_v47 }
 0x671   :  { %9747 = vmatpush1.bf16.msra.mxu0 %v13816_v0 }
 0x672   :  { %9749 = vmatprep.subr.bf16.mxu0 %v13834_v11 }
 0x675   :  { %9751 = vmatpush1.bf16.msra.mxu0 %v13832_v35 }
 0x676   :  { %9753 = vmatprep.subr.bf16.mxu0 %v13850_v32 }
 0x679   :  { %9755 = vmatpush1.bf16.msra.mxu0 %v13848_v51 }
 0x67a   :  { %9757 = vmatprep.subr.bf16.mxu0 %v13866_v54 }
 0x67d   :  { %9759 = vmatpush1.bf16.msra.mxu0 %v13864_v15 }
 0x67e   :  { %9761 = vmatprep.subr.bf16.mxu0 %v13882_v38 }
 0x681   :  { %9763 = vmatpush1.bf16.msra.mxu0 %v13880_v45 }
 0x682   :  { %9765 = vmatprep.subr.bf16.mxu0 %v13898_v23 }
 0x684   :  { %v14159_v44 = vpop.f32.mrb[56].mxu1 }
 0x685   :  { %9767 = vmatpush1.bf16.msra.mxu0 %v13896_v63  ;;  %v4623_v14 = vpop.f32.mrb[57].mxu1 }
 0x686   :  { %8351 = vmatprep.subr.msk.mxu0 %vm193_vm3, %v13902_v9  ;;  %8305 = vmatprep.mubr.msk.f32.mxu1 %vm4727_vm12, %v4623_v14 }
 0x687   :  { %4796 = vmatmul.mubr.f32.vlgmr.msra.gmra.mrb[58].mxu1 %v14159_v44 }
 0x688   :  { %8835 = vmatpush1.bf16.msra.mxu1 %v8834_v50  ;;  %8306 = vmatprep.mubr.msk.f32.mxu1 %vm4727_vm12, %v4623_v14  ;;  %v8852_v50 = vpack.c.bf16 %v4674_v26, %v4670_v2  ;;  %v4669_v14 = vld [vmem:[#allocation8 + $0x470] sm:$0xff] }
 0x689   :  { %8352 = vmatpush1.msk.msra.mxu0 %vm193_vm3, %v13918_v1  ;;  %8837 = vmatprep.subr.bf16.mxu1 %v8836_v10  ;;  %v4673_v10 = vld [vmem:[#allocation8 + $0x490] sm:$0xff] }
 0x68a   :  { %9865 = vmatprep.subr.bf16.mxu0 %v13706_v28  ;;  %8354 = vmatmul.mubr.msk.f32.vlgmr.msra.gmra.mrb[120].mxu0 %vm6674_vm14, %v10821_v57  ;;  %v8854_v18 = vpack.c.bf16 %v4673_v10, %v4669_v14  ;;  %v4701_v26 = vld [vmem:[#allocation8 + $0x570] sm:$0xff]  ;;  %v4714_v14 = vld [vmem:[#allocation8 + $0x5d8] sm:$0xff] }
 0x68b   :  { %9867 = vmatpush1.bf16.msra.mxu0 %v13704_v6  ;;  %8361 = vmatprep.mubr.msk.f32.mxu0 %vm4364_vm10, %v8358_v60  ;;  %v4681_v60 = vld [vmem:[#allocation8 + $0x4d0] sm:$0xff] }
 0x68c   :  { %8839 = vmatpush1.bf16.msra.mxu1 %v8838_v13  ;;  %9869 = vmatprep.subr.bf16.mxu0 %v13722_v4  ;;  %v4677_v13 = vld [vmem:[#allocation8 + $0x4b0] sm:$0xff] }
 0x68d   :  { %8841 = vmatprep.subr.bf16.mxu1 %v8840_v41  ;;  %v4686_v41 = vld [vmem:[#allocation8 + $0x4f8] sm:$0xff]  ;;  %v8858_v61 = vpack.c.bf16 %v4681_v60, %v4677_v13 }
 0x68e   :  { %v8860_v59 = vpack.c.bf16 %v4690_v24, %v4686_v41  ;;  %v4722_v13 = vld [vmem:[#allocation8 + $0x618] sm:$0xff]  ;;  %v4717_v24 = vld [vmem:[#allocation8 + $0x5f0] sm:$0xff] }
 0x68f   :  { %9871 = vmatpush1.bf16.msra.mxu0 %v13720_v33 }
 0x690   :  { %8843 = vmatpush1.bf16.msra.mxu1 %v8842_v20  ;;  %9873 = vmatprep.subr.bf16.mxu0 %v13738_v30  ;;  %v4689_v20 = vld [vmem:[#allocation8 + $0x510] sm:$0xff] }
 0x691   :  { %8845 = vmatprep.subr.bf16.mxu1 %v8844_v49  ;;  %v4694_v49 = vld [vmem:[#allocation8 + $0x538] sm:$0xff]  ;;  %v8862_v52 = vpack.c.bf16 %v4689_v20, %v4685_v36  ;;  %v4446_v20 = vld [vmem:[#allocation8 + $0x8] sm:$0xff] }
 0x692   :  { %v8864_v55 = vpack.c.bf16 %v4698_v16, %v4694_v49  ;;  %v4726_v36 = vld [vmem:[#allocation8 + $0x638] sm:$0xff]  ;;  %v4450_v49 = vld [vmem:[#allocation8 + $0x28] sm:$0xff]  ;;  %v4445_v16 = vld [vmem:[#allocation8] sm:$0xff] }
 0x693   :  { %9875 = vmatpush1.bf16.msra.mxu0 %v13736_v5 }
 0x694   :  { %8847 = vmatpush1.bf16.msra.mxu1 %v8846_v56  ;;  %9877 = vmatprep.subr.bf16.mxu0 %v13754_v40  ;;  %v4697_v56 = vld [vmem:[#allocation8 + $0x550] sm:$0xff] }
 0x695   :  { %8849 = vmatprep.subr.bf16.mxu1 %v8848_v43  ;;  %v4702_v43 = vld [vmem:[#allocation8 + $0x578] sm:$0xff]  ;;  %v8866_v27 = vpack.c.bf16 %v4697_v56, %v4693_v46  ;;  %v4458_v46 = vld [vmem:[#allocation8 + $0x68] sm:$0xff]  ;;  %v4725_v56 = vld [vmem:[#allocation8 + $0x630] sm:$0xff] }
 0x696   :  { %v8868_v2 = vpack.c.bf16 %v4706_v62, %v4702_v43  ;;  %v8880_v43 = vpack.c.bf16 %v4450_v49, %v4446_v20  ;;  %v4481_v20 = vld [vmem:[#allocation8 + $0x120] sm:$0xff]  ;;  %v4486_v49 = vld [vmem:[#allocation8 + $0x148] sm:$0xff] }
 0x697   :  { %9879 = vmatpush1.bf16.msra.mxu0 %v13752_v3 }
 0x698   :  { %8851 = vmatpush1.bf16.msra.mxu1 %v8850_v48  ;;  %9881 = vmatprep.subr.bf16.mxu0 %v13770_v22  ;;  %v4705_v48 = vld [vmem:[#allocation8 + $0x590] sm:$0xff] }
 0x699   :  { %8853 = vmatprep.subr.bf16.mxu1 %v8852_v50  ;;  %v4710_v50 = vld [vmem:[#allocation8 + $0x5b8] sm:$0xff]  ;;  %v8870_v10 = vpack.c.bf16 %v4705_v48, %v4701_v26  ;;  %v4457_v26 = vld [vmem:[#allocation8 + $0x60] sm:$0xff]  ;;  %v4462_v48 = vld [vmem:[#allocation8 + $0x88] sm:$0xff] }
 0x69a   :  { %v8872_v19 = vpack.c.bf16 %v4714_v14, %v4710_v50  ;;  %v4466_v50 = vld [vmem:[#allocation8 + $0xa8] sm:$0xff] }
 0x69b   :  { %9883 = vmatpush1.bf16.msra.mxu0 %v13768_v34 }
 0x69c   :  { %8855 = vmatpush1.bf16.msra.mxu1 %v8854_v18  ;;  %9885 = vmatprep.subr.bf16.mxu0 %v13786_v25  ;;  %v4713_v18 = vld [vmem:[#allocation8 + $0x5d0] sm:$0xff] }
 0x69d   :  { %8857 = vmatprep.subr.bf16.mxu1 %v8856_v58  ;;  %v4718_v58 = vld [vmem:[#allocation8 + $0x5f8] sm:$0xff]  ;;  %v8874_v60 = vpack.c.bf16 %v4713_v18, %v4709_v8  ;;  %v4465_v8 = vld [vmem:[#allocation8 + $0xa0] sm:$0xff]  ;;  %v4470_v18 = vld [vmem:[#allocation8 + $0xc8] sm:$0xff] }
 0x69e   :  { %v8876_v41 = vpack.c.bf16 %v4722_v13, %v4718_v58  ;;  %v4474_v58 = vld [vmem:[#allocation8 + $0xe8] sm:$0xff] }
 0x69f   :  { %9887 = vmatpush1.bf16.msra.mxu0 %v13784_v39  ;;  %v8892_v13 = vpack.c.bf16 %v4474_v58, %v4470_v18  ;;  %v4509_v18 = vld [vmem:[#allocation8 + $0x200] sm:$0xff]  ;;  %v4518_v58 = vld [vmem:[#allocation8 + $0x248] sm:$0xff] }
 0x6a0   :  { %8859 = vmatpush1.bf16.msra.mxu1 %v8858_v61  ;;  %9889 = vmatprep.subr.bf16.mxu0 %v13802_v17  ;;  %v4721_v61 = vld [vmem:[#allocation8 + $0x610] sm:$0xff] }
 0x6a1   :  { %8861 = vmatprep.subr.bf16.mxu1 %v8860_v59  ;;  %v8878_v59 = vpack.c.bf16 %v4721_v61, %v4717_v24  ;;  %v4478_v24 = vld [vmem:[#allocation8 + $0x108] sm:$0xff] }
 0x6a2   :  { %v4482_v61 = vld [vmem:[#allocation8 + $0x128] sm:$0xff] }
 0x6a3   :  { %9891 = vmatpush1.bf16.msra.mxu0 %v13800_v29 }
 0x6a4   :  { %8863 = vmatpush1.bf16.msra.mxu1 %v8862_v52  ;;  %9893 = vmatprep.subr.bf16.mxu0 %v13818_v47  ;;  %v4449_v52 = vld [vmem:[#allocation8 + $0x20] sm:$0xff] }
 0x6a5   :  { %8865 = vmatprep.subr.bf16.mxu1 %v8864_v55  ;;  %v4454_v55 = vld [vmem:[#allocation8 + $0x48] sm:$0xff]  ;;  %v8882_v62 = vpack.c.bf16 %v4449_v52, %v4445_v16 }
 0x6a6   :  { %v4490_v16 = vld [vmem:[#allocation8 + $0x168] sm:$0xff] }
 0x6a7   :  { %9895 = vmatpush1.bf16.msra.mxu0 %v13816_v0  ;;  %v8900_v52 = vpack.c.bf16 %v4490_v16, %v4486_v49  ;;  %v4533_v49 = vld [vmem:[#allocation8 + $0x2c0] sm:$0xff]  ;;  %v4542_v16 = vld [vmem:[#allocation8 + $0x308] sm:$0xff] }
 0x6a8   :  { %8867 = vmatpush1.bf16.msra.mxu1 %v8866_v27  ;;  %9897 = vmatprep.subr.bf16.mxu0 %v13834_v11  ;;  %v8884_v27 = vpack.c.bf16 %v4458_v46, %v4454_v55  ;;  %v4485_v55 = vld [vmem:[#allocation8 + $0x140] sm:$0xff]  ;;  %v4494_v46 = vld [vmem:[#allocation8 + $0x188] sm:$0xff] }
 0x6a9   :  { %8869 = vmatprep.subr.bf16.mxu1 %v8868_v2  ;;  %v4453_v2 = vld [vmem:[#allocation8 + $0x40] sm:$0xff] }
 0x6aa   :  { %v8886_v14 = vpack.c.bf16 %v4457_v26, %v4453_v2  ;;  %v4502_v2 = vld [vmem:[#allocation8 + $0x1c8] sm:$0xff] }
 0x6ab   :  { %9899 = vmatpush1.bf16.msra.mxu0 %v13832_v35  ;;  %v4506_v26 = vld [vmem:[#allocation8 + $0x1e8] sm:$0xff] }
 0x6ac   :  { %8871 = vmatpush1.bf16.msra.mxu1 %v8870_v10  ;;  %9901 = vmatprep.subr.bf16.mxu0 %v13850_v32  ;;  %v8888_v10 = vpack.c.bf16 %v4466_v50, %v4462_v48  ;;  %v8908_v48 = vpack.c.bf16 %v4506_v26, %v4502_v2  ;;  %v4505_v50 = vld [vmem:[#allocation8 + $0x1e0] sm:$0xff]  ;;  %v4467_v2 = vld [vmem:[#allocation8 + $0xb0] sm:$0xff]  ;;  %v4472_v26 = vld [vmem:[#allocation8 + $0xd8] sm:$0xff] }
 0x6ad   :  { %8873 = vmatprep.subr.bf16.mxu1 %v8872_v19  ;;  %v4461_v19 = vld [vmem:[#allocation8 + $0x80] sm:$0xff] }
 0x6af   :  { %9903 = vmatpush1.bf16.msra.mxu0 %v13848_v51 }
 0x6b0   :  { %8875 = vmatpush1.bf16.msra.mxu1 %v8874_v60  ;;  %9905 = vmatprep.subr.bf16.mxu0 %v13866_v54  ;;  %v4469_v60 = vld [vmem:[#allocation8 + $0xc0] sm:$0xff] }
 0x6b1   :  { %8877 = vmatprep.subr.bf16.mxu1 %v8876_v41  ;;  %v4473_v41 = vld [vmem:[#allocation8 + $0xe0] sm:$0xff] }
 0x6b2   :  { %v8894_v53 = vpack.c.bf16 %v4473_v41, %v4469_v60  ;;  %v4517_v60 = vld [vmem:[#allocation8 + $0x240] sm:$0xff]  ;;  %v4526_v41 = vld [vmem:[#allocation8 + $0x288] sm:$0xff] }
 0x6b3   :  { %9907 = vmatpush1.bf16.msra.mxu0 %v13864_v15 }
 0x6b4   :  { %8879 = vmatpush1.bf16.msra.mxu1 %v8878_v59  ;;  %9909 = vmatprep.subr.bf16.mxu0 %v13882_v38  ;;  %v8896_v59 = vpack.c.bf16 %v4482_v61, %v4478_v24  ;;  %v4530_v24 = vld [vmem:[#allocation8 + $0x2a8] sm:$0xff] }
 0x6b5   :  { %4850 = vmatprep.subr.mxu1 %v4726_v36  ;;  %v4477_v36 = vld [vmem:[#allocation8 + $0x100] sm:$0xff]  ;;  %v8920_v61 = vpack.c.bf16 %v4530_v24, %v4526_v41  ;;  %v4504_v41 = vld [vmem:[#allocation8 + $0x1d8] sm:$0xff] }
 0x6b6   :  { %v4508_v24 = vld [vmem:[#allocation8 + $0x1f8] sm:$0xff] }
 0x6b7   :  { %9911 = vmatpush1.bf16.msra.mxu0 %v13880_v45 }
 0x6b8   :  { %4851 = vmatpush1.msra.mxu1 %v4725_v56  ;;  %9913 = vmatprep.subr.bf16.mxu0 %v13898_v23  ;;  %v4498_v56 = vld [vmem:[#allocation8 + $0x1a8] sm:$0xff] }
 0x6b9   :  { %4867 = vmatmul.mubr.f32.vlgmr.msra.gmra.mrb[60].mxu1 %v14159_v44  ;;  %8881 = vmatprep.subr.bf16.mxu1 %v8880_v43  ;;  %v8890_v44 = vpack.c.bf16 %v4465_v8, %v4461_v19  ;;  %v14219_v43 = vpop.f32.mrb[110].mxu0 }
 0x6ba   :  { %8883 = vmatpush1.bf16.msra.mxu1 %v8882_v62  ;;  %8307 = vmatprep.mubr.msk.f32.mxu1 %vm4727_vm12, %v14119_v31  ;;  %v4493_v62 = vld [vmem:[#allocation8 + $0x180] sm:$0xff] }
 0x6bb   :  { %9915 = vmatpush1.bf16.msra.mxu0 %v13896_v63  ;;  %8885 = vmatprep.subr.bf16.mxu1 %v8884_v27  ;;  %v4497_v27 = vld [vmem:[#allocation8 + $0x1a0] sm:$0xff] }
 0x6bc   :  { %8359 = vmatprep.subr.msk.mxu0 %vm193_vm3, %v13902_v9 }
 0x6be   :  { %8887 = vmatpush1.bf16.msra.mxu1 %v8886_v14  ;;  %v4510_v14 = vld [vmem:[#allocation8 + $0x208] sm:$0xff] }
 0x6bf   :  { %8360 = vmatpush1.msk.msra.mxu0 %vm193_vm3, %v13918_v1  ;;  %8889 = vmatprep.subr.bf16.mxu1 %v8888_v10  ;;  %v4514_v10 = vld [vmem:[#allocation8 + $0x228] sm:$0xff] }
 0x6c0   :  { %10013 = vmatprep.subr.bf16.mxu0 %v13706_v28  ;;  %8362 = vmatmul.mubr.msk.f32.vlgmr.msra.gmra.mrb[122].mxu0 %vm7005_vm15, %v10821_v57  ;;  %v8898_v28 = vpack.c.bf16 %v4481_v20, %v4477_v36  ;;  %v8912_v8 = vpack.c.bf16 %v4514_v10, %v4510_v14  ;;  %v4538_v36 = vld [vmem:[#allocation8 + $0x2e8] sm:$0xff]  ;;  %v4479_v10 = vld [vmem:[#allocation8 + $0x110] sm:$0xff] }
 0x6c1   :  { %10015 = vmatpush1.bf16.msra.mxu0 %v13704_v6  ;;  %v4489_v6 = vld [vmem:[#allocation8 + $0x160] sm:$0xff] }
 0x6c2   :  { %8891 = vmatpush1.bf16.msra.mxu1 %v8890_v44  ;;  %10017 = vmatprep.subr.bf16.mxu0 %v13722_v4  ;;  %v8902_v4 = vpack.c.bf16 %v4489_v6, %v4485_v55  ;;  %v4522_v44 = vld [vmem:[#allocation8 + $0x268] sm:$0xff]  ;;  %v4451_v55 = vld [vmem:[#allocation8 + $0x30] sm:$0xff]  ;;  %v4460_v6 = vld [vmem:[#allocation8 + $0x78] sm:$0xff] }
 0x6c3   :  { %8893 = vmatprep.subr.bf16.mxu1 %v8892_v13  ;;  %v8916_v13 = vpack.c.bf16 %v4522_v44, %v4518_v58  ;;  %v4487_v58 = vld [vmem:[#allocation8 + $0x150] sm:$0xff] }
 0x6c4   :  { %v4491_v44 = vld [vmem:[#allocation8 + $0x170] sm:$0xff] }
 0x6c5   :  { %10019 = vmatpush1.bf16.msra.mxu0 %v13720_v33  ;;  %v8904_v33 = vpack.c.bf16 %v4498_v56, %v4494_v46  ;;  %v4541_v46 = vld [vmem:[#allocation8 + $0x300] sm:$0xff] }
 0x6c6   :  { %8895 = vmatpush1.bf16.msra.mxu1 %v8894_v53  ;;  %10021 = vmatprep.subr.bf16.mxu0 %v13738_v30  ;;  %v14221_v30 = vpop.f32.mrb[111].mxu0  ;;  %v4525_v53 = vld [vmem:[#allocation8 + $0x280] sm:$0xff] }
 0x6c7   :  { %8897 = vmatprep.subr.bf16.mxu1 %v8896_v59  ;;  %v4534_v59 = vld [vmem:[#allocation8 + $0x2c8] sm:$0xff] }
 0x6c8   :  { %v8924_v20 = vpack.c.bf16 %v4538_v36, %v4534_v59  ;;  %v4512_v59 = vld [vmem:[#allocation8 + $0x218] sm:$0xff] }
 0x6c9   :  { %10023 = vmatpush1.bf16.msra.mxu0 %v13736_v5  ;;  %v8906_v5 = vpack.c.bf16 %v4497_v27, %v4493_v62  ;;  %v4468_v62 = vld [vmem:[#allocation8 + $0xb8] sm:$0xff]  ;;  %v4463_v27 = vld [vmem:[#allocation8 + $0x90] sm:$0xff] }
 0x6ca   :  { %8899 = vmatpush1.bf16.msra.mxu1 %v8898_v28  ;;  %10025 = vmatprep.subr.bf16.mxu0 %v13754_v40  ;;  %v4501_v40 = vld [vmem:[#allocation8 + $0x1c0] sm:$0xff]  ;;  %v4448_v28 = vld [vmem:[#allocation8 + $0x18] sm:$0xff] }
 0x6cb   :  { %8901 = vmatprep.subr.bf16.mxu1 %v8900_v52  ;;  %v8910_v19 = vpack.c.bf16 %v4505_v50, %v4501_v40  ;;  %v4452_v52 = vld [vmem:[#allocation8 + $0x38] sm:$0xff]  ;;  %v4471_v40 = vld [vmem:[#allocation8 + $0xd0] sm:$0xff] }
 0x6cc   :  { %v4475_v50 = vld [vmem:[#allocation8 + $0xf0] sm:$0xff]  ;;  %v4516_v36 = vld [vmem:[#allocation8 + $0x238] sm:$0xff] }
 0x6cd   :  { %10027 = vmatpush1.bf16.msra.mxu0 %v13752_v3  ;;  %v4513_v3 = vld [vmem:[#allocation8 + $0x220] sm:$0xff]  ;;  %v8942_v14 = vpack.c.bf16 %v4475_v50, %v4471_v40  ;;  %v5109_v40 = vld [vmem:[#allocation8 + $0x688] sm:$0xff] }
 0x6ce   :  { %8903 = vmatpush1.bf16.msra.mxu1 %v8902_v4  ;;  %10029 = vmatprep.subr.bf16.mxu0 %v13770_v22  ;;  %v8914_v22 = vpack.c.bf16 %v4513_v3, %v4509_v18  ;;  %v4455_v4 = vld [vmem:[#allocation8 + $0x50] sm:$0xff]  ;;  %v5113_v50 = vld [vmem:[#allocation8 + $0x6a8] sm:$0xff] }
 0x6cf   :  { %8905 = vmatprep.subr.bf16.mxu1 %v8904_v33  ;;  %v4459_v33 = vld [vmem:[#allocation8 + $0x70] sm:$0xff] }
 0x6d1   :  { %10031 = vmatpush1.bf16.msra.mxu0 %v13768_v34  ;;  %v4521_v34 = vld [vmem:[#allocation8 + $0x260] sm:$0xff] }
 0x6d2   :  { %8907 = vmatpush1.bf16.msra.mxu1 %v8906_v5  ;;  %10033 = vmatprep.subr.bf16.mxu0 %v13786_v25  ;;  %v8918_v25 = vpack.c.bf16 %v4521_v34, %v4517_v60  ;;  %v8938_v5 = vpack.c.bf16 %v4467_v2, %v4463_v27  ;;  %v4495_v34 = vld [vmem:[#allocation8 + $0x190] sm:$0xff]  ;;  %v4544_v2 = vld [vmem:[#allocation8 + $0x318] sm:$0xff] }
 0x6d3   :  { %8909 = vmatprep.subr.bf16.mxu1 %v8908_v48 }
 0x6d5   :  { %10035 = vmatpush1.bf16.msra.mxu0 %v13784_v39  ;;  %v4529_v39 = vld [vmem:[#allocation8 + $0x2a0] sm:$0xff] }
 0x6d6   :  { %8911 = vmatpush1.bf16.msra.mxu1 %v8910_v19  ;;  %10037 = vmatprep.subr.bf16.mxu0 %v13802_v17  ;;  %v8922_v17 = vpack.c.bf16 %v4529_v39, %v4525_v53  ;;  %v4483_v19 = vld [vmem:[#allocation8 + $0x130] sm:$0xff] }
 0x6d7   :  { %8913 = vmatprep.subr.bf16.mxu1 %v8912_v8  ;;  %v4488_v8 = vld [vmem:[#allocation8 + $0x158] sm:$0xff]  ;;  %v8946_v18 = vpack.c.bf16 %v4483_v19, %v4479_v10  ;;  %v4503_v53 = vld [vmem:[#allocation8 + $0x1d0] sm:$0xff]  ;;  %v5108_v10 = vld [vmem:[#allocation8 + $0x680] sm:$0xff] }
 0x6d8   :  { %v4507_v39 = vld [vmem:[#allocation8 + $0x1f0] sm:$0xff]  ;;  %v5112_v19 = vld [vmem:[#allocation8 + $0x6a0] sm:$0xff] }
 0x6d9   :  { %10039 = vmatpush1.bf16.msra.mxu0 %v13800_v29  ;;  %v4537_v29 = vld [vmem:[#allocation8 + $0x2e0] sm:$0xff] }
 0x6da   :  { %8915 = vmatpush1.bf16.msra.mxu1 %v8914_v22  ;;  %10041 = vmatprep.subr.bf16.mxu0 %v13818_v47  ;;  %v8926_v47 = vpack.c.bf16 %v4537_v29, %v4533_v49  ;;  %v4500_v22 = vld [vmem:[#allocation8 + $0x1b8] sm:$0xff]  ;;  %v4511_v49 = vld [vmem:[#allocation8 + $0x210] sm:$0xff] }
 0x6db   :  { %8917 = vmatprep.subr.bf16.mxu1 %v8916_v13  ;;  %v8950_v13 = vpack.c.bf16 %v4491_v44, %v4487_v58  ;;  %v4515_v29 = vld [vmem:[#allocation8 + $0x230] sm:$0xff]  ;;  %v5116_v58 = vld [vmem:[#allocation8 + $0x6c0] sm:$0xff] }
 0x6dc   :  { %v5120_v44 = vld [vmem:[#allocation8 + $0x6e0] sm:$0xff] }
 0x6dd   :  { %10043 = vmatpush1.bf16.msra.mxu0 %v13816_v0  ;;  %v4447_v0 = vld [vmem:[#allocation8 + $0x10] sm:$0xff] }
 0x6de   :  { %8919 = vmatpush1.bf16.msra.mxu1 %v8918_v25  ;;  %10045 = vmatprep.subr.bf16.mxu0 %v13834_v11  ;;  %v4456_v11 = vld [vmem:[#allocation8 + $0x58] sm:$0xff]  ;;  %v8930_v56 = vpack.c.bf16 %v4451_v55, %v4447_v0  ;;  %v4519_v0 = vld [vmem:[#allocation8 + $0x250] sm:$0xff] }
 0x6df   :  { %8921 = vmatprep.subr.bf16.mxu1 %v8920_v61  ;;  %v8956_v61 = vpack.c.bf16 %v4508_v24, %v4504_v41  ;;  %v4523_v55 = vld [vmem:[#allocation8 + $0x270] sm:$0xff]  ;;  %v5133_v41 = vld [vmem:[#allocation8 + $0x748] sm:$0xff] }
 0x6e1   :  { %10047 = vmatpush1.bf16.msra.mxu0 %v13832_v35  ;;  %v8928_v35 = vpack.c.bf16 %v4452_v52, %v4448_v28  ;;  %v8962_v28 = vpack.c.bf16 %v4515_v29, %v4511_v49  ;;  %v5144_v49 = vld [vmem:[#allocation8 + $0x7a0] sm:$0xff]  ;;  %v5149_v29 = vld [vmem:[#allocation8 + $0x7c8] sm:$0xff] }
 0x6e2   :  { %8923 = vmatpush1.bf16.msra.mxu1 %v8922_v17  ;;  %10049 = vmatprep.subr.bf16.mxu0 %v13850_v32  ;;  %v8932_v32 = vpack.c.bf16 %v4460_v6, %v4456_v11  ;;  %v8958_v17 = vpack.c.bf16 %v4507_v39, %v4503_v53  ;;  %v4528_v11 = vld [vmem:[#allocation8 + $0x298] sm:$0xff]  ;;  %v5136_v53 = vld [vmem:[#allocation8 + $0x760] sm:$0xff]  ;;  %v5141_v39 = vld [vmem:[#allocation8 + $0x788] sm:$0xff] }
 0x6e3   :  { %8925 = vmatprep.subr.bf16.mxu1 %v8924_v20  ;;  %v8960_v20 = vpack.c.bf16 %v4516_v36, %v4512_v59  ;;  %v4532_v6 = vld [vmem:[#allocation8 + $0x2b8] sm:$0xff]  ;;  %v5145_v59 = vld [vmem:[#allocation8 + $0x7a8] sm:$0xff] }
 0x6e5   :  { %10051 = vmatpush1.bf16.msra.mxu0 %v13848_v51  ;;  %v4464_v51 = vld [vmem:[#allocation8 + $0x98] sm:$0xff] }
 0x6e6   :  { %8927 = vmatpush1.bf16.msra.mxu1 %v8926_v47  ;;  %10053 = vmatprep.subr.bf16.mxu0 %v13866_v54  ;;  %v8934_v54 = vpack.c.bf16 %v4459_v33, %v4455_v4  ;;  %v4520_v47 = vld [vmem:[#allocation8 + $0x258] sm:$0xff] }
 0x6e7   :  { %4924 = vmatprep.subr.mxu1 %v4542_v16  ;;  %v4524_v16 = vld [vmem:[#allocation8 + $0x278] sm:$0xff] }
 0x6e8   :  { %v8964_v52 = vpack.c.bf16 %v4524_v16, %v4520_v47  ;;  %v4536_v4 = vld [vmem:[#allocation8 + $0x2d8] sm:$0xff]  ;;  %v5153_v47 = vld [vmem:[#allocation8 + $0x7e8] sm:$0xff] }
 0x6e9   :  { %10055 = vmatpush1.bf16.msra.mxu0 %v13864_v15  ;;  %v8936_v15 = vpack.c.bf16 %v4468_v62, %v4464_v51  ;;  %v4540_v33 = vld [vmem:[#allocation8 + $0x2f8] sm:$0xff] }
 0x6ea   :  { %4925 = vmatpush1.msra.mxu1 %v4541_v46  ;;  %10057 = vmatprep.subr.bf16.mxu0 %v13882_v38  ;;  %v4476_v38 = vld [vmem:[#allocation8 + $0xf8] sm:$0xff]  ;;  %v8966_v46 = vpack.c.bf16 %v4523_v55, %v4519_v0  ;;  %v8972_v62 = vpack.c.bf16 %v4540_v33, %v4536_v4  ;;  %v5148_v0 = vld [vmem:[#allocation8 + $0x7c0] sm:$0xff]  ;;  %v5165_v33 = vld [vmem:[#allocation8 + $0x848] sm:$0xff] }
 0x6eb   :  { %4941 = vmatmul.mubr.f32.vlgmr.msra.gmra.mrb[58].mxu1 %v14116_v37  ;;  %8929 = vmatprep.subr.bf16.mxu1 %v8928_v35  ;;  %v8940_v48 = vpack.c.bf16 %v4476_v38, %v4472_v26  ;;  %v8968_v35 = vpack.c.bf16 %v4532_v6, %v4528_v11  ;;  %v5101_v26 = vld [vmem:[#allocation8 + $0x648] sm:$0xff]  ;;  %v5152_v55 = vld [vmem:[#allocation8 + $0x7e0] sm:$0xff] }
 0x6ec   :  { %8931 = vmatpush1.bf16.msra.mxu1 %v8930_v56  ;;  %8308 = vmatprep.mubr.msk.f32.mxu1 %vm4727_vm12, %v14119_v31  ;;  %v4484_v31 = vld [vmem:[#allocation8 + $0x138] sm:$0xff]  ;;  %v4527_v56 = vld [vmem:[#allocation8 + $0x290] sm:$0xff]  ;;  %v5105_v38 = vld [vmem:[#allocation8 + $0x668] sm:$0xff] }
 0x6ed   :  { %10059 = vmatpush1.bf16.msra.mxu0 %v13880_v45  ;;  %8933 = vmatprep.subr.bf16.mxu1 %v8932_v32  ;;  %v4480_v45 = vld [vmem:[#allocation8 + $0x118] sm:$0xff]  ;;  %v4531_v32 = vld [vmem:[#allocation8 + $0x2b0] sm:$0xff]  ;;  %v5157_v6 = vld [vmem:[#allocation8 + $0x808] sm:$0xff] }
 0x6ee   :  { %10061 = vmatprep.subr.bf16.mxu0 %v13898_v23  ;;  %v8944_v23 = vpack.c.bf16 %v4484_v31, %v4480_v45  ;;  %v8970_v51 = vpack.c.bf16 %v4531_v32, %v4527_v56  ;;  %v4543_v45 = vld [vmem:[#allocation8 + $0x310] sm:$0xff]  ;;  %v9028_v31 = vpack.c.bf16 %v5105_v38, %v5101_v26  ;;  %v5156_v32 = vld [vmem:[#allocation8 + $0x800] sm:$0xff]  ;;  %v5177_v26 = vld [vmem:[#allocation8 + $0x8a8] sm:$0xff] }
 0x6ef   :  { %v5160_v4 = vld [vmem:[#allocation8 + $0x820] sm:$0xff] }
 0x6f0   :  { %8935 = vmatpush1.bf16.msra.mxu1 %v8934_v54  ;;  %v4535_v54 = vld [vmem:[#allocation8 + $0x2d0] sm:$0xff] }
 0x6f1   :  { %10063 = vmatpush1.bf16.msra.mxu0 %v13896_v63  ;;  %8937 = vmatprep.subr.bf16.mxu1 %v8936_v15  ;;  %v4492_v63 = vld [vmem:[#allocation8 + $0x178] sm:$0xff]  ;;  %v4539_v15 = vld [vmem:[#allocation8 + $0x2f0] sm:$0xff] }
 0x6f2   :  { %8367 = vmatprep.subr.msk.mxu0 %vm193_vm3, %v13902_v9  ;;  %v8948_v3 = vpack.c.bf16 %v4492_v63, %v4488_v8  ;;  %v4496_v9 = vld [vmem:[#allocation8 + $0x198] sm:$0xff]  ;;  %v8974_v27 = vpack.c.bf16 %v4539_v15, %v4535_v54  ;;  %v5117_v8 = vld [vmem:[#allocation8 + $0x6c8] sm:$0xff]  ;;  %v5164_v15 = vld [vmem:[#allocation8 + $0x840] sm:$0xff] }
 0x6f3   :  { %v8952_v60 = vpack.c.bf16 %v4500_v22, %v4496_v9  ;;  %v5121_v63 = vld [vmem:[#allocation8 + $0x6e8] sm:$0xff] }
 0x6f4   :  { %8939 = vmatpush1.bf16.msra.mxu1 %v8938_v5  ;;  %v5100_v5 = vld [vmem:[#allocation8 + $0x640] sm:$0xff]  ;;  %v5125_v9 = vld [vmem:[#allocation8 + $0x708] sm:$0xff] }
 0x6f5   :  { %8368 = vmatpush1.msk.msra.mxu0 %vm193_vm3, %v13918_v1  ;;  %8941 = vmatprep.subr.bf16.mxu1 %v8940_v48  ;;  %v4499_v1 = vld [vmem:[#allocation8 + $0x1b0] sm:$0xff]  ;;  %v5104_v48 = vld [vmem:[#allocation8 + $0x660] sm:$0xff]  ;;  %v5129_v22 = vld [vmem:[#allocation8 + $0x728] sm:$0xff] }
 0x6f6   :  { %v8954_v25 = vpack.c.bf16 %v4499_v1, %v4495_v34  ;;  %v5124_v34 = vld [vmem:[#allocation8 + $0x700] sm:$0xff] }
 0x6f7   :  { %v5128_v1 = vld [vmem:[#allocation8 + $0x720] sm:$0xff] }
 0x6f8   :  { %8943 = vmatpush1.bf16.msra.mxu1 %v8942_v14  ;;  %v9030_v14 = vpack.c.bf16 %v5104_v48, %v5100_v5  ;;  %v9042_v24 = vpack.c.bf16 %v5128_v1, %v5124_v34  ;;  %v5172_v48 = vld [vmem:[#allocation8 + $0x880] sm:$0xff]  ;;  %v5106_v34 = vld [vmem:[#allocation8 + $0x670] sm:$0xff]  ;;  %v5111_v1 = vld [vmem:[#allocation8 + $0x698] sm:$0xff] }
 0x6f9   :  { %8945 = vmatprep.subr.bf16.mxu1 %v8944_v23  ;;  %v9032_v23 = vpack.c.bf16 %v5113_v50, %v5109_v40  ;;  %v5176_v40 = vld [vmem:[#allocation8 + $0x8a0] sm:$0xff]  ;;  %v5181_v50 = vld [vmem:[#allocation8 + $0x8c8] sm:$0xff] }
 0x6fc   :  { %8947 = vmatpush1.bf16.msra.mxu1 %v8946_v18  ;;  %v9034_v18 = vpack.c.bf16 %v5112_v19, %v5108_v10  ;;  %v5184_v10 = vld [vmem:[#allocation8 + $0x8e0] sm:$0xff]  ;;  %v5189_v19 = vld [vmem:[#allocation8 + $0x908] sm:$0xff] }
 0x6fd   :  { %8949 = vmatprep.subr.bf16.mxu1 %v8948_v3  ;;  %v9036_v3 = vpack.c.bf16 %v5121_v63, %v5117_v8  ;;  %v5193_v8 = vld [vmem:[#allocation8 + $0x928] sm:$0xff] }
 0x700   :  { %8951 = vmatpush1.bf16.msra.mxu1 %v8950_v13  ;;  %v9038_v13 = vpack.c.bf16 %v5120_v44, %v5116_v58  ;;  %v5192_v58 = vld [vmem:[#allocation8 + $0x920] sm:$0xff] }
 0x701   :  { %8953 = vmatprep.subr.bf16.mxu1 %v8952_v60  ;;  %v9040_v60 = vpack.c.bf16 %v5129_v22, %v5125_v9  ;;  %v5197_v9 = vld [vmem:[#allocation8 + $0x948] sm:$0xff]  ;;  %v5103_v22 = vld [vmem:[#allocation8 + $0x658] sm:$0xff] }
 0x704   :  { %8955 = vmatpush1.bf16.msra.mxu1 %v8954_v25 }
 0x705   :  { %8957 = vmatprep.subr.bf16.mxu1 %v8956_v61  ;;  %v5132_v61 = vld [vmem:[#allocation8 + $0x740] sm:$0xff] }
 0x706   :  { %v9046_v36 = vpack.c.bf16 %v5136_v53, %v5132_v61  ;;  %v5110_v53 = vld [vmem:[#allocation8 + $0x690] sm:$0xff] }
 0x708   :  { %8959 = vmatpush1.bf16.msra.mxu1 %v8958_v17  ;;  %v9048_v17 = vpack.c.bf16 %v5145_v59, %v5141_v39  ;;  %v5114_v39 = vld [vmem:[#allocation8 + $0x6b0] sm:$0xff]  ;;  %v5119_v59 = vld [vmem:[#allocation8 + $0x6d8] sm:$0xff] }
 0x709   :  { %8961 = vmatprep.subr.bf16.mxu1 %v8960_v20  ;;  %v5140_v20 = vld [vmem:[#allocation8 + $0x780] sm:$0xff] }
 0x70a   :  { %v9050_v16 = vpack.c.bf16 %v5144_v49, %v5140_v20  ;;  %v5118_v49 = vld [vmem:[#allocation8 + $0x6d0] sm:$0xff] }
 0x70c   :  { %8963 = vmatpush1.bf16.msra.mxu1 %v8962_v28  ;;  %v14252_v28 = vpop.f32.mrb[112].mxu0 }
 0x70d   :  { %8965 = vmatprep.subr.bf16.mxu1 %v8964_v52  ;;  %v9052_v52 = vpack.c.bf16 %v5153_v47, %v5149_v29  ;;  %v14254_v11 = vpop.f32.mrb[113].mxu0  ;;  %v5122_v29 = vld [vmem:[#allocation8 + $0x6f0] sm:$0xff]  ;;  %v5127_v47 = vld [vmem:[#allocation8 + $0x718] sm:$0xff] }
 0x710   :  { %8967 = vmatpush1.bf16.msra.mxu1 %v8966_v46  ;;  %v5161_v46 = vld [vmem:[#allocation8 + $0x828] sm:$0xff] }
 0x711   :  { %8969 = vmatprep.subr.bf16.mxu1 %v8968_v35  ;;  %v9054_v35 = vpack.c.bf16 %v5152_v55, %v5148_v0  ;;  %v9056_v56 = vpack.c.bf16 %v5161_v46, %v5157_v6  ;;  %v5126_v55 = vld [vmem:[#allocation8 + $0x710] sm:$0xff]  ;;  %v5135_v46 = vld [vmem:[#allocation8 + $0x758] sm:$0xff] }
 0x712   :  { %v5130_v6 = vld [vmem:[#allocation8 + $0x730] sm:$0xff] }
 0x714   :  { %8971 = vmatpush1.bf16.msra.mxu1 %v8970_v51  ;;  %v5169_v51 = vld [vmem:[#allocation8 + $0x868] sm:$0xff] }
 0x715   :  { %8973 = vmatprep.subr.bf16.mxu1 %v8972_v62  ;;  %v9058_v62 = vpack.c.bf16 %v5160_v4, %v5156_v32  ;;  %v9060_v54 = vpack.c.bf16 %v5169_v51, %v5165_v33  ;;  %v5134_v4 = vld [vmem:[#allocation8 + $0x750] sm:$0xff]  ;;  %v5143_v33 = vld [vmem:[#allocation8 + $0x798] sm:$0xff] }
 0x716   :  { %v5147_v51 = vld [vmem:[#allocation8 + $0x7b8] sm:$0xff] }
 0x718   :  { %8975 = vmatpush1.bf16.msra.mxu1 %v8974_v27  ;;  %v5168_v27 = vld [vmem:[#allocation8 + $0x860] sm:$0xff] }
 0x719   :  { %4995 = vmatprep.subr.mxu1 %v4544_v2  ;;  %v5173_v2 = vld [vmem:[#allocation8 + $0x888] sm:$0xff]  ;;  %v9062_v38 = vpack.c.bf16 %v5168_v27, %v5164_v15  ;;  %v5142_v15 = vld [vmem:[#allocation8 + $0x790] sm:$0xff] }
 0x71a   :  { %v9064_v5 = vpack.c.bf16 %v5177_v26, %v5173_v2  ;;  %v5146_v27 = vld [vmem:[#allocation8 + $0x7b0] sm:$0xff]  ;;  %v5151_v2 = vld [vmem:[#allocation8 + $0x7d8] sm:$0xff] }
 0x71b   :  { %v5155_v26 = vld [vmem:[#allocation8 + $0x7f8] sm:$0xff] }
 0x71c   :  { %4996 = vmatpush1.msra.mxu1 %v4543_v45  ;;  %v5185_v45 = vld [vmem:[#allocation8 + $0x8e8] sm:$0xff] }
 0x71d   :  { %5012 = vmatmul.mubr.f32.vlgmr.msra.gmra.mrb[60].mxu1 %v14116_v37  ;;  %9029 = vmatprep.subr.bf16.mxu1 %v9028_v31  ;;  %v5137_v37 = vld [vmem:[#allocation8 + $0x768] sm:$0xff]  ;;  %v9066_v31 = vpack.c.bf16 %v5176_v40, %v5172_v48  ;;  %v5150_v48 = vld [vmem:[#allocation8 + $0x7d0] sm:$0xff] }
 0x71e   :  { %9031 = vmatpush1.bf16.msra.mxu1 %v9030_v14  ;;  %8315 = vmatprep.mubr.msk.f32.mxu1 %vm4727_vm12, %v14221_v30  ;;  %v9044_v25 = vpack.c.bf16 %v5137_v37, %v5133_v41  ;;  %v9068_v14 = vpack.c.bf16 %v5185_v45, %v5181_v50  ;;  %v5115_v41 = vld [vmem:[#allocation8 + $0x6b8] sm:$0xff]  ;;  %v5196_v37 = vld [vmem:[#allocation8 + $0x940] sm:$0xff]  ;;  %v5154_v40 = vld [vmem:[#allocation8 + $0x7f0] sm:$0xff] }
 0x71f   :  { %9033 = vmatprep.subr.bf16.mxu1 %v9032_v23  ;;  %v5180_v23 = vld [vmem:[#allocation8 + $0x8c0] sm:$0xff]  ;;  %v9080_v61 = vpack.c.bf16 %v5115_v41, %v5111_v1  ;;  %v5159_v50 = vld [vmem:[#allocation8 + $0x818] sm:$0xff] }
 0x720   :  { %v9070_v63 = vpack.c.bf16 %v5184_v10, %v5180_v23  ;;  %v5163_v45 = vld [vmem:[#allocation8 + $0x838] sm:$0xff]  ;;  %v5158_v23 = vld [vmem:[#allocation8 + $0x810] sm:$0xff] }
 0x721   :  { %v5162_v10 = vld [vmem:[#allocation8 + $0x830] sm:$0xff]  ;;  %v5183_v1 = vld [vmem:[#allocation8 + $0x8d8] sm:$0xff] }
 0x722   :  { %9035 = vmatpush1.bf16.msra.mxu1 %v9034_v18  ;;  %v9072_v18 = vpack.c.bf16 %v5193_v8, %v5189_v19  ;;  %v5167_v19 = vld [vmem:[#allocation8 + $0x858] sm:$0xff] }
 0x723   :  { %9037 = vmatprep.subr.bf16.mxu1 %v9036_v3  ;;  %v5188_v3 = vld [vmem:[#allocation8 + $0x900] sm:$0xff]  ;;  %v5171_v8 = vld [vmem:[#allocation8 + $0x878] sm:$0xff] }
 0x724   :  { %v9074_v44 = vpack.c.bf16 %v5192_v58, %v5188_v3  ;;  %v5166_v3 = vld [vmem:[#allocation8 + $0x850] sm:$0xff]  ;;  %v5187_v41 = vld [vmem:[#allocation8 + $0x8f8] sm:$0xff] }
 0x725   :  { %v5170_v58 = vld [vmem:[#allocation8 + $0x870] sm:$0xff] }
 0x726   :  { %9039 = vmatpush1.bf16.msra.mxu1 %v9038_v13  ;;  %v5107_v13 = vld [vmem:[#allocation8 + $0x678] sm:$0xff] }
 0x727   :  { %9041 = vmatprep.subr.bf16.mxu1 %v9040_v60  ;;  %v5102_v60 = vld [vmem:[#allocation8 + $0x650] sm:$0xff] }
 0x72a   :  { %9043 = vmatpush1.bf16.msra.mxu1 %v9042_v24  ;;  %v9076_v24 = vpack.c.bf16 %v5107_v13, %v5103_v22  ;;  %v9110_v22 = vpack.c.bf16 %v5170_v58, %v5166_v3  ;;  %v5475_v3 = vld [vmem:[#allocation8 + $0xac0] sm:$0xff]  ;;  %v5480_v58 = vld [vmem:[#allocation8 + $0xae8] sm:$0xff] }
 0x72b   :  { %9045 = vmatprep.subr.bf16.mxu1 %v9044_v25  ;;  %v9078_v25 = vpack.c.bf16 %v5106_v34, %v5102_v60  ;;  %v5174_v60 = vld [vmem:[#allocation8 + $0x890] sm:$0xff] }
 0x72c   :  { %v5178_v34 = vld [vmem:[#allocation8 + $0x8b0] sm:$0xff] }
 0x72e   :  { %9047 = vmatpush1.bf16.msra.mxu1 %v9046_v36  ;;  %v5123_v36 = vld [vmem:[#allocation8 + $0x6f8] sm:$0xff] }
 0x72f   :  { %9049 = vmatprep.subr.bf16.mxu1 %v9048_v17  ;;  %v9082_v17 = vpack.c.bf16 %v5114_v39, %v5110_v53  ;;  %v9084_v20 = vpack.c.bf16 %v5123_v36, %v5119_v59  ;;  %v5191_v53 = vld [vmem:[#allocation8 + $0x918] sm:$0xff] }
 0x730   :  { %v5195_v39 = vld [vmem:[#allocation8 + $0x938] sm:$0xff] }
 0x731   :  { %v9120_v36 = vpack.c.bf16 %v5195_v39, %v5191_v53  ;;  %v5491_v53 = vld [vmem:[#allocation8 + $0xb40] sm:$0xff]  ;;  %v5496_v39 = vld [vmem:[#allocation8 + $0xb68] sm:$0xff] }
 0x732   :  { %9051 = vmatpush1.bf16.msra.mxu1 %v9050_v16  ;;  %v5131_v16 = vld [vmem:[#allocation8 + $0x738] sm:$0xff] }
 0x733   :  { %9053 = vmatprep.subr.bf16.mxu1 %v9052_v52  ;;  %v9086_v52 = vpack.c.bf16 %v5122_v29, %v5118_v49  ;;  %v9088_v0 = vpack.c.bf16 %v5131_v16, %v5127_v47  ;;  %v5199_v29 = vld [vmem:[#allocation8 + $0x958] sm:$0xff]  ;;  %v5432_v47 = vld [vmem:[#allocation8 + $0x968] sm:$0xff] }
 0x734   :  { %v5436_v16 = vld [vmem:[#allocation8 + $0x988] sm:$0xff] }
 0x736   :  { %9055 = vmatpush1.bf16.msra.mxu1 %v9054_v35  ;;  %v5139_v35 = vld [vmem:[#allocation8 + $0x778] sm:$0xff] }
 0x737   :  { %9057 = vmatprep.subr.bf16.mxu1 %v9056_v56  ;;  %v9090_v56 = vpack.c.bf16 %v5130_v6, %v5126_v55  ;;  %v9092_v32 = vpack.c.bf16 %v5139_v35, %v5135_v46  ;;  %v5440_v55 = vld [vmem:[#allocation8 + $0x9a8] sm:$0xff]  ;;  %v5198_v46 = vld [vmem:[#allocation8 + $0x950] sm:$0xff]  ;;  %v9176_v35 = vpack.c.bf16 %v5436_v16, %v5432_v47 }
 0x738   :  { %v5444_v6 = vld [vmem:[#allocation8 + $0x9c8] sm:$0xff] }
 0x739   :  { %v5508_v47 = vld [vmem:[#allocation8 + $0xbc8] sm:$0xff] }
 0x73a   :  { %9059 = vmatpush1.bf16.msra.mxu1 %v9058_v62 }
 0x73b   :  { %9061 = vmatprep.subr.bf16.mxu1 %v9060_v54  ;;  %v9096_v54 = vpack.c.bf16 %v5147_v51, %v5143_v33  ;;  %v5448_v33 = vld [vmem:[#allocation8 + $0x9e8] sm:$0xff] }
 0x73c   :  { %v5452_v51 = vld [vmem:[#allocation8 + $0xa08] sm:$0xff] }
 0x73e   :  { %9063 = vmatpush1.bf16.msra.mxu1 %v9062_v38  ;;  %v9098_v38 = vpack.c.bf16 %v5146_v27, %v5142_v15  ;;  %v5447_v15 = vld [vmem:[#allocation8 + $0x9e0] sm:$0xff] }
 0x73f   :  { %9065 = vmatprep.subr.bf16.mxu1 %v9064_v5  ;;  %v9100_v5 = vpack.c.bf16 %v5155_v26, %v5151_v2  ;;  %v5451_v27 = vld [vmem:[#allocation8 + $0xa00] sm:$0xff]  ;;  %v5456_v2 = vld [vmem:[#allocation8 + $0xa28] sm:$0xff] }
 0x740   :  { %v5460_v26 = vld [vmem:[#allocation8 + $0xa48] sm:$0xff] }
 0x742   :  { %9067 = vmatpush1.bf16.msra.mxu1 %v9066_v31  ;;  %v9102_v31 = vpack.c.bf16 %v5154_v40, %v5150_v48  ;;  %v5455_v48 = vld [vmem:[#allocation8 + $0xa20] sm:$0xff] }
 0x743   :  { %9069 = vmatprep.subr.bf16.mxu1 %v9068_v14  ;;  %v9104_v14 = vpack.c.bf16 %v5163_v45, %v5159_v50  ;;  %v5459_v40 = vld [vmem:[#allocation8 + $0xa40] sm:$0xff]  ;;  %v5464_v50 = vld [vmem:[#allocation8 + $0xa68] sm:$0xff] }
 0x744   :  { %v9190_v45 = vpack.c.bf16 %v5459_v40, %v5455_v48  ;;  %v5437_v48 = vld [vmem:[#allocation8 + $0x990] sm:$0xff]  ;;  %v5442_v40 = vld [vmem:[#allocation8 + $0x9b8] sm:$0xff] }
 0x746   :  { %9071 = vmatpush1.bf16.msra.mxu1 %v9070_v63  ;;  %v9106_v63 = vpack.c.bf16 %v5162_v10, %v5158_v23  ;;  %v5467_v23 = vld [vmem:[#allocation8 + $0xa80] sm:$0xff]  ;;  %v5472_v10 = vld [vmem:[#allocation8 + $0xaa8] sm:$0xff] }
 0x747   :  { %9073 = vmatprep.subr.bf16.mxu1 %v9072_v18  ;;  %v9108_v18 = vpack.c.bf16 %v5171_v8, %v5167_v19  ;;  %v5476_v19 = vld [vmem:[#allocation8 + $0xac8] sm:$0xff] }
 0x74a   :  { %9075 = vmatpush1.bf16.msra.mxu1 %v9074_v44  ;;  %v5175_v44 = vld [vmem:[#allocation8 + $0x898] sm:$0xff] }
 0x74b   :  { %5251 = vmatprep.subr.mxu1 %v5197_v9  ;;  %v5179_v9 = vld [vmem:[#allocation8 + $0x8b8] sm:$0xff] }
 0x74c   :  { %v9112_v13 = vpack.c.bf16 %v5179_v9, %v5175_v44  ;;  %v5484_v44 = vld [vmem:[#allocation8 + $0xb08] sm:$0xff] }
 0x74e   :  { %5252 = vmatpush1.msra.mxu1 %v5196_v37  ;;  %v9114_v37 = vpack.c.bf16 %v5178_v34, %v5174_v60  ;;  %v5479_v60 = vld [vmem:[#allocation8 + $0xae0] sm:$0xff] }
 0x74f   :  { %9077 = vmatprep.subr.bf16.mxu1 %v9076_v24  ;;  %5268 = vmatmul.mubr.f32.vlgmr.msra.gmra.mrb[58].mxu1 %v14219_v43  ;;  %v9116_v24 = vpack.c.bf16 %v5187_v41, %v5183_v1  ;;  %v5483_v34 = vld [vmem:[#allocation8 + $0xb00] sm:$0xff]  ;;  %v5488_v41 = vld [vmem:[#allocation8 + $0xb28] sm:$0xff] }
 0x750   :  { %9079 = vmatpush1.bf16.msra.mxu1 %v9078_v25  ;;  %8316 = vmatprep.mubr.msk.f32.mxu1 %vm4727_vm12, %v14221_v30  ;;  %v5138_v30 = vld [vmem:[#allocation8 + $0x770] sm:$0xff] }
 0x751   :  { %9081 = vmatprep.subr.bf16.mxu1 %v9080_v61  ;;  %v9094_v62 = vpack.c.bf16 %v5138_v30, %v5134_v4  ;;  %v5182_v25 = vld [vmem:[#allocation8 + $0x8d0] sm:$0xff]  ;;  %v5439_v4 = vld [vmem:[#allocation8 + $0x9a0] sm:$0xff] }
 0x752   :  { %v5186_v61 = vld [vmem:[#allocation8 + $0x8f0] sm:$0xff]  ;;  %v5443_v30 = vld [vmem:[#allocation8 + $0x9c0] sm:$0xff] }
 0x753   :  { %v9118_v59 = vpack.c.bf16 %v5186_v61, %v5182_v25  ;;  %v5487_v61 = vld [vmem:[#allocation8 + $0xb20] sm:$0xff] }
 0x754   :  { %9083 = vmatpush1.bf16.msra.mxu1 %v9082_v17  ;;  %v5190_v17 = vld [vmem:[#allocation8 + $0x910] sm:$0xff] }
 0x755   :  { %9085 = vmatprep.subr.bf16.mxu1 %v9084_v20  ;;  %v5194_v20 = vld [vmem:[#allocation8 + $0x930] sm:$0xff] }
 0x756   :  { %v9122_v49 = vpack.c.bf16 %v5194_v20, %v5190_v17  ;;  %v5495_v20 = vld [vmem:[#allocation8 + $0xb60] sm:$0xff] }
 0x758   :  { %9087 = vmatpush1.bf16.msra.mxu1 %v9086_v52  ;;  %v5431_v52 = vld [vmem:[#allocation8 + $0x960] sm:$0xff] }
 0x759   :  { %9089 = vmatprep.subr.bf16.mxu1 %v9088_v0  ;;  %v5435_v0 = vld [vmem:[#allocation8 + $0x980] sm:$0xff] }
 0x75c   :  { %9091 = vmatpush1.bf16.msra.mxu1 %v9090_v56  ;;  %v9178_v56 = vpack.c.bf16 %v5435_v0, %v5431_v52  ;;  %v5503_v0 = vld [vmem:[#allocation8 + $0xba0] sm:$0xff] }
 0x75d   :  { %9093 = vmatprep.subr.bf16.mxu1 %v9092_v32  ;;  %v9180_v32 = vpack.c.bf16 %v5444_v6, %v5440_v55  ;;  %v5507_v55 = vld [vmem:[#allocation8 + $0xbc0] sm:$0xff]  ;;  %v5512_v6 = vld [vmem:[#allocation8 + $0xbe8] sm:$0xff] }
 0x760   :  { %9095 = vmatpush1.bf16.msra.mxu1 %v9094_v62  ;;  %v9182_v62 = vpack.c.bf16 %v5443_v30, %v5439_v4  ;;  %v5515_v4 = vld [vmem:[#allocation8 + $0xc00] sm:$0xff]  ;;  %v5520_v30 = vld [vmem:[#allocation8 + $0xc28] sm:$0xff] }
 0x761   :  { %9097 = vmatprep.subr.bf16.mxu1 %v9096_v54  ;;  %v9184_v54 = vpack.c.bf16 %v5452_v51, %v5448_v33  ;;  %v5524_v33 = vld [vmem:[#allocation8 + $0xc48] sm:$0xff] }
 0x764   :  { %9099 = vmatpush1.bf16.msra.mxu1 %v9098_v38  ;;  %v9186_v38 = vpack.c.bf16 %v5451_v27, %v5447_v15  ;;  %v5523_v15 = vld [vmem:[#allocation8 + $0xc40] sm:$0xff] }
 0x765   :  { %9101 = vmatprep.subr.bf16.mxu1 %v9100_v5  ;;  %v9188_v5 = vpack.c.bf16 %v5460_v26, %v5456_v2  ;;  %v5528_v2 = vld [vmem:[#allocation8 + $0xc68] sm:$0xff]  ;;  %v5434_v26 = vld [vmem:[#allocation8 + $0x978] sm:$0xff] }
 0x768   :  { %9103 = vmatpush1.bf16.msra.mxu1 %v9102_v31 }
 0x769   :  { %9105 = vmatprep.subr.bf16.mxu1 %v9104_v14  ;;  %v5463_v14 = vld [vmem:[#allocation8 + $0xa60] sm:$0xff] }
 0x76a   :  { %v9194_v8 = vpack.c.bf16 %v5467_v23, %v5463_v14  ;;  %v5441_v23 = vld [vmem:[#allocation8 + $0x9b0] sm:$0xff] }
 0x76c   :  { %9107 = vmatpush1.bf16.msra.mxu1 %v9106_v63  ;;  %v9196_v63 = vpack.c.bf16 %v5476_v19, %v5472_v10  ;;  %v5445_v10 = vld [vmem:[#allocation8 + $0x9d0] sm:$0xff]  ;;  %v5450_v19 = vld [vmem:[#allocation8 + $0x9f8] sm:$0xff] }
 0x76d   :  { %9109 = vmatprep.subr.bf16.mxu1 %v9108_v18  ;;  %v5471_v18 = vld [vmem:[#allocation8 + $0xaa0] sm:$0xff] }
 0x76e   :  { %v9198_v9 = vpack.c.bf16 %v5475_v3, %v5471_v18  ;;  %v5449_v3 = vld [vmem:[#allocation8 + $0x9f0] sm:$0xff] }
 0x770   :  { %9111 = vmatpush1.bf16.msra.mxu1 %v9110_v22  ;;  %v14262_v22 = vpop.f32.mrb[114].mxu0 }
 0x771   :  { %9113 = vmatprep.subr.bf16.mxu1 %v9112_v13  ;;  %v9200_v13 = vpack.c.bf16 %v5484_v44, %v5480_v58  ;;  %v14264_v1 = vpop.f32.mrb[115].mxu0  ;;  %v5453_v58 = vld [vmem:[#allocation8 + $0xa10] sm:$0xff]  ;;  %v5458_v44 = vld [vmem:[#allocation8 + $0xa38] sm:$0xff] }
 0x774   :  { %9115 = vmatpush1.bf16.msra.mxu1 %v9114_v37  ;;  %v5492_v37 = vld [vmem:[#allocation8 + $0xb48] sm:$0xff] }
 0x775   :  { %9117 = vmatprep.subr.bf16.mxu1 %v9116_v24  ;;  %v9202_v24 = vpack.c.bf16 %v5483_v34, %v5479_v60  ;;  %v9204_v25 = vpack.c.bf16 %v5492_v37, %v5488_v41  ;;  %v5457_v34 = vld [vmem:[#allocation8 + $0xa30] sm:$0xff]  ;;  %v5466_v37 = vld [vmem:[#allocation8 + $0xa78] sm:$0xff] }
 0x776   :  { %v5461_v41 = vld [vmem:[#allocation8 + $0xa50] sm:$0xff] }
 0x778   :  { %9119 = vmatpush1.bf16.msra.mxu1 %v9118_v59  ;;  %v5500_v59 = vld [vmem:[#allocation8 + $0xb88] sm:$0xff] }
 0x779   :  { %9121 = vmatprep.subr.bf16.mxu1 %v9120_v36  ;;  %v9206_v36 = vpack.c.bf16 %v5491_v53, %v5487_v61  ;;  %v9208_v17 = vpack.c.bf16 %v5500_v59, %v5496_v39  ;;  %v5465_v53 = vld [vmem:[#allocation8 + $0xa70] sm:$0xff]  ;;  %v5474_v39 = vld [vmem:[#allocation8 + $0xab8] sm:$0xff] }
 0x77a   :  { %v5478_v59 = vld [vmem:[#allocation8 + $0xad8] sm:$0xff] }
 0x77c   :  { %9123 = vmatpush1.bf16.msra.mxu1 %v9122_v49  ;;  %v5499_v49 = vld [vmem:[#allocation8 + $0xb80] sm:$0xff] }
 0x77d   :  { %5322 = vmatprep.subr.mxu1 %v5199_v29  ;;  %v5504_v29 = vld [vmem:[#allocation8 + $0xba8] sm:$0xff]  ;;  %v9210_v16 = vpack.c.bf16 %v5499_v49, %v5495_v20  ;;  %v5473_v20 = vld [vmem:[#allocation8 + $0xab0] sm:$0xff] }
 0x77e   :  { %v9212_v52 = vpack.c.bf16 %v5508_v47, %v5504_v29  ;;  %v5477_v49 = vld [vmem:[#allocation8 + $0xad0] sm:$0xff]  ;;  %v5482_v29 = vld [vmem:[#allocation8 + $0xaf8] sm:$0xff] }
 0x77f   :  { %v5486_v47 = vld [vmem:[#allocation8 + $0xb18] sm:$0xff] }
 0x780   :  { %5323 = vmatpush1.msra.mxu1 %v5198_v46  ;;  %v5516_v46 = vld [vmem:[#allocation8 + $0xc08] sm:$0xff] }
 0x781   :  { %5339 = vmatmul.mubr.f32.vlgmr.msra.gmra.mrb[60].mxu1 %v14219_v43  ;;  %9177 = vmatprep.subr.bf16.mxu1 %v9176_v35  ;;  %v5468_v43 = vld [vmem:[#allocation8 + $0xa88] sm:$0xff]  ;;  %v9214_v35 = vpack.c.bf16 %v5507_v55, %v5503_v0  ;;  %v5481_v0 = vld [vmem:[#allocation8 + $0xaf0] sm:$0xff] }
 0x782   :  { %9179 = vmatpush1.bf16.msra.mxu1 %v9178_v56  ;;  %8323 = vmatprep.mubr.msk.f32.mxu1 %vm4727_vm12, %v14254_v11  ;;  %v9192_v31 = vpack.c.bf16 %v5468_v43, %v5464_v50  ;;  %v9216_v56 = vpack.c.bf16 %v5516_v46, %v5512_v6  ;;  %v5446_v50 = vld [vmem:[#allocation8 + $0x9d8] sm:$0xff]  ;;  %v5527_v43 = vld [vmem:[#allocation8 + $0xc60] sm:$0xff]  ;;  %v5485_v55 = vld [vmem:[#allocation8 + $0xb10] sm:$0xff] }
 0x783   :  { %9181 = vmatprep.subr.bf16.mxu1 %v9180_v32  ;;  %v5511_v32 = vld [vmem:[#allocation8 + $0xbe0] sm:$0xff]  ;;  %v9228_v14 = vpack.c.bf16 %v5446_v50, %v5442_v40  ;;  %v5490_v6 = vld [vmem:[#allocation8 + $0xb38] sm:$0xff] }
 0x784   :  { %v9218_v51 = vpack.c.bf16 %v5515_v4, %v5511_v32  ;;  %v5494_v46 = vld [vmem:[#allocation8 + $0xb58] sm:$0xff]  ;;  %v5489_v32 = vld [vmem:[#allocation8 + $0xb30] sm:$0xff] }
 0x785   :  { %v5493_v4 = vld [vmem:[#allocation8 + $0xb50] sm:$0xff]  ;;  %v5514_v40 = vld [vmem:[#allocation8 + $0xbf8] sm:$0xff] }
 0x786   :  { %9183 = vmatpush1.bf16.msra.mxu1 %v9182_v62  ;;  %v9220_v62 = vpack.c.bf16 %v5524_v33, %v5520_v30  ;;  %v5498_v30 = vld [vmem:[#allocation8 + $0xb78] sm:$0xff] }
 0x787   :  { %9185 = vmatprep.subr.bf16.mxu1 %v9184_v54  ;;  %v5519_v54 = vld [vmem:[#allocation8 + $0xc20] sm:$0xff]  ;;  %v5502_v33 = vld [vmem:[#allocation8 + $0xb98] sm:$0xff] }
 0x788   :  { %v9222_v27 = vpack.c.bf16 %v5523_v15, %v5519_v54  ;;  %v5497_v54 = vld [vmem:[#allocation8 + $0xb70] sm:$0xff]  ;;  %v5518_v50 = vld [vmem:[#allocation8 + $0xc18] sm:$0xff] }
 0x789   :  { %v5501_v15 = vld [vmem:[#allocation8 + $0xb90] sm:$0xff] }
 0x78a   :  { %9187 = vmatpush1.bf16.msra.mxu1 %v9186_v38  ;;  %v5438_v38 = vld [vmem:[#allocation8 + $0x998] sm:$0xff] }
 0x78b   :  { %9189 = vmatprep.subr.bf16.mxu1 %v9188_v5  ;;  %v5433_v5 = vld [vmem:[#allocation8 + $0x970] sm:$0xff] }
 0x78e   :  { %9191 = vmatpush1.bf16.msra.mxu1 %v9190_v45  ;;  %v9224_v45 = vpack.c.bf16 %v5438_v38, %v5434_v26  ;;  %v9258_v26 = vpack.c.bf16 %v5501_v15, %v5497_v54  ;;  %v5806_v54 = vld [vmem:[#allocation8 + $0xde0] sm:$0xff]  ;;  %v5811_v15 = vld [vmem:[#allocation8 + $0xe08] sm:$0xff] }
 0x78f   :  { %9193 = vmatprep.subr.bf16.mxu1 %v9192_v31  ;;  %v9226_v31 = vpack.c.bf16 %v5437_v48, %v5433_v5  ;;  %v5505_v5 = vld [vmem:[#allocation8 + $0xbb0] sm:$0xff] }
 0x790   :  { %v5509_v48 = vld [vmem:[#allocation8 + $0xbd0] sm:$0xff] }
 0x792   :  { %9195 = vmatpush1.bf16.msra.mxu1 %v9194_v8  ;;  %v5454_v8 = vld [vmem:[#allocation8 + $0xa18] sm:$0xff] }
 0x793   :  { %9197 = vmatprep.subr.bf16.mxu1 %v9196_v63  ;;  %v9230_v63 = vpack.c.bf16 %v5445_v10, %v5441_v23  ;;  %v9232_v18 = vpack.c.bf16 %v5454_v8, %v5450_v19  ;;  %v5522_v23 = vld [vmem:[#allocation8 + $0xc38] sm:$0xff] }
 0x794   :  { %v5526_v10 = vld [vmem:[#allocation8 + $0xc58] sm:$0xff] }
 0x795   :  { %v9268_v8 = vpack.c.bf16 %v5526_v10, %v5522_v23  ;;  %v5822_v23 = vld [vmem:[#allocation8 + $0xe60] sm:$0xff]  ;;  %v5827_v10 = vld [vmem:[#allocation8 + $0xe88] sm:$0xff] }
 0x796   :  { %9199 = vmatpush1.bf16.msra.mxu1 %v9198_v9  ;;  %v5462_v9 = vld [vmem:[#allocation8 + $0xa58] sm:$0xff] }
 0x797   :  { %9201 = vmatprep.subr.bf16.mxu1 %v9200_v13  ;;  %v9234_v13 = vpack.c.bf16 %v5453_v58, %v5449_v3  ;;  %v9236_v60 = vpack.c.bf16 %v5462_v9, %v5458_v44  ;;  %v5530_v58 = vld [vmem:[#allocation8 + $0xc78] sm:$0xff]  ;;  %v5763_v44 = vld [vmem:[#allocation8 + $0xc88] sm:$0xff] }
 0x798   :  { %v5767_v9 = vld [vmem:[#allocation8 + $0xca8] sm:$0xff] }
 0x79a   :  { %9203 = vmatpush1.bf16.msra.mxu1 %v9202_v24  ;;  %v5470_v24 = vld [vmem:[#allocation8 + $0xa98] sm:$0xff] }
 0x79b   :  { %9205 = vmatprep.subr.bf16.mxu1 %v9204_v25  ;;  %v9238_v25 = vpack.c.bf16 %v5461_v41, %v5457_v34  ;;  %v9240_v61 = vpack.c.bf16 %v5470_v24, %v5466_v37  ;;  %v5771_v34 = vld [vmem:[#allocation8 + $0xcc8] sm:$0xff]  ;;  %v5529_v37 = vld [vmem:[#allocation8 + $0xc70] sm:$0xff]  ;;  %v9324_v24 = vpack.c.bf16 %v5767_v9, %v5763_v44 }
 0x79c   :  { %v5775_v41 = vld [vmem:[#allocation8 + $0xce8] sm:$0xff] }
 0x79d   :  { %v5839_v44 = vld [vmem:[#allocation8 + $0xee8] sm:$0xff] }
 0x79e   :  { %9207 = vmatpush1.bf16.msra.mxu1 %v9206_v36 }
 0x79f   :  { %9209 = vmatprep.subr.bf16.mxu1 %v9208_v17  ;;  %v9244_v17 = vpack.c.bf16 %v5478_v59, %v5474_v39  ;;  %v5779_v39 = vld [vmem:[#allocation8 + $0xd08] sm:$0xff] }
 0x7a0   :  { %v5783_v59 = vld [vmem:[#allocation8 + $0xd28] sm:$0xff] }
 0x7a2   :  { %9211 = vmatpush1.bf16.msra.mxu1 %v9210_v16  ;;  %v9246_v16 = vpack.c.bf16 %v5477_v49, %v5473_v20  ;;  %v5778_v20 = vld [vmem:[#allocation8 + $0xd00] sm:$0xff] }
 0x7a3   :  { %9213 = vmatprep.subr.bf16.mxu1 %v9212_v52  ;;  %v9248_v52 = vpack.c.bf16 %v5486_v47, %v5482_v29  ;;  %v5782_v49 = vld [vmem:[#allocation8 + $0xd20] sm:$0xff]  ;;  %v5787_v29 = vld [vmem:[#allocation8 + $0xd48] sm:$0xff] }
 0x7a4   :  { %v5791_v47 = vld [vmem:[#allocation8 + $0xd68] sm:$0xff] }
 0x7a6   :  { %9215 = vmatpush1.bf16.msra.mxu1 %v9214_v35  ;;  %v9250_v35 = vpack.c.bf16 %v5485_v55, %v5481_v0  ;;  %v5786_v0 = vld [vmem:[#allocation8 + $0xd40] sm:$0xff] }
 0x7a7   :  { %9217 = vmatprep.subr.bf16.mxu1 %v9216_v56  ;;  %v9252_v56 = vpack.c.bf16 %v5494_v46, %v5490_v6  ;;  %v5790_v55 = vld [vmem:[#allocation8 + $0xd60] sm:$0xff]  ;;  %v5795_v6 = vld [vmem:[#allocation8 + $0xd88] sm:$0xff] }
 0x7a8   :  { %v9338_v46 = vpack.c.bf16 %v5790_v55, %v5786_v0  ;;  %v5768_v0 = vld [vmem:[#allocation8 + $0xcb0] sm:$0xff]  ;;  %v5773_v55 = vld [vmem:[#allocation8 + $0xcd8] sm:$0xff] }
 0x7aa   :  { %9219 = vmatpush1.bf16.msra.mxu1 %v9218_v51  ;;  %v9254_v51 = vpack.c.bf16 %v5493_v4, %v5489_v32  ;;  %v5798_v32 = vld [vmem:[#allocation8 + $0xda0] sm:$0xff]  ;;  %v5803_v4 = vld [vmem:[#allocation8 + $0xdc8] sm:$0xff] }
 0x7ab   :  { %9221 = vmatprep.subr.bf16.mxu1 %v9220_v62  ;;  %v9256_v62 = vpack.c.bf16 %v5502_v33, %v5498_v30  ;;  %v5807_v30 = vld [vmem:[#allocation8 + $0xde8] sm:$0xff] }
 0x7ae   :  { %9223 = vmatpush1.bf16.msra.mxu1 %v9222_v27  ;;  %v5506_v27 = vld [vmem:[#allocation8 + $0xbb8] sm:$0xff] }
 0x7af   :  { %5582 = vmatprep.subr.mxu1 %v5528_v2  ;;  %v5510_v2 = vld [vmem:[#allocation8 + $0xbd8] sm:$0xff] }
 0x7b0   :  { %v9260_v38 = vpack.c.bf16 %v5510_v2, %v5506_v27  ;;  %v5815_v27 = vld [vmem:[#allocation8 + $0xe28] sm:$0xff] }
 0x7b2   :  { %5583 = vmatpush1.msra.mxu1 %v5527_v43  ;;  %v9262_v43 = vpack.c.bf16 %v5509_v48, %v5505_v5  ;;  %v5810_v5 = vld [vmem:[#allocation8 + $0xe00] sm:$0xff] }
 0x7b3   :  { %9225 = vmatprep.subr.bf16.mxu1 %v9224_v45  ;;  %5599 = vmatmul.mubr.f32.vlgmr.msra.gmra.mrb[58].mxu1 %v14252_v28  ;;  %v9264_v45 = vpack.c.bf16 %v5518_v50, %v5514_v40  ;;  %v5814_v48 = vld [vmem:[#allocation8 + $0xe20] sm:$0xff]  ;;  %v5819_v50 = vld [vmem:[#allocation8 + $0xe48] sm:$0xff] }
 0x7b4   :  { %9227 = vmatpush1.bf16.msra.mxu1 %v9226_v31  ;;  %8324 = vmatprep.mubr.msk.f32.mxu1 %vm4727_vm12, %v14254_v11  ;;  %v5469_v11 = vld [vmem:[#allocation8 + $0xa90] sm:$0xff] }
 0x7b5   :  { %9229 = vmatprep.subr.bf16.mxu1 %v9228_v14  ;;  %v9242_v36 = vpack.c.bf16 %v5469_v11, %v5465_v53  ;;  %v5513_v31 = vld [vmem:[#allocation8 + $0xbf0] sm:$0xff]  ;;  %v5770_v53 = vld [vmem:[#allocation8 + $0xcc0] sm:$0xff] }
 0x7b6   :  { %v5517_v14 = vld [vmem:[#allocation8 + $0xc10] sm:$0xff]  ;;  %v5774_v11 = vld [vmem:[#allocation8 + $0xce0] sm:$0xff] }
 0x7b7   :  { %v9266_v19 = vpack.c.bf16 %v5517_v14, %v5513_v31  ;;  %v5818_v14 = vld [vmem:[#allocation8 + $0xe40] sm:$0xff] }
 0x7b8   :  { %9231 = vmatpush1.bf16.msra.mxu1 %v9230_v63  ;;  %v5521_v63 = vld [vmem:[#allocation8 + $0xc30] sm:$0xff] }
 0x7b9   :  { %9233 = vmatprep.subr.bf16.mxu1 %v9232_v18  ;;  %v5525_v18 = vld [vmem:[#allocation8 + $0xc50] sm:$0xff] }
 0x7ba   :  { %v9270_v3 = vpack.c.bf16 %v5525_v18, %v5521_v63  ;;  %v5826_v18 = vld [vmem:[#allocation8 + $0xe80] sm:$0xff] }
 0x7bc   :  { %9235 = vmatpush1.bf16.msra.mxu1 %v9234_v13  ;;  %v5762_v13 = vld [vmem:[#allocation8 + $0xc80] sm:$0xff] }
 0x7bd   :  { %9237 = vmatprep.subr.bf16.mxu1 %v9236_v60  ;;  %v5766_v60 = vld [vmem:[#allocation8 + $0xca0] sm:$0xff] }
 0x7c0   :  { %9239 = vmatpush1.bf16.msra.mxu1 %v9238_v25  ;;  %v9326_v25 = vpack.c.bf16 %v5766_v60, %v5762_v13  ;;  %v5834_v60 = vld [vmem:[#allocation8 + $0xec0] sm:$0xff] }
 0x7c1   :  { %9241 = vmatprep.subr.bf16.mxu1 %v9240_v61  ;;  %v9328_v61 = vpack.c.bf16 %v5775_v41, %v5771_v34  ;;  %v5838_v34 = vld [vmem:[#allocation8 + $0xee0] sm:$0xff]  ;;  %v5843_v41 = vld [vmem:[#allocation8 + $0xf08] sm:$0xff] }
 0x7c4   :  { %9243 = vmatpush1.bf16.msra.mxu1 %v9242_v36  ;;  %v9330_v36 = vpack.c.bf16 %v5774_v11, %v5770_v53  ;;  %v5846_v53 = vld [vmem:[#allocation8 + $0xf20] sm:$0xff]  ;;  %v5851_v11 = vld [vmem:[#allocation8 + $0xf48] sm:$0xff] }
 0x7c5   :  { %9245 = vmatprep.subr.bf16.mxu1 %v9244_v17  ;;  %v9332_v17 = vpack.c.bf16 %v5783_v59, %v5779_v39  ;;  %v5855_v39 = vld [vmem:[#allocation8 + $0xf68] sm:$0xff] }
 0x7c8   :  { %9247 = vmatpush1.bf16.msra.mxu1 %v9246_v16  ;;  %v9334_v16 = vpack.c.bf16 %v5782_v49, %v5778_v20  ;;  %v5854_v20 = vld [vmem:[#allocation8 + $0xf60] sm:$0xff] }
 0x7c9   :  { %9249 = vmatprep.subr.bf16.mxu1 %v9248_v52  ;;  %v9336_v52 = vpack.c.bf16 %v5791_v47, %v5787_v29  ;;  %v5859_v29 = vld [vmem:[#allocation8 + $0xf88] sm:$0xff]  ;;  %v5765_v47 = vld [vmem:[#allocation8 + $0xc98] sm:$0xff] }
 0x7cc   :  { %9251 = vmatpush1.bf16.msra.mxu1 %v9250_v35 }
 0x7cd   :  { %9253 = vmatprep.subr.bf16.mxu1 %v9252_v56  ;;  %v5794_v56 = vld [vmem:[#allocation8 + $0xd80] sm:$0xff] }
 0x7ce   :  { %v9342_v33 = vpack.c.bf16 %v5798_v32, %v5794_v56  ;;  %v5772_v32 = vld [vmem:[#allocation8 + $0xcd0] sm:$0xff] }
 0x7d0   :  { %9255 = vmatpush1.bf16.msra.mxu1 %v9254_v51  ;;  %v9344_v51 = vpack.c.bf16 %v5807_v30, %v5803_v4  ;;  %v5776_v4 = vld [vmem:[#allocation8 + $0xcf0] sm:$0xff]  ;;  %v5781_v30 = vld [vmem:[#allocation8 + $0xd18] sm:$0xff] }
 0x7d1   :  { %9257 = vmatprep.subr.bf16.mxu1 %v9256_v62  ;;  %v5802_v62 = vld [vmem:[#allocation8 + $0xdc0] sm:$0xff] }
 0x7d2   :  { %v9346_v2 = vpack.c.bf16 %v5806_v54, %v5802_v62  ;;  %v5780_v54 = vld [vmem:[#allocation8 + $0xd10] sm:$0xff] }
 0x7d4   :  { %9259 = vmatpush1.bf16.msra.mxu1 %v9258_v26  ;;  %v14272_v26 = vpop.f32.mrb[116].mxu0 }
 0x7d5   :  { %9261 = vmatprep.subr.bf16.mxu1 %v9260_v38  ;;  %v9348_v38 = vpack.c.bf16 %v5815_v27, %v5811_v15  ;;  %v14274_v40 = vpop.f32.mrb[117].mxu0  ;;  %v5784_v15 = vld [vmem:[#allocation8 + $0xd30] sm:$0xff]  ;;  %v5789_v27 = vld [vmem:[#allocation8 + $0xd58] sm:$0xff] }
 0x7d8   :  { %9263 = vmatpush1.bf16.msra.mxu1 %v9262_v43  ;;  %v5823_v43 = vld [vmem:[#allocation8 + $0xe68] sm:$0xff] }
 0x7d9   :  { %9265 = vmatprep.subr.bf16.mxu1 %v9264_v45  ;;  %v9350_v45 = vpack.c.bf16 %v5814_v48, %v5810_v5  ;;  %v9352_v31 = vpack.c.bf16 %v5823_v43, %v5819_v50  ;;  %v5788_v48 = vld [vmem:[#allocation8 + $0xd50] sm:$0xff]  ;;  %v5797_v43 = vld [vmem:[#allocation8 + $0xd98] sm:$0xff] }
 0x7da   :  { %v5792_v50 = vld [vmem:[#allocation8 + $0xd70] sm:$0xff] }
 0x7dc   :  { %9267 = vmatpush1.bf16.msra.mxu1 %v9266_v19  ;;  %v5831_v19 = vld [vmem:[#allocation8 + $0xea8] sm:$0xff] }
 0x7dd   :  { %9269 = vmatprep.subr.bf16.mxu1 %v9268_v8  ;;  %v9354_v8 = vpack.c.bf16 %v5822_v23, %v5818_v14  ;;  %v9356_v63 = vpack.c.bf16 %v5831_v19, %v5827_v10  ;;  %v5796_v23 = vld [vmem:[#allocation8 + $0xd90] sm:$0xff]  ;;  %v5805_v10 = vld [vmem:[#allocation8 + $0xdd8] sm:$0xff] }
 0x7de   :  { %v5809_v19 = vld [vmem:[#allocation8 + $0xdf8] sm:$0xff] }
 0x7e0   :  { %9271 = vmatpush1.bf16.msra.mxu1 %v9270_v3  ;;  %v5830_v3 = vld [vmem:[#allocation8 + $0xea0] sm:$0xff] }
 0x7e1   :  { %5653 = vmatprep.subr.mxu1 %v5530_v58  ;;  %v5835_v58 = vld [vmem:[#allocation8 + $0xec8] sm:$0xff]  ;;  %v9358_v9 = vpack.c.bf16 %v5830_v3, %v5826_v18  ;;  %v5804_v18 = vld [vmem:[#allocation8 + $0xdd0] sm:$0xff] }
 0x7e2   :  { %v9360_v13 = vpack.c.bf16 %v5839_v44, %v5835_v58  ;;  %v5808_v3 = vld [vmem:[#allocation8 + $0xdf0] sm:$0xff]  ;;  %v5813_v58 = vld [vmem:[#allocation8 + $0xe18] sm:$0xff] }
 0x7e3   :  { %v5817_v44 = vld [vmem:[#allocation8 + $0xe38] sm:$0xff] }
 0x7e4   :  { %5654 = vmatpush1.msra.mxu1 %v5529_v37  ;;  %v5847_v37 = vld [vmem:[#allocation8 + $0xf28] sm:$0xff] }
 0x7e5   :  { %5670 = vmatmul.mubr.f32.vlgmr.msra.gmra.mrb[60].mxu1 %v14252_v28  ;;  %9325 = vmatprep.subr.bf16.mxu1 %v9324_v24  ;;  %v5799_v28 = vld [vmem:[#allocation8 + $0xda8] sm:$0xff]  ;;  %v9362_v24 = vpack.c.bf16 %v5838_v34, %v5834_v60  ;;  %v5812_v60 = vld [vmem:[#allocation8 + $0xe10] sm:$0xff] }
 0x7e6   :  { %9327 = vmatpush1.bf16.msra.mxu1 %v9326_v25  ;;  %8331 = vmatprep.mubr.msk.f32.mxu1 %vm4727_vm12, %v14264_v1  ;;  %v9340_v35 = vpack.c.bf16 %v5799_v28, %v5795_v6  ;;  %v9364_v25 = vpack.c.bf16 %v5847_v37, %v5843_v41  ;;  %v5777_v6 = vld [vmem:[#allocation8 + $0xcf8] sm:$0xff]  ;;  %v5858_v28 = vld [vmem:[#allocation8 + $0xf80] sm:$0xff]  ;;  %v5816_v34 = vld [vmem:[#allocation8 + $0xe30] sm:$0xff] }
 0x7e7   :  { %9329 = vmatprep.subr.bf16.mxu1 %v9328_v61  ;;  %v5842_v61 = vld [vmem:[#allocation8 + $0xf00] sm:$0xff]  ;;  %v9376_v56 = vpack.c.bf16 %v5777_v6, %v5773_v55  ;;  %v5821_v41 = vld [vmem:[#allocation8 + $0xe58] sm:$0xff] }
 0x7e8   :  { %v9366_v59 = vpack.c.bf16 %v5846_v53, %v5842_v61  ;;  %v5825_v37 = vld [vmem:[#allocation8 + $0xe78] sm:$0xff]  ;;  %v5820_v61 = vld [vmem:[#allocation8 + $0xe50] sm:$0xff] }
 0x7e9   :  { %v5824_v53 = vld [vmem:[#allocation8 + $0xe70] sm:$0xff]  ;;  %v5845_v55 = vld [vmem:[#allocation8 + $0xf18] sm:$0xff] }
 0x7ea   :  { %9331 = vmatpush1.bf16.msra.mxu1 %v9330_v36  ;;  %v9368_v36 = vpack.c.bf16 %v5855_v39, %v5851_v11  ;;  %v5829_v11 = vld [vmem:[#allocation8 + $0xe98] sm:$0xff] }
 0x7eb   :  { %9333 = vmatprep.subr.bf16.mxu1 %v9332_v17  ;;  %v5850_v17 = vld [vmem:[#allocation8 + $0xf40] sm:$0xff]  ;;  %v5833_v39 = vld [vmem:[#allocation8 + $0xeb8] sm:$0xff] }
 0x7ec   :  { %v9370_v49 = vpack.c.bf16 %v5854_v20, %v5850_v17  ;;  %v5828_v17 = vld [vmem:[#allocation8 + $0xe90] sm:$0xff]  ;;  %v5849_v6 = vld [vmem:[#allocation8 + $0xf38] sm:$0xff] }
 0x7ed   :  { %v5832_v20 = vld [vmem:[#allocation8 + $0xeb0] sm:$0xff] }
 0x7ee   :  { %9335 = vmatpush1.bf16.msra.mxu1 %v9334_v16  ;;  %v5769_v16 = vld [vmem:[#allocation8 + $0xcb8] sm:$0xff] }
 0x7ef   :  { %9337 = vmatprep.subr.bf16.mxu1 %v9336_v52  ;;  %v5764_v52 = vld [vmem:[#allocation8 + $0xc90] sm:$0xff] }
 0x7f2   :  { %9339 = vmatpush1.bf16.msra.mxu1 %v9338_v46  ;;  %v9372_v46 = vpack.c.bf16 %v5769_v16, %v5765_v47  ;;  %v9406_v47 = vpack.c.bf16 %v5832_v20, %v5828_v17  ;;  %v6137_v17 = vld [vmem:[#allocation8 + $0x1100] sm:$0xff]  ;;  %v6142_v20 = vld [vmem:[#allocation8 + $0x1128] sm:$0xff] }
 0x7f3   :  { %9341 = vmatprep.subr.bf16.mxu1 %v9340_v35  ;;  %v9374_v35 = vpack.c.bf16 %v5768_v0, %v5764_v52  ;;  %v5836_v52 = vld [vmem:[#allocation8 + $0xed0] sm:$0xff] }
 0x7f4   :  { %v5840_v0 = vld [vmem:[#allocation8 + $0xef0] sm:$0xff] }
 0x7f6   :  { %9343 = vmatpush1.bf16.msra.mxu1 %v9342_v33  ;;  %v5785_v33 = vld [vmem:[#allocation8 + $0xd38] sm:$0xff] }
 0x7f7   :  { %9345 = vmatprep.subr.bf16.mxu1 %v9344_v51  ;;  %v9378_v51 = vpack.c.bf16 %v5776_v4, %v5772_v32  ;;  %v9380_v62 = vpack.c.bf16 %v5785_v33, %v5781_v30  ;;  %v5853_v32 = vld [vmem:[#allocation8 + $0xf58] sm:$0xff] }
 0x7f8   :  { %v5857_v4 = vld [vmem:[#allocation8 + $0xf78] sm:$0xff] }
 0x7f9   :  { %v9416_v33 = vpack.c.bf16 %v5857_v4, %v5853_v32  ;;  %v6153_v32 = vld [vmem:[#allocation8 + $0x1180] sm:$0xff]  ;;  %v6158_v4 = vld [vmem:[#allocation8 + $0x11a8] sm:$0xff] }
 0x7fa   :  { %9347 = vmatpush1.bf16.msra.mxu1 %v9346_v2  ;;  %v5793_v2 = vld [vmem:[#allocation8 + $0xd78] sm:$0xff] }
 0x7fb   :  { %9349 = vmatprep.subr.bf16.mxu1 %v9348_v38  ;;  %v9382_v38 = vpack.c.bf16 %v5784_v15, %v5780_v54  ;;  %v9384_v5 = vpack.c.bf16 %v5793_v2, %v5789_v27  ;;  %v5861_v15 = vld [vmem:[#allocation8 + $0xf98] sm:$0xff]  ;;  %v6094_v27 = vld [vmem:[#allocation8 + $0xfa8] sm:$0xff] }
 0x7fc   :  { %v6098_v2 = vld [vmem:[#allocation8 + $0xfc8] sm:$0xff] }
 0x7fe   :  { %9351 = vmatpush1.bf16.msra.mxu1 %v9350_v45  ;;  %v5801_v45 = vld [vmem:[#allocation8 + $0xdb8] sm:$0xff] }
 0x7ff   :  { %9353 = vmatprep.subr.bf16.mxu1 %v9352_v31  ;;  %v9386_v31 = vpack.c.bf16 %v5792_v50, %v5788_v48  ;;  %v9388_v14 = vpack.c.bf16 %v5801_v45, %v5797_v43  ;;  %v6102_v48 = vld [vmem:[#allocation8 + $0xfe8] sm:$0xff]  ;;  %v5860_v43 = vld [vmem:[#allocation8 + $0xf90] sm:$0xff]  ;;  %v9472_v45 = vpack.c.bf16 %v6098_v2, %v6094_v27 }
 0x800   :  { %v6106_v50 = vld [vmem:[#allocation8 + $0x1008] sm:$0xff] }
 0x801   :  { %v6170_v27 = vld [vmem:[#allocation8 + $0x1208] sm:$0xff] }
 0x802   :  { %9355 = vmatpush1.bf16.msra.mxu1 %v9354_v8 }
 0x803   :  { %9357 = vmatprep.subr.bf16.mxu1 %v9356_v63  ;;  %v9392_v63 = vpack.c.bf16 %v5809_v19, %v5805_v10  ;;  %v6110_v10 = vld [vmem:[#allocation8 + $0x1028] sm:$0xff] }
 0x804   :  { %v6114_v19 = vld [vmem:[#allocation8 + $0x1048] sm:$0xff] }
 0x806   :  { %9359 = vmatpush1.bf16.msra.mxu1 %v9358_v9  ;;  %v9394_v9 = vpack.c.bf16 %v5808_v3, %v5804_v18  ;;  %v6109_v18 = vld [vmem:[#allocation8 + $0x1020] sm:$0xff] }
 0x807   :  { %9361 = vmatprep.subr.bf16.mxu1 %v9360_v13  ;;  %v9396_v13 = vpack.c.bf16 %v5817_v44, %v5813_v58  ;;  %v6113_v3 = vld [vmem:[#allocation8 + $0x1040] sm:$0xff]  ;;  %v6118_v58 = vld [vmem:[#allocation8 + $0x1068] sm:$0xff] }
 0x808   :  { %v6122_v44 = vld [vmem:[#allocation8 + $0x1088] sm:$0xff] }
 0x80a   :  { %9363 = vmatpush1.bf16.msra.mxu1 %v9362_v24  ;;  %v9398_v24 = vpack.c.bf16 %v5816_v34, %v5812_v60  ;;  %v6117_v60 = vld [vmem:[#allocation8 + $0x1060] sm:$0xff] }
 0x80b   :  { %9365 = vmatprep.subr.bf16.mxu1 %v9364_v25  ;;  %v9400_v25 = vpack.c.bf16 %v5825_v37, %v5821_v41  ;;  %v6121_v34 = vld [vmem:[#allocation8 + $0x1080] sm:$0xff]  ;;  %v6126_v41 = vld [vmem:[#allocation8 + $0x10a8] sm:$0xff] }
 0x80c   :  { %v9486_v37 = vpack.c.bf16 %v6121_v34, %v6117_v60  ;;  %v6099_v60 = vld [vmem:[#allocation8 + $0xfd0] sm:$0xff]  ;;  %v6104_v34 = vld [vmem:[#allocation8 + $0xff8] sm:$0xff] }
 0x80e   :  { %9367 = vmatpush1.bf16.msra.mxu1 %v9366_v59  ;;  %v9402_v59 = vpack.c.bf16 %v5824_v53, %v5820_v61  ;;  %v6129_v61 = vld [vmem:[#allocation8 + $0x10c0] sm:$0xff]  ;;  %v6134_v53 = vld [vmem:[#allocation8 + $0x10e8] sm:$0xff] }
 0x80f   :  { %9369 = vmatprep.subr.bf16.mxu1 %v9368_v36  ;;  %v9404_v36 = vpack.c.bf16 %v5833_v39, %v5829_v11  ;;  %v6138_v11 = vld [vmem:[#allocation8 + $0x1108] sm:$0xff] }
 0x812   :  { %9371 = vmatpush1.bf16.msra.mxu1 %v9370_v49  ;;  %v5837_v49 = vld [vmem:[#allocation8 + $0xed8] sm:$0xff] }
 0x813   :  { %5913 = vmatprep.subr.mxu1 %v5859_v29  ;;  %v5841_v29 = vld [vmem:[#allocation8 + $0xef8] sm:$0xff] }
 0x814   :  { %v9408_v16 = vpack.c.bf16 %v5841_v29, %v5837_v49  ;;  %v6146_v49 = vld [vmem:[#allocation8 + $0x1148] sm:$0xff] }
 0x816   :  { %5914 = vmatpush1.msra.mxu1 %v5858_v28  ;;  %v9410_v28 = vpack.c.bf16 %v5840_v0, %v5836_v52  ;;  %v6141_v52 = vld [vmem:[#allocation8 + $0x1120] sm:$0xff] }
 0x817   :  { %9373 = vmatprep.subr.bf16.mxu1 %v9372_v46  ;;  %5930 = vmatmul.mubr.f32.vlgmr.msra.gmra.mrb[58].mxu1 %v14262_v22  ;;  %v9412_v46 = vpack.c.bf16 %v5849_v6, %v5845_v55  ;;  %v6145_v0 = vld [vmem:[#allocation8 + $0x1140] sm:$0xff]  ;;  %v6150_v6 = vld [vmem:[#allocation8 + $0x1168] sm:$0xff] }
 0x818   :  { %9375 = vmatpush1.bf16.msra.mxu1 %v9374_v35  ;;  %8332 = vmatprep.mubr.msk.f32.mxu1 %vm4727_vm12, %v14264_v1  ;;  %v5800_v1 = vld [vmem:[#allocation8 + $0xdb0] sm:$0xff] }
 0x819   :  { %9377 = vmatprep.subr.bf16.mxu1 %v9376_v56  ;;  %v9390_v8 = vpack.c.bf16 %v5800_v1, %v5796_v23  ;;  %v5844_v35 = vld [vmem:[#allocation8 + $0xf10] sm:$0xff]  ;;  %v6101_v23 = vld [vmem:[#allocation8 + $0xfe0] sm:$0xff] }
 0x81a   :  { %v5848_v56 = vld [vmem:[#allocation8 + $0xf30] sm:$0xff]  ;;  %v6105_v1 = vld [vmem:[#allocation8 + $0x1000] sm:$0xff] }
 0x81b   :  { %v9414_v30 = vpack.c.bf16 %v5848_v56, %v5844_v35  ;;  %v6149_v56 = vld [vmem:[#allocation8 + $0x1160] sm:$0xff] }
 0x81c   :  { %9379 = vmatpush1.bf16.msra.mxu1 %v9378_v51  ;;  %v5852_v51 = vld [vmem:[#allocation8 + $0xf50] sm:$0xff] }
 0x81d   :  { %9381 = vmatprep.subr.bf16.mxu1 %v9380_v62  ;;  %v5856_v62 = vld [vmem:[#allocation8 + $0xf70] sm:$0xff] }
 0x81e   :  { %v9418_v54 = vpack.c.bf16 %v5856_v62, %v5852_v51  ;;  %v6157_v62 = vld [vmem:[#allocation8 + $0x11a0] sm:$0xff] }
 0x820   :  { %9383 = vmatpush1.bf16.msra.mxu1 %v9382_v38  ;;  %v6093_v38 = vld [vmem:[#allocation8 + $0xfa0] sm:$0xff] }
 0x821   :  { %9385 = vmatprep.subr.bf16.mxu1 %v9384_v5  ;;  %v6097_v5 = vld [vmem:[#allocation8 + $0xfc0] sm:$0xff] }
 0x824   :  { %9387 = vmatpush1.bf16.msra.mxu1 %v9386_v31  ;;  %v9474_v31 = vpack.c.bf16 %v6097_v5, %v6093_v38  ;;  %v6165_v5 = vld [vmem:[#allocation8 + $0x11e0] sm:$0xff] }
 0x825   :  { %9389 = vmatprep.subr.bf16.mxu1 %v9388_v14  ;;  %v9476_v14 = vpack.c.bf16 %v6106_v50, %v6102_v48  ;;  %v6169_v48 = vld [vmem:[#allocation8 + $0x1200] sm:$0xff]  ;;  %v6174_v50 = vld [vmem:[#allocation8 + $0x1228] sm:$0xff] }
 0x828   :  { %9391 = vmatpush1.bf16.msra.mxu1 %v9390_v8  ;;  %v9478_v8 = vpack.c.bf16 %v6105_v1, %v6101_v23  ;;  %v6177_v23 = vld [vmem:[#allocation8 + $0x1240] sm:$0xff]  ;;  %v6182_v1 = vld [vmem:[#allocation8 + $0x1268] sm:$0xff] }
 0x829   :  { %9393 = vmatprep.subr.bf16.mxu1 %v9392_v63  ;;  %v9480_v63 = vpack.c.bf16 %v6114_v19, %v6110_v10  ;;  %v6186_v10 = vld [vmem:[#allocation8 + $0x1288] sm:$0xff] }
 0x82c   :  { %9395 = vmatpush1.bf16.msra.mxu1 %v9394_v9  ;;  %v9482_v9 = vpack.c.bf16 %v6113_v3, %v6109_v18  ;;  %v6185_v18 = vld [vmem:[#allocation8 + $0x1280] sm:$0xff] }
 0x82d   :  { %9397 = vmatprep.subr.bf16.mxu1 %v9396_v13  ;;  %v9484_v13 = vpack.c.bf16 %v6122_v44, %v6118_v58  ;;  %v6190_v58 = vld [vmem:[#allocation8 + $0x12a8] sm:$0xff]  ;;  %v6096_v44 = vld [vmem:[#allocation8 + $0xfb8] sm:$0xff] }
 0x830   :  { %9399 = vmatpush1.bf16.msra.mxu1 %v9398_v24 }
 0x831   :  { %9401 = vmatprep.subr.bf16.mxu1 %v9400_v25  ;;  %v6125_v25 = vld [vmem:[#allocation8 + $0x10a0] sm:$0xff] }
 0x832   :  { %v9490_v39 = vpack.c.bf16 %v6129_v61, %v6125_v25  ;;  %v6103_v61 = vld [vmem:[#allocation8 + $0xff0] sm:$0xff] }
 0x834   :  { %9403 = vmatpush1.bf16.msra.mxu1 %v9402_v59  ;;  %v9492_v59 = vpack.c.bf16 %v6138_v11, %v6134_v53  ;;  %v6107_v53 = vld [vmem:[#allocation8 + $0x1010] sm:$0xff]  ;;  %v6112_v11 = vld [vmem:[#allocation8 + $0x1038] sm:$0xff] }
 0x835   :  { %9405 = vmatprep.subr.bf16.mxu1 %v9404_v36  ;;  %v6133_v36 = vld [vmem:[#allocation8 + $0x10e0] sm:$0xff] }
 0x836   :  { %v9494_v29 = vpack.c.bf16 %v6137_v17, %v6133_v36  ;;  %v6111_v17 = vld [vmem:[#allocation8 + $0x1030] sm:$0xff] }
 0x838   :  { %9407 = vmatpush1.bf16.msra.mxu1 %v9406_v47  ;;  %v14282_v47 = vpop.f32.mrb[118].mxu0 }
 0x839   :  { %9409 = vmatprep.subr.bf16.mxu1 %v9408_v16  ;;  %v9496_v16 = vpack.c.bf16 %v6146_v49, %v6142_v20  ;;  %v14284_v55 = vpop.f32.mrb[119].mxu0  ;;  %v6115_v20 = vld [vmem:[#allocation8 + $0x1050] sm:$0xff]  ;;  %v6120_v49 = vld [vmem:[#allocation8 + $0x1078] sm:$0xff] }
 0x83c   :  { %9411 = vmatpush1.bf16.msra.mxu1 %v9410_v28  ;;  %v6154_v28 = vld [vmem:[#allocation8 + $0x1188] sm:$0xff] }
 0x83d   :  { %9413 = vmatprep.subr.bf16.mxu1 %v9412_v46  ;;  %v9498_v46 = vpack.c.bf16 %v6145_v0, %v6141_v52  ;;  %v9500_v35 = vpack.c.bf16 %v6154_v28, %v6150_v6  ;;  %v6119_v0 = vld [vmem:[#allocation8 + $0x1070] sm:$0xff]  ;;  %v6128_v28 = vld [vmem:[#allocation8 + $0x10b8] sm:$0xff] }
 0x83e   :  { %v6123_v6 = vld [vmem:[#allocation8 + $0x1090] sm:$0xff] }
 0x840   :  { %9415 = vmatpush1.bf16.msra.mxu1 %v9414_v30  ;;  %v6162_v30 = vld [vmem:[#allocation8 + $0x11c8] sm:$0xff] }
 0x841   :  { %9417 = vmatprep.subr.bf16.mxu1 %v9416_v33  ;;  %v9502_v33 = vpack.c.bf16 %v6153_v32, %v6149_v56  ;;  %v9504_v51 = vpack.c.bf16 %v6162_v30, %v6158_v4  ;;  %v6127_v32 = vld [vmem:[#allocation8 + $0x10b0] sm:$0xff]  ;;  %v6136_v4 = vld [vmem:[#allocation8 + $0x10f8] sm:$0xff] }
 0x842   :  { %v6140_v30 = vld [vmem:[#allocation8 + $0x1118] sm:$0xff] }
 0x844   :  { %9419 = vmatpush1.bf16.msra.mxu1 %v9418_v54  ;;  %v6161_v54 = vld [vmem:[#allocation8 + $0x11c0] sm:$0xff] }
 0x845   :  { %5984 = vmatprep.subr.mxu1 %v5861_v15  ;;  %v6166_v15 = vld [vmem:[#allocation8 + $0x11e8] sm:$0xff]  ;;  %v9506_v2 = vpack.c.bf16 %v6161_v54, %v6157_v62  ;;  %v6135_v62 = vld [vmem:[#allocation8 + $0x10f0] sm:$0xff] }
 0x846   :  { %v9508_v38 = vpack.c.bf16 %v6170_v27, %v6166_v15  ;;  %v6139_v54 = vld [vmem:[#allocation8 + $0x1110] sm:$0xff]  ;;  %v6144_v15 = vld [vmem:[#allocation8 + $0x1138] sm:$0xff] }
 0x847   :  { %v6148_v27 = vld [vmem:[#allocation8 + $0x1158] sm:$0xff] }
 0x848   :  { %5985 = vmatpush1.msra.mxu1 %v5860_v43  ;;  %v6178_v43 = vld [vmem:[#allocation8 + $0x1248] sm:$0xff] }
 0x849   :  { %6001 = vmatmul.mubr.f32.vlgmr.msra.gmra.mrb[60].mxu1 %v14262_v22  ;;  %9473 = vmatprep.subr.bf16.mxu1 %v9472_v45  ;;  %v6130_v22 = vld [vmem:[#allocation8 + $0x10c8] sm:$0xff]  ;;  %v9510_v45 = vpack.c.bf16 %v6169_v48, %v6165_v5  ;;  %v6143_v5 = vld [vmem:[#allocation8 + $0x1130] sm:$0xff] }
 0x84a   :  { %9475 = vmatpush1.bf16.msra.mxu1 %v9474_v31  ;;  %8339 = vmatprep.mubr.msk.f32.mxu1 %vm4727_vm12, %v14274_v40  ;;  %v9488_v24 = vpack.c.bf16 %v6130_v22, %v6126_v41  ;;  %v9512_v31 = vpack.c.bf16 %v6178_v43, %v6174_v50  ;;  %v6108_v41 = vld [vmem:[#allocation8 + $0x1018] sm:$0xff]  ;;  %v6189_v22 = vld [vmem:[#allocation8 + $0x12a0] sm:$0xff]  ;;  %v6147_v48 = vld [vmem:[#allocation8 + $0x1150] sm:$0xff] }
 0x84b   :  { %9477 = vmatprep.subr.bf16.mxu1 %v9476_v14  ;;  %v6173_v14 = vld [vmem:[#allocation8 + $0x1220] sm:$0xff]  ;;  %v9524_v25 = vpack.c.bf16 %v6108_v41, %v6104_v34  ;;  %v6152_v50 = vld [vmem:[#allocation8 + $0x1178] sm:$0xff] }
 0x84c   :  { %v9514_v19 = vpack.c.bf16 %v6177_v23, %v6173_v14  ;;  %v6156_v43 = vld [vmem:[#allocation8 + $0x1198] sm:$0xff]  ;;  %v6151_v14 = vld [vmem:[#allocation8 + $0x1170] sm:$0xff] }
 0x84d   :  { %v6155_v23 = vld [vmem:[#allocation8 + $0x1190] sm:$0xff]  ;;  %v6176_v34 = vld [vmem:[#allocation8 + $0x1238] sm:$0xff] }
 0x84e   :  { %9479 = vmatpush1.bf16.msra.mxu1 %v9478_v8  ;;  %v9516_v8 = vpack.c.bf16 %v6186_v10, %v6182_v1  ;;  %v6160_v1 = vld [vmem:[#allocation8 + $0x11b8] sm:$0xff] }
 0x84f   :  { %9481 = vmatprep.subr.bf16.mxu1 %v9480_v63  ;;  %v6181_v63 = vld [vmem:[#allocation8 + $0x1260] sm:$0xff]  ;;  %v6164_v10 = vld [vmem:[#allocation8 + $0x11d8] sm:$0xff] }
 0x850   :  { %v9518_v3 = vpack.c.bf16 %v6185_v18, %v6181_v63  ;;  %v6159_v63 = vld [vmem:[#allocation8 + $0x11b0] sm:$0xff]  ;;  %v6180_v41 = vld [vmem:[#allocation8 + $0x1258] sm:$0xff] }
 0x851   :  { %v6163_v18 = vld [vmem:[#allocation8 + $0x11d0] sm:$0xff] }
 0x852   :  { %9483 = vmatpush1.bf16.msra.mxu1 %v9482_v9  ;;  %v6100_v9 = vld [vmem:[#allocation8 + $0xfd8] sm:$0xff] }
 0x853   :  { %9485 = vmatprep.subr.bf16.mxu1 %v9484_v13  ;;  %v6095_v13 = vld [vmem:[#allocation8 + $0xfb0] sm:$0xff] }
 0x856   :  { %9487 = vmatpush1.bf16.msra.mxu1 %v9486_v37  ;;  %v9520_v37 = vpack.c.bf16 %v6100_v9, %v6096_v44  ;;  %v9554_v44 = vpack.c.bf16 %v6163_v18, %v6159_v63  ;;  %v6473_v63 = vld [vmem:[#allocation8 + $0x1448] sm:$0xff] }
 0x857   :  { %9489 = vmatprep.subr.bf16.mxu1 %v9488_v24  ;;  %v9522_v24 = vpack.c.bf16 %v6099_v60, %v6095_v13  ;;  %v6167_v13 = vld [vmem:[#allocation8 + $0x11f0] sm:$0xff] }
 0x858   :  { %v6171_v60 = vld [vmem:[#allocation8 + $0x1210] sm:$0xff] }
 0x85a   :  { %9491 = vmatpush1.bf16.msra.mxu1 %v9490_v39  ;;  %v6116_v39 = vld [vmem:[#allocation8 + $0x1058] sm:$0xff] }
 0x85b   :  { %9493 = vmatprep.subr.bf16.mxu1 %v9492_v59  ;;  %v9526_v59 = vpack.c.bf16 %v6107_v53, %v6103_v61  ;;  %v9528_v36 = vpack.c.bf16 %v6116_v39, %v6112_v11  ;;  %v6184_v61 = vld [vmem:[#allocation8 + $0x1278] sm:$0xff] }
 0x85c   :  { %v6188_v53 = vld [vmem:[#allocation8 + $0x1298] sm:$0xff] }
 0x85d   :  { %v9564_v39 = vpack.c.bf16 %v6188_v53, %v6184_v61 }
 0x85e   :  { %9495 = vmatpush1.bf16.msra.mxu1 %v9494_v29  ;;  %v6124_v29 = vld [vmem:[#allocation8 + $0x1098] sm:$0xff] }
 0x85f   :  { %9497 = vmatprep.subr.bf16.mxu1 %v9496_v16  ;;  %v9530_v16 = vpack.c.bf16 %v6115_v20, %v6111_v17  ;;  %v9532_v52 = vpack.c.bf16 %v6124_v29, %v6120_v49  ;;  %v6192_v20 = vld [vmem:[#allocation8 + $0x12b8] sm:$0xff]  ;;  %v6425_v49 = vld [vmem:[#allocation8 + $0x12c8] sm:$0xff] }
 0x860   :  { %v6429_v29 = vld [vmem:[#allocation8 + $0x12e8] sm:$0xff] }
 0x862   :  { %9499 = vmatpush1.bf16.msra.mxu1 %v9498_v46  ;;  %v6132_v46 = vld [vmem:[#allocation8 + $0x10d8] sm:$0xff] }
 0x863   :  { %9501 = vmatprep.subr.bf16.mxu1 %v9500_v35  ;;  %v9534_v35 = vpack.c.bf16 %v6123_v6, %v6119_v0  ;;  %v9536_v56 = vpack.c.bf16 %v6132_v46, %v6128_v28  ;;  %v6433_v0 = vld [vmem:[#allocation8 + $0x1308] sm:$0xff]  ;;  %v6191_v28 = vld [vmem:[#allocation8 + $0x12b0] sm:$0xff]  ;;  %v9620_v46 = vpack.c.bf16 %v6429_v29, %v6425_v49  ;;  %v6496_v49 = vld [vmem:[#allocation8 + $0x1500] sm:$0xff] }
 0x864   :  { %v6437_v6 = vld [vmem:[#allocation8 + $0x1328] sm:$0xff]  ;;  %v6500_v29 = vld [vmem:[#allocation8 + $0x1520] sm:$0xff] }
 0x866   :  { %9503 = vmatpush1.bf16.msra.mxu1 %v9502_v33 }
 0x867   :  { %9505 = vmatprep.subr.bf16.mxu1 %v9504_v51  ;;  %v9540_v51 = vpack.c.bf16 %v6140_v30, %v6136_v4  ;;  %v6441_v4 = vld [vmem:[#allocation8 + $0x1348] sm:$0xff] }
 0x868   :  { %v6445_v30 = vld [vmem:[#allocation8 + $0x1368] sm:$0xff] }
 0x86a   :  { %9507 = vmatpush1.bf16.msra.mxu1 %v9506_v2  ;;  %v9542_v2 = vpack.c.bf16 %v6139_v54, %v6135_v62  ;;  %v6440_v62 = vld [vmem:[#allocation8 + $0x1340] sm:$0xff] }
 0x86b   :  { %9509 = vmatprep.subr.bf16.mxu1 %v9508_v38  ;;  %v9544_v38 = vpack.c.bf16 %v6148_v27, %v6144_v15  ;;  %v6444_v54 = vld [vmem:[#allocation8 + $0x1360] sm:$0xff]  ;;  %v6449_v15 = vld [vmem:[#allocation8 + $0x1388] sm:$0xff] }
 0x86c   :  { %v6453_v27 = vld [vmem:[#allocation8 + $0x13a8] sm:$0xff] }
 0x86e   :  { %9511 = vmatpush1.bf16.msra.mxu1 %v9510_v45  ;;  %v9546_v45 = vpack.c.bf16 %v6147_v48, %v6143_v5  ;;  %v9632_v5 = vpack.c.bf16 %v6453_v27, %v6449_v15  ;;  %v6448_v48 = vld [vmem:[#allocation8 + $0x1380] sm:$0xff]  ;;  %v6426_v15 = vld [vmem:[#allocation8 + $0x12d0] sm:$0xff] }
 0x86f   :  { %9513 = vmatprep.subr.bf16.mxu1 %v9512_v31  ;;  %v9548_v31 = vpack.c.bf16 %v6156_v43, %v6152_v50  ;;  %v6457_v50 = vld [vmem:[#allocation8 + $0x13c8] sm:$0xff]  ;;  %v6430_v27 = vld [vmem:[#allocation8 + $0x12f0] sm:$0xff] }
 0x870   :  { %v6461_v43 = vld [vmem:[#allocation8 + $0x13e8] sm:$0xff] }
 0x872   :  { %9515 = vmatpush1.bf16.msra.mxu1 %v9514_v19  ;;  %v9550_v19 = vpack.c.bf16 %v6155_v23, %v6151_v14  ;;  %v9636_v14 = vpack.c.bf16 %v6461_v43, %v6457_v50  ;;  %v6456_v23 = vld [vmem:[#allocation8 + $0x13c0] sm:$0xff]  ;;  %v6434_v43 = vld [vmem:[#allocation8 + $0x1310] sm:$0xff] }
 0x873   :  { %9517 = vmatprep.subr.bf16.mxu1 %v9516_v8  ;;  %v9552_v8 = vpack.c.bf16 %v6164_v10, %v6160_v1  ;;  %v6465_v1 = vld [vmem:[#allocation8 + $0x1408] sm:$0xff] }
 0x874   :  { %v6469_v10 = vld [vmem:[#allocation8 + $0x1428] sm:$0xff] }
 0x876   :  { %9519 = vmatpush1.bf16.msra.mxu1 %v9518_v3  ;;  %v6168_v3 = vld [vmem:[#allocation8 + $0x11f8] sm:$0xff] }
 0x877   :  { %6244 = vmatprep.subr.mxu1 %v6190_v58  ;;  %v6172_v58 = vld [vmem:[#allocation8 + $0x1218] sm:$0xff] }
 0x878   :  { %v9556_v9 = vpack.c.bf16 %v6172_v58, %v6168_v3  ;;  %v14298_v3 = vpop.f32.mrb[120].mxu0 }
 0x87a   :  { %6245 = vmatpush1.msra.mxu1 %v6189_v22  ;;  %v9558_v22 = vpack.c.bf16 %v6171_v60, %v6167_v13  ;;  %v14300_v13 = vpop.f32.mrb[121].mxu0  ;;  %v6485_v60 = vld [vmem:[#allocation8 + $0x14a8] sm:$0xff] }
 0x87b   :  { %9521 = vmatprep.subr.bf16.mxu1 %v9520_v37  ;;  %6261 = vmatmul.mubr.f32.vlgmr.msra.gmra.mrb[58].mxu1 %v14272_v26  ;;  %v9560_v37 = vpack.c.bf16 %v6180_v41, %v6176_v34 }
 0x87c   :  { %9523 = vmatpush1.bf16.msra.mxu1 %v9522_v24  ;;  %8340 = vmatprep.mubr.msk.f32.mxu1 %vm4727_vm12, %v14274_v40  ;;  %v6131_v40 = vld [vmem:[#allocation8 + $0x10d0] sm:$0xff] }
 0x87d   :  { %9525 = vmatprep.subr.bf16.mxu1 %v9524_v25  ;;  %v9538_v33 = vpack.c.bf16 %v6131_v40, %v6127_v32  ;;  %v6175_v24 = vld [vmem:[#allocation8 + $0x1230] sm:$0xff]  ;;  %v6432_v32 = vld [vmem:[#allocation8 + $0x1300] sm:$0xff] }
 0x87e   :  { %v6179_v25 = vld [vmem:[#allocation8 + $0x1250] sm:$0xff]  ;;  %v6436_v40 = vld [vmem:[#allocation8 + $0x1320] sm:$0xff] }
 0x87f   :  { %v9562_v11 = vpack.c.bf16 %v6179_v25, %v6175_v24  ;;  %v6489_v24 = vld [vmem:[#allocation8 + $0x14c8] sm:$0xff] }
 0x880   :  { %9527 = vmatpush1.bf16.msra.mxu1 %v9526_v59  ;;  %v6183_v59 = vld [vmem:[#allocation8 + $0x1270] sm:$0xff]  ;;  %v6493_v25 = vld [vmem:[#allocation8 + $0x14e8] sm:$0xff] }
 0x881   :  { %9529 = vmatprep.subr.bf16.mxu1 %v9528_v36  ;;  %v6187_v36 = vld [vmem:[#allocation8 + $0x1290] sm:$0xff]  ;;  %v9652_v53 = vpack.c.bf16 %v6493_v25, %v6489_v24  ;;  %v6475_v25 = vld [vmem:[#allocation8 + $0x1458] sm:$0xff] }
 0x882   :  { %v9566_v17 = vpack.c.bf16 %v6187_v36, %v6183_v59  ;;  %v6497_v59 = vld [vmem:[#allocation8 + $0x1508] sm:$0xff]  ;;  %v6470_v24 = vld [vmem:[#allocation8 + $0x1430] sm:$0xff] }
 0x883   :  { %v6501_v36 = vld [vmem:[#allocation8 + $0x1528] sm:$0xff] }
 0x884   :  { %9531 = vmatpush1.bf16.msra.mxu1 %v9530_v16  ;;  %v6424_v16 = vld [vmem:[#allocation8 + $0x12c0] sm:$0xff] }
 0x885   :  { %9533 = vmatprep.subr.bf16.mxu1 %v9532_v52  ;;  %v6428_v52 = vld [vmem:[#allocation8 + $0x12e0] sm:$0xff] }
 0x888   :  { %9535 = vmatpush1.bf16.msra.mxu1 %v9534_v35  ;;  %v9622_v35 = vpack.c.bf16 %v6428_v52, %v6424_v16  ;;  %v6505_v16 = vld [vmem:[#allocation8 + $0x1548] sm:$0xff] }
 0x889   :  { %9537 = vmatprep.subr.bf16.mxu1 %v9536_v56  ;;  %v9624_v56 = vpack.c.bf16 %v6437_v6, %v6433_v0  ;;  %v6509_v52 = vld [vmem:[#allocation8 + $0x1568] sm:$0xff]  ;;  %v9658_v0 = vpack.c.bf16 %v6500_v29, %v6496_v49  ;;  %v6482_v29 = vld [vmem:[#allocation8 + $0x1490] sm:$0xff] }
 0x88a   :  { %v9660_v6 = vpack.c.bf16 %v6509_v52, %v6505_v16  ;;  %v6486_v16 = vld [vmem:[#allocation8 + $0x14b0] sm:$0xff]  ;;  %v6491_v52 = vld [vmem:[#allocation8 + $0x14d8] sm:$0xff] }
 0x88c   :  { %9539 = vmatpush1.bf16.msra.mxu1 %v9538_v33  ;;  %v9626_v33 = vpack.c.bf16 %v6436_v40, %v6432_v32 }
 0x88d   :  { %9541 = vmatprep.subr.bf16.mxu1 %v9540_v51  ;;  %v9628_v51 = vpack.c.bf16 %v6445_v30, %v6441_v4  ;;  %v6512_v4 = vld [vmem:[#allocation8 + $0x1580] sm:$0xff] }
 0x88e   :  { %v6516_v30 = vld [vmem:[#allocation8 + $0x15a0] sm:$0xff] }
 0x890   :  { %9543 = vmatpush1.bf16.msra.mxu1 %v9542_v2  ;;  %v9630_v2 = vpack.c.bf16 %v6444_v54, %v6440_v62  ;;  %v6427_v62 = vld [vmem:[#allocation8 + $0x12d8] sm:$0xff] }
 0x891   :  { %9545 = vmatprep.subr.bf16.mxu1 %v9544_v38  ;;  %v7335_v38 = vadd.s32 18, %v14815_v7  ;;  %v6460_v7 = vld [vmem:[#allocation8 + $0x13e0] sm:$0xff]  ;;  %v6431_v54 = vld [vmem:[#allocation8 + $0x12f8] sm:$0xff] }
 0x893   :  { %vm7337_vm3 = vcmp.eq.s32.totalorder %v14818_v42, %v7335_v38  ;;  %vm7336_vm0 = vcmp.eq.s32.totalorder %v14816_v12, %v7335_v38  ;;  %v9640_v42 = vpack.c.bf16 %v6469_v10, %v6465_v1  ;;  %v6468_v12 = vld [vmem:[#allocation8 + $0x1420] sm:$0xff]  ;;  %v6439_v38 = vld [vmem:[#allocation8 + $0x1338] sm:$0xff]  ;;  %v6442_v1 = vld [vmem:[#allocation8 + $0x1350] sm:$0xff] }
 0x894   :  { %9547 = vmatpush1.bf16.msra.mxu1 %v9546_v45  ;;  %v8366_v45 = vsel %vm7337_vm3, 1.0, %v14819_v21  ;;  %v6477_v21 = vld [vmem:[#allocation8 + $0x1468] sm:$0xff]  ;;  %v6446_v10 = vld [vmem:[#allocation8 + $0x1370] sm:$0xff] }
 0x895   :  { %9549 = vmatprep.subr.bf16.mxu1 %v9548_v31  ;;  %8369 = vmatprep.mubr.msk.f32.mxu0 %vm4364_vm10, %v8366_v45  ;;  %v9644_v58 = vpack.c.bf16 %v6477_v21, %v6473_v63  ;;  %v6438_v45 = vld [vmem:[#allocation8 + $0x1330] sm:$0xff] }
 0x896   :  { %8370 = vmatmul.mubr.msk.f32.vlgmr.msra.gmra.mrb[124].mxu0 %vm7336_vm0, %v10821_v57  ;;  %v6481_v57 = vld [vmem:[#allocation8 + $0x1488] sm:$0xff]  ;;  %v6450_v63 = vld [vmem:[#allocation8 + $0x1390] sm:$0xff] }
 0x897   :  { %v9648_v41 = vpack.c.bf16 %v6485_v60, %v6481_v57  ;;  %v6454_v21 = vld [vmem:[#allocation8 + $0x13b0] sm:$0xff]  ;;  %v6467_v60 = vld [vmem:[#allocation8 + $0x1418] sm:$0xff] }
 0x898   :  { %9551 = vmatpush1.bf16.msra.mxu1 %v9550_v19  ;;  %v9638_v19 = vpack.c.bf16 %v6460_v7, %v6456_v23  ;;  %v9674_v23 = vpack.c.bf16 %v6438_v45, %v6434_v43  ;;  %v6458_v57 = vld [vmem:[#allocation8 + $0x13d0] sm:$0xff] }
 0x899   :  { %9553 = vmatprep.subr.bf16.mxu1 %v9552_v8  ;;  %v6464_v8 = vld [vmem:[#allocation8 + $0x1400] sm:$0xff]  ;;  %v6518_v43 = vld [vmem:[#allocation8 + $0x15b0] sm:$0xff] }
 0x89a   :  { %v9642_v18 = vpack.c.bf16 %v6468_v12, %v6464_v8  ;;  %v9678_v8 = vpack.c.bf16 %v6446_v10, %v6442_v1  ;;  %v6759_v1 = vld [vmem:[#allocation8 + $0x1600] sm:$0xff]  ;;  %v6764_v10 = vld [vmem:[#allocation8 + $0x1628] sm:$0xff] }
 0x89c   :  { %9555 = vmatpush1.bf16.msra.mxu1 %v9554_v44  ;;  %v6472_v44 = vld [vmem:[#allocation8 + $0x1440] sm:$0xff] }
 0x89d   :  { %9557 = vmatprep.subr.bf16.mxu1 %v9556_v9  ;;  %v6476_v9 = vld [vmem:[#allocation8 + $0x1460] sm:$0xff] }
 0x89e   :  { %v9646_v34 = vpack.c.bf16 %v6476_v9, %v6472_v44  ;;  %v9682_v44 = vpack.c.bf16 %v6454_v21, %v6450_v63  ;;  %v6763_v21 = vld [vmem:[#allocation8 + $0x1620] sm:$0xff] }
 0x8a0   :  { %9559 = vmatpush1.bf16.msra.mxu1 %v9558_v22  ;;  %v6480_v22 = vld [vmem:[#allocation8 + $0x1480] sm:$0xff] }
 0x8a1   :  { %9561 = vmatprep.subr.bf16.mxu1 %v9560_v37  ;;  %v6484_v37 = vld [vmem:[#allocation8 + $0x14a0] sm:$0xff] }
 0x8a2   :  { %v9650_v61 = vpack.c.bf16 %v6484_v37, %v6480_v22  ;;  %v6466_v37 = vld [vmem:[#allocation8 + $0x1410] sm:$0xff] }
 0x8a4   :  { %9563 = vmatpush1.bf16.msra.mxu1 %v9562_v11  ;;  %v6488_v11 = vld [vmem:[#allocation8 + $0x14c0] sm:$0xff] }
 0x8a5   :  { %9565 = vmatprep.subr.bf16.mxu1 %v9564_v39  ;;  %v6492_v39 = vld [vmem:[#allocation8 + $0x14e0] sm:$0xff] }
 0x8a8   :  { %9567 = vmatpush1.bf16.msra.mxu1 %v9566_v17  ;;  %v9654_v17 = vpack.c.bf16 %v6492_v39, %v6488_v11  ;;  %v6474_v39 = vld [vmem:[#allocation8 + $0x1450] sm:$0xff] }
 0x8a9   :  { %6315 = vmatprep.subr.mxu1 %v6192_v20  ;;  %v9656_v20 = vpack.c.bf16 %v6501_v36, %v6497_v59  ;;  %v6478_v59 = vld [vmem:[#allocation8 + $0x1470] sm:$0xff]  ;;  %v6483_v36 = vld [vmem:[#allocation8 + $0x1498] sm:$0xff] }
 0x8ac   :  { %6316 = vmatpush1.msra.mxu1 %v6191_v28  ;;  %v6504_v28 = vld [vmem:[#allocation8 + $0x1540] sm:$0xff] }
 0x8ad   :  { %6332 = vmatmul.mubr.f32.vlgmr.msra.gmra.mrb[60].mxu1 %v14272_v26  ;;  %9621 = vmatprep.subr.bf16.mxu1 %v9620_v46  ;;  %v6452_v26 = vld [vmem:[#allocation8 + $0x13a0] sm:$0xff] }
 0x8ae   :  { %9623 = vmatpush1.bf16.msra.mxu1 %v9622_v35  ;;  %8347 = vmatprep.mubr.msk.f32.mxu1 %vm4727_vm12, %v14284_v55  ;;  %v9634_v31 = vpack.c.bf16 %v6452_v26, %v6448_v48  ;;  %v6508_v46 = vld [vmem:[#allocation8 + $0x1560] sm:$0xff]  ;;  %v6513_v35 = vld [vmem:[#allocation8 + $0x1588] sm:$0xff]  ;;  %v9668_v48 = vpack.c.bf16 %v6431_v54, %v6427_v62  ;;  %v9670_v26 = vpack.c.bf16 %v6430_v27, %v6426_v15  ;;  %v6511_v62 = vld [vmem:[#allocation8 + $0x1578] sm:$0xff] }
 0x8af   :  { %9625 = vmatprep.subr.bf16.mxu1 %v9624_v56  ;;  %v6517_v56 = vld [vmem:[#allocation8 + $0x15a8] sm:$0xff]  ;;  %v9662_v32 = vpack.c.bf16 %v6508_v46, %v6504_v28  ;;  %v6490_v46 = vld [vmem:[#allocation8 + $0x14d0] sm:$0xff] }
 0x8b0   :  { %v9664_v40 = vpack.c.bf16 %v6517_v56, %v6513_v35  ;;  %v6494_v35 = vld [vmem:[#allocation8 + $0x14f0] sm:$0xff]  ;;  %v6499_v56 = vld [vmem:[#allocation8 + $0x1518] sm:$0xff] }
 0x8b1   :  { %v6506_v27 = vld [vmem:[#allocation8 + $0x1550] sm:$0xff] }
 0x8b2   :  { %9627 = vmatpush1.bf16.msra.mxu1 %v9626_v33  ;;  %v9666_v33 = vpack.c.bf16 %v6516_v30, %v6512_v4  ;;  %v6498_v30 = vld [vmem:[#allocation8 + $0x1510] sm:$0xff] }
 0x8b3   :  { %9629 = vmatprep.subr.bf16.mxu1 %v9628_v51  ;;  %v6521_v51 = vld [vmem:[#allocation8 + $0x15c8] sm:$0xff] }
 0x8b6   :  { %9631 = vmatpush1.bf16.msra.mxu1 %v9630_v2  ;;  %v6435_v2 = vld [vmem:[#allocation8 + $0x1318] sm:$0xff] }
 0x8b7   :  { %9633 = vmatprep.subr.bf16.mxu1 %v9632_v5  ;;  %v6520_v5 = vld [vmem:[#allocation8 + $0x15c0] sm:$0xff]  ;;  %v9672_v50 = vpack.c.bf16 %v6439_v38, %v6435_v2  ;;  %v6510_v2 = vld [vmem:[#allocation8 + $0x1570] sm:$0xff]  ;;  %v6515_v38 = vld [vmem:[#allocation8 + $0x1598] sm:$0xff] }
 0x8ba   :  { %9635 = vmatpush1.bf16.msra.mxu1 %v9634_v31  ;;  %v6443_v31 = vld [vmem:[#allocation8 + $0x1358] sm:$0xff] }
 0x8bb   :  { %9637 = vmatprep.subr.bf16.mxu1 %v9636_v14  ;;  %v6447_v14 = vld [vmem:[#allocation8 + $0x1378] sm:$0xff] }
 0x8bc   :  { %v9676_v7 = vpack.c.bf16 %v6447_v14, %v6443_v31  ;;  %v6523_v31 = vld [vmem:[#allocation8 + $0x15d8] sm:$0xff]  ;;  %v6756_v14 = vld [vmem:[#allocation8 + $0x15e8] sm:$0xff] }
 0x8be   :  { %9639 = vmatpush1.bf16.msra.mxu1 %v9638_v19  ;;  %v6451_v19 = vld [vmem:[#allocation8 + $0x1398] sm:$0xff] }
 0x8bf   :  { %9641 = vmatprep.subr.bf16.mxu1 %v9640_v42  ;;  %v6455_v42 = vld [vmem:[#allocation8 + $0x13b8] sm:$0xff] }
 0x8c0   :  { %v9680_v12 = vpack.c.bf16 %v6455_v42, %v6451_v19  ;;  %v6768_v19 = vld [vmem:[#allocation8 + $0x1648] sm:$0xff]  ;;  %v6522_v42 = vld [vmem:[#allocation8 + $0x15d0] sm:$0xff] }
 0x8c1   :  { %v9772_v63 = vpack.c.bf16 %v6768_v19, %v6764_v10  ;;  %v6835_v10 = vld [vmem:[#allocation8 + $0x1860] sm:$0xff] }
 0x8c2   :  { %9643 = vmatpush1.bf16.msra.mxu1 %v9642_v18  ;;  %v6459_v18 = vld [vmem:[#allocation8 + $0x13d8] sm:$0xff]  ;;  %v6839_v19 = vld [vmem:[#allocation8 + $0x1880] sm:$0xff] }
 0x8c3   :  { %9645 = vmatprep.subr.bf16.mxu1 %v9644_v58  ;;  %v6463_v58 = vld [vmem:[#allocation8 + $0x13f8] sm:$0xff] }
 0x8c4   :  { %v9684_v9 = vpack.c.bf16 %v6463_v58, %v6459_v18  ;;  %v6767_v18 = vld [vmem:[#allocation8 + $0x1640] sm:$0xff]  ;;  %v6772_v58 = vld [vmem:[#allocation8 + $0x1668] sm:$0xff] }
 0x8c6   :  { %9647 = vmatpush1.bf16.msra.mxu1 %v9646_v34  ;;  %v6471_v34 = vld [vmem:[#allocation8 + $0x1438] sm:$0xff] }
 0x8c7   :  { %9649 = vmatprep.subr.bf16.mxu1 %v9648_v41  ;;  %v9688_v22 = vpack.c.bf16 %v6471_v34, %v6467_v60  ;;  %v6775_v60 = vld [vmem:[#allocation8 + $0x1680] sm:$0xff]  ;;  %v6780_v34 = vld [vmem:[#allocation8 + $0x16a8] sm:$0xff] }
 0x8ca   :  { %9651 = vmatpush1.bf16.msra.mxu1 %v9650_v61  ;;  %v6479_v61 = vld [vmem:[#allocation8 + $0x1478] sm:$0xff] }
 0x8cb   :  { %9653 = vmatprep.subr.bf16.mxu1 %v9652_v53  ;;  %v9690_v53 = vpack.c.bf16 %v6470_v24, %v6466_v37  ;;  %v9692_v11 = vpack.c.bf16 %v6479_v61, %v6475_v25  ;;  %v6779_v24 = vld [vmem:[#allocation8 + $0x16a0] sm:$0xff]  ;;  %v6788_v61 = vld [vmem:[#allocation8 + $0x16e8] sm:$0xff] }
 0x8cc   :  { %v6783_v25 = vld [vmem:[#allocation8 + $0x16c0] sm:$0xff] }
 0x8ce   :  { %9655 = vmatpush1.bf16.msra.mxu1 %v9654_v17  ;;  %v6487_v17 = vld [vmem:[#allocation8 + $0x14b8] sm:$0xff] }
 0x8cf   :  { %9657 = vmatprep.subr.bf16.mxu1 %v9656_v20  ;;  %v9694_v20 = vpack.c.bf16 %v6478_v59, %v6474_v39  ;;  %v9696_v49 = vpack.c.bf16 %v6487_v17, %v6483_v36  ;;  %v6787_v39 = vld [vmem:[#allocation8 + $0x16e0] sm:$0xff]  ;;  %v6796_v36 = vld [vmem:[#allocation8 + $0x1728] sm:$0xff] }
 0x8d0   :  { %v6791_v59 = vld [vmem:[#allocation8 + $0x1700] sm:$0xff]  ;;  %v6800_v17 = vld [vmem:[#allocation8 + $0x1748] sm:$0xff] }
 0x8d2   :  { %9659 = vmatpush1.bf16.msra.mxu1 %v9658_v0  ;;  %v6495_v0 = vld [vmem:[#allocation8 + $0x14f8] sm:$0xff] }
 0x8d3   :  { %9661 = vmatprep.subr.bf16.mxu1 %v9660_v6  ;;  %v9698_v6 = vpack.c.bf16 %v6486_v16, %v6482_v29  ;;  %v9700_v28 = vpack.c.bf16 %v6495_v0, %v6491_v52  ;;  %v6795_v29 = vld [vmem:[#allocation8 + $0x1720] sm:$0xff]  ;;  %v6804_v52 = vld [vmem:[#allocation8 + $0x1768] sm:$0xff] }
 0x8d4   :  { %v6799_v16 = vld [vmem:[#allocation8 + $0x1740] sm:$0xff]  ;;  %v6808_v0 = vld [vmem:[#allocation8 + $0x1788] sm:$0xff] }
 0x8d6   :  { %9663 = vmatpush1.bf16.msra.mxu1 %v9662_v32  ;;  %v6503_v32 = vld [vmem:[#allocation8 + $0x1538] sm:$0xff] }
 0x8d7   :  { %9665 = vmatprep.subr.bf16.mxu1 %v9664_v40  ;;  %v9702_v40 = vpack.c.bf16 %v6494_v35, %v6490_v46  ;;  %v9704_v4 = vpack.c.bf16 %v6503_v32, %v6499_v56  ;;  %v9792_v46 = vpack.c.bf16 %v6808_v0, %v6804_v52  ;;  %v6803_v35 = vld [vmem:[#allocation8 + $0x1760] sm:$0xff]  ;;  %v6781_v52 = vld [vmem:[#allocation8 + $0x16b0] sm:$0xff] }
 0x8d8   :  { %v6807_v56 = vld [vmem:[#allocation8 + $0x1780] sm:$0xff]  ;;  %v6785_v0 = vld [vmem:[#allocation8 + $0x16d0] sm:$0xff] }
 0x8da   :  { %9667 = vmatpush1.bf16.msra.mxu1 %v9666_v33  ;;  %v6502_v33 = vld [vmem:[#allocation8 + $0x1530] sm:$0xff] }
 0x8db   :  { %6575 = vmatprep.subr.mxu1 %v6521_v51  ;;  %v6507_v51 = vld [vmem:[#allocation8 + $0x1558] sm:$0xff]  ;;  %v9706_v54 = vpack.c.bf16 %v6502_v33, %v6498_v30  ;;  %v9794_v30 = vpack.c.bf16 %v6807_v56, %v6803_v35  ;;  %v9830_v35 = vpack.c.bf16 %v6785_v0, %v6781_v52  ;;  %v7094_v0 = vld [vmem:[#allocation8 + $0x1940] sm:$0xff] }
 0x8dc   :  { %v9708_v15 = vpack.c.bf16 %v6511_v62, %v6507_v51  ;;  %v6811_v51 = vld [vmem:[#allocation8 + $0x17a0] sm:$0xff] }
 0x8dd   :  { %v6815_v62 = vld [vmem:[#allocation8 + $0x17c0] sm:$0xff] }
 0x8de   :  { %6576 = vmatpush1.msra.mxu1 %v6520_v5  ;;  %v6519_v5 = vld [vmem:[#allocation8 + $0x15b8] sm:$0xff] }
 0x8df   :  { %9669 = vmatprep.subr.bf16.mxu1 %v9668_v48  ;;  %6592 = vmatmul.mubr.f32.vlgmr.msra.gmra.mrb[58].mxu1 %v14282_v47  ;;  %v9710_v48 = vpack.c.bf16 %v6510_v2, %v6506_v27  ;;  %v9798_v27 = vpack.c.bf16 %v6815_v62, %v6811_v51  ;;  %v6797_v62 = vld [vmem:[#allocation8 + $0x1730] sm:$0xff] }
 0x8e0   :  { %9671 = vmatpush1.bf16.msra.mxu1 %v9670_v26  ;;  %8348 = vmatprep.mubr.msk.f32.mxu1 %vm4727_vm12, %v14284_v55  ;;  %v6462_v55 = vld [vmem:[#allocation8 + $0x13f0] sm:$0xff]  ;;  %v9712_v26 = vpack.c.bf16 %v6519_v5, %v6515_v38  ;;  %v6819_v38 = vld [vmem:[#allocation8 + $0x17e0] sm:$0xff] }
 0x8e1   :  { %9673 = vmatprep.subr.bf16.mxu1 %v9672_v50  ;;  %v9686_v41 = vpack.c.bf16 %v6462_v55, %v6458_v57  ;;  %v6514_v50 = vld [vmem:[#allocation8 + $0x1590] sm:$0xff]  ;;  %v6771_v55 = vld [vmem:[#allocation8 + $0x1660] sm:$0xff] }
 0x8e2   :  { %v9714_v45 = vpack.c.bf16 %v6518_v43, %v6514_v50  ;;  %v6823_v5 = vld [vmem:[#allocation8 + $0x1800] sm:$0xff] }
 0x8e3   :  { %v9802_v50 = vpack.c.bf16 %v6823_v5, %v6819_v38  ;;  %v6805_v5 = vld [vmem:[#allocation8 + $0x1770] sm:$0xff] }
 0x8e4   :  { %9675 = vmatpush1.bf16.msra.mxu1 %v9674_v23  ;;  %v6760_v23 = vld [vmem:[#allocation8 + $0x1608] sm:$0xff] }
 0x8e5   :  { %9677 = vmatprep.subr.bf16.mxu1 %v9676_v7  ;;  %v6755_v7 = vld [vmem:[#allocation8 + $0x15e0] sm:$0xff] }
 0x8e8   :  { %9679 = vmatpush1.bf16.msra.mxu1 %v9678_v8  ;;  %v9768_v8 = vpack.c.bf16 %v6760_v23, %v6756_v14  ;;  %v6836_v14 = vld [vmem:[#allocation8 + $0x1868] sm:$0xff] }
 0x8e9   :  { %9681 = vmatprep.subr.bf16.mxu1 %v9680_v12  ;;  %v9770_v12 = vpack.c.bf16 %v6759_v1, %v6755_v7  ;;  %v6840_v23 = vld [vmem:[#allocation8 + $0x1888] sm:$0xff] }
 0x8ea   :  { %v9808_v1 = vpack.c.bf16 %v6840_v23, %v6836_v14  ;;  %v6817_v14 = vld [vmem:[#allocation8 + $0x17d0] sm:$0xff]  ;;  %v6822_v23 = vld [vmem:[#allocation8 + $0x17f8] sm:$0xff] }
 0x8ec   :  { %9683 = vmatpush1.bf16.msra.mxu1 %v9682_v44  ;;  %v6776_v44 = vld [vmem:[#allocation8 + $0x1688] sm:$0xff] }
 0x8ed   :  { %9685 = vmatprep.subr.bf16.mxu1 %v9684_v9  ;;  %v9774_v9 = vpack.c.bf16 %v6767_v18, %v6763_v21  ;;  %v9776_v57 = vpack.c.bf16 %v6776_v44, %v6772_v58  ;;  %v6843_v21 = vld [vmem:[#allocation8 + $0x18a0] sm:$0xff]  ;;  %v6852_v44 = vld [vmem:[#allocation8 + $0x18e8] sm:$0xff] }
 0x8ee   :  { %v6847_v18 = vld [vmem:[#allocation8 + $0x18c0] sm:$0xff] }
 0x8ef   :  { %v9814_v58 = vpack.c.bf16 %v6847_v18, %v6843_v21  ;;  %v6829_v18 = vld [vmem:[#allocation8 + $0x1830] sm:$0xff] }
 0x8f0   :  { %9687 = vmatpush1.bf16.msra.mxu1 %v9686_v41  ;;  %v6784_v41 = vld [vmem:[#allocation8 + $0x16c8] sm:$0xff] }
 0x8f1   :  { %9689 = vmatprep.subr.bf16.mxu1 %v9688_v22  ;;  %v9778_v22 = vpack.c.bf16 %v6775_v60, %v6771_v55  ;;  %v9780_v37 = vpack.c.bf16 %v6784_v41, %v6780_v34  ;;  %v6757_v55 = vld [vmem:[#allocation8 + $0x15f0] sm:$0xff]  ;;  %v6766_v34 = vld [vmem:[#allocation8 + $0x1638] sm:$0xff] }
 0x8f2   :  { %v6761_v60 = vld [vmem:[#allocation8 + $0x1610] sm:$0xff]  ;;  %v6770_v41 = vld [vmem:[#allocation8 + $0x1658] sm:$0xff] }
 0x8f4   :  { %9691 = vmatpush1.bf16.msra.mxu1 %v9690_v53  ;;  %v9782_v53 = vpack.c.bf16 %v6783_v25, %v6779_v24  ;;  %v9818_v24 = vpack.c.bf16 %v6761_v60, %v6757_v55  ;;  %v9820_v25 = vpack.c.bf16 %v6770_v41, %v6766_v34  ;;  %v6837_v60 = vld [vmem:[#allocation8 + $0x1870] sm:$0xff]  ;;  %v6846_v41 = vld [vmem:[#allocation8 + $0x18b8] sm:$0xff] }
 0x8f5   :  { %9693 = vmatprep.subr.bf16.mxu1 %v9692_v11  ;;  %v6841_v34 = vld [vmem:[#allocation8 + $0x1890] sm:$0xff] }
 0x8f8   :  { %9695 = vmatpush1.bf16.msra.mxu1 %v9694_v20  ;;  %v9786_v20 = vpack.c.bf16 %v6791_v59, %v6787_v39 }
 0x8f9   :  { %9697 = vmatprep.subr.bf16.mxu1 %v9696_v49  ;;  %v9788_v49 = vpack.c.bf16 %v6800_v17, %v6796_v36  ;;  %v6773_v36 = vld [vmem:[#allocation8 + $0x1670] sm:$0xff] }
 0x8fa   :  { %v6777_v17 = vld [vmem:[#allocation8 + $0x1690] sm:$0xff] }
 0x8fc   :  { %9699 = vmatpush1.bf16.msra.mxu1 %v9698_v6  ;;  %v9790_v6 = vpack.c.bf16 %v6799_v16, %v6795_v29  ;;  %v9826_v29 = vpack.c.bf16 %v6777_v17, %v6773_v36  ;;  %v7090_v36 = vld [vmem:[#allocation8 + $0x1920] sm:$0xff]  ;;  %v7095_v17 = vld [vmem:[#allocation8 + $0x1948] sm:$0xff] }
 0x8fd   :  { %9701 = vmatprep.subr.bf16.mxu1 %v9700_v28  ;;  %v14308_v28 = vpop.f32.mrb[122].mxu0 }
 0x8fe   :  { %v14310_v32 = vpop.f32.mrb[123].mxu0 }
 0x900   :  { %9703 = vmatpush1.bf16.msra.mxu1 %v9702_v40  ;;  %v6812_v40 = vld [vmem:[#allocation8 + $0x17a8] sm:$0xff] }
 0x901   :  { %9705 = vmatprep.subr.bf16.mxu1 %v9704_v4  ;;  %v6816_v4 = vld [vmem:[#allocation8 + $0x17c8] sm:$0xff] }
 0x902   :  { %v9796_v33 = vpack.c.bf16 %v6816_v4, %v6812_v40  ;;  %v6789_v40 = vld [vmem:[#allocation8 + $0x16f0] sm:$0xff]  ;;  %v6798_v4 = vld [vmem:[#allocation8 + $0x1738] sm:$0xff] }
 0x904   :  { %9707 = vmatpush1.bf16.msra.mxu1 %v9706_v54  ;;  %v6820_v54 = vld [vmem:[#allocation8 + $0x17e8] sm:$0xff] }
 0x905   :  { %9709 = vmatprep.subr.bf16.mxu1 %v9708_v15  ;;  %v6824_v15 = vld [vmem:[#allocation8 + $0x1808] sm:$0xff] }
 0x906   :  { %v9800_v2 = vpack.c.bf16 %v6824_v15, %v6820_v54  ;;  %v6801_v54 = vld [vmem:[#allocation8 + $0x1750] sm:$0xff]  ;;  %v6806_v15 = vld [vmem:[#allocation8 + $0x1778] sm:$0xff] }
 0x908   :  { %9711 = vmatpush1.bf16.msra.mxu1 %v9710_v48  ;;  %v6828_v48 = vld [vmem:[#allocation8 + $0x1828] sm:$0xff] }
 0x909   :  { %9713 = vmatprep.subr.bf16.mxu1 %v9712_v26  ;;  %v6832_v26 = vld [vmem:[#allocation8 + $0x1848] sm:$0xff] }
 0x90a   :  { %v9804_v43 = vpack.c.bf16 %v6832_v26, %v6828_v48  ;;  %v6809_v48 = vld [vmem:[#allocation8 + $0x1790] sm:$0xff]  ;;  %v6814_v26 = vld [vmem:[#allocation8 + $0x17b8] sm:$0xff] }
 0x90c   :  { %9715 = vmatpush1.bf16.msra.mxu1 %v9714_v45  ;;  %v6827_v45 = vld [vmem:[#allocation8 + $0x1820] sm:$0xff] }
 0x90d   :  { %6646 = vmatprep.subr.mxu1 %v6523_v31  ;;  %v6831_v31 = vld [vmem:[#allocation8 + $0x1840] sm:$0xff] }
 0x90e   :  { %v9806_v7 = vpack.c.bf16 %v6831_v31, %v6827_v45  ;;  %v6813_v31 = vld [vmem:[#allocation8 + $0x17b0] sm:$0xff] }
 0x910   :  { %6647 = vmatpush1.msra.mxu1 %v6522_v42  ;;  %v6844_v42 = vld [vmem:[#allocation8 + $0x18a8] sm:$0xff] }
 0x911   :  { %6663 = vmatmul.mubr.f32.vlgmr.msra.gmra.mrb[60].mxu1 %v14282_v47  ;;  %9769 = vmatprep.subr.bf16.mxu1 %v9768_v8  ;;  %v6792_v47 = vld [vmem:[#allocation8 + $0x1708] sm:$0xff] }
 0x912   :  { %9771 = vmatpush1.bf16.msra.mxu1 %v9770_v12  ;;  %8355 = vmatprep.mubr.msk.f32.mxu1 %vm4727_vm12, %v14300_v13  ;;  %v9784_v11 = vpack.c.bf16 %v6792_v47, %v6788_v61  ;;  %v6848_v8 = vld [vmem:[#allocation8 + $0x18c8] sm:$0xff]  ;;  %v9810_v12 = vpack.c.bf16 %v6839_v19, %v6835_v10  ;;  %v6765_v61 = vld [vmem:[#allocation8 + $0x1630] sm:$0xff] }
 0x913   :  { %9773 = vmatprep.subr.bf16.mxu1 %v9772_v63  ;;  %v9812_v63 = vpack.c.bf16 %v6848_v8, %v6844_v42  ;;  %v6769_v47 = vld [vmem:[#allocation8 + $0x1650] sm:$0xff]  ;;  %v6830_v8 = vld [vmem:[#allocation8 + $0x1838] sm:$0xff] }
 0x914   :  { %v9822_v39 = vpack.c.bf16 %v6769_v47, %v6765_v61  ;;  %v6821_v19 = vld [vmem:[#allocation8 + $0x17f0] sm:$0xff] }
 0x915   :  { %v6825_v42 = vld [vmem:[#allocation8 + $0x1810] sm:$0xff] }
 0x916   :  { %9775 = vmatpush1.bf16.msra.mxu1 %v9774_v9  ;;  %v6758_v9 = vld [vmem:[#allocation8 + $0x15f8] sm:$0xff]  ;;  %v6849_v61 = vld [vmem:[#allocation8 + $0x18d0] sm:$0xff] }
 0x917   :  { %9777 = vmatprep.subr.bf16.mxu1 %v9776_v57  ;;  %v6762_v57 = vld [vmem:[#allocation8 + $0x1618] sm:$0xff] }
 0x91a   :  { %9779 = vmatpush1.bf16.msra.mxu1 %v9778_v22  ;;  %v6851_v22 = vld [vmem:[#allocation8 + $0x18e0] sm:$0xff] }
 0x91b   :  { %9781 = vmatprep.subr.bf16.mxu1 %v9780_v37  ;;  %v9816_v37 = vpack.c.bf16 %v6762_v57, %v6758_v9  ;;  %v6842_v9 = vld [vmem:[#allocation8 + $0x1898] sm:$0xff] }
 0x91e   :  { %9783 = vmatpush1.bf16.msra.mxu1 %v9782_v53  ;;  %v6774_v53 = vld [vmem:[#allocation8 + $0x1678] sm:$0xff] }
 0x91f   :  { %9785 = vmatprep.subr.bf16.mxu1 %v9784_v11  ;;  %v6778_v11 = vld [vmem:[#allocation8 + $0x1698] sm:$0xff] }
 0x920   :  { %v9824_v59 = vpack.c.bf16 %v6778_v11, %v6774_v53  ;;  %v6854_v53 = vld [vmem:[#allocation8 + $0x18f8] sm:$0xff]  ;;  %v7087_v11 = vld [vmem:[#allocation8 + $0x1908] sm:$0xff] }
 0x922   :  { %9787 = vmatpush1.bf16.msra.mxu1 %v9786_v20  ;;  %v6782_v20 = vld [vmem:[#allocation8 + $0x16b8] sm:$0xff] }
 0x923   :  { %9789 = vmatprep.subr.bf16.mxu1 %v9788_v49  ;;  %v6786_v49 = vld [vmem:[#allocation8 + $0x16d8] sm:$0xff] }
 0x924   :  { %v9828_v16 = vpack.c.bf16 %v6786_v49, %v6782_v20  ;;  %v7099_v20 = vld [vmem:[#allocation8 + $0x1968] sm:$0xff]  ;;  %v6853_v49 = vld [vmem:[#allocation8 + $0x18f0] sm:$0xff] }
 0x925   :  { %v9920_v52 = vpack.c.bf16 %v7099_v20, %v7095_v17  ;;  %v7166_v17 = vld [vmem:[#allocation8 + $0x1b80] sm:$0xff] }
 0x926   :  { %9791 = vmatpush1.bf16.msra.mxu1 %v9790_v6  ;;  %v6790_v6 = vld [vmem:[#allocation8 + $0x16f8] sm:$0xff]  ;;  %v7170_v20 = vld [vmem:[#allocation8 + $0x1ba0] sm:$0xff] }
 0x927   :  { %9793 = vmatprep.subr.bf16.mxu1 %v9792_v46  ;;  %v6794_v46 = vld [vmem:[#allocation8 + $0x1718] sm:$0xff] }
 0x928   :  { %v9832_v56 = vpack.c.bf16 %v6794_v46, %v6790_v6  ;;  %v7098_v6 = vld [vmem:[#allocation8 + $0x1960] sm:$0xff]  ;;  %v7103_v46 = vld [vmem:[#allocation8 + $0x1988] sm:$0xff] }
 0x92a   :  { %9795 = vmatpush1.bf16.msra.mxu1 %v9794_v30  ;;  %v6802_v30 = vld [vmem:[#allocation8 + $0x1758] sm:$0xff] }
 0x92b   :  { %9797 = vmatprep.subr.bf16.mxu1 %v9796_v33  ;;  %v9836_v51 = vpack.c.bf16 %v6802_v30, %v6798_v4  ;;  %v7106_v4 = vld [vmem:[#allocation8 + $0x19a0] sm:$0xff]  ;;  %v7111_v30 = vld [vmem:[#allocation8 + $0x19c8] sm:$0xff] }
 0x92e   :  { %9799 = vmatpush1.bf16.msra.mxu1 %v9798_v27  ;;  %v6810_v27 = vld [vmem:[#allocation8 + $0x1798] sm:$0xff] }
 0x92f   :  { %9801 = vmatprep.subr.bf16.mxu1 %v9800_v2  ;;  %v9838_v2 = vpack.c.bf16 %v6801_v54, %v6797_v62  ;;  %v9840_v38 = vpack.c.bf16 %v6810_v27, %v6806_v15  ;;  %v7110_v54 = vld [vmem:[#allocation8 + $0x19c0] sm:$0xff]  ;;  %v7119_v27 = vld [vmem:[#allocation8 + $0x1a08] sm:$0xff] }
 0x930   :  { %v7114_v15 = vld [vmem:[#allocation8 + $0x19e0] sm:$0xff] }
 0x932   :  { %9803 = vmatpush1.bf16.msra.mxu1 %v9802_v50  ;;  %v6818_v50 = vld [vmem:[#allocation8 + $0x17d8] sm:$0xff] }
 0x933   :  { %9805 = vmatprep.subr.bf16.mxu1 %v9804_v43  ;;  %v9842_v43 = vpack.c.bf16 %v6809_v48, %v6805_v5  ;;  %v9844_v45 = vpack.c.bf16 %v6818_v50, %v6814_v26  ;;  %v7118_v5 = vld [vmem:[#allocation8 + $0x1a00] sm:$0xff]  ;;  %v7127_v26 = vld [vmem:[#allocation8 + $0x1a48] sm:$0xff] }
 0x934   :  { %v7122_v48 = vld [vmem:[#allocation8 + $0x1a20] sm:$0xff]  ;;  %v7131_v50 = vld [vmem:[#allocation8 + $0x1a68] sm:$0xff] }
 0x936   :  { %9807 = vmatpush1.bf16.msra.mxu1 %v9806_v7  ;;  %v6826_v7 = vld [vmem:[#allocation8 + $0x1818] sm:$0xff] }
 0x937   :  { %9809 = vmatprep.subr.bf16.mxu1 %v9808_v1  ;;  %v9846_v1 = vpack.c.bf16 %v6817_v14, %v6813_v31  ;;  %v9848_v10 = vpack.c.bf16 %v6826_v7, %v6822_v23  ;;  %v7126_v31 = vld [vmem:[#allocation8 + $0x1a40] sm:$0xff]  ;;  %v7135_v23 = vld [vmem:[#allocation8 + $0x1a88] sm:$0xff] }
 0x938   :  { %v7130_v14 = vld [vmem:[#allocation8 + $0x1a60] sm:$0xff]  ;;  %v7139_v7 = vld [vmem:[#allocation8 + $0x1aa8] sm:$0xff] }
 0x93a   :  { %9811 = vmatpush1.bf16.msra.mxu1 %v9810_v12  ;;  %v6834_v12 = vld [vmem:[#allocation8 + $0x1858] sm:$0xff] }
 0x93b   :  { %9813 = vmatprep.subr.bf16.mxu1 %v9812_v63  ;;  %v9850_v63 = vpack.c.bf16 %v6825_v42, %v6821_v19  ;;  %v9852_v21 = vpack.c.bf16 %v6834_v12, %v6830_v8  ;;  %v7134_v19 = vld [vmem:[#allocation8 + $0x1a80] sm:$0xff]  ;;  %v7143_v8 = vld [vmem:[#allocation8 + $0x1ac8] sm:$0xff] }
 0x93c   :  { %v7138_v42 = vld [vmem:[#allocation8 + $0x1aa0] sm:$0xff]  ;;  %v7147_v12 = vld [vmem:[#allocation8 + $0x1ae8] sm:$0xff] }
 0x93e   :  { %9815 = vmatpush1.bf16.msra.mxu1 %v9814_v58  ;;  %v6833_v58 = vld [vmem:[#allocation8 + $0x1850] sm:$0xff] }
 0x93f   :  { %6906 = vmatprep.subr.mxu1 %v6852_v44  ;;  %v6838_v44 = vld [vmem:[#allocation8 + $0x1878] sm:$0xff]  ;;  %v9854_v57 = vpack.c.bf16 %v6833_v58, %v6829_v18  ;;  %v9944_v18 = vpack.c.bf16 %v7147_v12, %v7143_v8  ;;  %v7142_v58 = vld [vmem:[#allocation8 + $0x1ac0] sm:$0xff]  ;;  %v7120_v8 = vld [vmem:[#allocation8 + $0x1a10] sm:$0xff] }
 0x940   :  { %v9856_v55 = vpack.c.bf16 %v6842_v9, %v6838_v44  ;;  %v7146_v44 = vld [vmem:[#allocation8 + $0x1ae0] sm:$0xff]  ;;  %v7129_v12 = vld [vmem:[#allocation8 + $0x1a58] sm:$0xff] }
 0x942   :  { %6907 = vmatpush1.msra.mxu1 %v6851_v22  ;;  %v6850_v22 = vld [vmem:[#allocation8 + $0x18d8] sm:$0xff] }
 0x943   :  { %9817 = vmatprep.subr.bf16.mxu1 %v9816_v37  ;;  %6923 = vmatmul.mubr.f32.vlgmr.msra.gmra.mrb[58].mxu1 %v14298_v3  ;;  %v9858_v37 = vpack.c.bf16 %v6841_v34, %v6837_v60  ;;  %v9946_v60 = vpack.c.bf16 %v7146_v44, %v7142_v58  ;;  %v7128_v44 = vld [vmem:[#allocation8 + $0x1a50] sm:$0xff] }
 0x944   :  { %9819 = vmatpush1.bf16.msra.mxu1 %v9818_v24  ;;  %8356 = vmatprep.mubr.msk.f32.mxu1 %vm4727_vm12, %v14300_v13  ;;  %v6793_v13 = vld [vmem:[#allocation8 + $0x1710] sm:$0xff]  ;;  %v9860_v24 = vpack.c.bf16 %v6850_v22, %v6846_v41  ;;  %v7150_v41 = vld [vmem:[#allocation8 + $0x1b00] sm:$0xff] }
 0x945   :  { %9821 = vmatprep.subr.bf16.mxu1 %v9820_v25  ;;  %v9834_v33 = vpack.c.bf16 %v6793_v13, %v6789_v40  ;;  %v6845_v25 = vld [vmem:[#allocation8 + $0x18b0] sm:$0xff]  ;;  %v7102_v13 = vld [vmem:[#allocation8 + $0x1980] sm:$0xff] }
 0x946   :  { %v9862_v47 = vpack.c.bf16 %v6849_v61, %v6845_v25  ;;  %v7154_v22 = vld [vmem:[#allocation8 + $0x1b20] sm:$0xff] }
 0x947   :  { %v9950_v25 = vpack.c.bf16 %v7154_v22, %v7150_v41  ;;  %v7136_v22 = vld [vmem:[#allocation8 + $0x1a90] sm:$0xff] }
 0x948   :  { %9823 = vmatpush1.bf16.msra.mxu1 %v9822_v39  ;;  %v7091_v39 = vld [vmem:[#allocation8 + $0x1928] sm:$0xff] }
 0x949   :  { %9825 = vmatprep.subr.bf16.mxu1 %v9824_v59  ;;  %v7086_v59 = vld [vmem:[#allocation8 + $0x1900] sm:$0xff] }
 0x94c   :  { %9827 = vmatpush1.bf16.msra.mxu1 %v9826_v29  ;;  %v9916_v29 = vpack.c.bf16 %v7091_v39, %v7087_v11  ;;  %v7167_v11 = vld [vmem:[#allocation8 + $0x1b88] sm:$0xff] }
 0x94d   :  { %9829 = vmatprep.subr.bf16.mxu1 %v9828_v16  ;;  %v9918_v16 = vpack.c.bf16 %v7090_v36, %v7086_v59  ;;  %v7171_v39 = vld [vmem:[#allocation8 + $0x1ba8] sm:$0xff] }
 0x94e   :  { %v9956_v36 = vpack.c.bf16 %v7171_v39, %v7167_v11  ;;  %v7153_v11 = vld [vmem:[#allocation8 + $0x1b18] sm:$0xff] }
 0x94f   :  { %v7157_v39 = vld [vmem:[#allocation8 + $0x1b38] sm:$0xff] }
 0x950   :  { %9831 = vmatpush1.bf16.msra.mxu1 %v9830_v35  ;;  %v7107_v35 = vld [vmem:[#allocation8 + $0x19a8] sm:$0xff] }
 0x951   :  { %9833 = vmatprep.subr.bf16.mxu1 %v9832_v56  ;;  %v9922_v56 = vpack.c.bf16 %v7098_v6, %v7094_v0  ;;  %v9924_v40 = vpack.c.bf16 %v7107_v35, %v7103_v46  ;;  %v7174_v0 = vld [vmem:[#allocation8 + $0x1bc0] sm:$0xff]  ;;  %v7183_v35 = vld [vmem:[#allocation8 + $0x1c08] sm:$0xff] }
 0x952   :  { %v7178_v6 = vld [vmem:[#allocation8 + $0x1be0] sm:$0xff] }
 0x953   :  { %v9962_v46 = vpack.c.bf16 %v7178_v6, %v7174_v0 }
 0x954   :  { %9835 = vmatpush1.bf16.msra.mxu1 %v9834_v33  ;;  %v7115_v33 = vld [vmem:[#allocation8 + $0x19e8] sm:$0xff] }
 0x955   :  { %9837 = vmatprep.subr.bf16.mxu1 %v9836_v51  ;;  %v9926_v51 = vpack.c.bf16 %v7106_v4, %v7102_v13  ;;  %v9928_v62 = vpack.c.bf16 %v7115_v33, %v7111_v30  ;;  %v7088_v13 = vld [vmem:[#allocation8 + $0x1910] sm:$0xff]  ;;  %v7097_v30 = vld [vmem:[#allocation8 + $0x1958] sm:$0xff] }
 0x956   :  { %v7092_v4 = vld [vmem:[#allocation8 + $0x1930] sm:$0xff]  ;;  %v7101_v33 = vld [vmem:[#allocation8 + $0x1978] sm:$0xff] }
 0x958   :  { %9839 = vmatpush1.bf16.msra.mxu1 %v9838_v2  ;;  %v9930_v2 = vpack.c.bf16 %v7114_v15, %v7110_v54  ;;  %v9966_v54 = vpack.c.bf16 %v7092_v4, %v7088_v13  ;;  %v9968_v15 = vpack.c.bf16 %v7101_v33, %v7097_v30  ;;  %v7717_v13 = vld [vmem:[#allocation11 + $0xa8] sm:$0xff]  ;;  %v9996_v4 = vpack.c.bf16 %v7157_v39, %v7153_v11 }
 0x959   :  { %9841 = vmatprep.subr.bf16.mxu1 %v9840_v38  ;;  %v7152_v30 = vld [vmem:[#allocation8 + $0x1b10] sm:$0xff] }
 0x95a   :  { %v7156_v33 = vld [vmem:[#allocation8 + $0x1b30] sm:$0xff] }
 0x95b   :  { %v7725_v11 = vld [vmem:[#allocation11 + $0xe8] sm:$0xff] }
 0x95c   :  { %9843 = vmatpush1.bf16.msra.mxu1 %v9842_v43  ;;  %v9934_v43 = vpack.c.bf16 %v7122_v48, %v7118_v5 }
 0x95d   :  { %9845 = vmatprep.subr.bf16.mxu1 %v9844_v45  ;;  %v9936_v45 = vpack.c.bf16 %v7131_v50, %v7127_v26  ;;  %v7104_v26 = vld [vmem:[#allocation8 + $0x1990] sm:$0xff] }
 0x95e   :  { %v7108_v50 = vld [vmem:[#allocation8 + $0x19b0] sm:$0xff] }
 0x960   :  { %9847 = vmatpush1.bf16.msra.mxu1 %v9846_v1  ;;  %v9938_v1 = vpack.c.bf16 %v7130_v14, %v7126_v31  ;;  %v9974_v31 = vpack.c.bf16 %v7108_v50, %v7104_v26  ;;  %v7160_v26 = vld [vmem:[#allocation8 + $0x1b50] sm:$0xff] }
 0x961   :  { %9849 = vmatprep.subr.bf16.mxu1 %v9848_v10  ;;  %v9940_v10 = vpack.c.bf16 %v7139_v7, %v7135_v23  ;;  %v7112_v23 = vld [vmem:[#allocation8 + $0x19d0] sm:$0xff] }
 0x962   :  { %v7116_v7 = vld [vmem:[#allocation8 + $0x19f0] sm:$0xff] }
 0x963   :  { %v7164_v50 = vld [vmem:[#allocation8 + $0x1b70] sm:$0xff] }
 0x964   :  { %9851 = vmatpush1.bf16.msra.mxu1 %v9850_v63  ;;  %v9942_v63 = vpack.c.bf16 %v7138_v42, %v7134_v19  ;;  %v9978_v19 = vpack.c.bf16 %v7116_v7, %v7112_v23  ;;  %v7702_v23 = vld [vmem:[#allocation11 + $0x30] sm:$0xff]  ;;  %v7703_v7 = vld [vmem:[#allocation11 + $0x38] sm:$0xff] }
 0x965   :  { %9853 = vmatprep.subr.bf16.mxu1 %v9852_v21 }
 0x968   :  { %9855 = vmatpush1.bf16.msra.mxu1 %v9854_v57  ;;  %v7151_v57 = vld [vmem:[#allocation8 + $0x1b08] sm:$0xff] }
 0x969   :  { %9857 = vmatprep.subr.bf16.mxu1 %v9856_v55  ;;  %v14318_v21 = vpop.f32.mrb[124].mxu0  ;;  %v7155_v55 = vld [vmem:[#allocation8 + $0x1b28] sm:$0xff] }
 0x96a   :  { %v14320_v9 = vpop.f32.mrb[125].mxu0  ;;  %v9948_v34 = vpack.c.bf16 %v7155_v55, %v7151_v57  ;;  %v7132_v57 = vld [vmem:[#allocation8 + $0x1a70] sm:$0xff]  ;;  %v7137_v55 = vld [vmem:[#allocation8 + $0x1a98] sm:$0xff] }
 0x96c   :  { %9859 = vmatpush1.bf16.msra.mxu1 %v9858_v37  ;;  %v7159_v37 = vld [vmem:[#allocation8 + $0x1b48] sm:$0xff] }
 0x96d   :  { %9861 = vmatprep.subr.bf16.mxu1 %v9860_v24  ;;  %v7163_v24 = vld [vmem:[#allocation8 + $0x1b68] sm:$0xff] }
 0x96e   :  { %v9952_v61 = vpack.c.bf16 %v7163_v24, %v7159_v37  ;;  %v7140_v37 = vld [vmem:[#allocation8 + $0x1ab0] sm:$0xff]  ;;  %v7145_v24 = vld [vmem:[#allocation8 + $0x1ad8] sm:$0xff] }
 0x970   :  { %9863 = vmatpush1.bf16.msra.mxu1 %v9862_v47  ;;  %v7158_v47 = vld [vmem:[#allocation8 + $0x1b40] sm:$0xff] }
 0x971   :  { %6977 = vmatprep.subr.mxu1 %v6854_v53  ;;  %v7162_v53 = vld [vmem:[#allocation8 + $0x1b60] sm:$0xff] }
 0x972   :  { %v9954_v59 = vpack.c.bf16 %v7162_v53, %v7158_v47  ;;  %v9990_v47 = vpack.c.bf16 %v7140_v37, %v7136_v22  ;;  %v7148_v53 = vld [vmem:[#allocation8 + $0x1af0] sm:$0xff] }
 0x973   :  { %v7176_v22 = vld [vmem:[#allocation8 + $0x1bd0] sm:$0xff] }
 0x974   :  { %6978 = vmatpush1.msra.mxu1 %v6853_v49  ;;  %v7175_v49 = vld [vmem:[#allocation8 + $0x1bc8] sm:$0xff]  ;;  %v7180_v37 = vld [vmem:[#allocation8 + $0x1bf0] sm:$0xff] }
 0x975   :  { %6994 = vmatmul.mubr.f32.vlgmr.msra.gmra.mrb[60].mxu1 %v14298_v3  ;;  %9917 = vmatprep.subr.bf16.mxu1 %v9916_v29  ;;  %v7123_v3 = vld [vmem:[#allocation8 + $0x1a28] sm:$0xff]  ;;  %v10010_v39 = vpack.c.bf16 %v7180_v37, %v7176_v22 }
 0x976   :  { %9919 = vmatpush1.bf16.msra.mxu1 %v9918_v16  ;;  %8363 = vmatprep.mubr.msk.f32.mxu1 %vm4727_vm12, %v14310_v32  ;;  %v9932_v38 = vpack.c.bf16 %v7123_v3, %v7119_v27  ;;  %v7179_v29 = vld [vmem:[#allocation8 + $0x1be8] sm:$0xff]  ;;  %v9958_v16 = vpack.c.bf16 %v7170_v20, %v7166_v17  ;;  %v7096_v27 = vld [vmem:[#allocation8 + $0x1950] sm:$0xff] }
 0x977   :  { %9921 = vmatprep.subr.bf16.mxu1 %v9920_v52  ;;  %v9960_v52 = vpack.c.bf16 %v7179_v29, %v7175_v49  ;;  %v7100_v3 = vld [vmem:[#allocation8 + $0x1970] sm:$0xff]  ;;  %v7696_v20 = vld [vmem:[#allocation11] sm:$0xff] }
 0x978   :  { %v9970_v5 = vpack.c.bf16 %v7100_v3, %v7096_v27  ;;  %v7713_v17 = vld [vmem:[#allocation11 + $0x88] sm:$0xff]  ;;  %v7700_v27 = vld [vmem:[#allocation11 + $0x20] sm:$0xff] }
 0x979   :  { %v7697_v29 = vld [vmem:[#allocation11 + $0x8] sm:$0xff] }
 0x97a   :  { %9923 = vmatpush1.bf16.msra.mxu1 %v9922_v56  ;;  %v7089_v56 = vld [vmem:[#allocation8 + $0x1918] sm:$0xff]  ;;  %v10162_v0 = vpack.c.bf16 %v7697_v29, %v7696_v20  ;;  %v7701_v3 = vld [vmem:[#allocation11 + $0x28] sm:$0xff]  ;;  %v7417_v29 = vld [vmem:[#allocation8 + $0x1c20] sm:$0xff] }
 0x97b   :  { %9925 = vmatprep.subr.bf16.mxu1 %v9924_v40  ;;  %v7093_v40 = vld [vmem:[#allocation8 + $0x1938] sm:$0xff]  ;;  %v7422_v20 = vld [vmem:[#allocation8 + $0x1c48] sm:$0xff] }
 0x97e   :  { %9927 = vmatpush1.bf16.msra.mxu1 %v9926_v51  ;;  %v7182_v51 = vld [vmem:[#allocation8 + $0x1c00] sm:$0xff] }
 0x97f   :  { %9929 = vmatprep.subr.bf16.mxu1 %v9928_v62  ;;  %v9964_v62 = vpack.c.bf16 %v7093_v40, %v7089_v56  ;;  %v7716_v56 = vld [vmem:[#allocation11 + $0xa0] sm:$0xff] }
 0x982   :  { %9931 = vmatpush1.bf16.msra.mxu1 %v9930_v2  ;;  %v7105_v2 = vld [vmem:[#allocation8 + $0x1998] sm:$0xff] }
 0x983   :  { %9933 = vmatprep.subr.bf16.mxu1 %v9932_v38  ;;  %v7109_v38 = vld [vmem:[#allocation8 + $0x19b8] sm:$0xff] }
 0x984   :  { %v9972_v48 = vpack.c.bf16 %v7109_v38, %v7105_v2  ;;  %v7718_v2 = vld [vmem:[#allocation11 + $0xb0] sm:$0xff]  ;;  %v7719_v38 = vld [vmem:[#allocation11 + $0xb8] sm:$0xff] }
 0x986   :  { %9935 = vmatpush1.bf16.msra.mxu1 %v9934_v43  ;;  %v7113_v43 = vld [vmem:[#allocation8 + $0x19d8] sm:$0xff] }
 0x987   :  { %9937 = vmatprep.subr.bf16.mxu1 %v9936_v45  ;;  %v7117_v45 = vld [vmem:[#allocation8 + $0x19f8] sm:$0xff] }
 0x988   :  { %v9976_v14 = vpack.c.bf16 %v7117_v45, %v7113_v43  ;;  %v7169_v43 = vld [vmem:[#allocation8 + $0x1b98] sm:$0xff]  ;;  %v10170_v45 = vpack.c.bf16 %v7701_v3, %v7700_v27  ;;  %v7446_v27 = vld [vmem:[#allocation8 + $0x1d08] sm:$0xff] }
 0x98a   :  { %9939 = vmatpush1.bf16.msra.mxu1 %v9938_v1  ;;  %v7121_v1 = vld [vmem:[#allocation8 + $0x1a18] sm:$0xff] }
 0x98b   :  { %9941 = vmatprep.subr.bf16.mxu1 %v9940_v10  ;;  %v7125_v10 = vld [vmem:[#allocation8 + $0x1a38] sm:$0xff] }
 0x98c   :  { %v9980_v42 = vpack.c.bf16 %v7125_v10, %v7121_v1  ;;  %v7720_v1 = vld [vmem:[#allocation11 + $0xc0] sm:$0xff]  ;;  %v7721_v10 = vld [vmem:[#allocation11 + $0xc8] sm:$0xff] }
 0x98e   :  { %9943 = vmatpush1.bf16.msra.mxu1 %v9942_v63  ;;  %v7133_v63 = vld [vmem:[#allocation8 + $0x1a78] sm:$0xff] }
 0x98f   :  { %9945 = vmatprep.subr.bf16.mxu1 %v9944_v18  ;;  %v9984_v58 = vpack.c.bf16 %v7133_v63, %v7129_v12  ;;  %v7177_v12 = vld [vmem:[#allocation8 + $0x1bd8] sm:$0xff]  ;;  %v10174_v63 = vpack.c.bf16 %v7703_v7, %v7702_v23 }
 0x992   :  { %9947 = vmatpush1.bf16.msra.mxu1 %v9946_v60  ;;  %v7141_v60 = vld [vmem:[#allocation8 + $0x1ab8] sm:$0xff] }
 0x993   :  { %9949 = vmatprep.subr.bf16.mxu1 %v9948_v34  ;;  %v9986_v34 = vpack.c.bf16 %v7132_v57, %v7128_v44  ;;  %v9988_v41 = vpack.c.bf16 %v7141_v60, %v7137_v55  ;;  %v7704_v44 = vld [vmem:[#allocation11 + $0x40] sm:$0xff]  ;;  %v7705_v57 = vld [vmem:[#allocation11 + $0x48] sm:$0xff]  ;;  %v7722_v55 = vld [vmem:[#allocation11 + $0xd0] sm:$0xff] }
 0x994   :  { %v7723_v60 = vld [vmem:[#allocation11 + $0xd8] sm:$0xff] }
 0x996   :  { %9951 = vmatpush1.bf16.msra.mxu1 %v9950_v25  ;;  %v7149_v25 = vld [vmem:[#allocation8 + $0x1af8] sm:$0xff] }
 0x997   :  { %9953 = vmatprep.subr.bf16.mxu1 %v9952_v61  ;;  %v7144_v61 = vld [vmem:[#allocation8 + $0x1ad0] sm:$0xff] }
 0x998   :  { %v9994_v40 = vpack.c.bf16 %v7148_v53, %v7144_v61  ;;  %v7706_v61 = vld [vmem:[#allocation11 + $0x50] sm:$0xff]  ;;  %v7724_v53 = vld [vmem:[#allocation11 + $0xe0] sm:$0xff] }
 0x99a   :  { %9955 = vmatpush1.bf16.msra.mxu1 %v9954_v59  ;;  %v9992_v59 = vpack.c.bf16 %v7149_v25, %v7145_v24  ;;  %v10178_v24 = vpack.c.bf16 %v7705_v57, %v7704_v44  ;;  %v10180_v25 = vpack.c.bf16 %v7723_v60, %v7722_v55  ;;  %v7473_v55 = vld [vmem:[#allocation8 + $0x1de0] sm:$0xff] }
 0x99b   :  { %9957 = vmatprep.subr.bf16.mxu1 %v9956_v36  ;;  %v7712_v36 = vld [vmem:[#allocation11 + $0x80] sm:$0xff] }
 0x99c   :  { %v10160_v49 = vpack.c.bf16 %v7713_v17, %v7712_v36  ;;  %v7185_v36 = vld [vmem:[#allocation8 + $0x1c18] sm:$0xff]  ;;  %v7418_v17 = vld [vmem:[#allocation8 + $0x1c28] sm:$0xff]  ;;  %v7477_v60 = vld [vmem:[#allocation8 + $0x1e00] sm:$0xff] }
 0x99d   :  { %v10094_v22 = vpack.c.bf16 %v7477_v60, %v7473_v55  ;;  %v7463_v55 = vld [vmem:[#allocation8 + $0x1d90] sm:$0xff]  ;;  %v7468_v60 = vld [vmem:[#allocation8 + $0x1db8] sm:$0xff] }
 0x99e   :  { %9959 = vmatpush1.bf16.msra.mxu1 %v9958_v16  ;;  %v7714_v16 = vld [vmem:[#allocation11 + $0x90] sm:$0xff]  ;;  %10161 = vmatprep.subr.bf16.mxu0 %v10160_v49  ;;  %v10184_v49 = vpack.c.bf16 %v7725_v11, %v7724_v53 }
 0x99f   :  { %9961 = vmatprep.subr.bf16.mxu1 %v9960_v52  ;;  %v7715_v52 = vld [vmem:[#allocation11 + $0x98] sm:$0xff]  ;;  %10163 = vmatpush3.bf16.msra.mxu0 %v10162_v0  ;;  %v7430_v0 = vld [vmem:[#allocation8 + $0x1c88] sm:$0xff] }
 0x9a0   :  { %v10164_v6 = vpack.c.bf16 %v7715_v52, %v7714_v16  ;;  %v7421_v16 = vld [vmem:[#allocation8 + $0x1c40] sm:$0xff]  ;;  %v7426_v52 = vld [vmem:[#allocation8 + $0x1c68] sm:$0xff] }
 0x9a2   :  { %9963 = vmatpush1.bf16.msra.mxu1 %v9962_v46  ;;  %v7698_v46 = vld [vmem:[#allocation11 + $0x10] sm:$0xff]  ;;  %10165 = vmatprep.subr.bf16.mxu0 %v10164_v6 }
 0x9a3   :  { %7237 = vmatprep.subr.mxu1 %v7183_v35  ;;  %v7699_v35 = vld [vmem:[#allocation11 + $0x18] sm:$0xff]  ;;  %v7184_v6 = vld [vmem:[#allocation8 + $0x1c10] sm:$0xff] }
 0x9a6   :  { %7238 = vmatpush1.msra.mxu1 %v7182_v51  ;;  %v7161_v51 = vld [vmem:[#allocation8 + $0x1b58] sm:$0xff] }
 0x9a7   :  { %9965 = vmatprep.subr.bf16.mxu1 %v9964_v62  ;;  %7254 = vmatmul.mubr.f32.vlgmr.msra.gmra.mrb[58].mxu1 %v14308_v28  ;;  %v10166_v62 = vpack.c.bf16 %v7699_v35, %v7698_v46  ;;  %v10064_v46 = vpack.c.bf16 %v7422_v20, %v7418_v17  ;;  %v10066_v35 = vpack.c.bf16 %v7421_v16, %v7417_v29  ;;  %v7502_v17 = vld [vmem:[#allocation8 + $0x1ec8] sm:$0xff]  ;;  %v7497_v29 = vld [vmem:[#allocation8 + $0x1ea0] sm:$0xff] }
 0x9a8   :  { %9967 = vmatpush1.bf16.msra.mxu1 %v9966_v54  ;;  %8364 = vmatprep.mubr.msk.f32.mxu1 %vm4727_vm12, %v14310_v32  ;;  %v7124_v32 = vld [vmem:[#allocation8 + $0x1a30] sm:$0xff]  ;;  %v7165_v54 = vld [vmem:[#allocation8 + $0x1b78] sm:$0xff]  ;;  %v7501_v16 = vld [vmem:[#allocation8 + $0x1ec0] sm:$0xff] }
 0x9a9   :  { %9969 = vmatprep.subr.bf16.mxu1 %v9968_v15  ;;  %v9982_v18 = vpack.c.bf16 %v7124_v32, %v7120_v8  ;;  %v10168_v15 = vpack.c.bf16 %v7717_v13, %v7716_v56  ;;  %10167 = vmatpush3.bf16.msra.mxu0 %v10166_v62  ;;  %v7168_v8 = vld [vmem:[#allocation8 + $0x1b90] sm:$0xff]  ;;  %v10068_v56 = vpack.c.bf16 %v7430_v0, %v7426_v52  ;;  %v7429_v13 = vld [vmem:[#allocation8 + $0x1c80] sm:$0xff]  ;;  %v7506_v52 = vld [vmem:[#allocation8 + $0x1ee8] sm:$0xff] }
 0x9aa   :  { %v7172_v32 = vld [vmem:[#allocation8 + $0x1bb0] sm:$0xff]  ;;  %v7433_v62 = vld [vmem:[#allocation8 + $0x1ca0] sm:$0xff]  ;;  %v7510_v0 = vld [vmem:[#allocation8 + $0x1f08] sm:$0xff] }
 0x9ab   :  { %10169 = vmatprep.subr.bf16.mxu0 %v10168_v15  ;;  %v7442_v15 = vld [vmem:[#allocation8 + $0x1ce8] sm:$0xff] }
 0x9ac   :  { %9971 = vmatpush1.bf16.msra.mxu1 %v9970_v5  ;;  %v9998_v5 = vpack.c.bf16 %v7156_v33, %v7152_v30  ;;  %v7438_v30 = vld [vmem:[#allocation8 + $0x1cc8] sm:$0xff] }
 0x9ad   :  { %9973 = vmatprep.subr.bf16.mxu1 %v9972_v48  ;;  %v10000_v48 = vpack.c.bf16 %v7165_v54, %v7161_v51  ;;  %10171 = vmatpush3.bf16.msra.mxu0 %v10170_v45  ;;  %v7437_v54 = vld [vmem:[#allocation8 + $0x1cc0] sm:$0xff] }
 0x9ae   :  { %v10074_v3 = vpack.c.bf16 %v7437_v54, %v7433_v62  ;;  %v7453_v45 = vld [vmem:[#allocation8 + $0x1d40] sm:$0xff]  ;;  %v7428_v62 = vld [vmem:[#allocation8 + $0x1c78] sm:$0xff] }
 0x9af   :  { %v7432_v54 = vld [vmem:[#allocation8 + $0x1c98] sm:$0xff] }
 0x9b0   :  { %9975 = vmatpush1.bf16.msra.mxu1 %v9974_v31  ;;  %v7173_v31 = vld [vmem:[#allocation8 + $0x1bb8] sm:$0xff] }
 0x9b1   :  { %9977 = vmatprep.subr.bf16.mxu1 %v9976_v14  ;;  %v10172_v14 = vpack.c.bf16 %v7719_v38, %v7718_v2  ;;  %v10076_v2 = vpack.c.bf16 %v7446_v27, %v7442_v15  ;;  %v7441_v38 = vld [vmem:[#allocation8 + $0x1ce0] sm:$0xff] }
 0x9b2   :  { %v7513_v15 = vld [vmem:[#allocation8 + $0x1f20] sm:$0xff] }
 0x9b3   :  { %10173 = vmatprep.subr.bf16.mxu0 %v10172_v14  ;;  %v7462_v14 = vld [vmem:[#allocation8 + $0x1d88] sm:$0xff] }
 0x9b4   :  { %9979 = vmatpush1.bf16.msra.mxu1 %v9978_v19  ;;  %v10002_v19 = vpack.c.bf16 %v7164_v50, %v7160_v26  ;;  %10175 = vmatpush3.bf16.msra.mxu0 %v10174_v63  ;;  %v7469_v63 = vld [vmem:[#allocation8 + $0x1dc0] sm:$0xff] }
 0x9b5   :  { %9981 = vmatprep.subr.bf16.mxu1 %v9980_v42  ;;  %v10004_v42 = vpack.c.bf16 %v7173_v31, %v7169_v43  ;;  %v7449_v43 = vld [vmem:[#allocation8 + $0x1d20] sm:$0xff]  ;;  %v7458_v31 = vld [vmem:[#allocation8 + $0x1d68] sm:$0xff] }
 0x9b6   :  { %v10082_v23 = vpack.c.bf16 %v7453_v45, %v7449_v43  ;;  %v10084_v7 = vpack.c.bf16 %v7462_v14, %v7458_v31  ;;  %v7435_v43 = vld [vmem:[#allocation8 + $0x1cb0] sm:$0xff]  ;;  %v7444_v31 = vld [vmem:[#allocation8 + $0x1cf8] sm:$0xff] }
 0x9b7   :  { %v7439_v45 = vld [vmem:[#allocation8 + $0x1cd0] sm:$0xff]  ;;  %v7448_v14 = vld [vmem:[#allocation8 + $0x1d18] sm:$0xff] }
 0x9b8   :  { %9983 = vmatpush1.bf16.msra.mxu1 %v9982_v18  ;;  %v7181_v18 = vld [vmem:[#allocation8 + $0x1bf8] sm:$0xff] }
 0x9b9   :  { %9985 = vmatprep.subr.bf16.mxu1 %v9984_v58  ;;  %v10176_v58 = vpack.c.bf16 %v7721_v10, %v7720_v1  ;;  %v7457_v1 = vld [vmem:[#allocation8 + $0x1d60] sm:$0xff] }
 0x9ba   :  { %v7461_v10 = vld [vmem:[#allocation8 + $0x1d80] sm:$0xff] }
 0x9bb   :  { %10177 = vmatprep.subr.bf16.mxu0 %v10176_v58  ;;  %v7478_v58 = vld [vmem:[#allocation8 + $0x1e08] sm:$0xff] }
 0x9bc   :  { %9987 = vmatpush1.bf16.msra.mxu1 %v9986_v34  ;;  %v10006_v34 = vpack.c.bf16 %v7172_v32, %v7168_v8  ;;  %10179 = vmatpush3.bf16.msra.mxu0 %v10178_v24  ;;  %v10086_v8 = vpack.c.bf16 %v7461_v10, %v7457_v1  ;;  %v7481_v24 = vld [vmem:[#allocation8 + $0x1e20] sm:$0xff]  ;;  %v7443_v1 = vld [vmem:[#allocation8 + $0x1cf0] sm:$0xff] }
 0x9bd   :  { %9989 = vmatprep.subr.bf16.mxu1 %v9988_v41  ;;  %v10008_v41 = vpack.c.bf16 %v7181_v18, %v7177_v12  ;;  %10181 = vmatprep.subr.bf16.mxu0 %v10180_v25  ;;  %v7465_v12 = vld [vmem:[#allocation8 + $0x1da0] sm:$0xff]  ;;  %v7474_v18 = vld [vmem:[#allocation8 + $0x1de8] sm:$0xff]  ;;  %v7447_v10 = vld [vmem:[#allocation8 + $0x1d10] sm:$0xff] }
 0x9be   :  { %v10090_v44 = vpack.c.bf16 %v7469_v63, %v7465_v12  ;;  %v10092_v57 = vpack.c.bf16 %v7478_v58, %v7474_v18  ;;  %v7485_v25 = vld [vmem:[#allocation8 + $0x1e40] sm:$0xff]  ;;  %v7451_v12 = vld [vmem:[#allocation8 + $0x1d30] sm:$0xff]  ;;  %v7460_v63 = vld [vmem:[#allocation8 + $0x1d78] sm:$0xff] }
 0x9bf   :  { %v10098_v53 = vpack.c.bf16 %v7485_v25, %v7481_v24  ;;  %v7464_v18 = vld [vmem:[#allocation8 + $0x1d98] sm:$0xff]  ;;  %v7471_v24 = vld [vmem:[#allocation8 + $0x1dd0] sm:$0xff] }
 0x9c0   :  { %9991 = vmatpush1.bf16.msra.mxu1 %v9990_v47  ;;  %v7707_v47 = vld [vmem:[#allocation11 + $0x58] sm:$0xff] }
 0x9c1   :  { %9993 = vmatprep.subr.bf16.mxu1 %v9992_v59  ;;  %v10182_v59 = vpack.c.bf16 %v7707_v47, %v7706_v61  ;;  %v7490_v61 = vld [vmem:[#allocation8 + $0x1e68] sm:$0xff]  ;;  %v7476_v25 = vld [vmem:[#allocation8 + $0x1df8] sm:$0xff] }
 0x9c2   :  { %v7494_v47 = vld [vmem:[#allocation8 + $0x1e88] sm:$0xff] }
 0x9c3   :  { %10183 = vmatpush3.bf16.msra.mxu0 %v10182_v59  ;;  %v10100_v11 = vpack.c.bf16 %v7494_v47, %v7490_v61  ;;  %v7493_v59 = vld [vmem:[#allocation8 + $0x1e80] sm:$0xff]  ;;  %v7480_v61 = vld [vmem:[#allocation8 + $0x1e18] sm:$0xff] }
 0x9c4   :  { %9995 = vmatpush1.bf16.msra.mxu1 %v9994_v40  ;;  %10185 = vmatprep.subr.bf16.mxu0 %v10184_v49  ;;  %v7425_v40 = vld [vmem:[#allocation8 + $0x1c60] sm:$0xff] }
 0x9c5   :  { %9997 = vmatprep.subr.bf16.mxu1 %v9996_v4  ;;  %v7434_v4 = vld [vmem:[#allocation8 + $0x1ca8] sm:$0xff]  ;;  %v10070_v33 = vpack.c.bf16 %v7429_v13, %v7425_v40 }
 0x9c6   :  { %v10072_v51 = vpack.c.bf16 %v7438_v30, %v7434_v4  ;;  %v7514_v13 = vld [vmem:[#allocation8 + $0x1f28] sm:$0xff]  ;;  %v7420_v4 = vld [vmem:[#allocation8 + $0x1c38] sm:$0xff] }
 0x9c7   :  { %v7424_v30 = vld [vmem:[#allocation8 + $0x1c58] sm:$0xff] }
 0x9c8   :  { %9999 = vmatpush1.bf16.msra.mxu1 %v9998_v5  ;;  %v7445_v5 = vld [vmem:[#allocation8 + $0x1d00] sm:$0xff]  ;;  %v10112_v27 = vpack.c.bf16 %v7424_v30, %v7420_v4  ;;  %v7499_v30 = vld [vmem:[#allocation8 + $0x1eb0] sm:$0xff] }
 0x9c9   :  { %10001 = vmatprep.subr.bf16.mxu1 %v10000_v48  ;;  %v7450_v48 = vld [vmem:[#allocation8 + $0x1d28] sm:$0xff]  ;;  %v10078_v26 = vpack.c.bf16 %v7445_v5, %v7441_v38  ;;  %v7427_v38 = vld [vmem:[#allocation8 + $0x1c70] sm:$0xff] }
 0x9ca   :  { %v7431_v5 = vld [vmem:[#allocation8 + $0x1c90] sm:$0xff] }
 0x9cc   :  { %10003 = vmatpush1.bf16.msra.mxu1 %v10002_v19  ;;  %v7466_v19 = vld [vmem:[#allocation8 + $0x1da8] sm:$0xff] }
 0x9cd   :  { %10005 = vmatprep.subr.bf16.mxu1 %v10004_v42  ;;  %v7470_v42 = vld [vmem:[#allocation8 + $0x1dc8] sm:$0xff] }
 0x9ce   :  { %v10088_v32 = vpack.c.bf16 %v7470_v42, %v7466_v19  ;;  %v7452_v19 = vld [vmem:[#allocation8 + $0x1d38] sm:$0xff] }
 0x9cf   :  { %v7456_v42 = vld [vmem:[#allocation8 + $0x1d58] sm:$0xff] }
 0x9d0   :  { %10007 = vmatpush1.bf16.msra.mxu1 %v10006_v34  ;;  %v7482_v34 = vld [vmem:[#allocation8 + $0x1e28] sm:$0xff] }
 0x9d1   :  { %10009 = vmatprep.subr.bf16.mxu1 %v10008_v41  ;;  %v7486_v41 = vld [vmem:[#allocation8 + $0x1e48] sm:$0xff] }
 0x9d2   :  { %v10096_v37 = vpack.c.bf16 %v7486_v41, %v7482_v34  ;;  %v7472_v34 = vld [vmem:[#allocation8 + $0x1dd8] sm:$0xff] }
 0x9d4   :  { %10011 = vmatpush1.bf16.msra.mxu1 %v10010_v39  ;;  %v7489_v39 = vld [vmem:[#allocation8 + $0x1e60] sm:$0xff] }
 0x9d5   :  { %7308 = vmatprep.subr.mxu1 %v7185_v36  ;;  %v7498_v36 = vld [vmem:[#allocation8 + $0x1ea8] sm:$0xff]  ;;  %v10102_v20 = vpack.c.bf16 %v7493_v59, %v7489_v39  ;;  %v7479_v39 = vld [vmem:[#allocation8 + $0x1e10] sm:$0xff]  ;;  %v7484_v59 = vld [vmem:[#allocation8 + $0x1e38] sm:$0xff] }
 0x9d6   :  { %v10104_v49 = vpack.c.bf16 %v7502_v17, %v7498_v36  ;;  %v7488_v36 = vld [vmem:[#allocation8 + $0x1e58] sm:$0xff] }
 0x9d8   :  { %7309 = vmatpush1.msra.mxu1 %v7184_v6  ;;  %v10106_v6 = vpack.c.bf16 %v7501_v16, %v7497_v29  ;;  %v7487_v29 = vld [vmem:[#allocation8 + $0x1e50] sm:$0xff]  ;;  %v7492_v16 = vld [vmem:[#allocation8 + $0x1e78] sm:$0xff] }
 0x9d9   :  { %7325 = vmatmul.mubr.f32.vlgmr.msra.gmra.mrb[60].mxu1 %v14308_v28  ;;  %10065 = vmatprep.subr.bf16.mxu1 %v10064_v46  ;;  %v7454_v28 = vld [vmem:[#allocation8 + $0x1d48] sm:$0xff]  ;;  %v10108_v46 = vpack.c.bf16 %v7510_v0, %v7506_v52  ;;  %v7496_v52 = vld [vmem:[#allocation8 + $0x1e98] sm:$0xff] }
 0x9da   :  { %10067 = vmatpush1.bf16.msra.mxu1 %v10066_v35  ;;  %8371 = vmatprep.mubr.msk.f32.mxu1 %vm4727_vm12, %v14320_v9  ;;  %v10080_v50 = vpack.c.bf16 %v7454_v28, %v7450_v48  ;;  %v7505_v35 = vld [vmem:[#allocation8 + $0x1ee0] sm:$0xff]  ;;  %v7436_v48 = vld [vmem:[#allocation8 + $0x1cb8] sm:$0xff] }
 0x9db   :  { %10069 = vmatprep.subr.bf16.mxu1 %v10068_v56  ;;  %v7509_v56 = vld [vmem:[#allocation8 + $0x1f00] sm:$0xff]  ;;  %v7440_v28 = vld [vmem:[#allocation8 + $0x1cd8] sm:$0xff] }
 0x9dc   :  { %v10110_v40 = vpack.c.bf16 %v7509_v56, %v7505_v35  ;;  %v7495_v35 = vld [vmem:[#allocation8 + $0x1e90] sm:$0xff]  ;;  %v7500_v56 = vld [vmem:[#allocation8 + $0x1eb8] sm:$0xff] }
 0x9de   :  { %10071 = vmatpush1.bf16.msra.mxu1 %v10070_v33  ;;  %v7419_v33 = vld [vmem:[#allocation8 + $0x1c30] sm:$0xff] }
 0x9df   :  { %10073 = vmatprep.subr.bf16.mxu1 %v10072_v51  ;;  %v7423_v51 = vld [vmem:[#allocation8 + $0x1c50] sm:$0xff] }
 0x9e2   :  { %10075 = vmatpush1.bf16.msra.mxu1 %v10074_v3  ;;  %v10114_v3 = vpack.c.bf16 %v7423_v51, %v7419_v33  ;;  %v7503_v33 = vld [vmem:[#allocation8 + $0x1ed0] sm:$0xff]  ;;  %v7508_v51 = vld [vmem:[#allocation8 + $0x1ef8] sm:$0xff] }
 0x9e3   :  { %10077 = vmatprep.subr.bf16.mxu1 %v10076_v2  ;;  %v10116_v2 = vpack.c.bf16 %v7432_v54, %v7428_v62  ;;  %v7512_v62 = vld [vmem:[#allocation8 + $0x1f18] sm:$0xff]  ;;  %v10154_v54 = vpack.c.bf16 %v7503_v33, %v7499_v30 }
 0x9e4   :  { %v7738_v30 = vld [vmem:[#allocation11 + $0x150] sm:$0xff]  ;;  %v7739_v33 = vld [vmem:[#allocation11 + $0x158] sm:$0xff] }
 0x9e6   :  { %10079 = vmatpush1.bf16.msra.mxu1 %v10078_v26  ;;  %v10118_v26 = vpack.c.bf16 %v7431_v5, %v7427_v38  ;;  %v7516_v38 = vld [vmem:[#allocation8 + $0x1f38] sm:$0xff]  ;;  %v7515_v5 = vld [vmem:[#allocation8 + $0x1f30] sm:$0xff] }
 0x9e7   :  { %10081 = vmatprep.subr.bf16.mxu1 %v10080_v50  ;;  %v10120_v50 = vpack.c.bf16 %v7440_v28, %v7436_v48  ;;  %v7708_v48 = vld [vmem:[#allocation11 + $0x60] sm:$0xff]  ;;  %v7709_v28 = vld [vmem:[#allocation11 + $0x68] sm:$0xff] }
 0x9ea   :  { %10083 = vmatpush1.bf16.msra.mxu1 %v10082_v23  ;;  %v10122_v23 = vpack.c.bf16 %v7439_v45, %v7435_v43  ;;  %v7727_v43 = vld [vmem:[#allocation11 + $0xf8] sm:$0xff] }
 0x9eb   :  { %10085 = vmatprep.subr.bf16.mxu1 %v10084_v7  ;;  %v10124_v7 = vpack.c.bf16 %v7448_v14, %v7444_v31  ;;  %v7710_v31 = vld [vmem:[#allocation11 + $0x70] sm:$0xff]  ;;  %v7711_v14 = vld [vmem:[#allocation11 + $0x78] sm:$0xff] }
 0x9ee   :  { %10087 = vmatpush1.bf16.msra.mxu1 %v10086_v8  ;;  %v10126_v8 = vpack.c.bf16 %v7447_v10, %v7443_v1  ;;  %v7745_v1 = vld [vmem:[#allocation11 + $0x188] sm:$0xff] }
 0x9ef   :  { %10089 = vmatprep.subr.bf16.mxu1 %v10088_v32  ;;  %v10128_v32 = vpack.c.bf16 %v7456_v42, %v7452_v19  ;;  %v14332_v19 = vld [vmem:[#allocation10] sm:$0xf]  ;;  %v14820_v42 = vld [vmem:[#allocation21_spill] sm:$0xff] }
 0x9f2   :  { %10091 = vmatpush1.bf16.msra.mxu1 %v10090_v44  ;;  %v10132_v44 = vpack.c.bf16 %v7464_v18, %v7460_v63  ;;  %v7728_v18 = vld [vmem:[#allocation11 + $0x100] sm:$0xff] }
 0x9f3   :  { %10093 = vmatprep.subr.bf16.mxu1 %v10092_v57  ;;  %v7459_v57 = vld [vmem:[#allocation8 + $0x1d70] sm:$0xff] }
 0x9f4   :  { %v10134_v41 = vpack.c.bf16 %v7463_v55, %v7459_v57  ;;  %v7746_v57 = vld [vmem:[#allocation11 + $0x190] sm:$0xff]  ;;  %v7747_v55 = vld [vmem:[#allocation11 + $0x198] sm:$0xff] }
 0x9f6   :  { %10095 = vmatpush1.bf16.msra.mxu1 %v10094_v22  ;;  %v10136_v22 = vpack.c.bf16 %v7472_v34, %v7468_v60 }
 0x9f7   :  { %10097 = vmatprep.subr.bf16.mxu1 %v10096_v37  ;;  %v7467_v37 = vld [vmem:[#allocation8 + $0x1db0] sm:$0xff] }
 0x9f8   :  { %v10138_v47 = vpack.c.bf16 %v7471_v24, %v7467_v37  ;;  %v7730_v37 = vld [vmem:[#allocation11 + $0x110] sm:$0xff]  ;;  %v7731_v24 = vld [vmem:[#allocation11 + $0x118] sm:$0xff] }
 0x9fa   :  { %10099 = vmatpush1.bf16.msra.mxu1 %v10098_v53  ;;  %v10140_v53 = vpack.c.bf16 %v7480_v61, %v7476_v25  ;;  %v7748_v25 = vld [vmem:[#allocation11 + $0x1a0] sm:$0xff]  ;;  %v7749_v61 = vld [vmem:[#allocation11 + $0x1a8] sm:$0xff] }
 0x9fb   :  { %10101 = vmatprep.subr.bf16.mxu1 %v10100_v11  ;;  %v7475_v11 = vld [vmem:[#allocation8 + $0x1df0] sm:$0xff] }
 0x9fc   :  { %v10142_v17 = vpack.c.bf16 %v7479_v39, %v7475_v11  ;;  %v7732_v11 = vld [vmem:[#allocation11 + $0x120] sm:$0xff]  ;;  %v7733_v39 = vld [vmem:[#allocation11 + $0x128] sm:$0xff] }
 0x9fe   :  { %10103 = vmatpush1.bf16.msra.mxu1 %v10102_v20  ;;  %v10144_v20 = vpack.c.bf16 %v7488_v36, %v7484_v59  ;;  %v7750_v59 = vld [vmem:[#allocation11 + $0x1b0] sm:$0xff]  ;;  %v7751_v36 = vld [vmem:[#allocation11 + $0x1b8] sm:$0xff] }
 0x9ff   :  { %10105 = vmatprep.subr.bf16.mxu1 %v10104_v49  ;;  %v7483_v49 = vld [vmem:[#allocation8 + $0x1e30] sm:$0xff] }
 0xa00   :  { %v10146_v0 = vpack.c.bf16 %v7487_v29, %v7483_v49  ;;  %v7734_v49 = vld [vmem:[#allocation11 + $0x130] sm:$0xff]  ;;  %v7735_v29 = vld [vmem:[#allocation11 + $0x138] sm:$0xff] }
 0xa02   :  { %10107 = vmatpush1.bf16.msra.mxu1 %v10106_v6  ;;  %v10148_v6 = vpack.c.bf16 %v7496_v52, %v7492_v16  ;;  %v7752_v16 = vld [vmem:[#allocation11 + $0x1c0] sm:$0xff]  ;;  %v7753_v52 = vld [vmem:[#allocation11 + $0x1c8] sm:$0xff] }
 0xa03   :  { %10109 = vmatprep.subr.bf16.mxu1 %v10108_v46  ;;  %v7491_v46 = vld [vmem:[#allocation8 + $0x1e70] sm:$0xff] }
 0xa06   :  { %10111 = vmatpush1.bf16.msra.mxu1 %v10110_v40  ;;  %v7504_v40 = vld [vmem:[#allocation8 + $0x1ed8] sm:$0xff] }
 0xa07   :  { %7568 = vmatprep.subr.mxu1 %v7514_v13  ;;  %v10150_v13 = vpack.c.bf16 %v7495_v35, %v7491_v46  ;;  %v10152_v4 = vpack.c.bf16 %v7504_v40, %v7500_v56  ;;  %v7736_v46 = vld [vmem:[#allocation11 + $0x140] sm:$0xff]  ;;  %v7737_v35 = vld [vmem:[#allocation11 + $0x148] sm:$0xff]  ;;  %v7754_v56 = vld [vmem:[#allocation11 + $0x1d0] sm:$0xff] }
 0xa08   :  { %v7755_v40 = vld [vmem:[#allocation11 + $0x1d8] sm:$0xff] }
 0xa0a   :  { %7569 = vmatpush1.msra.mxu1 %v7513_v15  ;;  %v10156_v15 = vpack.c.bf16 %v7512_v62, %v7508_v51  ;;  %v7756_v51 = vld [vmem:[#allocation11 + $0x1e0] sm:$0xff]  ;;  %v7757_v62 = vld [vmem:[#allocation11 + $0x1e8] sm:$0xff] }
 0xa0b   :  { %7585 = vmatmul.mubr.f32.vlgmr.msra.gmra.mrb[58].mxu1 %v14318_v21  ;;  %10113 = vmatprep.subr.bf16.mxu1 %v10112_v27  ;;  %v7507_v27 = vld [vmem:[#allocation8 + $0x1ef0] sm:$0xff] }
 0xa0c   :  { %10115 = vmatpush1.bf16.msra.mxu1 %v10114_v3  ;;  %8372 = vmatprep.mubr.msk.f32.mxu1 %vm4727_vm12, %v14320_v9  ;;  %v7455_v9 = vld [vmem:[#allocation8 + $0x1d50] sm:$0xff] }
 0xa0d   :  { %10117 = vmatprep.subr.bf16.mxu1 %v10116_v2  ;;  %v10130_v58 = vpack.c.bf16 %v7455_v9, %v7451_v12  ;;  %v7511_v3 = vld [vmem:[#allocation8 + $0x1f10] sm:$0xff] }
 0xa0e   :  { %v10158_v2 = vpack.c.bf16 %v7511_v3, %v7507_v27  ;;  %v7740_v27 = vld [vmem:[#allocation11 + $0x160] sm:$0xff]  ;;  %v7741_v3 = vld [vmem:[#allocation11 + $0x168] sm:$0xff] }
 0xa10   :  { %10119 = vmatpush1.bf16.msra.mxu1 %v10118_v26  ;;  %v10186_v26 = vpack.c.bf16 %v7709_v28, %v7708_v48  ;;  %v7742_v28 = vld [vmem:[#allocation11 + $0x170] sm:$0xff] }
 0xa11   :  { %10121 = vmatprep.subr.bf16.mxu1 %v10120_v50  ;;  %v7726_v50 = vld [vmem:[#allocation11 + $0xf0] sm:$0xff] }
 0xa12   :  { %10187 = vmatpush3.bf16.msra.mxu0 %v10186_v26  ;;  %v10188_v45 = vpack.c.bf16 %v7727_v43, %v7726_v50  ;;  %v7743_v26 = vld [vmem:[#allocation11 + $0x178] sm:$0xff]  ;;  %v14822_v43 = vld [vmem:[#allocation20_spill] sm:$0xff] }
 0xa13   :  { %v10222_v50 = vpack.c.bf16 %v7743_v26, %v7742_v28 }
 0xa14   :  { %10123 = vmatpush1.bf16.msra.mxu1 %v10122_v23  ;;  %v10190_v23 = vpack.c.bf16 %v7711_v14, %v7710_v31  ;;  %10189 = vmatprep.subr.bf16.mxu0 %v10188_v45  ;;  %v7678_v45 = vsub.s32 2, %v14822_v43  ;;  %v7682_v31 = vsub.s32 3, %v14822_v43 }
 0xa15   :  { %10125 = vmatprep.subr.bf16.mxu1 %v10124_v7  ;;  %v7744_v7 = vld [vmem:[#allocation11 + $0x180] sm:$0xff] }
 0xa16   :  { %10191 = vmatpush3.bf16.msra.mxu0 %v10190_v23  ;;  %v10192_v10 = vpack.c.bf16 %v7745_v1, %v7744_v7  ;;  %v7679_v14 = vrot.slane %v14332_v19, %v7678_v45  ;;  %v7683_v23 = vrot.slane %v14332_v19, %v7682_v31 }
 0xa18   :  { %10127 = vmatpush1.bf16.msra.mxu1 %v10126_v8  ;;  %10193 = vmatprep.subr.bf16.mxu0 %v10192_v10  ;;  %v14821_v8 = vld [vmem:[#allocation22_spill] sm:$0xff] }
 0xa19   :  { %10129 = vmatprep.subr.bf16.mxu1 %v10128_v32  ;;  %v7675_v32 = vrot.slane %v14332_v19, %v14821_v8 }
 0xa1c   :  { %10131 = vmatpush1.bf16.msra.mxu1 %v10130_v58  ;;  %v7729_v58 = vld [vmem:[#allocation11 + $0x108] sm:$0xff] }
 0xa1d   :  { %10133 = vmatprep.subr.bf16.mxu1 %v10132_v44  ;;  %v10194_v34 = vpack.c.bf16 %v7729_v58, %v7728_v18 }
 0xa20   :  { %10135 = vmatpush1.bf16.msra.mxu1 %v10134_v41 }
 0xa21   :  { %10137 = vmatprep.subr.bf16.mxu1 %v10136_v22  ;;  %v10196_v22 = vpack.c.bf16 %v7747_v55, %v7746_v57 }
 0xa24   :  { %10139 = vmatpush1.bf16.msra.mxu1 %v10138_v47  ;;  %v10198_v47 = vpack.c.bf16 %v7731_v24, %v7730_v37 }
 0xa25   :  { %10141 = vmatprep.subr.bf16.mxu1 %v10140_v53  ;;  %v10200_v53 = vpack.c.bf16 %v7749_v61, %v7748_v25 }
 0xa28   :  { %10143 = vmatpush1.bf16.msra.mxu1 %v10142_v17  ;;  %v10202_v17 = vpack.c.bf16 %v7733_v39, %v7732_v11 }
 0xa29   :  { %10145 = vmatprep.subr.bf16.mxu1 %v10144_v20  ;;  %v10204_v20 = vpack.c.bf16 %v7751_v36, %v7750_v59 }
 0xa2c   :  { %10147 = vmatpush1.bf16.msra.mxu1 %v10146_v0  ;;  %v10206_v0 = vpack.c.bf16 %v7735_v29, %v7734_v49 }
 0xa2d   :  { %10149 = vmatprep.subr.bf16.mxu1 %v10148_v6  ;;  %v10208_v6 = vpack.c.bf16 %v7753_v52, %v7752_v16 }
 0xa30   :  { %10151 = vmatpush1.bf16.msra.mxu1 %v10150_v13  ;;  %v10210_v13 = vpack.c.bf16 %v7737_v35, %v7736_v46 }
 0xa31   :  { %10153 = vmatprep.subr.bf16.mxu1 %v10152_v4  ;;  %v10212_v4 = vpack.c.bf16 %v7755_v40, %v7754_v56 }
 0xa34   :  { %10155 = vmatpush1.bf16.msra.mxu1 %v10154_v54  ;;  %v10214_v54 = vpack.c.bf16 %v7739_v33, %v7738_v30 }
 0xa35   :  { %10157 = vmatprep.subr.bf16.mxu1 %v10156_v15  ;;  %v10216_v15 = vpack.c.bf16 %v7757_v62, %v7756_v51 }
 0xa38   :  { %10159 = vmatpush1.bf16.msra.mxu1 %v10158_v2  ;;  %v7758_v2 = vld [vmem:[#allocation11 + $0x1f0] sm:$0xff] }
 0xa39   :  { %7639 = vmatprep.subr.mxu1 %v7516_v38  ;;  %v7759_v38 = vld [vmem:[#allocation11 + $0x1f8] sm:$0xff] }
 0xa3a   :  { %v10220_v48 = vpack.c.bf16 %v7759_v38, %v7758_v2 }
 0xa3c   :  { %7640 = vmatpush1.msra.mxu1 %v7515_v5  ;;  %v10218_v5 = vpack.c.bf16 %v7741_v3, %v7740_v27 }
 0xa3d   :  { %7656 = vmatmul.mubr.f32.vlgmr.msra.gmra.mrb[60].mxu1 %v14318_v21  ;;  %v7671_v21 = vrot.slane %v14332_v19, %v14820_v42 }
 0xade   :  { %v7586_v12 = vpop.f32.mrb[58].mxu1 }
 0xadf   :  { %v7688_v9 = vadd.f32 %v7671_v21, %v7586_v12  ;;  %v7588_v63 = vpop.f32.mrb[59].mxu1 }
 0xae0   :  { %v7689_v44 = vadd.f32 %v7675_v32, %v7588_v63  ;;  %v8373_v63 = vld [vmem:[#allocation13] ss:$0 sm:$0xff] }
 0xae1   :  { %v7692_v41 = vmax.f32 %v7688_v9, 0.0 }
 0xae2   :  { %v7693_v60 = vmax.f32 %v7689_v44, 0.0 }
 0xae4   :  { %7831 = vmatprep.mubr.f32.mxu0 %v7693_v60 }
 0xae5   :  { %7832 = vmatmul.mubr.f32.vlgmr.msra.gmra.mrb[126].mxu0 %v7692_v41 }
 0xae6   :  { %10195 = vmatpush3.bf16.msra.mxu0 %v10194_v34 }
 0xae7   :  { %10197 = vmatprep.subr.bf16.mxu0 %v10196_v22 }
 0xaea   :  { %10199 = vmatpush3.bf16.msra.mxu0 %v10198_v47 }
 0xaeb   :  { %10201 = vmatprep.subr.bf16.mxu0 %v10200_v53 }
 0xaee   :  { %10203 = vmatpush3.bf16.msra.mxu0 %v10202_v17 }
 0xaef   :  { %10205 = vmatprep.subr.bf16.mxu0 %v10204_v20 }
 0xaf2   :  { %10207 = vmatpush3.bf16.msra.mxu0 %v10206_v0 }
 0xaf3   :  { %10209 = vmatprep.subr.bf16.mxu0 %v10208_v6 }
 0xaf6   :  { %10211 = vmatpush3.bf16.msra.mxu0 %v10210_v13 }
 0xaf7   :  { %10213 = vmatprep.subr.bf16.mxu0 %v10212_v4 }
 0xafa   :  { %10215 = vmatpush3.bf16.msra.mxu0 %v10214_v54 }
 0xafb   :  { %10217 = vmatprep.subr.bf16.mxu0 %v10216_v15 }
 0xafe   :  { %10219 = vmatpush3.bf16.msra.mxu0 %v10218_v5 }
 0xaff   :  { %10221 = vmatprep.subr.bf16.mxu0 %v10220_v48 }
 0xb02   :  { %10223 = vmatpush3.bf16.msra.mxu0 %v10222_v50 }
 0xb10   :  { %v7657_v7 = vpop.f32.mrb[60].mxu1 }
 0xb11   :  { %v7690_v1 = vadd.f32 %v7679_v14, %v7657_v7  ;;  %v7659_v10 = vpop.f32.mrb[61].mxu1 }
 0xb12   :  { %v7691_v42 = vadd.f32 %v7683_v23, %v7659_v10 }
 0xb13   :  { %v7694_v8 = vmax.f32 %v7690_v1, 0.0 }
 0xb14   :  { %v7695_v21 = vmax.f32 %v7691_v42, 0.0 }
 0xb16   :  { %7901 = vmatprep.mubr.f32.mxu0 %v7695_v21 }
 0xb17   :  { %7902 = vmatmul.mubr.f32.vlgmr.msra.gmra.mrb[128].mxu0 %v7694_v8 }
 0xbb8   :  { %v8406_v32 = vpop.f32.mrb[126].mxu0 }
 0xbb9   :  { %v8407_v12 = vpop.f32.mrb[127].mxu0 }
 0xbba   :  { %v8408_v9 = vadd.f32 %v8407_v12, %v8406_v32 }
 0xbbc   :  { %v7834_v44 = vadd.f32 %v8408_v9, %v8373_v63 }
 0xbea   :  { %v8441_v18 = vpop.f32.mrb[128].mxu0 }
 0xbeb   :  { %v8442_v58 = vpop.f32.mrb[129].mxu0 }
 0xbec   :  { %v8443_v57 = vadd.f32 %v8442_v58, %v8441_v18 }
 0xbee   :  { %v7904_v55 = vadd.f32 %v8443_v57, %v7834_v44 }
 0xbf0   :  { %7907 = vmax.xlane.f32.xlu1 %v7904_v55 }
 0xc7d   :  { %v7908_v60 = vpop.xlane.xlu1 %7907 }
 0xc7e   :  { %v7909_v19 = vsub.f32 %v7904_v55, %v7908_v60 }
 0xc80   :  { %v7910_v34 = vmul.f32 1.442695, %v7909_v19 }
 0xc82   :  { %10615 = vpow2.f32 %v7910_v34 }
 0xc8c   :  { %v10616_v41 = vpop.eup %10615 }
 0xc8d   :  { %7912 = vadd.xlane.f32.xlu0 %v10616_v41 }
 0xd1a   :  { %v7913_v22 = vpop.xlane.xlu0 %7912 }
 0xd1b   :  { %10617 = vlog2.f32 %v7913_v22 }
 0xd25   :  { %v10618_v37 = vpop.eup %10617 }
 0xd26   :  { %v7915_v24 = vmul.f32 0.6931472, %v10618_v37 }
 0xd28   :  { %v7916_v25 = vsub.f32 %v7909_v19, %v7915_v24 }
 0xd2a   :  { %7917 = vst [vmem:[#allocation14] sm:$0xff] %v7916_v25 }
 0xd2b   :  { %10784 = shalt.err (!%p10781_p4)
}
 0xd2c   :  { %s10785_s17 = scalar_lea.hbm %s14363_s9, 128 }
 0xd2d   :  { %p10786_p5 = scmp.ne.s32.totalorder %s14363_s9, %s10785_s17  ;;  %p10789_p6 = scmp.lt.u32.totalorder %s10785_s17, %s14363_s9 }
 0xd2f   :  { %p10791_p7 = pnand %p10789_p6, %p10786_p5 }
 0xd31   :  { %10794 = shalt.err (!%p10791_p7)
}
 0xd32   :  { %7927 = dma.vmem_to_hbm [thread:$0]  %s7925_s7, 128, %s14363_s9, [#allocation4]  }
 0xd33   :  { %10803 = dma.done.wait [#allocation4], 128  }
 0xd34   :  { %10804 = vsyncadd [#allocation4], 4294967168 }
 0xd35   :  { %7931 = vsyncpa [#allocation3], 1 }
 0xd36   :  { %7932 = vsyncpa [#allocation6], 1 }
 0xd37   :  { %7933 = vsyncpa [#allocation9], 1 }
 0xd38   :  { %7934 = vsyncpa [#allocation12], 1 }
 0xd39   :  { %7935 = vsyncpa [#allocation4], 1 }

</bundles_post_ra>
